<compile_context>
chip_gen: v7x
topology: tpu7x:2x2x1
jax: 0.10.0
libtpu: 0.0.40
codegen_flags: <defaults>
</compile_context>

<pallas_src>
import jax
import jax.numpy as jnp
from jax.experimental import pallas as pl
from jax.experimental.pallas import tpu as pltpu

EPS = 1e-5
NHIDDEN = 128
KS = 3
MXU_DTYPE = jnp.bfloat16   # bf16 MXU operands (f32 accumulation). Use jnp.float32 to disable.


def _zero_halo(ref, H, W, C):
    """Zero only the 1-px halo ring of a (H+2, W+2, C) scratch buffer."""
    ref[0:1, :, :] = jnp.zeros((1, W + 2, C), ref.dtype)
    ref[H + 1:H + 2, :, :] = jnp.zeros((1, W + 2, C), ref.dtype)
    ref[:, 0:1, :] = jnp.zeros((H + 2, 1, C), ref.dtype)
    ref[:, W + 1:W + 2, :] = jnp.zeros((H + 2, 1, C), ref.dtype)


# --------------------------------------------------------------------------
# Fused kernel: per sample n
#   instance-norm + shared conv(+ReLU, actv in VMEM) + fused gamma|beta conv
#   + SPADE combine.  Layout inside the kernel is NHWC (channels on lanes).
# --------------------------------------------------------------------------
def _landmark_norm_fused_kernel(x_ref, seg_ref, ws_ref, bs_ref, wgb_ref, bgb_ref,
                                o_ref, segp_scr, actvp_scr):
    _, H, W, norm_nc = o_ref.shape
    label_nc = seg_ref.shape[3]

    # ---- in-kernel padding: zero only the halo (interior fully overwritten) -
    _zero_halo(segp_scr, H, W, label_nc)
    _zero_halo(actvp_scr, H, W, NHIDDEN)
    segp_scr[1:H + 1, 1:W + 1, :] = seg_ref[0]            # (H, W, label_nc) f32

    # ---- shared 3x3 conv + ReLU; actv stays in VMEM ------------------------
    acc = jnp.zeros((H * W, NHIDDEN), jnp.float32)
    for kh in range(KS):
        for kw in range(KS):
            patch = segp_scr[kh:kh + H, kw:kw + W, :].reshape(H * W, label_nc)
            acc = acc + jnp.dot(patch.astype(MXU_DTYPE), ws_ref[kh, kw],
                                preferred_element_type=jnp.float32)
    actv = jnp.maximum(acc + bs_ref[0], 0.0)               # (H*W, 128) f32
    actvp_scr[1:H + 1, 1:W + 1, :] = (
        actv.reshape(H, W, NHIDDEN).astype(actvp_scr.dtype))

    # ---- fused gamma|beta 3x3 conv: kw taps folded into K = 3*128,
    #      gamma and beta outputs side by side (2*norm_nc lanes) --------------
    gb = jnp.zeros((H * W, 2 * norm_nc), jnp.float32)
    for kh in range(KS):
        rw = actvp_scr[kh:kh + H, :, :]                    # (H, W+2, 128) MXU dtype
        slab = jnp.concatenate(
            [rw[:, 0:W, :].reshape(H * W, NHIDDEN),
             rw[:, 1:W + 1, :].reshape(H * W, NHIDDEN),
             rw[:, 2:W + 2, :].reshape(H * W, NHIDDEN)],
            axis=1)                                        # (H*W, 384) lane-aligned
        gb = gb + jnp.dot(slab, wgb_ref[kh],
                          preferred_element_type=jnp.float32)
    gb = gb + bgb_ref[0]
    gamma = gb[:, :norm_nc]
    beta = gb[:, norm_nc:]

    # ---- instance norm (two-pass, f32) + SPADE combine ---------------------
    x = x_ref[...]                                         # (1, H, W, norm_nc) f32
    mean = jnp.mean(x, axis=(1, 2), keepdims=True)
    var = jnp.mean((x - mean) * (x - mean), axis=(1, 2), keepdims=True)
    nrm = ((x - mean) * jax.lax.rsqrt(var + EPS)).reshape(H * W, norm_nc)
    o_ref[...] = (nrm * (1.0 + gamma) + beta).reshape(1, H, W, norm_nc)


# --------------------------------------------------------------------------
# Wrapper: NCHW<->NHWC glue, nearest upsample, weight pre-fold / pre-cast
# --------------------------------------------------------------------------
def nearest_resize_nhwc(seg_nhwc, out_h, out_w):
    # Matches PyTorch F.interpolate(mode='nearest'): src = floor(dst * in/out)
    _, in_h, in_w, _ = seg_nhwc.shape
    idx_h = (jnp.arange(out_h) * in_h // out_h).astype(jnp.int32)
    idx_w = (jnp.arange(out_w) * in_w // out_w).astype(jnp.int32)
    return seg_nhwc[:, idx_h][:, :, idx_w]


@jax.jit
def landmark_norm_forward(x_nchw, seg_nchw, params):
    x = jnp.transpose(x_nchw, (0, 2, 3, 1)).astype(jnp.float32)       # NHWC
    seg = jnp.transpose(seg_nchw, (0, 2, 3, 1)).astype(jnp.float32)   # NHWC
    N, H, W, norm_nc = x.shape
    label_nc = seg.shape[-1]
    seg_up = nearest_resize_nhwc(seg, H, W)

    # Pre-cast the shared-conv weights to the MXU dtype.
    ws = params["w_shared"].astype(MXU_DTYPE)                          # (3,3,label_nc,128)

    # Fold the kw taps of the gamma/beta weights into the contraction dim
    # (rows ordered kw-major) AND concatenate gamma|beta on the output axis:
    # (KS, KS, 128, norm_nc) x2  ->  (KS, KS*128, 2*norm_nc), pre-cast to bf16.
    wgb = jnp.concatenate(
        [params["w_gamma"].reshape(KS, KS * NHIDDEN, norm_nc),
         params["w_beta"].reshape(KS, KS * NHIDDEN, norm_nc)],
        axis=-1).astype(MXU_DTYPE)
    bgb = jnp.concatenate([params["b_gamma"], params["b_beta"]]).reshape(1, 2 * norm_nc)

    out_nhwc = pl.pallas_call(
        _landmark_norm_fused_kernel,
        out_shape=jax.ShapeDtypeStruct((N, H, W, norm_nc), jnp.float32),
        grid_spec=pltpu.PrefetchScalarGridSpec(
            num_scalar_prefetch=0,
            grid=(N,),
            in_specs=[
                pl.BlockSpec((1, H, W, norm_nc), lambda n: (n, 0, 0, 0)),           # x
                pl.BlockSpec((1, H, W, label_nc), lambda n: (n, 0, 0, 0)),          # seg_up
                pl.BlockSpec((KS, KS, label_nc, NHIDDEN), lambda n: (0, 0, 0, 0)),  # w_shared
                pl.BlockSpec((1, NHIDDEN), lambda n: (0, 0)),                       # b_shared
                pl.BlockSpec((KS, KS * NHIDDEN, 2 * norm_nc), lambda n: (0, 0, 0)),  # w_gamma|beta
                pl.BlockSpec((1, 2 * norm_nc), lambda n: (0, 0)),                   # b_gamma|beta
            ],
            out_specs=pl.BlockSpec((1, H, W, norm_nc), lambda n: (n, 0, 0, 0)),
            scratch_shapes=[
                pltpu.VMEM((H + 2, W + 2, label_nc), jnp.float32),   # padded segmap
                pltpu.VMEM((H + 2, W + 2, NHIDDEN), MXU_DTYPE),      # padded actv (MXU dtype)
            ],
        ),
        compiler_params=pltpu.CompilerParams(
            dimension_semantics=("parallel",),
            vmem_limit_bytes=48 * 1024 * 1024,
        ),
    )(x, seg_up,
      ws, params["b_shared"].reshape(1, NHIDDEN),
      wgb, bgb)

    return jnp.transpose(out_nhwc, (0, 3, 1, 2))                      # back to NCHW


def init_params(key, label_nc, norm_nc):
    ks = jax.random.split(key, 6)

    def w(k, cin, cout):
        scale = 1.0 / jnp.sqrt(jnp.float32(cin * KS * KS))
        return jax.random.normal(k, (KS, KS, cin, cout), jnp.float32) * scale

    return {
        "w_shared": w(ks[0], label_nc, NHIDDEN),
        "b_shared": jax.random.normal(ks[1], (NHIDDEN,), jnp.float32) * 0.01,
        "w_gamma": w(ks[2], NHIDDEN, norm_nc),
        "b_gamma": jax.random.normal(ks[3], (norm_nc,), jnp.float32) * 0.01,
        "w_beta": w(ks[4], NHIDDEN, norm_nc),
        "b_beta": jax.random.normal(ks[5], (norm_nc,), jnp.float32) * 0.01,
    }


# --------------------------------------------------------------------------
# Pure-JAX reference (lax.conv).  `mxu_dtype` lets us mirror the kernel's
# bf16 MXU-operand rounding (accumulation stays f32 in both).
# --------------------------------------------------------------------------
def reference_forward(x_nchw, seg_nchw, params, mxu_dtype=MXU_DTYPE):
    x = x_nchw.astype(jnp.float32)
    mean = jnp.mean(x, axis=(2, 3), keepdims=True)
    var = jnp.mean((x - mean) ** 2, axis=(2, 3), keepdims=True)
    normalized = (x - mean) * jax.lax.rsqrt(var + EPS)

    seg = jnp.transpose(seg_nchw, (0, 2, 3, 1)).astype(jnp.float32)
    seg_up = nearest_resize_nhwc(seg, x.shape[2], x.shape[3])

    def conv(inp_nhwc, w_hwio, b):
        out = jax.lax.conv_general_dilated(
            inp_nhwc.astype(mxu_dtype), w_hwio.astype(mxu_dtype),
            window_strides=(1, 1), padding="SAME",
            dimension_numbers=("NHWC", "HWIO", "NHWC"),
            preferred_element_type=jnp.float32)
        return out + b.reshape(1, 1, 1, -1)

    actv = jnp.maximum(conv(seg_up, params["w_shared"], params["b_shared"]), 0.0)
    gamma = conv(actv, params["w_gamma"], params["b_gamma"])
    beta = conv(actv, params["w_beta"], params["b_beta"])
    normalized_nhwc = jnp.transpose(normalized, (0, 2, 3, 1))
    out = normalized_nhwc * (1.0 + gamma) + beta
    return jnp.transpose(out, (0, 3, 1, 2))


if __name__ == "__main__":
    key = jax.random.PRNGKey(0)
    k_x, k_seg, k_p = jax.random.split(key, 3)

    N, norm_nc, H, W = 2, 4, 16, 16       # x:      (2, 4, 16, 16)  NCHW
    label_nc, Hs, Ws = 3, 8, 8            # segmap: (2, 3, 8, 8)    NCHW (nearest-up to 16x16)

    x = jax.random.normal(k_x, (N, norm_nc, H, W), jnp.float32)
    segmap = jax.random.normal(k_seg, (N, label_nc, Hs, Ws), jnp.float32)
    params = init_params(k_p, label_nc, norm_nc)

    out = landmark_norm_forward(x, segmap, params)
    jax.block_until_ready(out)
    assert out.shape == (N, norm_nc, H, W)

    # Full semantic check against lax.conv with the same MXU-operand precision.
    ref = reference_forward(x, segmap, params, mxu_dtype=MXU_DTYPE)
    assert jnp.allclose(out, ref, rtol=2e-3, atol=2e-3), "mismatch vs matched-precision reference"

    # Sanity bound against the pure-f32 reference (only bf16 rounding differs).
    ref_f32 = reference_forward(x, segmap, params, mxu_dtype=jnp.float32)
    max_diff = float(jnp.max(jnp.abs(out - ref_f32)))
    assert max_diff < 0.25, f"unexpectedly large deviation from f32 reference: {max_diff}"

    print("KERNEL_OK")
</pallas_src>

<mosaic_0001>
module attributes {stable_mosaic.version = 11 : i64} {
  func.func @_landmark_norm_fused_kernel(%arg0: i32, %arg1: memref<1x16x16x4xf32, #tpu.memory_space<vmem>>, %arg2: memref<1x16x16x3xf32, #tpu.memory_space<vmem>>, %arg3: memref<3x3x3x128xbf16, #tpu.memory_space<vmem>>, %arg4: memref<1x128xf32, #tpu.memory_space<vmem>>, %arg5: memref<3x384x8xbf16, #tpu.memory_space<vmem>>, %arg6: memref<1x8xf32, #tpu.memory_space<vmem>>, %arg7: memref<1x16x16x4xf32, #tpu.memory_space<vmem>>, %arg8: memref<18x18x3xf32, #tpu.memory_space<vmem>>, %arg9: memref<18x18x128xbf16, #tpu.memory_space<vmem>>) attributes {dimension_semantics = [#tpu.dimension_semantics<parallel>], iteration_bounds = array<i64: 2>, scalar_prefetch = 0 : i64, scratch_operands = 2 : i64, tpu.core_type = #tpu.core_type<tc>, window_params = [{transform_indices = @transform_0, window_bounds = array<i64: 1, 16, 16, 4>}, {transform_indices = @transform_1, window_bounds = array<i64: 1, 16, 16, 3>}, {pipeline_mode = #tpu.pipeline_mode<synchronous>, transform_indices = @transform_2, window_bounds = array<i64: 3, 3, 3, 128>}, {pipeline_mode = #tpu.pipeline_mode<synchronous>, transform_indices = @transform_3, window_bounds = array<i64: 1, 128>}, {pipeline_mode = #tpu.pipeline_mode<synchronous>, transform_indices = @transform_4, window_bounds = array<i64: 3, 384, 8>}, {pipeline_mode = #tpu.pipeline_mode<synchronous>, transform_indices = @transform_5, window_bounds = array<i64: 1, 8>}, {transform_indices = @transform_6, window_bounds = array<i64: 1, 16, 16, 4>}]} {
    %cst = arith.constant 0.000000e+00 : f32
    %0 = vector.broadcast %cst : f32 to vector<1x18x3xf32>
    %c0 = arith.constant 0 : index
    %c0_0 = arith.constant 0 : index
    %c0_1 = arith.constant 0 : index
    %1 = vector.load %arg8[%c0, %c0_0, %c0_1] : memref<18x18x3xf32, #tpu.memory_space<vmem>>, vector<1x18x3xf32>
    tpu.vector_store %arg8[%c0, %c0_0, %c0_1], %0 {strides = array<i32>} : memref<18x18x3xf32, #tpu.memory_space<vmem>>, vector<1x18x3xf32>,
    %cst_2 = arith.constant 0.000000e+00 : f32
    %2 = vector.broadcast %cst_2 : f32 to vector<1x18x3xf32>
    %c17 = arith.constant 17 : index
    %c0_3 = arith.constant 0 : index
    %c0_4 = arith.constant 0 : index
    %3 = vector.load %arg8[%c17, %c0_3, %c0_4] : memref<18x18x3xf32, #tpu.memory_space<vmem>>, vector<1x18x3xf32>
    tpu.vector_store %arg8[%c17, %c0_3, %c0_4], %2 {strides = array<i32>} : memref<18x18x3xf32, #tpu.memory_space<vmem>>, vector<1x18x3xf32>,
    %cst_5 = arith.constant 0.000000e+00 : f32
    %4 = vector.broadcast %cst_5 : f32 to vector<18x1x3xf32>
    %c0_6 = arith.constant 0 : index
    %c0_7 = arith.constant 0 : index
    %c0_8 = arith.constant 0 : index
    %5 = vector.load %arg8[%c0_6, %c0_7, %c0_8] : memref<18x18x3xf32, #tpu.memory_space<vmem>>, vector<18x1x3xf32>
    tpu.vector_store %arg8[%c0_6, %c0_7, %c0_8], %4 {strides = array<i32>} : memref<18x18x3xf32, #tpu.memory_space<vmem>>, vector<18x1x3xf32>,
    %cst_9 = arith.constant 0.000000e+00 : f32
    %6 = vector.broadcast %cst_9 : f32 to vector<18x1x3xf32>
    %c0_10 = arith.constant 0 : index
    %c17_11 = arith.constant 17 : index
    %c0_12 = arith.constant 0 : index
    %7 = vector.load %arg8[%c0_10, %c17_11, %c0_12] : memref<18x18x3xf32, #tpu.memory_space<vmem>>, vector<18x1x3xf32>
    tpu.vector_store %arg8[%c0_10, %c17_11, %c0_12], %6 {strides = array<i32>} : memref<18x18x3xf32, #tpu.memory_space<vmem>>, vector<18x1x3xf32>,
    %cst_13 = arith.constant 0.000000e+00 : bf16
    %8 = vector.broadcast %cst_13 : bf16 to vector<1x18x128xbf16>
    %c0_14 = arith.constant 0 : index
    %c0_15 = arith.constant 0 : index
    %c0_16 = arith.constant 0 : index
    %9 = vector.load %arg9[%c0_14, %c0_15, %c0_16] : memref<18x18x128xbf16, #tpu.memory_space<vmem>>, vector<1x18x128xbf16>
    tpu.vector_store %arg9[%c0_14, %c0_15, %c0_16], %8 {strides = array<i32>} : memref<18x18x128xbf16, #tpu.memory_space<vmem>>, vector<1x18x128xbf16>,
    %cst_17 = arith.constant 0.000000e+00 : bf16
    %10 = vector.broadcast %cst_17 : bf16 to vector<1x18x128xbf16>
    %c17_18 = arith.constant 17 : index
    %c0_19 = arith.constant 0 : index
    %c0_20 = arith.constant 0 : index
    %11 = vector.load %arg9[%c17_18, %c0_19, %c0_20] : memref<18x18x128xbf16, #tpu.memory_space<vmem>>, vector<1x18x128xbf16>
    tpu.vector_store %arg9[%c17_18, %c0_19, %c0_20], %10 {strides = array<i32>} : memref<18x18x128xbf16, #tpu.memory_space<vmem>>, vector<1x18x128xbf16>,
    %cst_21 = arith.constant 0.000000e+00 : bf16
    %12 = vector.broadcast %cst_21 : bf16 to vector<18x1x128xbf16>
    %c0_22 = arith.constant 0 : index
    %c0_23 = arith.constant 0 : index
    %c0_24 = arith.constant 0 : index
    %13 = vector.load %arg9[%c0_22, %c0_23, %c0_24] : memref<18x18x128xbf16, #tpu.memory_space<vmem>>, vector<18x1x128xbf16>
    tpu.vector_store %arg9[%c0_22, %c0_23, %c0_24], %12 {strides = array<i32>} : memref<18x18x128xbf16, #tpu.memory_space<vmem>>, vector<18x1x128xbf16>,
    %cst_25 = arith.constant 0.000000e+00 : bf16
    %14 = vector.broadcast %cst_25 : bf16 to vector<18x1x128xbf16>
    %c0_26 = arith.constant 0 : index
    %c17_27 = arith.constant 17 : index
    %c0_28 = arith.constant 0 : index
    %15 = vector.load %arg9[%c0_26, %c17_27, %c0_28] : memref<18x18x128xbf16, #tpu.memory_space<vmem>>, vector<18x1x128xbf16>
    tpu.vector_store %arg9[%c0_26, %c17_27, %c0_28], %14 {strides = array<i32>} : memref<18x18x128xbf16, #tpu.memory_space<vmem>>, vector<18x1x128xbf16>,
    %c0_29 = arith.constant 0 : index
    %c0_30 = arith.constant 0 : index
    %c0_31 = arith.constant 0 : index
    %c0_32 = arith.constant 0 : index
    %16 = vector.load %arg2[%c0_29, %c0_30, %c0_31, %c0_32] : memref<1x16x16x3xf32, #tpu.memory_space<vmem>>, vector<1x16x16x3xf32>
    %17 = vector.shape_cast %16 : vector<1x16x16x3xf32> to vector<16x16x3xf32>
    %c1 = arith.constant 1 : index
    %c1_33 = arith.constant 1 : index
    %c0_34 = arith.constant 0 : index
    %18 = vector.load %arg8[%c1, %c1_33, %c0_34] : memref<18x18x3xf32, #tpu.memory_space<vmem>>, vector<16x16x3xf32>
    tpu.vector_store %arg8[%c1, %c1_33, %c0_34], %17 {strides = array<i32>} : memref<18x18x3xf32, #tpu.memory_space<vmem>>, vector<16x16x3xf32>,
    %cst_35 = arith.constant 0.000000e+00 : f32
    %19 = vector.broadcast %cst_35 : f32 to vector<256x128xf32>
    %c0_36 = arith.constant 0 : index
    %c0_37 = arith.constant 0 : index
    %c0_38 = arith.constant 0 : index
    %20 = vector.load %arg8[%c0_36, %c0_37, %c0_38] : memref<18x18x3xf32, #tpu.memory_space<vmem>>, vector<16x16x3xf32>
    %21 = vector.shape_cast %20 : vector<16x16x3xf32> to vector<256x3xf32>
    %22 = arith.truncf %21 : vector<256x3xf32> to vector<256x3xbf16>
    %c0_39 = arith.constant 0 : index
    %c0_40 = arith.constant 0 : index
    %c0_41 = arith.constant 0 : index
    %c0_42 = arith.constant 0 : index
    %23 = vector.load %arg3[%c0_39, %c0_40, %c0_41, %c0_42] : memref<3x3x3x128xbf16, #tpu.memory_space<vmem>>, vector<1x1x3x128xbf16>
    %24 = vector.shape_cast %23 : vector<1x1x3x128xbf16> to vector<3x128xbf16>
    %cst_43 = arith.constant dense<0.000000e+00> : vector<256x128xf32>
    %25 = tpu.matmul %22, %24, %cst_43 {dimension_numbers = #tpu.dot_dimension_numbers<[1], [0], [0], [1], [0, 0, 1, 1], [], []>} : vector<256x3xbf16>, vector<3x128xbf16>, vector<256x128xf32> -> vector<256x128xf32>
    %26 = arith.addf %19, %25 : vector<256x128xf32>
    %c0_44 = arith.constant 0 : index
    %c1_45 = arith.constant 1 : index
    %c0_46 = arith.constant 0 : index
    %27 = vector.load %arg8[%c0_44, %c1_45, %c0_46] : memref<18x18x3xf32, #tpu.memory_space<vmem>>, vector<16x16x3xf32>
    %28 = vector.shape_cast %27 : vector<16x16x3xf32> to vector<256x3xf32>
    %29 = arith.truncf %28 : vector<256x3xf32> to vector<256x3xbf16>
    %c0_47 = arith.constant 0 : index
    %c1_48 = arith.constant 1 : index
    %c0_49 = arith.constant 0 : index
    %c0_50 = arith.constant 0 : index
    %30 = vector.load %arg3[%c0_47, %c1_48, %c0_49, %c0_50] : memref<3x3x3x128xbf16, #tpu.memory_space<vmem>>, vector<1x1x3x128xbf16>
    %31 = vector.shape_cast %30 : vector<1x1x3x128xbf16> to vector<3x128xbf16>
    %cst_51 = arith.constant dense<0.000000e+00> : vector<256x128xf32>
    %32 = tpu.matmul %29, %31, %cst_51 {dimension_numbers = #tpu.dot_dimension_numbers<[1], [0], [0], [1], [0, 0, 1, 1], [], []>} : vector<256x3xbf16>, vector<3x128xbf16>, vector<256x128xf32> -> vector<256x128xf32>
    %33 = arith.addf %26, %32 : vector<256x128xf32>
    %c0_52 = arith.constant 0 : index
    %c2 = arith.constant 2 : index
    %c0_53 = arith.constant 0 : index
    %34 = vector.load %arg8[%c0_52, %c2, %c0_53] : memref<18x18x3xf32, #tpu.memory_space<vmem>>, vector<16x16x3xf32>
    %35 = vector.shape_cast %34 : vector<16x16x3xf32> to vector<256x3xf32>
    %36 = arith.truncf %35 : vector<256x3xf32> to vector<256x3xbf16>
    %c0_54 = arith.constant 0 : index
    %c2_55 = arith.constant 2 : index
    %c0_56 = arith.constant 0 : index
    %c0_57 = arith.constant 0 : index
    %37 = vector.load %arg3[%c0_54, %c2_55, %c0_56, %c0_57] : memref<3x3x3x128xbf16, #tpu.memory_space<vmem>>, vector<1x1x3x128xbf16>
    %38 = vector.shape_cast %37 : vector<1x1x3x128xbf16> to vector<3x128xbf16>
    %cst_58 = arith.constant dense<0.000000e+00> : vector<256x128xf32>
    %39 = tpu.matmul %36, %38, %cst_58 {dimension_numbers = #tpu.dot_dimension_numbers<[1], [0], [0], [1], [0, 0, 1, 1], [], []>} : vector<256x3xbf16>, vector<3x128xbf16>, vector<256x128xf32> -> vector<256x128xf32>
    %40 = arith.addf %33, %39 : vector<256x128xf32>
    %c1_59 = arith.constant 1 : index
    %c0_60 = arith.constant 0 : index
    %c0_61 = arith.constant 0 : index
    %41 = vector.load %arg8[%c1_59, %c0_60, %c0_61] : memref<18x18x3xf32, #tpu.memory_space<vmem>>, vector<16x16x3xf32>
    %42 = vector.shape_cast %41 : vector<16x16x3xf32> to vector<256x3xf32>
    %43 = arith.truncf %42 : vector<256x3xf32> to vector<256x3xbf16>
    %c1_62 = arith.constant 1 : index
    %c0_63 = arith.constant 0 : index
    %c0_64 = arith.constant 0 : index
    %c0_65 = arith.constant 0 : index
    %44 = vector.load %arg3[%c1_62, %c0_63, %c0_64, %c0_65] : memref<3x3x3x128xbf16, #tpu.memory_space<vmem>>, vector<1x1x3x128xbf16>
    %45 = vector.shape_cast %44 : vector<1x1x3x128xbf16> to vector<3x128xbf16>
    %cst_66 = arith.constant dense<0.000000e+00> : vector<256x128xf32>
    %46 = tpu.matmul %43, %45, %cst_66 {dimension_numbers = #tpu.dot_dimension_numbers<[1], [0], [0], [1], [0, 0, 1, 1], [], []>} : vector<256x3xbf16>, vector<3x128xbf16>, vector<256x128xf32> -> vector<256x128xf32>
    %47 = arith.addf %40, %46 : vector<256x128xf32>
    %c1_67 = arith.constant 1 : index
    %c1_68 = arith.constant 1 : index
    %c0_69 = arith.constant 0 : index
    %48 = vector.load %arg8[%c1_67, %c1_68, %c0_69] : memref<18x18x3xf32, #tpu.memory_space<vmem>>, vector<16x16x3xf32>
    %49 = vector.shape_cast %48 : vector<16x16x3xf32> to vector<256x3xf32>
    %50 = arith.truncf %49 : vector<256x3xf32> to vector<256x3xbf16>
    %c1_70 = arith.constant 1 : index
    %c1_71 = arith.constant 1 : index
    %c0_72 = arith.constant 0 : index
    %c0_73 = arith.constant 0 : index
    %51 = vector.load %arg3[%c1_70, %c1_71, %c0_72, %c0_73] : memref<3x3x3x128xbf16, #tpu.memory_space<vmem>>, vector<1x1x3x128xbf16>
    %52 = vector.shape_cast %51 : vector<1x1x3x128xbf16> to vector<3x128xbf16>
    %cst_74 = arith.constant dense<0.000000e+00> : vector<256x128xf32>
    %53 = tpu.matmul %50, %52, %cst_74 {dimension_numbers = #tpu.dot_dimension_numbers<[1], [0], [0], [1], [0, 0, 1, 1], [], []>} : vector<256x3xbf16>, vector<3x128xbf16>, vector<256x128xf32> -> vector<256x128xf32>
    %54 = arith.addf %47, %53 : vector<256x128xf32>
    %c1_75 = arith.constant 1 : index
    %c2_76 = arith.constant 2 : index
    %c0_77 = arith.constant 0 : index
    %55 = vector.load %arg8[%c1_75, %c2_76, %c0_77] : memref<18x18x3xf32, #tpu.memory_space<vmem>>, vector<16x16x3xf32>
    %56 = vector.shape_cast %55 : vector<16x16x3xf32> to vector<256x3xf32>
    %57 = arith.truncf %56 : vector<256x3xf32> to vector<256x3xbf16>
    %c1_78 = arith.constant 1 : index
    %c2_79 = arith.constant 2 : index
    %c0_80 = arith.constant 0 : index
    %c0_81 = arith.constant 0 : index
    %58 = vector.load %arg3[%c1_78, %c2_79, %c0_80, %c0_81] : memref<3x3x3x128xbf16, #tpu.memory_space<vmem>>, vector<1x1x3x128xbf16>
    %59 = vector.shape_cast %58 : vector<1x1x3x128xbf16> to vector<3x128xbf16>
    %cst_82 = arith.constant dense<0.000000e+00> : vector<256x128xf32>
    %60 = tpu.matmul %57, %59, %cst_82 {dimension_numbers = #tpu.dot_dimension_numbers<[1], [0], [0], [1], [0, 0, 1, 1], [], []>} : vector<256x3xbf16>, vector<3x128xbf16>, vector<256x128xf32> -> vector<256x128xf32>
    %61 = arith.addf %54, %60 : vector<256x128xf32>
    %c2_83 = arith.constant 2 : index
    %c0_84 = arith.constant 0 : index
    %c0_85 = arith.constant 0 : index
    %62 = vector.load %arg8[%c2_83, %c0_84, %c0_85] : memref<18x18x3xf32, #tpu.memory_space<vmem>>, vector<16x16x3xf32>
    %63 = vector.shape_cast %62 : vector<16x16x3xf32> to vector<256x3xf32>
    %64 = arith.truncf %63 : vector<256x3xf32> to vector<256x3xbf16>
    %c2_86 = arith.constant 2 : index
    %c0_87 = arith.constant 0 : index
    %c0_88 = arith.constant 0 : index
    %c0_89 = arith.constant 0 : index
    %65 = vector.load %arg3[%c2_86, %c0_87, %c0_88, %c0_89] : memref<3x3x3x128xbf16, #tpu.memory_space<vmem>>, vector<1x1x3x128xbf16>
    %66 = vector.shape_cast %65 : vector<1x1x3x128xbf16> to vector<3x128xbf16>
    %cst_90 = arith.constant dense<0.000000e+00> : vector<256x128xf32>
    %67 = tpu.matmul %64, %66, %cst_90 {dimension_numbers = #tpu.dot_dimension_numbers<[1], [0], [0], [1], [0, 0, 1, 1], [], []>} : vector<256x3xbf16>, vector<3x128xbf16>, vector<256x128xf32> -> vector<256x128xf32>
    %68 = arith.addf %61, %67 : vector<256x128xf32>
    %c2_91 = arith.constant 2 : index
    %c1_92 = arith.constant 1 : index
    %c0_93 = arith.constant 0 : index
    %69 = vector.load %arg8[%c2_91, %c1_92, %c0_93] : memref<18x18x3xf32, #tpu.memory_space<vmem>>, vector<16x16x3xf32>
    %70 = vector.shape_cast %69 : vector<16x16x3xf32> to vector<256x3xf32>
    %71 = arith.truncf %70 : vector<256x3xf32> to vector<256x3xbf16>
    %c2_94 = arith.constant 2 : index
    %c1_95 = arith.constant 1 : index
    %c0_96 = arith.constant 0 : index
    %c0_97 = arith.constant 0 : index
    %72 = vector.load %arg3[%c2_94, %c1_95, %c0_96, %c0_97] : memref<3x3x3x128xbf16, #tpu.memory_space<vmem>>, vector<1x1x3x128xbf16>
    %73 = vector.shape_cast %72 : vector<1x1x3x128xbf16> to vector<3x128xbf16>
    %cst_98 = arith.constant dense<0.000000e+00> : vector<256x128xf32>
    %74 = tpu.matmul %71, %73, %cst_98 {dimension_numbers = #tpu.dot_dimension_numbers<[1], [0], [0], [1], [0, 0, 1, 1], [], []>} : vector<256x3xbf16>, vector<3x128xbf16>, vector<256x128xf32> -> vector<256x128xf32>
    %75 = arith.addf %68, %74 : vector<256x128xf32>
    %c2_99 = arith.constant 2 : index
    %c2_100 = arith.constant 2 : index
    %c0_101 = arith.constant 0 : index
    %76 = vector.load %arg8[%c2_99, %c2_100, %c0_101] : memref<18x18x3xf32, #tpu.memory_space<vmem>>, vector<16x16x3xf32>
    %77 = vector.shape_cast %76 : vector<16x16x3xf32> to vector<256x3xf32>
    %78 = arith.truncf %77 : vector<256x3xf32> to vector<256x3xbf16>
    %c2_102 = arith.constant 2 : index
    %c2_103 = arith.constant 2 : index
    %c0_104 = arith.constant 0 : index
    %c0_105 = arith.constant 0 : index
    %79 = vector.load %arg3[%c2_102, %c2_103, %c0_104, %c0_105] : memref<3x3x3x128xbf16, #tpu.memory_space<vmem>>, vector<1x1x3x128xbf16>
    %80 = vector.shape_cast %79 : vector<1x1x3x128xbf16> to vector<3x128xbf16>
    %cst_106 = arith.constant dense<0.000000e+00> : vector<256x128xf32>
    %81 = tpu.matmul %78, %80, %cst_106 {dimension_numbers = #tpu.dot_dimension_numbers<[1], [0], [0], [1], [0, 0, 1, 1], [], []>} : vector<256x3xbf16>, vector<3x128xbf16>, vector<256x128xf32> -> vector<256x128xf32>
    %82 = arith.addf %75, %81 : vector<256x128xf32>
    %c0_107 = arith.constant 0 : index
    %c0_108 = arith.constant 0 : index
    %83 = vector.load %arg4[%c0_107, %c0_108] : memref<1x128xf32, #tpu.memory_space<vmem>>, vector<1x128xf32>
    %84 = vector.shape_cast %83 : vector<1x128xf32> to vector<128xf32>
    %85 = vector.shape_cast %84 : vector<128xf32> to vector<1x128xf32>
    %86 = vector.broadcast %85 : vector<1x128xf32> to vector<256x128xf32>
    %87 = arith.addf %82, %86 : vector<256x128xf32>
    %cst_109 = arith.constant 0.000000e+00 : f32
    %88 = vector.broadcast %cst_109 : f32 to vector<256x128xf32>
    %89 = arith.maximumf %87, %88 : vector<256x128xf32>
    %90 = vector.shape_cast %89 : vector<256x128xf32> to vector<16x16x128xf32>
    %91 = arith.truncf %90 : vector<16x16x128xf32> to vector<16x16x128xbf16>
    %c1_110 = arith.constant 1 : index
    %c1_111 = arith.constant 1 : index
    %c0_112 = arith.constant 0 : index
    %92 = vector.load %arg9[%c1_110, %c1_111, %c0_112] : memref<18x18x128xbf16, #tpu.memory_space<vmem>>, vector<16x16x128xbf16>
    tpu.vector_store %arg9[%c1_110, %c1_111, %c0_112], %91 {strides = array<i32>} : memref<18x18x128xbf16, #tpu.memory_space<vmem>>, vector<16x16x128xbf16>,
    %cst_113 = arith.constant 0.000000e+00 : f32
    %93 = vector.broadcast %cst_113 : f32 to vector<256x8xf32>
    %c0_114 = arith.constant 0 : index
    %c0_115 = arith.constant 0 : index
    %c0_116 = arith.constant 0 : index
    %94 = vector.load %arg9[%c0_114, %c0_115, %c0_116] : memref<18x18x128xbf16, #tpu.memory_space<vmem>>, vector<16x18x128xbf16>
    %95 = vector.extract_strided_slice %94 {offsets = [0, 0, 0], sizes = [16, 16, 128], strides = [1, 1, 1]} : vector<16x18x128xbf16> to vector<16x16x128xbf16>
    %96 = vector.shape_cast %95 : vector<16x16x128xbf16> to vector<256x128xbf16>
    %97 = vector.extract_strided_slice %94 {offsets = [0, 1, 0], sizes = [16, 16, 128], strides = [1, 1, 1]} : vector<16x18x128xbf16> to vector<16x16x128xbf16>
    %98 = vector.shape_cast %97 : vector<16x16x128xbf16> to vector<256x128xbf16>
    %99 = vector.extract_strided_slice %94 {offsets = [0, 2, 0], sizes = [16, 16, 128], strides = [1, 1, 1]} : vector<16x18x128xbf16> to vector<16x16x128xbf16>
    %100 = vector.shape_cast %99 : vector<16x16x128xbf16> to vector<256x128xbf16>
    %101 = tpu.concatenate %96, %98, %100 in 1 : vector<256x128xbf16>, vector<256x128xbf16>, vector<256x128xbf16> -> vector<256x384xbf16>
    %c0_117 = arith.constant 0 : index
    %c0_118 = arith.constant 0 : index
    %c0_119 = arith.constant 0 : index
    %102 = vector.load %arg5[%c0_117, %c0_118, %c0_119] : memref<3x384x8xbf16, #tpu.memory_space<vmem>>, vector<1x384x8xbf16>
    %103 = vector.shape_cast %102 : vector<1x384x8xbf16> to vector<384x8xbf16>
    %cst_120 = arith.constant dense<0.000000e+00> : vector<256x8xf32>
    %104 = tpu.matmul %101, %103, %cst_120 {dimension_numbers = #tpu.dot_dimension_numbers<[1], [0], [0], [1], [0, 0, 1, 1], [], []>} : vector<256x384xbf16>, vector<384x8xbf16>, vector<256x8xf32> -> vector<256x8xf32>
    %105 = arith.addf %93, %104 : vector<256x8xf32>
    %c1_121 = arith.constant 1 : index
    %c0_122 = arith.constant 0 : index
    %c0_123 = arith.constant 0 : index
    %106 = vector.load %arg9[%c1_121, %c0_122, %c0_123] : memref<18x18x128xbf16, #tpu.memory_space<vmem>>, vector<16x18x128xbf16>
    %107 = vector.extract_strided_slice %106 {offsets = [0, 0, 0], sizes = [16, 16, 128], strides = [1, 1, 1]} : vector<16x18x128xbf16> to vector<16x16x128xbf16>
    %108 = vector.shape_cast %107 : vector<16x16x128xbf16> to vector<256x128xbf16>
    %109 = vector.extract_strided_slice %106 {offsets = [0, 1, 0], sizes = [16, 16, 128], strides = [1, 1, 1]} : vector<16x18x128xbf16> to vector<16x16x128xbf16>
    %110 = vector.shape_cast %109 : vector<16x16x128xbf16> to vector<256x128xbf16>
    %111 = vector.extract_strided_slice %106 {offsets = [0, 2, 0], sizes = [16, 16, 128], strides = [1, 1, 1]} : vector<16x18x128xbf16> to vector<16x16x128xbf16>
    %112 = vector.shape_cast %111 : vector<16x16x128xbf16> to vector<256x128xbf16>
    %113 = tpu.concatenate %108, %110, %112 in 1 : vector<256x128xbf16>, vector<256x128xbf16>, vector<256x128xbf16> -> vector<256x384xbf16>
    %c1_124 = arith.constant 1 : index
    %c0_125 = arith.constant 0 : index
    %c0_126 = arith.constant 0 : index
    %114 = vector.load %arg5[%c1_124, %c0_125, %c0_126] : memref<3x384x8xbf16, #tpu.memory_space<vmem>>, vector<1x384x8xbf16>
    %115 = vector.shape_cast %114 : vector<1x384x8xbf16> to vector<384x8xbf16>
    %cst_127 = arith.constant dense<0.000000e+00> : vector<256x8xf32>
    %116 = tpu.matmul %113, %115, %cst_127 {dimension_numbers = #tpu.dot_dimension_numbers<[1], [0], [0], [1], [0, 0, 1, 1], [], []>} : vector<256x384xbf16>, vector<384x8xbf16>, vector<256x8xf32> -> vector<256x8xf32>
    %117 = arith.addf %105, %116 : vector<256x8xf32>
    %c2_128 = arith.constant 2 : index
    %c0_129 = arith.constant 0 : index
    %c0_130 = arith.constant 0 : index
    %118 = vector.load %arg9[%c2_128, %c0_129, %c0_130] : memref<18x18x128xbf16, #tpu.memory_space<vmem>>, vector<16x18x128xbf16>
    %119 = vector.extract_strided_slice %118 {offsets = [0, 0, 0], sizes = [16, 16, 128], strides = [1, 1, 1]} : vector<16x18x128xbf16> to vector<16x16x128xbf16>
    %120 = vector.shape_cast %119 : vector<16x16x128xbf16> to vector<256x128xbf16>
    %121 = vector.extract_strided_slice %118 {offsets = [0, 1, 0], sizes = [16, 16, 128], strides = [1, 1, 1]} : vector<16x18x128xbf16> to vector<16x16x128xbf16>
    %122 = vector.shape_cast %121 : vector<16x16x128xbf16> to vector<256x128xbf16>
    %123 = vector.extract_strided_slice %118 {offsets = [0, 2, 0], sizes = [16, 16, 128], strides = [1, 1, 1]} : vector<16x18x128xbf16> to vector<16x16x128xbf16>
    %124 = vector.shape_cast %123 : vector<16x16x128xbf16> to vector<256x128xbf16>
    %125 = tpu.concatenate %120, %122, %124 in 1 : vector<256x128xbf16>, vector<256x128xbf16>, vector<256x128xbf16> -> vector<256x384xbf16>
    %c2_131 = arith.constant 2 : index
    %c0_132 = arith.constant 0 : index
    %c0_133 = arith.constant 0 : index
    %126 = vector.load %arg5[%c2_131, %c0_132, %c0_133] : memref<3x384x8xbf16, #tpu.memory_space<vmem>>, vector<1x384x8xbf16>
    %127 = vector.shape_cast %126 : vector<1x384x8xbf16> to vector<384x8xbf16>
    %cst_134 = arith.constant dense<0.000000e+00> : vector<256x8xf32>
    %128 = tpu.matmul %125, %127, %cst_134 {dimension_numbers = #tpu.dot_dimension_numbers<[1], [0], [0], [1], [0, 0, 1, 1], [], []>} : vector<256x384xbf16>, vector<384x8xbf16>, vector<256x8xf32> -> vector<256x8xf32>
    %129 = arith.addf %117, %128 : vector<256x8xf32>
    %c0_135 = arith.constant 0 : index
    %c0_136 = arith.constant 0 : index
    %130 = vector.load %arg6[%c0_135, %c0_136] : memref<1x8xf32, #tpu.memory_space<vmem>>, vector<1x8xf32>
    %131 = vector.shape_cast %130 : vector<1x8xf32> to vector<8xf32>
    %132 = vector.shape_cast %131 : vector<8xf32> to vector<1x8xf32>
    %133 = vector.broadcast %132 : vector<1x8xf32> to vector<256x8xf32>
    %134 = arith.addf %129, %133 : vector<256x8xf32>
    %135 = vector.extract_strided_slice %134 {offsets = [0, 0], sizes = [256, 4], strides = [1, 1]} : vector<256x8xf32> to vector<256x4xf32>
    %136 = vector.extract_strided_slice %134 {offsets = [0, 4], sizes = [256, 4], strides = [1, 1]} : vector<256x8xf32> to vector<256x4xf32>
    %c0_137 = arith.constant 0 : index
    %c0_138 = arith.constant 0 : index
    %c0_139 = arith.constant 0 : index
    %c0_140 = arith.constant 0 : index
    %137 = vector.load %arg1[%c0_137, %c0_138, %c0_139, %c0_140] : memref<1x16x16x4xf32, #tpu.memory_space<vmem>>, vector<1x16x16x4xf32>
    %cst_141 = arith.constant dense<0.000000e+00> : vector<1x4xf32>
    %138 = vector.multi_reduction <add>, %137, %cst_141 [1, 2] : vector<1x16x16x4xf32> to vector<1x4xf32>
    %139 = vector.shape_cast %138 : vector<1x4xf32> to vector<1x1x1x4xf32>
    %cst_142 = arith.constant 2.560000e+02 : f32
    %140 = vector.broadcast %cst_142 : f32 to vector<1x1x1x4xf32>
    %141 = arith.divf %139, %140 : vector<1x1x1x4xf32>
    %142 = vector.broadcast %141 : vector<1x1x1x4xf32> to vector<1x16x16x4xf32>
    %143 = arith.subf %137, %142 : vector<1x16x16x4xf32>
    %144 = vector.broadcast %141 : vector<1x1x1x4xf32> to vector<1x16x16x4xf32>
    %145 = arith.subf %137, %144 : vector<1x16x16x4xf32>
    %146 = arith.mulf %143, %145 : vector<1x16x16x4xf32>
    %cst_143 = arith.constant dense<0.000000e+00> : vector<1x4xf32>
    %147 = vector.multi_reduction <add>, %146, %cst_143 [1, 2] : vector<1x16x16x4xf32> to vector<1x4xf32>
    %148 = vector.shape_cast %147 : vector<1x4xf32> to vector<1x1x1x4xf32>
    %cst_144 = arith.constant 2.560000e+02 : f32
    %149 = vector.broadcast %cst_144 : f32 to vector<1x1x1x4xf32>
    %150 = arith.divf %148, %149 : vector<1x1x1x4xf32>
    %151 = vector.broadcast %141 : vector<1x1x1x4xf32> to vector<1x16x16x4xf32>
    %152 = arith.subf %137, %151 : vector<1x16x16x4xf32>
    %cst_145 = arith.constant 9.99999974E-6 : f32
    %153 = vector.broadcast %cst_145 : f32 to vector<1x1x1x4xf32>
    %154 = arith.addf %150, %153 : vector<1x1x1x4xf32>
    %155 = math.rsqrt %154 : vector<1x1x1x4xf32>
    %156 = vector.broadcast %155 : vector<1x1x1x4xf32> to vector<1x16x16x4xf32>
    %157 = arith.mulf %152, %156 : vector<1x16x16x4xf32>
    %158 = vector.shape_cast %157 : vector<1x16x16x4xf32> to vector<256x4xf32>
    %cst_146 = arith.constant 1.000000e+00 : f32
    %159 = vector.broadcast %cst_146 : f32 to vector<256x4xf32>
    %160 = arith.addf %159, %135 : vector<256x4xf32>
    %161 = arith.mulf %158, %160 : vector<256x4xf32>
    %162 = arith.addf %161, %136 : vector<256x4xf32>
    %163 = vector.shape_cast %162 : vector<256x4xf32> to vector<1x16x16x4xf32>
    %c0_147 = arith.constant 0 : index
    %c0_148 = arith.constant 0 : index
    %c0_149 = arith.constant 0 : index
    %c0_150 = arith.constant 0 : index
    %164 = vector.load %arg7[%c0_147, %c0_148, %c0_149, %c0_150] : memref<1x16x16x4xf32, #tpu.memory_space<vmem>>, vector<1x16x16x4xf32>
    tpu.vector_store %arg7[%c0_147, %c0_148, %c0_149, %c0_150], %163 {strides = array<i32>} : memref<1x16x16x4xf32, #tpu.memory_space<vmem>>, vector<1x16x16x4xf32>,
    return
  }
  func.func @transform_0(%arg0: i32) -> (i32, i32, i32, i32) {
    %c0_i32 = arith.constant 0 : i32
    %c0_i32_0 = arith.constant 0 : i32
    %c0_i32_1 = arith.constant 0 : i32
    %c0_i32_2 = arith.constant 0 : i32
    return %arg0, %c0_i32, %c0_i32_0, %c0_i32_1 : i32, i32, i32, i32
  }
  func.func @transform_1(%arg0: i32) -> (i32, i32, i32, i32) {
    %c0_i32 = arith.constant 0 : i32
    %c0_i32_0 = arith.constant 0 : i32
    %c0_i32_1 = arith.constant 0 : i32
    %c0_i32_2 = arith.constant 0 : i32
    return %arg0, %c0_i32, %c0_i32_0, %c0_i32_1 : i32, i32, i32, i32
  }
  func.func @transform_2(%arg0: i32) -> (i32, i32, i32, i32) {
    %c0_i32 = arith.constant 0 : i32
    %c0_i32_0 = arith.constant 0 : i32
    %c0_i32_1 = arith.constant 0 : i32
    %c0_i32_2 = arith.constant 0 : i32
    %c0_i32_3 = arith.constant 0 : i32
    return %c0_i32, %c0_i32_0, %c0_i32_1, %c0_i32_2 : i32, i32, i32, i32
  }
  func.func @transform_3(%arg0: i32) -> (i32, i32) {
    %c0_i32 = arith.constant 0 : i32
    %c0_i32_0 = arith.constant 0 : i32
    %c0_i32_1 = arith.constant 0 : i32
    return %c0_i32, %c0_i32_0 : i32, i32
  }
  func.func @transform_4(%arg0: i32) -> (i32, i32, i32) {
    %c0_i32 = arith.constant 0 : i32
    %c0_i32_0 = arith.constant 0 : i32
    %c0_i32_1 = arith.constant 0 : i32
    %c0_i32_2 = arith.constant 0 : i32
    return %c0_i32, %c0_i32_0, %c0_i32_1 : i32, i32, i32
  }
  func.func @transform_5(%arg0: i32) -> (i32, i32) {
    %c0_i32 = arith.constant 0 : i32
    %c0_i32_0 = arith.constant 0 : i32
    %c0_i32_1 = arith.constant 0 : i32
    return %c0_i32, %c0_i32_0 : i32, i32
  }
  func.func @transform_6(%arg0: i32) -> (i32, i32, i32, i32) {
    %c0_i32 = arith.constant 0 : i32
    %c0_i32_0 = arith.constant 0 : i32
    %c0_i32_1 = arith.constant 0 : i32
    %c0_i32_2 = arith.constant 0 : i32
    return %arg0, %c0_i32, %c0_i32_0, %c0_i32_1 : i32, i32, i32, i32
  }
}

</mosaic_0001>

<bundles_post_ra>
// kernel: landmark_norm_forward.1
= control target key start
LH: loop header
LB: loop body
LE: loop exit
PB: predicated region body
PF: predicated region fallthrough
CT: control target
= control target key end

     0   :  { %s10524_s21 = smov 0   ;;  %s14358_s0 = inlined_call_operand.vmem [shape: f32[2,16,16,4], index: 0, kind: input, shape index: {}]   ;;  %s14359_s1 = inlined_call_operand.vmem [shape: f32[2,16,16,3], index: 1, kind: input, shape index: {}]   ;;  %s14360_s2 = inlined_call_operand.vmem [shape: bf16[3,3,3,128], index: 2, kind: input, shape index: {}]   ;;  %s14361_s3 = inlined_call_operand.vmem [shape: f32[1,128], index: 3, kind: input, shape index: {}]   ;;  %s14362_s4 = inlined_call_operand.vmem [shape: bf16[3,384,8], index: 4, kind: input, shape index: {}]   ;;  %s14363_s5 = inlined_call_operand.vmem [shape: f32[1,8], index: 5, kind: input, shape index: {}]   ;;  %s14364_s6 = inlined_call_operand.vmem [shape: f32[2,16,16,4], index: 6, kind: output, shape index: {}]  }
   0x1 LB: > { %s8263_s22 = sadd.s32 4294967295, %s10483_s21   ;;  %p8267_p0 = scmp.ge.s32.totalorder %s10483_s21, 1  ;;  %s10483_s21 = sphi %s10524_s21, %s16_s21  }
   0x2   : > { %p222_p1 = scmp.lt.s32.totalorder %s10483_s21, 3 }
   0x4   : > { %p223_p2 = pnand %p8267_p0, %p222_p1 }
   0x6   : > { %226 = sbr.rel (%p223_p2) target bundleno = 1765 (0x6e5), region = 44 }
   0xd   : > { %vm326_vm0 = vcmask 1040384   ;;  %vm652_vm1 = vcmask 1041408   ;;  %v8274_v0 = vld [vmem:[%s14360_s2 + $0x2] sm:$0x3]  ;;  %vm273_vm2 = vcmask 23552   ;;  %vm276_vm3 = vcmask 17408  }
   0xe   : > { %v10485_v1 = vmov 65535   ;;  %v10486_v3 = vmov 0.0   ;;  %vm282_vm4 = vcmask 16384   ;;  %v552_v4 = vld [vmem:[%s14360_s2] sm:$0x3]  ;;  %p10545_p3 = scmp.lt.s32.totalorder %s8263_s22, 1 }
   0xf   : > { %v653_v2 = vsel %vm326_vm0, 4294967295, %v10485_v1  ;;  %274 = vst.msk [vmem:[#allocation2] sm:$0xff] %vm273_vm2, %v10486_v3  ;;  %275 = vst.msk [vmem:[#allocation2 + $0x8] sm:$0xff] %vm273_vm2, %v10486_v3  ;;  %v8307_v24 = vld [vmem:[%s14360_s2 + $0x4] sm:$0x3]  ;;  %vm3580_vm9 = vcmask 1043456  }
  0x10   : > { %277 = vst.msk [vmem:[#allocation2 + $0x10] sm:$0x3] %vm276_vm3, %v10486_v3  ;;  %281 = vst.msk [vmem:[#allocation2 + $0x1a8] sm:$0x3] %vm276_vm3, %v10486_v3  ;;  %v10550_v5 = vsel %vm652_vm1, %v653_v2, 0  ;;  %s14816_s22 = smov (!%p10545_p3, %s8263_s22), 1 }
  0x11   : > { %279 = vst.msk [vmem:[#allocation2 + $0x198] sm:$0xff] %vm273_vm2, %v10486_v3  ;;  %280 = vst.msk [vmem:[#allocation2 + $0x1a0] sm:$0xff] %vm273_vm2, %v10486_v3  ;;  %v656_v6 = vand.u32 %v8274_v0, %v10550_v5  ;;  %v10590_v7 = vand.u32 %v10550_v5, %v552_v4  ;;  %s10596_s28 = sshll.u32 %s14816_s22, 8  ;;  %v10658_v41 = vand.u32 %v8307_v24, %v10550_v5  ;;  %vm327_vm5 = vsmask.f32 256  ;;  %s10488_s22 = smov 124  }
  0x12   : > { %283 = vst.msk [vmem:[#allocation2] sm:$0x1] %vm282_vm4, %v10486_v3  ;;  %301 = vst.msk [vmem:[#allocation2 + $0x11] sm:$0x1] %vm282_vm4, %v10486_v3  ;;  %s10602_s7 = scalar_lea.vmem %s14359_s1, %s10596_s28  ;;  %vm383_vm7 = vsmask.f32 7938  ;;  %s13434_s18 = scalar_lea.vmem %s14358_s0, %s10596_s28 }
  0x13   : > { %318 = vst.msk [vmem:[#allocation2 + $0x1a9] sm:$0x1] %vm282_vm4, %v10486_v3  ;;  %284 = vst.msk [vmem:[#allocation2 + $0x18] sm:$0x1] %vm282_vm4, %v10486_v3  ;;  %9418 = vmatprep.subr.bf16.mxu0 %v656_v6  ;;  %v439_v8 = vld [vmem:[%s10602_s7] sm:$0xff]  ;;  %v440_v9 = vld [vmem:[%s10602_s7 + $0x8] sm:$0xff]  ;;  %s14185_s25 = scalar_lea.vmem %s14364_s6, %s10596_s28 }
  0x14   : > { %285 = vst.msk [vmem:[#allocation2 + $0x30] sm:$0x1] %vm282_vm4, %v10486_v3  ;;  %286 = vst.msk [vmem:[#allocation2 + $0x48] sm:$0x1] %vm282_vm4, %v10486_v3  ;;  %9419 = vmatpush3.bf16.msra.mxu0 %v656_v6  ;;  %v441_v10 = vld [vmem:[%s10602_s7 + $0x10] sm:$0xff]  ;;  %v442_v13 = vld [vmem:[%s10602_s7 + $0x18] sm:$0xff] }
  0x15   : > { %287 = vst.msk [vmem:[#allocation2 + $0x60] sm:$0x1] %vm282_vm4, %v10486_v3  ;;  %288 = vst.msk [vmem:[#allocation2 + $0x78] sm:$0x1] %vm282_vm4, %v10486_v3  ;;  %9452 = vmatprep.subr.bf16.mxu0 %v10590_v7  ;;  %v443_v15 = vld [vmem:[%s10602_s7 + $0x20] sm:$0xff]  ;;  %v444_v16 = vld [vmem:[%s10602_s7 + $0x28] sm:$0xff] }
  0x16   : > { %289 = vst.msk [vmem:[#allocation2 + $0x90] sm:$0x1] %vm282_vm4, %v10486_v3  ;;  %290 = vst.msk [vmem:[#allocation2 + $0xa8] sm:$0x1] %vm282_vm4, %v10486_v3  ;;  %v553_v11 = vld [vmem:[#allocation2 + $0x1] sm:$0xff]  ;;  %v445_v17 = vld [vmem:[%s10602_s7 + $0x30] sm:$0xff] }
  0x17   : > { %291 = vst.msk [vmem:[#allocation2 + $0xc0] sm:$0x1] %vm282_vm4, %v10486_v3  ;;  %292 = vst.msk [vmem:[#allocation2 + $0xd8] sm:$0x1] %vm282_vm4, %v10486_v3  ;;  %v554_v12 = vld [vmem:[#allocation2 + $0x9] sm:$0xff]  ;;  %v446_v18 = vld [vmem:[%s10602_s7 + $0x38] sm:$0xff] }
  0x18   : > { %293 = vst.msk [vmem:[#allocation2 + $0xf0] sm:$0x1] %vm282_vm4, %v10486_v3  ;;  %294 = vst.msk [vmem:[#allocation2 + $0x108] sm:$0x1] %vm282_vm4, %v10486_v3  ;;  %v585_v14 = vpack.c.bf16 %v554_v12, %v553_v11  ;;  %v447_v19 = vld [vmem:[%s10602_s7 + $0x40] sm:$0xff]  ;;  %v448_v20 = vld [vmem:[%s10602_s7 + $0x48] sm:$0xff] }
  0x19   : > { %295 = vst.msk [vmem:[#allocation2 + $0x120] sm:$0x1] %vm282_vm4, %v10486_v3  ;;  %296 = vst.msk [vmem:[#allocation2 + $0x138] sm:$0x1] %vm282_vm4, %v10486_v3  ;;  %v449_v21 = vld [vmem:[%s10602_s7 + $0x50] sm:$0xff]  ;;  %v450_v22 = vld [vmem:[%s10602_s7 + $0x58] sm:$0xff] }
  0x1a   : > { %297 = vst.msk [vmem:[#allocation2 + $0x150] sm:$0x1] %vm282_vm4, %v10486_v3  ;;  %298 = vst.msk [vmem:[#allocation2 + $0x168] sm:$0x1] %vm282_vm4, %v10486_v3  ;;  %9420 = vmatprep.mubr.msk.bf16.mxu0 %vm273_vm2, %v585_v14  ;;  %v451_v23 = vld [vmem:[%s10602_s7 + $0x60] sm:$0xff]  ;;  %v452_v25 = vld [vmem:[%s10602_s7 + $0x68] sm:$0xff] }
  0x1b   : > { %299 = vst.msk [vmem:[#allocation2 + $0x180] sm:$0x1] %vm282_vm4, %v10486_v3  ;;  %302 = vst.msk [vmem:[#allocation2 + $0x29] sm:$0x1] %vm282_vm4, %v10486_v3  ;;  %v453_v26 = vld [vmem:[%s10602_s7 + $0x70] sm:$0xff]  ;;  %v454_v27 = vld [vmem:[%s10602_s7 + $0x78] sm:$0xff] }
  0x1c   : > { %303 = vst.msk [vmem:[#allocation2 + $0x41] sm:$0x1] %vm282_vm4, %v10486_v3  ;;  %304 = vst.msk [vmem:[#allocation2 + $0x59] sm:$0x1] %vm282_vm4, %v10486_v3  ;;  %v455_v28 = vld [vmem:[%s10602_s7 + $0x80] sm:$0xff]  ;;  %v456_v29 = vld [vmem:[%s10602_s7 + $0x88] sm:$0xff] }
  0x1d   : > { %305 = vst.msk [vmem:[#allocation2 + $0x71] sm:$0x1] %vm282_vm4, %v10486_v3  ;;  %306 = vst.msk [vmem:[#allocation2 + $0x89] sm:$0x1] %vm282_vm4, %v10486_v3  ;;  %v457_v30 = vld [vmem:[%s10602_s7 + $0x90] sm:$0xff]  ;;  %v458_v31 = vld [vmem:[%s10602_s7 + $0x98] sm:$0xff] }
  0x1e   : > { %307 = vst.msk [vmem:[#allocation2 + $0xa1] sm:$0x1] %vm282_vm4, %v10486_v3  ;;  %308 = vst.msk [vmem:[#allocation2 + $0xb9] sm:$0x1] %vm282_vm4, %v10486_v3  ;;  %v459_v32 = vld [vmem:[%s10602_s7 + $0xa0] sm:$0xff]  ;;  %v460_v33 = vld [vmem:[%s10602_s7 + $0xa8] sm:$0xff] }
  0x1f   : > { %309 = vst.msk [vmem:[#allocation2 + $0xd1] sm:$0x1] %vm282_vm4, %v10486_v3  ;;  %310 = vst.msk [vmem:[#allocation2 + $0xe9] sm:$0x1] %vm282_vm4, %v10486_v3  ;;  %v461_v39 = vld [vmem:[%s10602_s7 + $0xb0] sm:$0xff]  ;;  %v462_v40 = vld [vmem:[%s10602_s7 + $0xb8] sm:$0xff] }
  0x20   : > { %311 = vst.msk [vmem:[#allocation2 + $0x101] sm:$0x1] %vm282_vm4, %v10486_v3  ;;  %312 = vst.msk [vmem:[#allocation2 + $0x119] sm:$0x1] %vm282_vm4, %v10486_v3  ;;  %v463_v49 = vld [vmem:[%s10602_s7 + $0xc0] sm:$0xff]  ;;  %v464_v50 = vld [vmem:[%s10602_s7 + $0xc8] sm:$0xff] }
  0x21   : > { %313 = vst.msk [vmem:[#allocation2 + $0x131] sm:$0x1] %vm282_vm4, %v10486_v3  ;;  %314 = vst.msk [vmem:[#allocation2 + $0x149] sm:$0x1] %vm282_vm4, %v10486_v3  ;;  %v465_v51 = vld [vmem:[%s10602_s7 + $0xd0] sm:$0xff]  ;;  %v466_v52 = vld [vmem:[%s10602_s7 + $0xd8] sm:$0xff] }
  0x22   : > { %315 = vst.msk [vmem:[#allocation2 + $0x161] sm:$0x1] %vm282_vm4, %v10486_v3  ;;  %316 = vst.msk [vmem:[#allocation2 + $0x179] sm:$0x1] %vm282_vm4, %v10486_v3  ;;  %v467_v53 = vld [vmem:[%s10602_s7 + $0xe0] sm:$0xff]  ;;  %v468_v54 = vld [vmem:[%s10602_s7 + $0xe8] sm:$0xff] }
  0x23   : > { %317 = vst.msk [vmem:[#allocation2 + $0x191] sm:$0x1] %vm282_vm4, %v10486_v3  ;;  %300 = vst.msk [vmem:[#allocation2 + $0x198] sm:$0x1] %vm282_vm4, %v10486_v3  ;;  %vm3257_vm10 = vsmask.f32 4368 }
  0x24   : > { %472 = vst.msk [vmem:[#allocation2 + $0x19] sm:$0xff] %vm273_vm2, %v439_v8  ;;  %473 = vst.msk [vmem:[#allocation2 + $0x21] sm:$0xff] %vm273_vm2, %v440_v9  ;;  %vm3742_vm13 = vsmask.f32 3328  ;;  %vm4177_vm14 = vcmask 1042432   ;;  %vm4178_vm15 = vcmask 1046532  }
  0x25   : > { %474 = vst.msk [vmem:[#allocation2 + $0x31] sm:$0xff] %vm273_vm2, %v441_v10  ;;  %475 = vst.msk [vmem:[#allocation2 + $0x39] sm:$0xff] %vm273_vm2, %v442_v13  ;;  %vm7700_vm3 = vcmask 31744  }
  0x26   : > { %476 = vst.msk [vmem:[#allocation2 + $0x49] sm:$0xff] %vm273_vm2, %v443_v15  ;;  %477 = vst.msk [vmem:[#allocation2 + $0x51] sm:$0xff] %vm273_vm2, %v444_v16 }
  0x27   : > { %478 = vst.msk [vmem:[#allocation2 + $0x61] sm:$0xff] %vm273_vm2, %v445_v17  ;;  %479 = vst.msk [vmem:[#allocation2 + $0x69] sm:$0xff] %vm273_vm2, %v446_v18 }
  0x28   : > { %480 = vst.msk [vmem:[#allocation2 + $0x79] sm:$0xff] %vm273_vm2, %v447_v19  ;;  %481 = vst.msk [vmem:[#allocation2 + $0x81] sm:$0xff] %vm273_vm2, %v448_v20 }
  0x29   : > { %482 = vst.msk [vmem:[#allocation2 + $0x91] sm:$0xff] %vm273_vm2, %v449_v21  ;;  %483 = vst.msk [vmem:[#allocation2 + $0x99] sm:$0xff] %vm273_vm2, %v450_v22  ;;  %v504_v22 = vld [vmem:[#allocation2] sm:$0xff] }
  0x2a   : > { %484 = vst.msk [vmem:[#allocation2 + $0xa9] sm:$0xff] %vm273_vm2, %v451_v23  ;;  %485 = vst.msk [vmem:[#allocation2 + $0xb1] sm:$0xff] %vm273_vm2, %v452_v25  ;;  %v505_v23 = vld [vmem:[#allocation2 + $0x8] sm:$0xff] }
  0x2b   : > { %486 = vst.msk [vmem:[#allocation2 + $0xc1] sm:$0xff] %vm273_vm2, %v453_v26  ;;  %487 = vst.msk [vmem:[#allocation2 + $0xc9] sm:$0xff] %vm273_vm2, %v454_v27  ;;  %v555_v34 = vld [vmem:[#allocation2 + $0x19] sm:$0xff]  ;;  %v556_v35 = vld [vmem:[#allocation2 + $0x21] sm:$0xff]  ;;  %v536_v27 = vpack.c.bf16 %v505_v23, %v504_v22 }
  0x2c   : > { %488 = vst.msk [vmem:[#allocation2 + $0xd9] sm:$0xff] %vm273_vm2, %v455_v28  ;;  %489 = vst.msk [vmem:[#allocation2 + $0xe1] sm:$0xff] %vm273_vm2, %v456_v29  ;;  %v557_v36 = vld [vmem:[#allocation2 + $0x31] sm:$0xff]  ;;  %v10653_v37 = vpack.c.bf16 %v556_v35, %v555_v34  ;;  %v558_v38 = vld [vmem:[#allocation2 + $0x39] sm:$0xff] }
  0x2d   : > { %490 = vst.msk [vmem:[#allocation2 + $0xf1] sm:$0xff] %vm273_vm2, %v457_v30  ;;  %491 = vst.msk [vmem:[#allocation2 + $0xf9] sm:$0xff] %vm273_vm2, %v458_v31  ;;  %v10660_v42 = vpack.c.bf16 %v558_v38, %v557_v36  ;;  %v559_v43 = vld [vmem:[#allocation2 + $0x49] sm:$0xff]  ;;  %v560_v44 = vld [vmem:[#allocation2 + $0x51] sm:$0xff] }
  0x2e   : > { %492 = vst.msk [vmem:[#allocation2 + $0x109] sm:$0xff] %vm273_vm2, %v459_v32  ;;  %493 = vst.msk [vmem:[#allocation2 + $0x111] sm:$0xff] %vm273_vm2, %v460_v33  ;;  %9421 = vmatmul.mubr.msk.bf16.vlgmr.msra.gmra.mrb[0].mxu0 %vm273_vm2, %v10653_v37  ;;  %v561_v45 = vld [vmem:[#allocation2 + $0x61] sm:$0xff]  ;;  %v562_v46 = vld [vmem:[#allocation2 + $0x69] sm:$0xff]  ;;  %v10670_v47 = vpack.c.bf16 %v560_v44, %v559_v43 }
  0x2f   : > { %494 = vst.msk [vmem:[#allocation2 + $0x121] sm:$0xff] %vm273_vm2, %v461_v39  ;;  %495 = vst.msk [vmem:[#allocation2 + $0x129] sm:$0xff] %vm273_vm2, %v462_v40  ;;  %9453 = vmatpush3.bf16.msra.mxu0 %v10590_v7  ;;  %9424 = vmatprep.mubr.msk.bf16.mxu0 %vm273_vm2, %v10660_v42  ;;  %v10672_v48 = vpack.c.bf16 %v562_v46, %v561_v45  ;;  %v563_v55 = vld [vmem:[#allocation2 + $0x79] sm:$0xff]  ;;  %v564_v56 = vld [vmem:[#allocation2 + $0x81] sm:$0xff] }
  0x30   : > { %9486 = vmatprep.subr.bf16.mxu0 %v10658_v41  ;;  %496 = vst.msk [vmem:[#allocation2 + $0x139] sm:$0xff] %vm273_vm2, %v463_v49  ;;  %497 = vst.msk [vmem:[#allocation2 + $0x141] sm:$0xff] %vm273_vm2, %v464_v50  ;;  %v565_v57 = vld [vmem:[#allocation2 + $0x91] sm:$0xff]  ;;  %v566_v58 = vld [vmem:[#allocation2 + $0x99] sm:$0xff]  ;;  %v10690_v59 = vpack.c.bf16 %v564_v56, %v563_v55 }
  0x31   : > { %498 = vst.msk [vmem:[#allocation2 + $0x151] sm:$0xff] %vm273_vm2, %v465_v51  ;;  %499 = vst.msk [vmem:[#allocation2 + $0x159] sm:$0xff] %vm273_vm2, %v466_v52  ;;  %v10692_v60 = vpack.c.bf16 %v566_v58, %v565_v57  ;;  %v567_v61 = vld [vmem:[#allocation2 + $0xa9] sm:$0xff]  ;;  %v568_v62 = vld [vmem:[#allocation2 + $0xb1] sm:$0xff] }
  0x32   : > { %500 = vst.msk [vmem:[#allocation2 + $0x169] sm:$0xff] %vm273_vm2, %v467_v53  ;;  %501 = vst.msk [vmem:[#allocation2 + $0x171] sm:$0xff] %vm273_vm2, %v468_v54  ;;  %v569_v63 = vld [vmem:[#allocation2 + $0xc1] sm:$0xff]  ;;  %v570_v0 = vld [vmem:[#allocation2 + $0xc9] sm:$0xff]  ;;  %v10698_v1 = vpack.c.bf16 %v568_v62, %v567_v61 }
  0x33   : > { %v10700_v2 = vpack.c.bf16 %v570_v0, %v569_v63  ;;  %v571_v3 = vld [vmem:[#allocation2 + $0xd9] sm:$0xff]  ;;  %v572_v4 = vld [vmem:[#allocation2 + $0xe1] sm:$0xff]  ;;  %v508_v30 = vld [vmem:[#allocation2 + $0x30] sm:$0xff] }
  0x34   : > { %v573_v6 = vld [vmem:[#allocation2 + $0xf1] sm:$0xff]  ;;  %v574_v7 = vld [vmem:[#allocation2 + $0xf9] sm:$0xff]  ;;  %v10706_v8 = vpack.c.bf16 %v572_v4, %v571_v3  ;;  %v8324_v32 = vld [vmem:[%s14360_s2 + $0x6] sm:$0x3] }
  0x35   : > { %v10708_v9 = vpack.c.bf16 %v574_v7, %v573_v6  ;;  %v575_v10 = vld [vmem:[#allocation2 + $0x109] sm:$0xff]  ;;  %v576_v11 = vld [vmem:[#allocation2 + $0x111] sm:$0xff]  ;;  %v507_v29 = vld [vmem:[#allocation2 + $0x20] sm:$0xff]  ;;  %v10743_v35 = vand.u32 %v8324_v32, %v10550_v5 }
  0x36   : > { %9425 = vmatmul.mubr.msk.bf16.gmra.mrb[4].mxu0 %vm273_vm2, %v10670_v47  ;;  %v577_v12 = vld [vmem:[#allocation2 + $0x121] sm:$0xff]  ;;  %v578_v13 = vld [vmem:[#allocation2 + $0x129] sm:$0xff]  ;;  %v10714_v14 = vpack.c.bf16 %v576_v11, %v575_v10  ;;  %v506_v28 = vld [vmem:[#allocation2 + $0x18] sm:$0xff] }
  0x37   : > { %9428 = vmatprep.mubr.msk.bf16.mxu0 %vm273_vm2, %v10672_v48  ;;  %v10716_v15 = vpack.c.bf16 %v578_v13, %v577_v12  ;;  %v579_v16 = vld [vmem:[#allocation2 + $0x139] sm:$0xff]  ;;  %v580_v17 = vld [vmem:[#allocation2 + $0x141] sm:$0xff]  ;;  %v10738_v33 = vpack.c.bf16 %v507_v29, %v506_v28  ;;  %v511_v38 = vld [vmem:[#allocation2 + $0x50] sm:$0xff] }
  0x38   : > { %v581_v18 = vld [vmem:[#allocation2 + $0x151] sm:$0xff]  ;;  %v582_v19 = vld [vmem:[#allocation2 + $0x159] sm:$0xff]  ;;  %v10722_v20 = vpack.c.bf16 %v580_v17, %v579_v16  ;;  %v510_v36 = vld [vmem:[#allocation2 + $0x48] sm:$0xff] }
  0x39   : > { %v10724_v21 = vpack.c.bf16 %v582_v19, %v581_v18  ;;  %v583_v24 = vld [vmem:[#allocation2 + $0x169] sm:$0xff]  ;;  %v584_v25 = vld [vmem:[#allocation2 + $0x171] sm:$0xff]  ;;  %v512_v39 = vld [vmem:[#allocation2 + $0x60] sm:$0xff]  ;;  %v10751_v43 = vpack.c.bf16 %v511_v38, %v510_v36 }
  0x3a   : > { %v10730_v26 = vpack.c.bf16 %v584_v25, %v583_v24  ;;  %v509_v31 = vld [vmem:[#allocation2 + $0x38] sm:$0xff]  ;;  %v513_v40 = vld [vmem:[#allocation2 + $0x68] sm:$0xff]  ;;  %v515_v46 = vld [vmem:[#allocation2 + $0x80] sm:$0xff] }
  0x3b   : > { %v10740_v34 = vpack.c.bf16 %v509_v31, %v508_v30  ;;  %v10753_v44 = vpack.c.bf16 %v513_v40, %v512_v39  ;;  %v514_v45 = vld [vmem:[#allocation2 + $0x78] sm:$0xff]  ;;  %v516_v49 = vld [vmem:[#allocation2 + $0x90] sm:$0xff]  ;;  %v518_v52 = vld [vmem:[#allocation2 + $0xa8] sm:$0xff] }
  0x3c   : > { %v517_v50 = vld [vmem:[#allocation2 + $0x98] sm:$0xff]  ;;  %v519_v53 = vld [vmem:[#allocation2 + $0xb0] sm:$0xff]  ;;  %v520_v54 = vld [vmem:[#allocation2 + $0xc0] sm:$0xff] }
  0x3d   : > { %v10761_v51 = vpack.c.bf16 %v517_v50, %v516_v49  ;;  %v521_v55 = vld [vmem:[#allocation2 + $0xc8] sm:$0xff]  ;;  %v10767_v56 = vpack.c.bf16 %v519_v53, %v518_v52  ;;  %v522_v58 = vld [vmem:[#allocation2 + $0xd8] sm:$0xff]  ;;  %v523_v61 = vld [vmem:[#allocation2 + $0xe0] sm:$0xff] }
  0x3e   : > { %9429 = vmatmul.mubr.msk.bf16.gmra.mrb[8].mxu0 %vm273_vm2, %v10690_v59  ;;  %v10769_v57 = vpack.c.bf16 %v521_v55, %v520_v54  ;;  %v524_v62 = vld [vmem:[#allocation2 + $0xf0] sm:$0xff]  ;;  %v525_v63 = vld [vmem:[#allocation2 + $0xf8] sm:$0xff]  ;;  %v10775_v0 = vpack.c.bf16 %v523_v61, %v522_v58  ;;  %v526_v4 = vld [vmem:[#allocation2 + $0x108] sm:$0xff] }
  0x3f   : > { %9432 = vmatprep.mubr.msk.bf16.mxu0 %vm273_vm2, %v10692_v60  ;;  %v10777_v3 = vpack.c.bf16 %v525_v63, %v524_v62  ;;  %v527_v6 = vld [vmem:[#allocation2 + $0x110] sm:$0xff]  ;;  %v528_v7 = vld [vmem:[#allocation2 + $0x120] sm:$0xff]  ;;  %v529_v10 = vld [vmem:[#allocation2 + $0x128] sm:$0xff] }
  0x40   : > { %v10783_v11 = vpack.c.bf16 %v527_v6, %v526_v4  ;;  %v10785_v12 = vpack.c.bf16 %v529_v10, %v528_v7  ;;  %v530_v13 = vld [vmem:[#allocation2 + $0x138] sm:$0xff]  ;;  %v531_v16 = vld [vmem:[#allocation2 + $0x140] sm:$0xff]  ;;  %v532_v17 = vld [vmem:[#allocation2 + $0x150] sm:$0xff] }
  0x41   : > { %v533_v18 = vld [vmem:[#allocation2 + $0x158] sm:$0xff]  ;;  %v10791_v19 = vpack.c.bf16 %v531_v16, %v530_v13  ;;  %v469_v23 = vld [vmem:[%s10602_s7 + $0xf0] sm:$0xff]  ;;  %v534_v25 = vld [vmem:[#allocation2 + $0x168] sm:$0xff] }
  0x42   : > { %v10793_v22 = vpack.c.bf16 %v533_v18, %v532_v17  ;;  %v470_v24 = vld [vmem:[%s10602_s7 + $0xf8] sm:$0xff]  ;;  %502 = vst.msk [vmem:[#allocation2 + $0x181] sm:$0xff] %vm273_vm2, %v469_v23  ;;  %v1031_v28 = vld [vmem:[#allocation2 + $0x2] sm:$0xff]  ;;  %v1032_v29 = vld [vmem:[#allocation2 + $0xa] sm:$0xff] }
  0x43   : > { %503 = vst.msk [vmem:[#allocation2 + $0x189] sm:$0xff] %vm273_vm2, %v470_v24  ;;  %v1063_v31 = vpack.c.bf16 %v1032_v29, %v1031_v28  ;;  %v1033_v32 = vld [vmem:[#allocation2 + $0x1a] sm:$0xff]  ;;  %v1034_v36 = vld [vmem:[#allocation2 + $0x22] sm:$0xff]  ;;  %v1035_v38 = vld [vmem:[#allocation2 + $0x32] sm:$0xff] }
  0x44   : > { %v1036_v39 = vld [vmem:[#allocation2 + $0x3a] sm:$0xff]  ;;  %v8341_v40 = vld [vmem:[%s14360_s2 + $0x8] sm:$0x3]  ;;  %v1037_v50 = vld [vmem:[#allocation2 + $0x4a] sm:$0xff] }
  0x45   : > { %v1718_v49 = vand.u32 %v8341_v40, %v10550_v5  ;;  %v1038_v52 = vld [vmem:[#allocation2 + $0x52] sm:$0xff]  ;;  %v1039_v53 = vld [vmem:[#allocation2 + $0x62] sm:$0xff]  ;;  %v1040_v54 = vld [vmem:[#allocation2 + $0x6a] sm:$0xff] }
  0x46   : > { %9433 = vmatmul.mubr.msk.bf16.gmra.mrb[12].mxu0 %vm273_vm2, %v10698_v1  ;;  %v10821_v55 = vpack.c.bf16 %v1038_v52, %v1037_v50  ;;  %v10823_v58 = vpack.c.bf16 %v1040_v54, %v1039_v53  ;;  %v1041_v61 = vld [vmem:[#allocation2 + $0x7a] sm:$0xff]  ;;  %v1043_v62 = vld [vmem:[#allocation2 + $0x92] sm:$0xff]  ;;  %v1045_v7 = vld [vmem:[#allocation2 + $0xaa] sm:$0xff] }
  0x47   : > { %9436 = vmatprep.mubr.msk.bf16.mxu0 %vm273_vm2, %v10700_v2  ;;  %v1044_v63 = vld [vmem:[#allocation2 + $0x9a] sm:$0xff]  ;;  %v1046_v10 = vld [vmem:[#allocation2 + $0xb2] sm:$0xff]  ;;  %v1047_v13 = vld [vmem:[#allocation2 + $0xc2] sm:$0xff] }
  0x48   : > { %v10831_v6 = vpack.c.bf16 %v1044_v63, %v1043_v62  ;;  %v1048_v16 = vld [vmem:[#allocation2 + $0xca] sm:$0xff]  ;;  %v10837_v17 = vpack.c.bf16 %v1046_v10, %v1045_v7  ;;  %v1049_v23 = vld [vmem:[#allocation2 + $0xda] sm:$0xff]  ;;  %v1050_v24 = vld [vmem:[#allocation2 + $0xe2] sm:$0xff] }
  0x49   : > { %v10839_v18 = vpack.c.bf16 %v1048_v16, %v1047_v13  ;;  %v10845_v28 = vpack.c.bf16 %v1050_v24, %v1049_v23  ;;  %v1057_v50 = vld [vmem:[#allocation2 + $0x13a] sm:$0xff]  ;;  %v1058_v52 = vld [vmem:[#allocation2 + $0x142] sm:$0xff]  ;;  %v1059_v53 = vld [vmem:[#allocation2 + $0x152] sm:$0xff] }
  0x4a   : > { %v1060_v54 = vld [vmem:[#allocation2 + $0x15a] sm:$0xff]  ;;  %v1061_v62 = vld [vmem:[#allocation2 + $0x16a] sm:$0xff]  ;;  %v1062_v63 = vld [vmem:[#allocation2 + $0x172] sm:$0xff] }
  0x4b   : > { %v10869_v7 = vpack.c.bf16 %v1062_v63, %v1061_v62  ;;  %v8358_v10 = vld [vmem:[%s14360_s2 + $0xa] sm:$0x3]  ;;  %v8375_v23 = vld [vmem:[%s14360_s2 + $0xc] sm:$0x3]  ;;  %vm11023_vm6 = vmand %vm326_vm0, %vm327_vm5 }
  0x4c   : > { %v2012_v13 = vand.u32 %v8358_v10, %v10550_v5  ;;  %v2307_v24 = vand.u32 %v8375_v23, %v10550_v5  ;;  %vm11094_vm8 = vmand %vm326_vm0, %vm383_vm7  ;;  %v347_v62 = vld [vmem:[#allocation3 + $0x48] sm:$0x1]  ;;  %v10320_v63 = vld [vmem:[%s14362_s4 + $0x120] sm:$0xff]   ;;  %vm3743_vm0 = vsmask.f32 7440 }
  0x4d   : > { %v344_v10 = vld [vmem:[#allocation3 + $0x3c] sm:$0x1]  ;;  %v400_v23 = vld [vmem:[#allocation3 + $0x44] sm:$0x1]  ;;  %vm11222_vm11 = vmand %vm3580_vm9, %vm383_vm7 }
  0x4e   : > { %9437 = vmatmul.mubr.msk.bf16.gmra.mrb[16].mxu0 %vm273_vm2, %v10706_v8  ;;  %vm11229_vm12 = vmor %vm327_vm5, %vm3257_vm10 }
  0x4f   : > { %9440 = vmatprep.mubr.msk.bf16.mxu0 %vm273_vm2, %v10708_v9  ;;  %vm11348_vm1 = vmor %vm3742_vm13, %vm3743_vm0 }
  0x56   : > { %9441 = vmatmul.mubr.msk.bf16.gmra.mrb[20].mxu0 %vm273_vm2, %v10714_v14 }
  0x57   : > { %9444 = vmatprep.mubr.msk.bf16.mxu0 %vm273_vm2, %v10716_v15 }
  0x5e   : > { %9445 = vmatmul.mubr.msk.bf16.gmra.mrb[24].mxu0 %vm273_vm2, %v10722_v20 }
  0x5f   : > { %9448 = vmatprep.mubr.msk.bf16.mxu0 %vm273_vm2, %v10724_v21 }
  0x66   : > { %9449 = vmatmul.mubr.msk.bf16.gmra.mrb[28].mxu0 %vm273_vm2, %v10730_v26 }
  0x67   : > { %9454 = vmatprep.mubr.msk.bf16.mxu0 %vm273_vm2, %v536_v27  ;;  %v535_v27 = vld [vmem:[#allocation2 + $0x170] sm:$0xff] }
  0x68   : > { %v10803_v30 = vpack.c.bf16 %v535_v27, %v534_v25  ;;  %v1051_v25 = vld [vmem:[#allocation2 + $0xf2] sm:$0xff]  ;;  %v1052_v27 = vld [vmem:[#allocation2 + $0xfa] sm:$0xff] }
  0x69   : > { %v10847_v29 = vpack.c.bf16 %v1052_v27, %v1051_v25  ;;  %v1944_v27 = vld [vmem:[#allocation2 + $0x18a] sm:$0xff] }
  0x6e   : > { %9455 = vmatmul.mubr.msk.bf16.vlgmr.msra.gmra.mrb[0].mxu0 %vm273_vm2, %v10738_v33 }
  0x6f   : > { %9487 = vmatpush3.bf16.msra.mxu0 %v10658_v41  ;;  %9458 = vmatprep.mubr.msk.bf16.mxu0 %vm273_vm2, %v10740_v34  ;;  %v10759_v41 = vpack.c.bf16 %v515_v46, %v514_v45  ;;  %v10811_v45 = vpack.c.bf16 %v1034_v36, %v1033_v32  ;;  %v10813_v46 = vpack.c.bf16 %v1036_v39, %v1035_v38  ;;  %v1054_v32 = vld [vmem:[#allocation2 + $0x112] sm:$0xff]  ;;  %v1055_v36 = vld [vmem:[#allocation2 + $0x122] sm:$0xff]  ;;  %v1056_v38 = vld [vmem:[#allocation2 + $0x12a] sm:$0xff] }
  0x70   : > { %9520 = vmatprep.subr.bf16.mxu0 %v10743_v35  ;;  %v10855_v40 = vpack.c.bf16 %v1056_v38, %v1055_v36 }
  0x76   : > { %9459 = vmatmul.mubr.msk.bf16.gmra.mrb[4].mxu0 %vm273_vm2, %v10751_v43 }
  0x77   : > { %9462 = vmatprep.mubr.msk.bf16.mxu0 %vm273_vm2, %v10753_v44 }
  0x7e   : > { %9463 = vmatmul.mubr.msk.bf16.gmra.mrb[8].mxu0 %vm273_vm2, %v10759_v41 }
  0x7f   : > { %9466 = vmatprep.mubr.msk.bf16.mxu0 %vm273_vm2, %v10761_v51 }
  0x86   : > { %9467 = vmatmul.mubr.msk.bf16.gmra.mrb[12].mxu0 %vm273_vm2, %v10767_v56 }
  0x87   : > { %9470 = vmatprep.mubr.msk.bf16.mxu0 %vm273_vm2, %v10769_v57 }
  0x8e   : > { %9471 = vmatmul.mubr.msk.bf16.gmra.mrb[16].mxu0 %vm273_vm2, %v10775_v0 }
  0x8f   : > { %9474 = vmatprep.mubr.msk.bf16.mxu0 %vm273_vm2, %v10777_v3 }
  0x96   : > { %9475 = vmatmul.mubr.msk.bf16.gmra.mrb[20].mxu0 %vm273_vm2, %v10783_v11 }
  0x97   : > { %9478 = vmatprep.mubr.msk.bf16.mxu0 %vm273_vm2, %v10785_v12 }
  0x9e   : > { %9479 = vmatmul.mubr.msk.bf16.gmra.mrb[24].mxu0 %vm273_vm2, %v10791_v19 }
  0x9f   : > { %9482 = vmatprep.mubr.msk.bf16.mxu0 %vm273_vm2, %v10793_v22 }
  0xa6   : > { %9483 = vmatmul.mubr.msk.bf16.gmra.mrb[28].mxu0 %vm273_vm2, %v10803_v30 }
  0xa7   : > { %9488 = vmatprep.mubr.msk.bf16.mxu0 %vm273_vm2, %v1063_v31  ;;  %v1053_v31 = vld [vmem:[#allocation2 + $0x10a] sm:$0xff] }
  0xa8   : > { %v10853_v39 = vpack.c.bf16 %v1054_v32, %v1053_v31  ;;  %v8409_v32 = vld [vmem:[%s14360_s2 + $0x10] sm:$0x3] }
  0xa9   : > { %v2895_v36 = vand.u32 %v8409_v32, %v10550_v5  ;;  %v409_v32 = vld [vmem:[#allocation3 + $0x68] sm:$0x1] }
  0xae   : > { %9489 = vmatmul.mubr.msk.bf16.vlgmr.msra.gmra.mrb[0].mxu0 %vm273_vm2, %v10811_v45 }
  0xaf   : > { %9521 = vmatpush3.bf16.msra.mxu0 %v10743_v35  ;;  %9492 = vmatprep.mubr.msk.bf16.mxu0 %vm273_vm2, %v10813_v46  ;;  %v1042_v35 = vld [vmem:[#allocation2 + $0x82] sm:$0xff] }
  0xb0   : > { %9554 = vmatprep.subr.bf16.mxu0 %v1718_v49  ;;  %v10829_v4 = vpack.c.bf16 %v1042_v35, %v1041_v61  ;;  %v10861_v61 = vpack.c.bf16 %v1058_v52, %v1057_v50  ;;  %v10863_v35 = vpack.c.bf16 %v1060_v54, %v1059_v53  ;;  %v10316_v50 = vld [vmem:[%s14362_s4 + $0x110] sm:$0xff]   ;;  %v394_v53 = vld [vmem:[#allocation3 + $0x2c] sm:$0x1] }
  0xb1   : > { %v10317_v52 = vld [vmem:[%s14362_s4 + $0xd0] sm:$0xff]   ;;  %v10318_v54 = vld [vmem:[%s14362_s4 + $0x118] sm:$0xff]  }
  0xb6   : > { %9493 = vmatmul.mubr.msk.bf16.gmra.mrb[4].mxu0 %vm273_vm2, %v10821_v55 }
  0xb7   : > { %9496 = vmatprep.mubr.msk.bf16.mxu0 %vm273_vm2, %v10823_v58 }
  0xbe   : > { %9497 = vmatmul.mubr.msk.bf16.gmra.mrb[8].mxu0 %vm273_vm2, %v10829_v4 }
  0xbf   : > { %9500 = vmatprep.mubr.msk.bf16.mxu0 %vm273_vm2, %v10831_v6 }
  0xc6   : > { %9501 = vmatmul.mubr.msk.bf16.gmra.mrb[12].mxu0 %vm273_vm2, %v10837_v17 }
  0xc7   : > { %9504 = vmatprep.mubr.msk.bf16.mxu0 %vm273_vm2, %v10839_v18 }
  0xce   : > { %9505 = vmatmul.mubr.msk.bf16.gmra.mrb[16].mxu0 %vm273_vm2, %v10845_v28 }
  0xcf   : > { %9508 = vmatprep.mubr.msk.bf16.mxu0 %vm273_vm2, %v10847_v29 }
  0xd6   : > { %9509 = vmatmul.mubr.msk.bf16.gmra.mrb[20].mxu0 %vm273_vm2, %v10853_v39 }
  0xd7   : > { %9512 = vmatprep.mubr.msk.bf16.mxu0 %vm273_vm2, %v10855_v40 }
  0xde   : > { %9513 = vmatmul.mubr.msk.bf16.gmra.mrb[24].mxu0 %vm273_vm2, %v10861_v61 }
  0xdf   : > { %9516 = vmatprep.mubr.msk.bf16.mxu0 %vm273_vm2, %v10863_v35 }
  0xe6   : > { %9517 = vmatmul.mubr.msk.bf16.gmra.mrb[28].mxu0 %vm273_vm2, %v10869_v7 }
  0xe7   : > { %9522 = vmatprep.mubr.msk.bf16.mxu0 %vm273_vm2, %v10738_v33  ;;  %v1355_v33 = vld [vmem:[#allocation2 + $0x180] sm:$0xff] }
  0xee   : > { %9523 = vmatmul.mubr.msk.bf16.vlgmr.msra.gmra.mrb[0].mxu0 %vm273_vm2, %v10740_v34 }
  0xef   : > { %9555 = vmatpush3.bf16.msra.mxu0 %v1718_v49  ;;  %9526 = vmatprep.mubr.msk.bf16.mxu0 %vm273_vm2, %v10751_v43  ;;  %v1356_v49 = vld [vmem:[#allocation2 + $0x188] sm:$0xff] }
  0xf0   : > { %9588 = vmatprep.subr.bf16.mxu0 %v2012_v13  ;;  %v10907_v16 = vpack.c.bf16 %v1356_v49, %v1355_v33  ;;  %v345_v33 = vsel %vm11023_vm6, 0, %v344_v10  ;;  %v403_v49 = vld [vmem:[#allocation3 + $0x50] sm:$0x1] }
  0xf1   : > { %346 = vst [vmem:[#allocation3 + $0x3c] sm:$0x1] %v345_v33 }
  0xf6   : > { %9527 = vmatmul.mubr.msk.bf16.gmra.mrb[4].mxu0 %vm273_vm2, %v10753_v44 }
  0xf7   : > { %9530 = vmatprep.mubr.msk.bf16.mxu0 %vm273_vm2, %v10759_v41 }
  0xfe   : > { %9531 = vmatmul.mubr.msk.bf16.gmra.mrb[8].mxu0 %vm273_vm2, %v10761_v51 }
  0xff   : > { %9534 = vmatprep.mubr.msk.bf16.mxu0 %vm273_vm2, %v10767_v56 }
 0x106   : > { %9535 = vmatmul.mubr.msk.bf16.gmra.mrb[12].mxu0 %vm273_vm2, %v10769_v57 }
 0x107   : > { %9538 = vmatprep.mubr.msk.bf16.mxu0 %vm273_vm2, %v10775_v0 }
 0x10e   : > { %9539 = vmatmul.mubr.msk.bf16.gmra.mrb[16].mxu0 %vm273_vm2, %v10777_v3 }
 0x10f   : > { %9542 = vmatprep.mubr.msk.bf16.mxu0 %vm273_vm2, %v10783_v11 }
 0x116   : > { %9543 = vmatmul.mubr.msk.bf16.gmra.mrb[20].mxu0 %vm273_vm2, %v10785_v12 }
 0x117   : > { %9546 = vmatprep.mubr.msk.bf16.mxu0 %vm273_vm2, %v10791_v19 }
 0x11e   : > { %9547 = vmatmul.mubr.msk.bf16.gmra.mrb[24].mxu0 %vm273_vm2, %v10793_v22 }
 0x11f   : > { %9550 = vmatprep.mubr.msk.bf16.mxu0 %vm273_vm2, %v10803_v30 }
 0x126   : > { %9551 = vmatmul.mubr.msk.bf16.gmra.mrb[28].mxu0 %vm273_vm2, %v10907_v16 }
 0x127   : > { %9556 = vmatprep.mubr.msk.bf16.mxu0 %vm273_vm2, %v10653_v37  ;;  %v1649_v37 = vld [vmem:[#allocation2 + $0x181] sm:$0xff] }
 0x12e   : > { %9557 = vmatmul.mubr.msk.bf16.vlgmr.msra.gmra.mrb[0].mxu0 %vm273_vm2, %v10660_v42  ;;  %v1650_v42 = vld [vmem:[#allocation2 + $0x189] sm:$0xff] }
 0x12f   : > { %9589 = vmatpush3.bf16.msra.mxu0 %v2012_v13  ;;  %9560 = vmatprep.mubr.msk.bf16.mxu0 %vm273_vm2, %v10670_v47  ;;  %v10945_v47 = vpack.c.bf16 %v1650_v42, %v1649_v37  ;;  %v10321_v13 = vld [vmem:[%s14362_s4 + $0xe0] sm:$0xff]   ;;  %v401_v37 = vsel %vm11094_vm8, 0, %v400_v23  ;;  %v10323_v42 = vld [vmem:[%s14362_s4 + $0xe8] sm:$0xff]  }
 0x130   : > { %9622 = vmatprep.subr.bf16.mxu0 %v2307_v24  ;;  %402 = vst [vmem:[#allocation3 + $0x44] sm:$0x1] %v401_v37 }
 0x136   : > { %9561 = vmatmul.mubr.msk.bf16.gmra.mrb[4].mxu0 %vm273_vm2, %v10672_v48  ;;  %v8392_v48 = vld [vmem:[%s14360_s2 + $0xe] sm:$0x3] }
 0x137   : > { %9564 = vmatprep.mubr.msk.bf16.mxu0 %vm273_vm2, %v10690_v59  ;;  %v2601_v25 = vand.u32 %v8392_v48, %v10550_v5  ;;  %v2238_v5 = vld [vmem:[#allocation2 + $0x198] sm:$0xff]  ;;  %v353_v48 = vld [vmem:[#allocation3 + $0x60] sm:$0x1] }
 0x13e   : > { %9565 = vmatmul.mubr.msk.bf16.gmra.mrb[8].mxu0 %vm273_vm2, %v10692_v60 }
 0x13f   : > { %9568 = vmatprep.mubr.msk.bf16.mxu0 %vm273_vm2, %v10698_v1 }
 0x146   : > { %9569 = vmatmul.mubr.msk.bf16.gmra.mrb[12].mxu0 %vm273_vm2, %v10700_v2 }
 0x147   : > { %9572 = vmatprep.mubr.msk.bf16.mxu0 %vm273_vm2, %v10706_v8 }
 0x14e   : > { %9573 = vmatmul.mubr.msk.bf16.gmra.mrb[16].mxu0 %vm273_vm2, %v10708_v9 }
 0x14f   : > { %9576 = vmatprep.mubr.msk.bf16.mxu0 %vm273_vm2, %v10714_v14 }
 0x156   : > { %9577 = vmatmul.mubr.msk.bf16.gmra.mrb[20].mxu0 %vm273_vm2, %v10716_v15 }
 0x157   : > { %9580 = vmatprep.mubr.msk.bf16.mxu0 %vm273_vm2, %v10722_v20 }
 0x15e   : > { %9581 = vmatmul.mubr.msk.bf16.gmra.mrb[24].mxu0 %vm273_vm2, %v10724_v21 }
 0x15f   : > { %9584 = vmatprep.mubr.msk.bf16.mxu0 %vm273_vm2, %v10730_v26 }
 0x166   : > { %9585 = vmatmul.mubr.msk.bf16.gmra.mrb[28].mxu0 %vm273_vm2, %v10945_v47 }
 0x167   : > { %9590 = vmatprep.mubr.msk.bf16.mxu0 %vm273_vm2, %v10811_v45  ;;  %v1943_v45 = vld [vmem:[#allocation2 + $0x182] sm:$0xff] }
 0x168   : > { %v10983_v31 = vpack.c.bf16 %v1944_v27, %v1943_v45  ;;  %v354_v45 = vsel %vm11023_vm6, 0, %v353_v48  ;;  %v350_v27 = vld [vmem:[#allocation3 + $0x54] sm:$0x1] }
 0x169   : > { %355 = vst [vmem:[#allocation3 + $0x60] sm:$0x1] %v354_v45 }
 0x16e   : > { %9591 = vmatmul.mubr.msk.bf16.vlgmr.msra.gmra.mrb[0].mxu0 %vm273_vm2, %v10813_v46 }
 0x16f   : > { %9623 = vmatpush3.bf16.msra.mxu0 %v2307_v24  ;;  %9594 = vmatprep.mubr.msk.bf16.mxu0 %vm273_vm2, %v10821_v55  ;;  %v10322_v24 = vld [vmem:[%s14362_s4 + $0x128] sm:$0xff]  }
 0x170   : > { %9656 = vmatprep.subr.bf16.mxu0 %v2601_v25 }
 0x176   : > { %9595 = vmatmul.mubr.msk.bf16.gmra.mrb[4].mxu0 %vm273_vm2, %v10823_v58 }
 0x177   : > { %9598 = vmatprep.mubr.msk.bf16.mxu0 %vm273_vm2, %v10829_v4 }
 0x17e   : > { %9599 = vmatmul.mubr.msk.bf16.gmra.mrb[8].mxu0 %vm273_vm2, %v10831_v6 }
 0x17f   : > { %9602 = vmatprep.mubr.msk.bf16.mxu0 %vm273_vm2, %v10837_v17 }
 0x186   : > { %9603 = vmatmul.mubr.msk.bf16.gmra.mrb[12].mxu0 %vm273_vm2, %v10839_v18 }
 0x187   : > { %9606 = vmatprep.mubr.msk.bf16.mxu0 %vm273_vm2, %v10845_v28 }
 0x18e   : > { %9607 = vmatmul.mubr.msk.bf16.gmra.mrb[16].mxu0 %vm273_vm2, %v10847_v29 }
 0x18f   : > { %9610 = vmatprep.mubr.msk.bf16.mxu0 %vm273_vm2, %v10853_v39 }
 0x196   : > { %9611 = vmatmul.mubr.msk.bf16.gmra.mrb[20].mxu0 %vm273_vm2, %v10855_v40 }
 0x197   : > { %9614 = vmatprep.mubr.msk.bf16.mxu0 %vm273_vm2, %v10861_v61 }
 0x19e   : > { %9615 = vmatmul.mubr.msk.bf16.gmra.mrb[24].mxu0 %vm273_vm2, %v10863_v35 }
 0x19f   : > { %9618 = vmatprep.mubr.msk.bf16.mxu0 %vm273_vm2, %v10869_v7 }
 0x1a6   : > { %9619 = vmatmul.mubr.msk.bf16.gmra.mrb[28].mxu0 %vm273_vm2, %v10983_v31 }
 0x1a7   : > { %9624 = vmatprep.mubr.msk.bf16.mxu0 %vm273_vm2, %v10740_v34  ;;  %v2239_v34 = vld [vmem:[#allocation2 + $0x1a0] sm:$0xff] }
 0x1ae   : > { %9625 = vmatmul.mubr.msk.bf16.vlgmr.msra.gmra.mrb[0].mxu0 %vm273_vm2, %v10751_v43  ;;  %v2502_v43 = vld [vmem:[#allocation2 + $0x31] sm:$0xff] }
 0x1af   : > { %9657 = vmatpush3.bf16.msra.mxu0 %v2601_v25  ;;  %9628 = vmatprep.mubr.msk.bf16.mxu0 %vm273_vm2, %v10753_v44  ;;  %v2503_v44 = vld [vmem:[#allocation2 + $0x39] sm:$0xff]  ;;  %v10325_v25 = vld [vmem:[%s14362_s4 + $0xf0] sm:$0xff]  }
 0x1b0   : > { %9690 = vmatprep.subr.bf16.mxu0 %v2895_v36 }
 0x1b6   : > { %9629 = vmatmul.mubr.msk.bf16.gmra.mrb[4].mxu0 %vm273_vm2, %v10759_v41  ;;  %v2255_v41 = vpack.c.bf16 %v2239_v34, %v2238_v5  ;;  %v406_v5 = vld [vmem:[#allocation3 + $0x5c] sm:$0x1]  ;;  %v10326_v34 = vld [vmem:[%s14362_s4 + $0x138] sm:$0xff]  }
 0x1b7   : > { %9632 = vmatprep.mubr.msk.bf16.mxu0 %vm273_vm2, %v10761_v51  ;;  %v2534_v51 = vpack.c.bf16 %v2503_v44, %v2502_v43  ;;  %v407_v43 = vsel %vm11094_vm8, 0, %v406_v5  ;;  %v10327_v44 = vld [vmem:[%s14362_s4 + $0xf8] sm:$0xff]  }
 0x1b8   : > { %408 = vst [vmem:[#allocation3 + $0x5c] sm:$0x1] %v407_v43 }
 0x1be   : > { %9633 = vmatmul.mubr.msk.bf16.gmra.mrb[8].mxu0 %vm273_vm2, %v10767_v56  ;;  %v14471_v56 = vmov 0 }
 0x1bf   : > { %9636 = vmatprep.mubr.msk.bf16.mxu0 %vm273_vm2, %v10769_v57  ;;  %v14472_v56 = vsel %vm11023_vm6, 4294967295, %v14471_v56  ;;  %v335_v57 = vld [vmem:[#allocation3 + $0x18] sm:$0x1] }
 0x1c0   : > { %14473 = vst [vmem:[#allocation4_spill] sm:$0xff] %v14472_v56 }
 0x1c6   : > { %9637 = vmatmul.mubr.msk.bf16.gmra.mrb[12].mxu0 %vm273_vm2, %v10775_v0  ;;  %v2504_v0 = vld [vmem:[#allocation2 + $0x49] sm:$0xff] }
 0x1c7   : > { %9640 = vmatprep.mubr.msk.bf16.mxu0 %vm273_vm2, %v10777_v3  ;;  %v2505_v3 = vld [vmem:[#allocation2 + $0x51] sm:$0xff] }
 0x1ce   : > { %9641 = vmatmul.mubr.msk.bf16.gmra.mrb[16].mxu0 %vm273_vm2, %v10783_v11  ;;  %v336_v11 = vsel %vm11023_vm6, 0, %v335_v57  ;;  %v356_v57 = vld [vmem:[#allocation3 + $0x6c] sm:$0x1] }
 0x1cf   : > { %9644 = vmatprep.mubr.msk.bf16.mxu0 %vm273_vm2, %v10785_v12  ;;  %v2506_v12 = vld [vmem:[#allocation2 + $0x61] sm:$0xff]  ;;  %337 = vst [vmem:[#allocation3 + $0x18] sm:$0x1] %v336_v11 }
 0x1d6   : > { %9645 = vmatmul.mubr.msk.bf16.gmra.mrb[20].mxu0 %vm273_vm2, %v10791_v19  ;;  %v2507_v19 = vld [vmem:[#allocation2 + $0x69] sm:$0xff] }
 0x1d7   : > { %9648 = vmatprep.mubr.msk.bf16.mxu0 %vm273_vm2, %v10793_v22  ;;  %v2535_v22 = vpack.c.bf16 %v2505_v3, %v2504_v0  ;;  %v357_v0 = vsel %vm11023_vm6, 0, %v356_v57  ;;  %v415_v3 = vld [vmem:[#allocation3 + $0x80] sm:$0x1] }
 0x1d8   : > { %358 = vst [vmem:[#allocation3 + $0x6c] sm:$0x1] %v357_v0  ;;  %v416_v11 = vsel %vm11094_vm8, 0, %v415_v3 }
 0x1d9   : > { %417 = vst [vmem:[#allocation3 + $0x80] sm:$0x1] %v416_v11 }
 0x1de   : > { %9649 = vmatmul.mubr.msk.bf16.gmra.mrb[24].mxu0 %vm273_vm2, %v10803_v30  ;;  %v2536_v30 = vpack.c.bf16 %v2507_v19, %v2506_v12  ;;  %v412_v12 = vld [vmem:[#allocation3 + $0x74] sm:$0x1] }
 0x1df   : > { %9652 = vmatprep.mubr.msk.bf16.mxu0 %vm273_vm2, %v10907_v16  ;;  %v404_v16 = vsel %vm11094_vm8, 0, %v403_v49  ;;  %v413_v19 = vsel %vm11094_vm8, 0, %v412_v12 }
 0x1e0   : > { %405 = vst [vmem:[#allocation3 + $0x50] sm:$0x1] %v404_v16  ;;  %414 = vst [vmem:[#allocation3 + $0x74] sm:$0x1] %v413_v19 }
 0x1e6   : > { %9653 = vmatmul.mubr.msk.bf16.gmra.mrb[28].mxu0 %vm273_vm2, %v2255_v41  ;;  %v359_v41 = vld [vmem:[#allocation3 + $0x78] sm:$0x1] }
 0x1e7   : > { %9658 = vmatprep.mubr.msk.bf16.mxu0 %vm273_vm2, %v2534_v51  ;;  %v360_v51 = vsel %vm11023_vm6, 0, %v359_v41 }
 0x1e8   : > { %361 = vst [vmem:[#allocation3 + $0x78] sm:$0x1] %v360_v51 }
 0x1ee   : > { %9659 = vmatmul.mubr.msk.bf16.vlgmr.msra.gmra.mrb[0].mxu0 %vm273_vm2, %v2535_v22  ;;  %v11184_v22 = vld [vmem:[%s14362_s4 + $0x140] sm:$0xff]  }
 0x1ef   : > { %9691 = vmatpush3.bf16.msra.mxu0 %v2895_v36  ;;  %9662 = vmatprep.mubr.msk.bf16.mxu0 %vm273_vm2, %v2536_v30  ;;  %v410_v36 = vsel %vm11094_vm8, 0, %v409_v32  ;;  %v365_v30 = vld [vmem:[#allocation3 + $0x90] sm:$0x1] }
 0x1f0   : > { %411 = vst [vmem:[#allocation3 + $0x68] sm:$0x1] %v410_v36 }
 0x1f6   : > { %9663 = vmatmul.mubr.msk.bf16.gmra.mrb[4].mxu0 %vm273_vm2, %v10690_v59  ;;  %v2532_v59 = vld [vmem:[#allocation2 + $0x199] sm:$0xff] }
 0x1f7   : > { %9666 = vmatprep.mubr.msk.bf16.mxu0 %vm273_vm2, %v10692_v60  ;;  %v2533_v60 = vld [vmem:[#allocation2 + $0x1a1] sm:$0xff] }
 0x1fe   : > { %9667 = vmatmul.mubr.msk.bf16.gmra.mrb[8].mxu0 %vm273_vm2, %v10698_v1  ;;  %v2549_v1 = vpack.c.bf16 %v2533_v60, %v2532_v59  ;;  %v366_v59 = vsel %vm11023_vm6, 0, %v365_v30  ;;  %v362_v60 = vld [vmem:[#allocation3 + $0x84] sm:$0x1] }
 0x1ff   : > { %9670 = vmatprep.mubr.msk.bf16.mxu0 %vm273_vm2, %v10700_v2  ;;  %v2826_v2 = vld [vmem:[#allocation2 + $0x19a] sm:$0xff]  ;;  %367 = vst [vmem:[#allocation3 + $0x90] sm:$0x1] %v366_v59 }
 0x206   : > { %9671 = vmatmul.mubr.msk.bf16.gmra.mrb[12].mxu0 %vm273_vm2, %v10706_v8  ;;  %v2827_v8 = vld [vmem:[#allocation2 + $0x1a2] sm:$0xff] }
 0x207   : > { %9674 = vmatprep.mubr.msk.bf16.mxu0 %vm273_vm2, %v10708_v9  ;;  %v2843_v9 = vpack.c.bf16 %v2827_v8, %v2826_v2  ;;  %v363_v2 = vsel %vm11023_vm6, 0, %v362_v60 }
 0x208   : > { %364 = vst [vmem:[#allocation3 + $0x84] sm:$0x1] %v363_v2 }
 0x20e   : > { %9675 = vmatmul.mubr.msk.bf16.gmra.mrb[16].mxu0 %vm273_vm2, %v10714_v14  ;;  %v10312_v14 = vld [vmem:[%s14362_s4 + $0x100] sm:$0xff]  }
 0x20f   : > { %9678 = vmatprep.mubr.msk.bf16.mxu0 %vm273_vm2, %v10716_v15  ;;  %v14474_v15 = vmov 0  ;;  %9868 = vmatprep.subr.bf16.mxu1 %v10312_v14 }
 0x210   : > { %v14475_v15 = vsel %vm11094_vm8, 4294967295, %v14474_v15  ;;  %9010 = vmatprep.subr.bf16.mxu0 %v10312_v14 }
 0x211   : > { %14476 = vst [vmem:[#allocation5_spill] sm:$0xff] %v14475_v15 }
 0x216   : > { %9679 = vmatmul.mubr.msk.bf16.gmra.mrb[20].mxu0 %vm273_vm2, %v10722_v20  ;;  %v10313_v20 = vld [vmem:[%s14362_s4 + $0xc0] sm:$0xff]  }
 0x217   : > { %9682 = vmatprep.mubr.msk.bf16.mxu0 %vm273_vm2, %v10724_v21  ;;  %v332_v21 = vld [vmem:[#allocation3 + $0xc] sm:$0x1]  ;;  %9876 = vmatpush3.bf16.msra.mxu1 %v10313_v20 }
 0x21e   : > { %9683 = vmatmul.mubr.msk.bf16.gmra.mrb[24].mxu0 %vm273_vm2, %v10730_v26  ;;  %v333_v26 = vsel %vm11023_vm6, 0, %v332_v21 }
 0x21f   : > { %9686 = vmatprep.mubr.msk.bf16.mxu0 %vm273_vm2, %v10945_v47  ;;  %334 = vst [vmem:[#allocation3 + $0xc] sm:$0x1] %v333_v26  ;;  %v10324_v47 = vld [vmem:[%s14362_s4 + $0x130] sm:$0xff]   ;;  %v368_v26 = vld [vmem:[#allocation3 + $0x9c] sm:$0x1] }
 0x226   : > { %9687 = vmatmul.mubr.msk.bf16.gmra.mrb[28].mxu0 %vm273_vm2, %v2549_v1  ;;  %v421_v1 = vld [vmem:[#allocation3 + $0x98] sm:$0x1]  ;;  %v3582_v19 = vld [vmem:[#allocation3 + $0xc] sm:$0xf] }
 0x227   : > { %9692 = vmatprep.mubr.msk.bf16.mxu0 %vm273_vm2, %v10813_v46  ;;  %v391_v46 = vld [vmem:[#allocation3 + $0x20] sm:$0x1]  ;;  %v422_v8 = vsel %vm11094_vm8, 0, %v421_v1 }
 0x228   : > { %423 = vst [vmem:[#allocation3 + $0x98] sm:$0x1] %v422_v8 }
 0x22e   : > { %9693 = vmatmul.mubr.msk.bf16.vlgmr.msra.gmra.mrb[0].mxu0 %vm273_vm2, %v10821_v55  ;;  %v392_v55 = vsel %vm11094_vm8, 0, %v391_v46  ;;  %v369_v46 = vsel %vm11023_vm6, 0, %v368_v26 }
 0x22f   : > { %9696 = vmatprep.mubr.msk.bf16.mxu0 %vm273_vm2, %v10823_v58  ;;  %9011 = vmatpush3.bf16.msra.mxu0 %v10313_v20  ;;  %v388_v58 = vld [vmem:[#allocation3 + $0x14] sm:$0x1]  ;;  %393 = vst [vmem:[#allocation3 + $0x20] sm:$0x1] %v392_v55  ;;  %v371_v20 = vld [vmem:[#allocation3 + $0xa8] sm:$0x1] }
 0x230   : > { %v372_v21 = vsel %vm11023_vm6, 0, %v371_v20  ;;  %370 = vst [vmem:[#allocation3 + $0x9c] sm:$0x1] %v369_v46  ;;  %v427_v55 = vld [vmem:[#allocation3 + $0xb0] sm:$0x1] }
 0x231   : > { %373 = vst [vmem:[#allocation3 + $0xa8] sm:$0x1] %v372_v21 }
 0x236   : > { %9697 = vmatmul.mubr.msk.bf16.gmra.mrb[4].mxu0 %vm273_vm2, %v10829_v4  ;;  %v10314_v4 = vld [vmem:[%s14362_s4 + $0x108] sm:$0xff]  }
 0x237   : > { %9700 = vmatprep.mubr.msk.bf16.mxu0 %vm273_vm2, %v10831_v6  ;;  %v389_v6 = vsel %vm11094_vm8, 0, %v388_v58  ;;  %9869 = vmatprep.subr.bf16.mxu1 %v10314_v4  ;;  %v428_v58 = vsel %vm11094_vm8, 0, %v427_v55 }
 0x238   : > { %390 = vst [vmem:[#allocation3 + $0x14] sm:$0x1] %v389_v6  ;;  %9012 = vmatprep.subr.bf16.mxu0 %v10314_v4  ;;  %v424_v4 = vld [vmem:[#allocation3 + $0xa4] sm:$0x1]  ;;  %429 = vst [vmem:[#allocation3 + $0xb0] sm:$0x1] %v428_v58 }
 0x239   : > { %v425_v6 = vsel %vm11094_vm8, 0, %v424_v4 }
 0x23a   : > { %426 = vst [vmem:[#allocation3 + $0xa4] sm:$0x1] %v425_v6 }
 0x23e   : > { %9701 = vmatmul.mubr.msk.bf16.gmra.mrb[8].mxu0 %vm273_vm2, %v10837_v17  ;;  %v10315_v17 = vld [vmem:[%s14362_s4 + $0xc8] sm:$0xff]  }
 0x23f   : > { %9704 = vmatprep.mubr.msk.bf16.mxu0 %vm273_vm2, %v10839_v18  ;;  %9877 = vmatpush3.bf16.msra.mxu1 %v10315_v17  ;;  %v341_v18 = vld [vmem:[#allocation3 + $0x30] sm:$0x1]  ;;  %v3586_v55 = vld [vmem:[#allocation3 + $0x14] sm:$0x1] }
 0x240   : > { %9013 = vmatpush3.bf16.msra.mxu0 %v10315_v17  ;;  %9870 = vmatprep.subr.bf16.mxu1 %v10316_v50  ;;  %v377_v17 = vld [vmem:[#allocation3 + $0xc0] sm:$0x1] }
 0x241   : > { %9014 = vmatprep.subr.bf16.mxu0 %v10316_v50 }
 0x243   : > { %9878 = vmatpush3.bf16.msra.mxu1 %v10317_v52 }
 0x244   : > { %9015 = vmatpush3.bf16.msra.mxu0 %v10317_v52  ;;  %9871 = vmatprep.subr.bf16.mxu1 %v10318_v54  ;;  %v11214_v52 = vld [vmem:[%s14361_s3] ss:$0 sm:$0xff] }
 0x245   : > { %9016 = vmatprep.subr.bf16.mxu0 %v10318_v54 }
 0x246   : > { %9705 = vmatmul.mubr.msk.bf16.gmra.mrb[12].mxu0 %vm273_vm2, %v10845_v28  ;;  %v342_v28 = vsel %vm11023_vm6, 0, %v341_v18  ;;  %v378_v18 = vsel %vm11023_vm6, 0, %v377_v17 }
 0x247   : > { %9708 = vmatprep.mubr.msk.bf16.mxu0 %vm273_vm2, %v10847_v29  ;;  %v338_v29 = vld [vmem:[#allocation3 + $0x24] sm:$0x1]  ;;  %343 = vst [vmem:[#allocation3 + $0x30] sm:$0x1] %v342_v28  ;;  %379 = vst [vmem:[#allocation3 + $0xc0] sm:$0x1] %v378_v18 }
 0x248   : > { %v339_v38 = vsel %vm11023_vm6, 0, %v338_v29  ;;  %v374_v28 = vld [vmem:[#allocation3 + $0xb4] sm:$0x1] }
 0x249   : > { %340 = vst [vmem:[#allocation3 + $0x24] sm:$0x1] %v339_v38  ;;  %v375_v29 = vsel %vm11023_vm6, 0, %v374_v28  ;;  %v433_v38 = vld [vmem:[#allocation3 + $0xc8] sm:$0x1] }
 0x24a   : > { %376 = vst [vmem:[#allocation3 + $0xb4] sm:$0x1] %v375_v29 }
 0x24e   : > { %9709 = vmatmul.mubr.msk.bf16.gmra.mrb[16].mxu0 %vm273_vm2, %v10853_v39  ;;  %v397_v39 = vld [vmem:[#allocation3 + $0x38] sm:$0x1] }
 0x24f   : > { %9712 = vmatprep.mubr.msk.bf16.mxu0 %vm273_vm2, %v10855_v40  ;;  %v398_v40 = vsel %vm11094_vm8, 0, %v397_v39  ;;  %v430_v39 = vld [vmem:[#allocation3 + $0xbc] sm:$0x1] }
 0x250   : > { %399 = vst [vmem:[#allocation3 + $0x38] sm:$0x1] %v398_v40  ;;  %v434_v40 = vsel %vm11094_vm8, 0, %v433_v38  ;;  %v431_v50 = vsel %vm11094_vm8, 0, %v430_v39 }
 0x251   : > { %435 = vst [vmem:[#allocation3 + $0xc8] sm:$0x1] %v434_v40  ;;  %432 = vst [vmem:[#allocation3 + $0xbc] sm:$0x1] %v431_v50 }
 0x256   : > { %9713 = vmatmul.mubr.msk.bf16.gmra.mrb[20].mxu0 %vm273_vm2, %v10861_v61  ;;  %v395_v61 = vsel %vm11094_vm8, 0, %v394_v53 }
 0x257   : > { %9716 = vmatprep.mubr.msk.bf16.mxu0 %vm273_vm2, %v10863_v35  ;;  %v10319_v35 = vld [vmem:[%s14362_s4 + $0xd8] sm:$0xff]   ;;  %396 = vst [vmem:[#allocation3 + $0x2c] sm:$0x1] %v395_v61 }
 0x258   : > { %9879 = vmatpush3.bf16.msra.mxu1 %v10319_v35  ;;  %9017 = vmatpush3.bf16.msra.mxu0 %v10319_v35 }
 0x259   : > { %9872 = vmatprep.subr.bf16.mxu1 %v10320_v63  ;;  %9018 = vmatprep.subr.bf16.mxu0 %v10320_v63 }
 0x25c   : > { %9880 = vmatpush3.bf16.msra.mxu1 %v10321_v13  ;;  %9019 = vmatpush3.bf16.msra.mxu0 %v10321_v13 }
 0x25d   : > { %9873 = vmatprep.subr.bf16.mxu1 %v10322_v24  ;;  %9020 = vmatprep.subr.bf16.mxu0 %v10322_v24 }
 0x25e   : > { %9717 = vmatmul.mubr.msk.bf16.gmra.mrb[24].mxu0 %vm273_vm2, %v10869_v7  ;;  %v348_v7 = vsel %vm11023_vm6, 0, %v347_v62 }
 0x25f   : > { %9720 = vmatprep.mubr.msk.bf16.mxu0 %vm273_vm2, %v10983_v31  ;;  %349 = vst [vmem:[#allocation3 + $0x48] sm:$0x1] %v348_v7  ;;  %v351_v31 = vsel %vm11023_vm6, 0, %v350_v27 }
 0x260   : > { %9881 = vmatpush3.bf16.msra.mxu1 %v10323_v42  ;;  %9021 = vmatpush3.bf16.msra.mxu0 %v10323_v42  ;;  %352 = vst [vmem:[#allocation3 + $0x54] sm:$0x1] %v351_v31 }
 0x261   : > { %9874 = vmatprep.subr.bf16.mxu1 %v10324_v47  ;;  %9022 = vmatprep.subr.bf16.mxu0 %v10324_v47 }
 0x264   : > { %9882 = vmatpush3.bf16.msra.mxu1 %v10325_v25  ;;  %9023 = vmatpush3.bf16.msra.mxu0 %v10325_v25 }
 0x265   : > { %9875 = vmatprep.subr.bf16.mxu1 %v10326_v34  ;;  %9024 = vmatprep.subr.bf16.mxu0 %v10326_v34 }
 0x266   : > { %9721 = vmatmul.mubr.msk.bf16.gmra.mrb[28].mxu0 %vm273_vm2, %v2843_v9  ;;  %v418_v9 = vld [vmem:[#allocation3 + $0x8c] sm:$0x1]  ;;  %vm11380_vm2 = vmor %vm4177_vm14, %vm4178_vm15 }
 0x267   : > { %v419_v14 = vsel %vm11094_vm8, 0, %v418_v9  ;;  %v3593_v9 = vld [vmem:[#allocation3 + $0x20] sm:$0x1] }
 0x268   : > { %9883 = vmatpush3.bf16.msra.mxu1 %v10327_v44  ;;  %9025 = vmatpush3.bf16.msra.mxu0 %v10327_v44  ;;  %420 = vst [vmem:[#allocation3 + $0x8c] sm:$0x1] %v419_v14  ;;  %v3589_v44 = vld [vmem:[#allocation3 + $0x18] sm:$0xf] }
 0x269   : > { %9724 = vmatprep.subr.bf16.mxu1 %v11184_v22 }
 0x301   : > { %v9694_v53 = vpop.f32.mrb[0].mxu0 }
 0x302   : > { %v3099_v54 = vadd.f32 %v9694_v53, %v11214_v52  ;;  %v2931_v61 = vpop.f32.mrb[1].mxu0 }
 0x303   : > { %v3097_v35 = vadd.f32 %v11214_v52, %v2931_v61  ;;  %v9695_v62 = vpop.f32.mrb[2].mxu0 }
 0x304   : > { %v3131_v63 = vmax.f32 %v3099_v54, 0.0  ;;  %v3100_v7 = vadd.f32 %v9695_v62, %v11214_v52  ;;  %v2934_v10 = vpop.f32.mrb[3].mxu0 }
 0x305   : > { %v3129_v13 = vmax.f32 %v3097_v35, 0.0  ;;  %v3098_v33 = vadd.f32 %v11214_v52, %v2934_v10  ;;  %v3603_v10 = vld [vmem:[#allocation3 + $0x30] sm:$0xf] }
 0x306   : > { %v8827_v49 = vpack.c.bf16 %v3131_v63, %v3131_v63  ;;  %v3132_v16 = vmax.f32 %v3100_v7, 0.0 }
 0x307   : > { %v8825_v23 = vpack.c.bf16 %v3129_v13, %v3129_v13  ;;  %v3130_v24 = vmax.f32 %v3098_v33, 0.0 }
 0x308   : > { %v3277_v37 = vshrl.u32 %v8827_v49, 16  ;;  %v8828_v42 = vpack.c.bf16 %v3132_v16, %v3132_v16  ;;  %v3280_v47 = vshll.u32 %v8827_v49, 16 }
 0x309   : > { %v3260_v48 = vshrl.u32 %v8825_v23, 16  ;;  %v3263_v25 = vshll.u32 %v8825_v23, 16  ;;  %v8826_v45 = vpack.c.bf16 %v3130_v24, %v3130_v24  ;;  %v9698_v27 = vpop.f32.mrb[4].mxu0 }
 0x30a   : > { %v3279_v31 = vrot.slane %v3277_v37, 7  ;;  %v3285_v32 = vshrl.u32 %v8828_v42, 16  ;;  %v3288_v36 = vshll.u32 %v8828_v42, 16  ;;  %v3103_v5 = vadd.f32 %v9698_v27, %v11214_v52  ;;  %v2947_v34 = vpop.f32.mrb[5].mxu0  ;;  %v3596_v37 = vld [vmem:[#allocation3 + $0x24] sm:$0xf] }
 0x30b   : > { %v3262_v41 = vrot.slane %v3260_v48, 7  ;;  %v3268_v51 = vshrl.u32 %v8826_v45, 16  ;;  %v3271_v57 = vshll.u32 %v8826_v45, 16  ;;  %v3101_v0 = vadd.f32 %v11214_v52, %v2947_v34  ;;  %v9699_v3 = vpop.f32.mrb[6].mxu0 }
 0x30c   : > { %v3282_v11 = vor.u32 %v3280_v47, %v3279_v31  ;;  %v3283_v12 = vrot.slane %v3279_v31, 4  ;;  %v3287_v30 = vrot.slane %v3285_v32, 7  ;;  %v3135_v59 = vmax.f32 %v3103_v5, 0.0  ;;  %v2950_v60 = vpop.f32.mrb[7].mxu0 }
 0x30d   : > { %v3265_v1 = vor.u32 %v3263_v25, %v3262_v41  ;;  %v3266_v2 = vrot.slane %v3262_v41, 4  ;;  %v3270_v14 = vrot.slane %v3268_v51, 7  ;;  %v3133_v20 = vmax.f32 %v3101_v0, 0.0 }
 0x30e   : > { %v3590_v21 = vsel %vm11222_vm11, %v3282_v11, %v3589_v44  ;;  %v3290_v26 = vor.u32 %v3288_v36, %v3287_v30  ;;  %v3292_v46 = vrot.slane %v3287_v30, 4  ;;  %v8831_v58 = vpack.c.bf16 %v3135_v59, %v3135_v59  ;;  %v3600_v30 = vld [vmem:[#allocation3 + $0x2c] sm:$0x1] }
 0x30f   : > { %3591 = vst [vmem:[#allocation3 + $0x18] sm:$0xf] %v3590_v21  ;;  %v3583_v4 = vsel %vm11222_vm11, %v3265_v1, %v3582_v19  ;;  %v3273_v6 = vor.u32 %v3271_v57, %v3270_v14  ;;  %v3275_v17 = vrot.slane %v3270_v14, 4  ;;  %v8829_v18 = vpack.c.bf16 %v3133_v20, %v3133_v20  ;;  %v3607_v19 = vld [vmem:[#allocation3 + $0x38] sm:$0x1] }
 0x310   : > { %3584 = vst [vmem:[#allocation3 + $0xc] sm:$0xf] %v3583_v4  ;;  %v3291_v28 = vsel %vm11229_vm12, %v3283_v12, %v3290_v26  ;;  %v3594_v29 = vsel %vm11023_vm6, %v3292_v46, %v3593_v9  ;;  %v3311_v38 = vshrl.u32 %v8831_v58, 16  ;;  %v3314_v50 = vshll.u32 %v8831_v58, 16  ;;  %v3617_v58 = vld [vmem:[#allocation3 + $0x48] sm:$0xf] }
 0x311   : > { %3592 = vst [vmem:[#allocation3 + $0x1c] sm:$0xf] %v3291_v28  ;;  %3595 = vst [vmem:[#allocation3 + $0x20] sm:$0x1] %v3594_v29  ;;  %v3274_v39 = vsel %vm11229_vm12, %v3266_v2, %v3273_v6  ;;  %v3587_v40 = vsel %vm11023_vm6, %v3275_v17, %v3586_v55  ;;  %v3294_v53 = vshrl.u32 %v8829_v18, 16  ;;  %v9702_v54 = vpop.f32.mrb[8].mxu0  ;;  %v3104_v35 = vadd.f32 %v9699_v3, %v11214_v52 }
 0x312   : > { %3585 = vst [vmem:[#allocation3 + $0x10] sm:$0xf] %v3274_v39  ;;  %3588 = vst [vmem:[#allocation3 + $0x14] sm:$0x1] %v3587_v40  ;;  %v11245_v61 = vrot.slane %v3311_v38, 7  ;;  %v3102_v62 = vadd.f32 %v11214_v52, %v2950_v60  ;;  %v3107_v63 = vadd.f32 %v9702_v54, %v11214_v52  ;;  %v2963_v7 = vpop.f32.mrb[9].mxu0 }
 0x313   : > { %v3296_v13 = vrot.slane %v3294_v53, 7  ;;  %v3297_v33 = vshll.u32 %v8829_v18, 16  ;;  %v3105_v49 = vadd.f32 %v11214_v52, %v2963_v7  ;;  %v9703_v16 = vpop.f32.mrb[10].mxu0  ;;  %v3136_v42 = vmax.f32 %v3104_v35, 0.0  ;;  %v3610_v40 = vld [vmem:[#allocation3 + $0x3c] sm:$0xf] }
 0x314   : > { %v3316_v23 = vor.u32 %v3314_v50, %v11245_v61  ;;  %v3317_v24 = vrot.slane %v11245_v61, 4  ;;  %v3134_v47 = vmax.f32 %v3102_v62, 0.0  ;;  %v2966_v48 = vpop.f32.mrb[11].mxu0  ;;  %v3139_v27 = vmax.f32 %v3107_v63, 0.0 }
 0x315   : > { %v3299_v25 = vor.u32 %v3297_v33, %v3296_v13  ;;  %v3300_v45 = vrot.slane %v3296_v13, 4  ;;  %v3137_v31 = vmax.f32 %v3105_v49, 0.0  ;;  %v8832_v36 = vpack.c.bf16 %v3136_v42, %v3136_v42 }
 0x316   : > { %v3604_v32 = vsel %vm11222_vm11, %v3316_v23, %v3603_v10  ;;  %v8830_v5 = vpack.c.bf16 %v3134_v47, %v3134_v47  ;;  %v3108_v34 = vadd.f32 %v9703_v16, %v11214_v52  ;;  %v8835_v41 = vpack.c.bf16 %v3139_v27, %v3139_v27 }
 0x317   : > { %3605 = vst [vmem:[#allocation3 + $0x30] sm:$0xf] %v3604_v32  ;;  %v3597_v44 = vsel %vm11222_vm11, %v3299_v25, %v3596_v37  ;;  %v8833_v51 = vpack.c.bf16 %v3137_v31, %v3137_v31  ;;  %v3106_v57 = vadd.f32 %v11214_v52, %v2966_v48  ;;  %v3319_v0 = vshrl.u32 %v8832_v36, 16  ;;  %v3621_v31 = vld [vmem:[#allocation3 + $0x50] sm:$0x1] }
 0x318   : > { %3598 = vst [vmem:[#allocation3 + $0x24] sm:$0xf] %v3597_v44  ;;  %v3322_v3 = vshll.u32 %v8832_v36, 16  ;;  %v3302_v11 = vshrl.u32 %v8830_v5, 16  ;;  %v3305_v12 = vshll.u32 %v8830_v5, 16  ;;  %v3345_v59 = vshrl.u32 %v8835_v41, 16 }
 0x319   : > { %v3348_v60 = vshll.u32 %v8835_v41, 16  ;;  %v3328_v1 = vshrl.u32 %v8833_v51, 16  ;;  %v3331_v2 = vshll.u32 %v8833_v51, 16  ;;  %v9706_v9 = vpop.f32.mrb[12].mxu0  ;;  %v3321_v14 = vrot.slane %v3319_v0, 7 }
 0x31a   : > { %v3304_v20 = vrot.slane %v3302_v11, 7  ;;  %v3140_v21 = vmax.f32 %v3108_v34, 0.0  ;;  %v3138_v26 = vmax.f32 %v3106_v57, 0.0  ;;  %v2979_v46 = vpop.f32.mrb[13].mxu0  ;;  %v11259_v55 = vrot.slane %v3345_v59, 7 }
 0x31b   : > { %v11261_v4 = vrot.slane %v3328_v1, 7  ;;  %v3111_v6 = vadd.f32 %v9706_v9, %v11214_v52  ;;  %v3109_v17 = vadd.f32 %v11214_v52, %v2979_v46  ;;  %v9707_v18 = vpop.f32.mrb[14].mxu0  ;;  %v3324_v28 = vor.u32 %v3322_v3, %v3321_v14  ;;  %v3614_v57 = vld [vmem:[#allocation3 + $0x44] sm:$0x1] }
 0x31c   : > { %v3326_v29 = vrot.slane %v3321_v14, 4  ;;  %v3307_v38 = vor.u32 %v3305_v12, %v3304_v20  ;;  %v3309_v39 = vrot.slane %v3304_v20, 4  ;;  %v2982_v50 = vpop.f32.mrb[15].mxu0  ;;  %v3350_v53 = vor.u32 %v3348_v60, %v11259_v55 }
 0x31d   : > { %v3351_v54 = vrot.slane %v11259_v55, 4  ;;  %v3333_v61 = vor.u32 %v3331_v2, %v11261_v4  ;;  %v3334_v35 = vrot.slane %v11261_v4, 4  ;;  %v3325_v62 = vsel %vm11229_vm12, %v3317_v24, %v3324_v28 }
 0x31e   : > { %v3608_v63 = vsel %vm11023_vm6, %v3326_v29, %v3607_v19  ;;  %v3308_v7 = vsel %vm11229_vm12, %v3300_v45, %v3307_v38  ;;  %v3601_v10 = vsel %vm11023_vm6, %v3309_v39, %v3600_v30  ;;  %3606 = vst [vmem:[#allocation3 + $0x34] sm:$0xf] %v3325_v62  ;;  %v3618_v13 = vsel %vm11222_vm11, %v3350_v53, %v3617_v58 }
 0x31f   : > { %3609 = vst [vmem:[#allocation3 + $0x38] sm:$0x1] %v3608_v63  ;;  %3599 = vst [vmem:[#allocation3 + $0x28] sm:$0xf] %v3308_v7  ;;  %v3611_v33 = vsel %vm11222_vm11, %v3333_v61, %v3610_v40  ;;  %v8836_v49 = vpack.c.bf16 %v3140_v21, %v3140_v21  ;;  %v8834_v16 = vpack.c.bf16 %v3138_v26, %v3138_v26  ;;  %v3143_v23 = vmax.f32 %v3111_v6, 0.0 }
 0x320   : > { %3602 = vst [vmem:[#allocation3 + $0x2c] sm:$0x1] %v3601_v10  ;;  %3619 = vst [vmem:[#allocation3 + $0x48] sm:$0xf] %v3618_v13  ;;  %v3141_v24 = vmax.f32 %v3109_v17, 0.0  ;;  %v3112_v37 = vadd.f32 %v9707_v18, %v11214_v52  ;;  %v3110_v42 = vadd.f32 %v11214_v52, %v2982_v50 }
 0x321   : > { %3612 = vst [vmem:[#allocation3 + $0x3c] sm:$0xf] %v3611_v33  ;;  %v3353_v47 = vshrl.u32 %v8836_v49, 16  ;;  %v3356_v48 = vshll.u32 %v8836_v49, 16  ;;  %v3336_v25 = vshrl.u32 %v8834_v16, 16  ;;  %v3339_v45 = vshll.u32 %v8834_v16, 16 }
 0x322   : > { %v9710_v27 = vpop.f32.mrb[16].mxu0  ;;  %v8839_v32 = vpack.c.bf16 %v3143_v23, %v3143_v23  ;;  %v8837_v36 = vpack.c.bf16 %v3141_v24, %v3141_v24  ;;  %v3144_v5 = vmax.f32 %v3112_v37, 0.0  ;;  %v3142_v34 = vmax.f32 %v3110_v42, 0.0  ;;  %v3631_v17 = vld [vmem:[#allocation3 + $0x60] sm:$0xf] }
 0x323   : > { %v2995_v44 = vpop.f32.mrb[17].mxu0  ;;  %v3355_v41 = vrot.slane %v3353_v47, 7  ;;  %v3338_v51 = vrot.slane %v3336_v25, 7  ;;  %v3115_v0 = vadd.f32 %v9710_v27, %v11214_v52  ;;  %v3624_v18 = vld [vmem:[#allocation3 + $0x54] sm:$0xf] }
 0x324   : > { %v3113_v3 = vadd.f32 %v11214_v52, %v2995_v44  ;;  %v9711_v11 = vpop.f32.mrb[18].mxu0  ;;  %v3379_v12 = vshrl.u32 %v8839_v32, 16  ;;  %v3382_v19 = vshll.u32 %v8839_v32, 16  ;;  %v3362_v30 = vshrl.u32 %v8837_v36, 16  ;;  %v11293_v40 = vld [vmem:[#allocation3 + $0x18] sm:$0xf] }
 0x325   : > { %v3365_v59 = vshll.u32 %v8837_v36, 16  ;;  %v2998_v60 = vpop.f32.mrb[19].mxu0  ;;  %v3358_v1 = vor.u32 %v3356_v48, %v3355_v41  ;;  %v3360_v2 = vrot.slane %v3355_v41, 4  ;;  %v3341_v9 = vor.u32 %v3339_v45, %v3338_v51  ;;  %v3635_v49 = vld [vmem:[#allocation3 + $0x68] sm:$0x1] }
 0x326   : > { %v3343_v14 = vrot.slane %v3338_v51, 4  ;;  %v3381_v20 = vrot.slane %v3379_v12, 7  ;;  %v3364_v21 = vrot.slane %v3362_v30, 7  ;;  %v8840_v26 = vpack.c.bf16 %v3144_v5, %v3144_v5  ;;  %v3628_v42 = vld [vmem:[#allocation3 + $0x5c] sm:$0x1] }
 0x327   : > { %v8838_v46 = vpack.c.bf16 %v3142_v34, %v3142_v34  ;;  %v3359_v55 = vsel %vm11229_vm12, %v3351_v54, %v3358_v1  ;;  %v3622_v58 = vsel %vm11023_vm6, %v3360_v2, %v3621_v31  ;;  %v3342_v4 = vsel %vm11229_vm12, %v3334_v35, %v3341_v9  ;;  %v3638_v30 = vld [vmem:[#allocation3 + $0x6c] sm:$0xf]  ;;  %v11325_v9 = vld [vmem:[#allocation3 + $0x20] sm:$0x1] }
 0x328   : > { %v3615_v6 = vsel %vm11023_vm6, %v3343_v14, %v3614_v57  ;;  %3620 = vst [vmem:[#allocation3 + $0x4c] sm:$0xf] %v3359_v55  ;;  %3623 = vst [vmem:[#allocation3 + $0x50] sm:$0x1] %v3622_v58  ;;  %v3384_v28 = vor.u32 %v3382_v19, %v3381_v20  ;;  %v3385_v29 = vrot.slane %v3381_v20, 4  ;;  %v3367_v38 = vor.u32 %v3365_v59, %v3364_v21 }
 0x329   : > { %3613 = vst [vmem:[#allocation3 + $0x40] sm:$0xf] %v3342_v4  ;;  %3616 = vst [vmem:[#allocation3 + $0x44] sm:$0x1] %v3615_v6  ;;  %v3368_v39 = vrot.slane %v3364_v21, 4  ;;  %v3387_v50 = vshrl.u32 %v8840_v26, 16  ;;  %v3116_v23 = vadd.f32 %v9711_v11, %v11214_v52  ;;  %v3114_v24 = vadd.f32 %v11214_v52, %v2998_v60 }
 0x32a   : > { %v3390_v53 = vshll.u32 %v8840_v26, 16  ;;  %v3370_v54 = vshrl.u32 %v8838_v46, 16  ;;  %v3373_v61 = vshll.u32 %v8838_v46, 16  ;;  %v11295_v35 = vpop.f32.mrb[20].mxu0  ;;  %v3632_v62 = vsel %vm11222_vm11, %v3384_v28, %v3631_v17  ;;  %v11311_v57 = vld [vmem:[#allocation3 + $0x1c] sm:$0xf] }
 0x32b   : > { %v3625_v63 = vsel %vm11222_vm11, %v3367_v38, %v3624_v18  ;;  %v3147_v7 = vmax.f32 %v3115_v0, 0.0  ;;  %v3145_v10 = vmax.f32 %v3113_v3, 0.0  ;;  %v11301_v13 = vpop.f32.mrb[21].mxu0  ;;  %3633 = vst [vmem:[#allocation3 + $0x60] sm:$0xf] %v3632_v62  ;;  %v3389_v33 = vrot.slane %v3387_v50, 7 }
 0x32c   : > { %3626 = vst [vmem:[#allocation3 + $0x54] sm:$0xf] %v3625_v63  ;;  %v3372_v16 = vrot.slane %v3370_v54, 7  ;;  %v11305_v37 = vpop.f32.mrb[22].mxu0  ;;  %v4605_v25 = vshrl.u32 %v11293_v40, 16  ;;  %v4608_v45 = vshll.u32 %v11293_v40, 16 }
 0x32d   : > { %v8843_v47 = vpack.c.bf16 %v3147_v7, %v3147_v7  ;;  %v8841_v48 = vpack.c.bf16 %v3145_v10, %v3145_v10  ;;  %v11309_v27 = vpop.f32.mrb[23].mxu0  ;;  %v3392_v31 = vor.u32 %v3390_v53, %v3389_v33  ;;  %v3394_v32 = vrot.slane %v3389_v33, 4  ;;  %v3645_v19 = vld [vmem:[#allocation3 + $0x78] sm:$0xf] }
 0x32e   : > { %v3375_v36 = vor.u32 %v3373_v61, %v3372_v16  ;;  %v3377_v5 = vrot.slane %v3372_v16, 4  ;;  %v3148_v1 = vmax.f32 %v3116_v23, 0.0  ;;  %v3146_v2 = vmax.f32 %v3114_v24, 0.0 }
 0x32f   : > { %v3413_v34 = vshrl.u32 %v8843_v47, 16  ;;  %v3416_v44 = vshll.u32 %v8843_v47, 16  ;;  %v3396_v41 = vshrl.u32 %v8841_v48, 16  ;;  %v3399_v51 = vshll.u32 %v8841_v48, 16  ;;  %v3649_v48 = vld [vmem:[#allocation3 + $0x80] sm:$0x1] }
 0x330   : > { %v3393_v0 = vsel %vm11229_vm12, %v3385_v29, %v3392_v31  ;;  %v3636_v3 = vsel %vm11023_vm6, %v3394_v32, %v3635_v49  ;;  %v3376_v11 = vsel %vm11229_vm12, %v3368_v39, %v3375_v36  ;;  %v3629_v12 = vsel %vm11023_vm6, %v3377_v5, %v3628_v42  ;;  %v11352_v49 = vld [vmem:[#allocation3 + $0xc] sm:$0xf]  ;;  %v3642_v32 = vld [vmem:[#allocation3 + $0x74] sm:$0x1] }
 0x331   : > { %3634 = vst [vmem:[#allocation3 + $0x64] sm:$0xf] %v3393_v0  ;;  %3637 = vst [vmem:[#allocation3 + $0x68] sm:$0x1] %v3636_v3  ;;  %v11321_v59 = vrot.slane %v3413_v34, 7  ;;  %v11323_v60 = vrot.slane %v3396_v41, 7  ;;  %v8844_v17 = vpack.c.bf16 %v3148_v1, %v3148_v1  ;;  %v8842_v18 = vpack.c.bf16 %v3146_v2, %v3146_v2 }
 0x332   : > { %3627 = vst [vmem:[#allocation3 + $0x58] sm:$0xf] %v3376_v11  ;;  %3630 = vst [vmem:[#allocation3 + $0x5c] sm:$0x1] %v3629_v12  ;;  %v4607_v14 = vrot.slane %v4605_v25, 4  ;;  %v4610_v20 = vrot.slane %v4608_v45, 5 }
 0x333   : > { %v4614_v21 = vshll.u32 %v11311_v57, 16  ;;  %v4618_v26 = vshrl.u32 %v11311_v57, 16  ;;  %v11329_v46 = vpop.f32.mrb[24].mxu0  ;;  %v3418_v55 = vor.u32 %v3416_v44, %v11321_v59  ;;  %v3419_v58 = vrot.slane %v11321_v59, 4  ;;  %v11360_v11 = vld [vmem:[#allocation3 + $0x10] sm:$0xf] }
 0x334   : > { %v3401_v4 = vor.u32 %v3399_v51, %v11323_v60  ;;  %v11334_v6 = vpop.f32.mrb[25].mxu0  ;;  %v4611_v28 = vor.u32 %v4610_v20, %v4607_v14  ;;  %v4624_v54 = vshll.u32 %v11325_v9, 16  ;;  %v3402_v62 = vrot.slane %v11323_v60, 4  ;;  %v4534_v59 = vld [vmem:[#allocation3 + $0x14] sm:$0x1] }
 0x335   : > { %v4616_v29 = vrot.slane %v4614_v21, 5  ;;  %v11336_v38 = vpop.f32.mrb[26].mxu0  ;;  %v3646_v39 = vsel %vm11222_vm11, %v3418_v55, %v3645_v19  ;;  %v4620_v53 = vrot.slane %v4618_v26, 4  ;;  %v3421_v63 = vshrl.u32 %v8844_v17, 16 }
 0x336   : > { %v3639_v50 = vsel %vm11222_vm11, %v3401_v4, %v3638_v30  ;;  %v11343_v61 = vpop.f32.mrb[27].mxu0  ;;  %3647 = vst [vmem:[#allocation3 + $0x78] sm:$0xf] %v3646_v39  ;;  %v3424_v7 = vshll.u32 %v8844_v17, 16  ;;  %v3404_v10 = vshrl.u32 %v8842_v18, 16  ;;  %v3407_v16 = vshll.u32 %v8842_v18, 16 }
 0x337   : > { %3640 = vst [vmem:[#allocation3 + $0x6c] sm:$0xf] %v3639_v50  ;;  %v4612_v23 = vrot.slane %v4611_v28, 4  ;;  %v4621_v24 = vor.u32 %v4620_v53, %v4616_v29  ;;  %v4626_v42 = vrot.slane %v4624_v54, 5  ;;  %v3423_v47 = vrot.slane %v3421_v63, 7 }
 0x338   : > { %v3406_v25 = vrot.slane %v3404_v10, 7  ;;  %v14365_v45 = vrot.slane %v11311_v57, 5  ;;  %v5024_v31 = vrot.slane %v11325_v9, 5  ;;  %v4581_v34 = vshrl.u32 %v11352_v49, 16  ;;  %v11398_v54 = vld [vmem:[#allocation3 + $0x24] sm:$0xf] }
 0x339   : > { %v4617_v36 = vsel %vm11348_vm1, %v4612_v23, %v4616_v29  ;;  %v4622_v5 = vrot.slane %v4621_v24, 4  ;;  %v4584_v44 = vshll.u32 %v11352_v49, 16  ;;  %v3426_v41 = vor.u32 %v3424_v7, %v3423_v47  ;;  %v11362_v12 = vpop.f32.mrb[28].mxu0 }
 0x33a   : > { %v3428_v51 = vrot.slane %v3423_v47, 4  ;;  %v3409_v0 = vor.u32 %v3407_v16, %v3406_v25  ;;  %v3411_v3 = vrot.slane %v3406_v25, 4  ;;  %v5023_v30 = vrot.slane %v14365_v45, 4  ;;  %v11368_v2 = vpop.f32.mrb[29].mxu0 }
 0x33b   : > { %v4627_v19 = vsel %vm11348_vm1, %v4622_v5, %v4626_v42  ;;  %v4583_v60 = vrot.slane %v4581_v34, 4  ;;  %v4586_v1 = vrot.slane %v4584_v44, 5  ;;  %v3427_v9 = vsel %vm11229_vm12, %v3419_v58, %v3426_v41  ;;  %v11384_v55 = vpop.f32.mrb[30].mxu0  ;;  %v11411_v42 = vld [vmem:[#allocation3 + $0x28] sm:$0xf] }
 0x33c   : > { %v3650_v14 = vsel %vm11023_vm6, %v3428_v51, %v3649_v48  ;;  %v3410_v20 = vsel %vm11229_vm12, %v3402_v62, %v3409_v0  ;;  %v3643_v21 = vsel %vm11023_vm6, %v3411_v3, %v3642_v32  ;;  %3648 = vst [vmem:[#allocation3 + $0x7c] sm:$0xf] %v3427_v9  ;;  %v11388_v58 = vsel %vm11380_vm2, %v5023_v30, %v5024_v31  ;;  %v11391_v28 = vpop.f32.mrb[31].mxu0  ;;  %v10332_v62 = vld [vmem:[%s14362_s4 + $0x148] sm:$0xff]  }
 0x33d   : > { %3651 = vst [vmem:[#allocation3 + $0x80] sm:$0x1] %v3650_v14  ;;  %3641 = vst [vmem:[#allocation3 + $0x70] sm:$0xf] %v3410_v20  ;;  %v8556_v4 = vcombine.low %v4617_v36, %v4627_v19  ;;  %v4587_v17 = vor.u32 %v4586_v1, %v4583_v60  ;;  %v4590_v18 = vshll.u32 %v11360_v11, 16  ;;  %v4594_v29 = vshrl.u32 %v11360_v11, 16 }
 0x33e   : > { %3644 = vst [vmem:[#allocation3 + $0x74] sm:$0x1] %v3643_v21  ;;  %v4600_v39 = vshll.u32 %v4534_v59, 16  ;;  %v8540_v50 = vcombine.low %v11293_v40, %v11311_v57  ;;  %v8539_v53 = vcombine.low %v11352_v49, %v11360_v11  ;;  %v3119_v10 = vadd.f32 %v11295_v35, %v11214_v52  ;;  %v10338_v14 = vld [vmem:[%s14362_s4 + $0x158] sm:$0xff]  }
 0x33f   : > { %5549 = vmatprep.mubr.bf16.mxu1 %v8556_v4  ;;  %v4588_v63 = vrot.slane %v4587_v17, 4  ;;  %v4592_v7 = vrot.slane %v4590_v18, 5  ;;  %v3117_v16 = vadd.f32 %v11214_v52, %v11301_v13  ;;  %v4596_v23 = vrot.slane %v4594_v29, 4  ;;  %v3659_v4 = vld [vmem:[#allocation3 + $0x90] sm:$0xf] }
 0x340   : > { %v4602_v40 = vrot.slane %v4600_v39, 5  ;;  %5550 = vmatmul.mubr.bf16.vlgmr.msra.gmra.mrb[0].mxu1 %v8540_v50  ;;  %v3120_v49 = vadd.f32 %v11305_v37, %v11214_v52  ;;  %v3118_v24 = vadd.f32 %v11214_v52, %v11309_v27  ;;  %v3151_v35 = vmax.f32 %v3119_v10, 0.0  ;;  %v10335_v37 = vld [vmem:[%s14362_s4 + $0x150] sm:$0xff]  }
 0x341   : > { %v4593_v47 = vsel %vm11348_vm1, %v4588_v63, %v4592_v7  ;;  %9725 = vmatpush3.bf16.msra.mxu1 %v11184_v22  ;;  %v3149_v48 = vmax.f32 %v3117_v16, 0.0  ;;  %v4629_v13 = vshrl.u32 %v11398_v54, 16  ;;  %v4597_v25 = vor.u32 %v4596_v23, %v4592_v7  ;;  %v3652_v29 = vld [vmem:[#allocation3 + $0x84] sm:$0xf] }
 0x342   : > { %v3152_v31 = vmax.f32 %v3120_v49, 0.0  ;;  %v3150_v32 = vmax.f32 %v3118_v24, 0.0  ;;  %v4632_v36 = vshll.u32 %v11398_v54, 16  ;;  %9726 = vmatprep.subr.bf16.mxu1 %v10332_v62  ;;  %v8847_v27 = vpack.c.bf16 %v3151_v35, %v3151_v35  ;;  %v3656_v49 = vld [vmem:[#allocation3 + $0x8c] sm:$0x1] }
 0x343   : > { %v8845_v5 = vpack.c.bf16 %v3149_v48, %v3149_v48  ;;  %v4631_v34 = vrot.slane %v4629_v13, 4  ;;  %v4638_v44 = vshll.u32 %v11411_v42, 16  ;;  %v4598_v22 = vrot.slane %v4597_v25, 4  ;;  %v4540_v13 = vld [vmem:[#allocation3 + $0x2c] sm:$0x1]  ;;  %v10341_v25 = vld [vmem:[%s14362_s4 + $0x160] sm:$0xff]  }
 0x344   : > { %v8848_v41 = vpack.c.bf16 %v3152_v31, %v3152_v31  ;;  %v8846_v51 = vpack.c.bf16 %v3150_v32, %v3150_v32  ;;  %v4634_v0 = vrot.slane %v4632_v36, 5  ;;  %v3447_v3 = vshrl.u32 %v8847_v27, 16 }
 0x345   : > { %v3450_v11 = vshll.u32 %v8847_v27, 16  ;;  %v3430_v19 = vshrl.u32 %v8845_v5, 16  ;;  %v3433_v30 = vshll.u32 %v8845_v5, 16  ;;  %9727 = vmatpush3.bf16.msra.mxu1 %v10332_v62  ;;  %v4603_v59 = vsel %vm11348_vm1, %v4598_v22, %v4602_v40  ;;  %v3663_v40 = vld [vmem:[#allocation3 + $0x98] sm:$0x1] }
 0x346   : > { %v3455_v60 = vshrl.u32 %v8848_v41, 16  ;;  %v3458_v1 = vshll.u32 %v8848_v41, 16  ;;  %v3438_v9 = vshrl.u32 %v8846_v51, 16  ;;  %9728 = vmatprep.subr.bf16.mxu1 %v10335_v37  ;;  %v8555_v20 = vcombine.low %v4593_v47, %v4603_v59  ;;  %v11439_v27 = vld [vmem:[#allocation3 + $0x34] sm:$0xf] }
 0x347   : > { %v3449_v21 = vrot.slane %v3447_v3, 7  ;;  %v3432_v17 = vrot.slane %v3430_v19, 7  ;;  %v3441_v18 = vshll.u32 %v8846_v51, 16  ;;  %v4635_v62 = vor.u32 %v4634_v0, %v4631_v34  ;;  %v4543_v41 = vld [vmem:[#allocation3 + $0x38] sm:$0x1] }
 0x348   : > { %v3457_v39 = vrot.slane %v3455_v60, 7  ;;  %v3440_v50 = vrot.slane %v3438_v9, 7  ;;  %v11427_v63 = vrot.slane %v4638_v44, 5  ;;  %5541 = vmatprep.mubr.bf16.mxu0 %v8555_v20  ;;  %v4648_v3 = vshll.u32 %v4540_v13, 16 }
 0x349   : > { %v3452_v7 = vor.u32 %v3450_v11, %v3449_v21  ;;  %v3453_v10 = vrot.slane %v3449_v21, 4  ;;  %v3435_v16 = vor.u32 %v3433_v30, %v3432_v17  ;;  %v3436_v23 = vrot.slane %v3432_v17, 4  ;;  %9729 = vmatpush3.bf16.msra.mxu1 %v10335_v37  ;;  %5542 = vmatmul.mubr.bf16.vlgmr.msra.gmra.mrb[32].mxu0 %v8539_v53  ;;  %v11437_v53 = vld [vmem:[#allocation3 + $0x30] sm:$0xf] }
 0x34a   : > { %v3460_v24 = vor.u32 %v3458_v1, %v3457_v39  ;;  %v3462_v47 = vrot.slane %v3457_v39, 4  ;;  %v3443_v35 = vor.u32 %v3441_v18, %v3440_v50  ;;  %v3445_v48 = vrot.slane %v3440_v50, 4  ;;  %9730 = vmatprep.subr.bf16.mxu1 %v10338_v14  ;;  %v10344_v1 = vld [vmem:[%s14362_s4 + $0x168] sm:$0xff]  }
 0x34b   : > { %v3660_v31 = vsel %vm11222_vm11, %v3452_v7, %v3659_v4  ;;  %v3653_v32 = vsel %vm11222_vm11, %v3435_v16, %v3652_v29  ;;  %v4636_v36 = vrot.slane %v4635_v62, 4  ;;  %v4642_v37 = vshrl.u32 %v11411_v42, 16 }
 0x34c   : > { %3661 = vst [vmem:[#allocation3 + $0x90] sm:$0xf] %v3660_v31  ;;  %3654 = vst [vmem:[#allocation3 + $0x84] sm:$0xf] %v3653_v32  ;;  %v3461_v5 = vsel %vm11229_vm12, %v3453_v10, %v3460_v24  ;;  %v3664_v34 = vsel %vm11023_vm6, %v3462_v47, %v3663_v40  ;;  %v3444_v44 = vsel %vm11229_vm12, %v3436_v23, %v3443_v35  ;;  %v4653_v19 = vshrl.u32 %v11437_v53, 16 }
 0x34d   : > { %v3657_v22 = vsel %vm11023_vm6, %v3445_v48, %v3656_v49  ;;  %3662 = vst [vmem:[#allocation3 + $0x94] sm:$0xf] %v3461_v5  ;;  %3665 = vst [vmem:[#allocation3 + $0x98] sm:$0x1] %v3664_v34  ;;  %v4641_v51 = vsel %vm11348_vm1, %v4636_v36, %v11427_v63  ;;  %v4644_v0 = vrot.slane %v4642_v37, 4  ;;  %v8541_v11 = vcombine.low %v11398_v54, %v11411_v42  ;;  %v10350_v34 = vld [vmem:[%s14362_s4 + $0x178] sm:$0xff]  }
 0x34e   : > { %3655 = vst [vmem:[#allocation3 + $0x88] sm:$0xf] %v3444_v44  ;;  %3658 = vst [vmem:[#allocation3 + $0x8c] sm:$0x1] %v3657_v22  ;;  %9731 = vmatpush3.bf16.msra.mxu1 %v10338_v14  ;;  %v4656_v30 = vshll.u32 %v11437_v53, 16  ;;  %v4662_v59 = vshll.u32 %v11439_v27, 16  ;;  %v3123_v54 = vadd.f32 %v11329_v46, %v11214_v52  ;;  %v3121_v50 = vadd.f32 %v11214_v52, %v11334_v6 }
 0x34f   : > { %v4666_v60 = vshrl.u32 %v11439_v27, 16  ;;  %9732 = vmatprep.subr.bf16.mxu1 %v10341_v25  ;;  %v4645_v9 = vor.u32 %v4644_v0, %v11427_v63  ;;  %v4650_v20 = vrot.slane %v4648_v3, 5  ;;  %v4672_v21 = vshll.u32 %v4543_v41, 16  ;;  %v10347_v46 = vld [vmem:[%s14362_s4 + $0x170] sm:$0xff]   ;;  %v11477_v49 = vld [vmem:[#allocation3 + $0x3c] sm:$0xf] }
 0x350   : > { %v4655_v42 = vrot.slane %v4653_v19, 4  ;;  %v4658_v14 = vrot.slane %v4656_v30, 5  ;;  %v4664_v4 = vrot.slane %v4662_v59, 5  ;;  %v3155_v39 = vmax.f32 %v3123_v54, 0.0  ;;  %14485 = vst [vmem:[#allocation6_spill] sm:$0xff] %v11477_v49 }
 0x351   : > { %v4668_v17 = vrot.slane %v4666_v60, 4  ;;  %v4646_v18 = vrot.slane %v4645_v9, 4  ;;  %v4674_v29 = vrot.slane %v4672_v21, 5  ;;  %v3124_v63 = vadd.f32 %v11336_v38, %v11214_v52  ;;  %v3673_v36 = vld [vmem:[#allocation3 + $0xa8] sm:$0xf] }
 0x352   : > { %9733 = vmatpush3.bf16.msra.mxu1 %v10341_v25  ;;  %v4659_v62 = vor.u32 %v4658_v14, %v4655_v42  ;;  %v3122_v10 = vadd.f32 %v11214_v52, %v11343_v61  ;;  %v8851_v23 = vpack.c.bf16 %v3155_v39, %v3155_v39  ;;  %v3153_v40 = vmax.f32 %v3121_v50, 0.0  ;;  %v11487_v0 = vld [vmem:[#allocation3 + $0x40] sm:$0xf]  ;;  %v3666_v3 = vld [vmem:[#allocation3 + $0x9c] sm:$0xf] }
 0x353   : > { %v4669_v7 = vor.u32 %v4668_v17, %v4664_v4  ;;  %9734 = vmatprep.subr.bf16.mxu1 %v10344_v1  ;;  %v4651_v16 = vsel %vm11348_vm1, %v4646_v18, %v4650_v20  ;;  %v8542_v6 = vcombine.low %v11437_v53, %v11439_v27  ;;  %v3156_v35 = vmax.f32 %v3124_v63, 0.0  ;;  %14486 = vst [vmem:[#allocation7_spill] sm:$0xff] %v11487_v0  ;;  %v11489_v21 = vld [vmem:[#allocation3 + $0x44] sm:$0x1]  ;;  %v10352_v17 = vld [vmem:[%s14362_s4 + $0x40] sm:$0xff]  }
 0x354   : > { %v8557_v24 = vcombine.low %v4641_v51, %v4651_v16  ;;  %v4660_v38 = vrot.slane %v4659_v62, 4  ;;  %v3481_v61 = vshrl.u32 %v8851_v23, 16  ;;  %v3484_v48 = vshll.u32 %v8851_v23, 16  ;;  %14487 = vst [vmem:[#allocation8_spill] sm:$0xff] %v11489_v21  ;;  %v3677_v50 = vld [vmem:[#allocation3 + $0xb0] sm:$0x1] }
 0x355   : > { %v4670_v47 = vrot.slane %v4669_v7, 4  ;;  %v8849_v13 = vpack.c.bf16 %v3153_v40, %v3153_v40  ;;  %v3154_v25 = vmax.f32 %v3122_v10, 0.0  ;;  %v8852_v37 = vpack.c.bf16 %v3156_v35, %v3156_v35  ;;  %v3670_v23 = vld [vmem:[#allocation3 + $0xa4] sm:$0x1] }
 0x356   : > { %9735 = vmatpush3.bf16.msra.mxu1 %v10344_v1  ;;  %5557 = vmatprep.mubr.bf16.mxu1 %v8557_v24  ;;  %v4665_v31 = vsel %vm11348_vm1, %v4660_v38, %v4664_v4  ;;  %v4677_v5 = vshrl.u32 %v11477_v49, 16  ;;  %v3483_v22 = vrot.slane %v3481_v61, 7  ;;  %v4680_v54 = vshll.u32 %v11477_v49, 16 }
 0x357   : > { %v4675_v32 = vsel %vm11348_vm1, %v4670_v47, %v4674_v29  ;;  %9736 = vmatprep.subr.bf16.mxu1 %v10347_v46  ;;  %5558 = vmatmul.mubr.bf16.gmra.mrb[4].mxu1 %v8541_v11  ;;  %v3464_v41 = vshrl.u32 %v8849_v13, 16  ;;  %v3467_v51 = vshll.u32 %v8849_v13, 16  ;;  %v3489_v19 = vshrl.u32 %v8852_v37, 16 }
 0x358   : > { %v8558_v44 = vcombine.low %v4665_v31, %v4675_v32  ;;  %v3492_v30 = vshll.u32 %v8852_v37, 16  ;;  %v8850_v59 = vpack.c.bf16 %v3154_v25, %v3154_v25  ;;  %v4679_v60 = vrot.slane %v4677_v5, 4 }
 0x359   : > { %v3486_v1 = vor.u32 %v3484_v48, %v3483_v22  ;;  %v3487_v9 = vrot.slane %v3483_v22, 4  ;;  %v3466_v20 = vrot.slane %v3464_v41, 7  ;;  %v3491_v11 = vrot.slane %v3489_v19, 7  ;;  %v11525_v22 = vld [vmem:[#allocation3 + $0x4c] sm:$0xf] }
 0x35a   : > { %5565 = vmatprep.mubr.bf16.mxu1 %v8558_v44  ;;  %9737 = vmatpush3.bf16.msra.mxu1 %v10347_v46  ;;  %v3472_v42 = vshrl.u32 %v8850_v59, 16  ;;  %v3475_v14 = vshll.u32 %v8850_v59, 16  ;;  %v4686_v4 = vshll.u32 %v11487_v0, 16  ;;  %v4682_v62 = vrot.slane %v4680_v54, 5 }
 0x35b   : > { %9738 = vmatprep.subr.bf16.mxu1 %v10350_v34  ;;  %v3674_v18 = vsel %vm11222_vm11, %v3486_v1, %v3673_v36  ;;  %v3469_v29 = vor.u32 %v3467_v51, %v3466_v20  ;;  %v3470_v39 = vrot.slane %v3466_v20, 4  ;;  %v3494_v7 = vor.u32 %v3492_v30, %v3491_v11  ;;  %v11511_v36 = vld [vmem:[#allocation3 + $0x48] sm:$0xf] }
 0x35c   : > { %3675 = vst [vmem:[#allocation3 + $0xa8] sm:$0xf] %v3674_v18  ;;  %v3496_v63 = vrot.slane %v3491_v11, 4  ;;  %v3474_v10 = vrot.slane %v3472_v42, 7  ;;  %v4688_v46 = vrot.slane %v4686_v4, 5  ;;  %v4683_v40 = vor.u32 %v4682_v62, %v4679_v60 }
 0x35d   : > { %v3667_v16 = vsel %vm11222_vm11, %v3469_v29, %v3666_v3  ;;  %v4690_v24 = vshrl.u32 %v11487_v0, 16  ;;  %v4696_v38 = vshll.u32 %v11489_v21, 16  ;;  %v3495_v47 = vsel %vm11229_vm12, %v3487_v9, %v3494_v7 }
 0x35e   : > { %9739 = vmatpush3.bf16.msra.mxu1 %v10350_v34  ;;  %3668 = vst [vmem:[#allocation3 + $0x9c] sm:$0xf] %v3667_v16  ;;  %v3678_v35 = vsel %vm11023_vm6, %v3496_v63, %v3677_v50  ;;  %v3477_v61 = vor.u32 %v3475_v14, %v3474_v10  ;;  %v3479_v48 = vrot.slane %v3474_v10, 4  ;;  %3676 = vst [vmem:[#allocation3 + $0xac] sm:$0xf] %v3495_v47  ;;  %v4684_v13 = vrot.slane %v4683_v40, 4 }
 0x35f   : > { %9146 = vmatprep.subr.bf16.mxu1 %v10352_v17  ;;  %3679 = vst [vmem:[#allocation3 + $0xb0] sm:$0x1] %v3678_v35  ;;  %5566 = vmatmul.mubr.bf16.gmra.mrb[8].mxu1 %v8542_v6  ;;  %v4692_v25 = vrot.slane %v4690_v24, 4  ;;  %v4698_v31 = vrot.slane %v4696_v38, 5  ;;  %v3127_v32 = vadd.f32 %v11362_v12, %v11214_v52  ;;  %v10434_v34 = vld [vmem:[%s14361_s3] ss:$0 sm:$0xff]  ;;  %v8543_v3 = vcombine.low %v11477_v49, %v11487_v0 }
 0x360   : > { %v3478_v37 = vsel %vm11229_vm12, %v3470_v39, %v3477_v61  ;;  %v3671_v5 = vsel %vm11023_vm6, %v3479_v48, %v3670_v23  ;;  %v3125_v53 = vadd.f32 %v10434_v34, %v11368_v2  ;;  %v3128_v27 = vadd.f32 %v10434_v34, %v11384_v55  ;;  %v3687_v39 = vld [vmem:[#allocation3 + $0xc0] sm:$0xf]  ;;  %v3680_v10 = vld [vmem:[#allocation3 + $0xb4] sm:$0xf]  ;;  %v3691_v38 = vld [vmem:[#allocation3 + $0xc8] sm:$0x1] }
 0x361   : > { %3669 = vst [vmem:[#allocation3 + $0xa0] sm:$0xf] %v3478_v37  ;;  %3672 = vst [vmem:[#allocation3 + $0xa4] sm:$0x1] %v3671_v5  ;;  %v4689_v52 = vsel %vm11348_vm1, %v4684_v13, %v4688_v46  ;;  %v4693_v12 = vor.u32 %v4692_v25, %v4688_v46  ;;  %v3159_v6 = vmax.f32 %v3127_v32, 0.0  ;;  %v3126_v44 = vadd.f32 %v10434_v34, %v11391_v28 }
 0x362   : > { %v3157_v41 = vmax.f32 %v3125_v53, 0.0  ;;  %v3160_v51 = vmax.f32 %v3128_v27, 0.0  ;;  %v4701_v2 = vshrl.u32 %v11511_v36, 16  ;;  %v4704_v59 = vshll.u32 %v11511_v36, 16  ;;  %v11535_v32 = vld [vmem:[#allocation3 + $0x50] sm:$0x1] }
 0x363   : > { %v4694_v19 = vrot.slane %v4693_v12, 4  ;;  %v8855_v55 = vpack.c.bf16 %v3159_v6, %v3159_v6  ;;  %v3158_v30 = vmax.f32 %v3126_v44, 0.0  ;;  %v4710_v20 = vshll.u32 %v11525_v22, 16  ;;  %v11539_v27 = vld [vmem:[#allocation3 + $0x54] sm:$0xf] }
 0x364   : > { %v8853_v60 = vpack.c.bf16 %v3157_v41, %v3157_v41  ;;  %v8856_v1 = vpack.c.bf16 %v3160_v51, %v3160_v51  ;;  %v4703_v9 = vrot.slane %v4701_v2, 4  ;;  %v4706_v16 = vrot.slane %v4704_v59, 5  ;;  %v11547_v41 = vld [vmem:[#allocation3 + $0x58] sm:$0xf]  ;;  %v11554_v2 = vld [vmem:[#allocation3 + $0x60] sm:$0xf] }
 0x365   : > { %v4699_v28 = vsel %vm11348_vm1, %v4694_v19, %v4698_v31  ;;  %v3515_v54 = vshrl.u32 %v8855_v55, 16  ;;  %v3518_v11 = vshll.u32 %v8855_v55, 16  ;;  %v8854_v42 = vpack.c.bf16 %v3158_v30, %v3158_v30  ;;  %v3684_v31 = vld [vmem:[#allocation3 + $0xbc] sm:$0x1] }
 0x366   : > { %v8559_v14 = vcombine.low %v4689_v52, %v4699_v28  ;;  %v3498_v4 = vshrl.u32 %v8853_v60, 16  ;;  %v3501_v17 = vshll.u32 %v8853_v60, 16  ;;  %v3523_v18 = vshrl.u32 %v8856_v1, 16  ;;  %v11556_v30 = vld [vmem:[#allocation3 + $0x5c] sm:$0x1] }
 0x367   : > { %v3517_v29 = vrot.slane %v3515_v54, 7  ;;  %v3526_v50 = vshll.u32 %v8856_v1, 16  ;;  %v3506_v62 = vshrl.u32 %v8854_v42, 16  ;;  %v3509_v7 = vshll.u32 %v8854_v42, 16  ;;  %v11687_v0 = vld [vmem:[#allocation3 + $0xb0] sm:$0x1] }
 0x368   : > { %5573 = vmatprep.mubr.bf16.mxu1 %v8559_v14  ;;  %v3500_v63 = vrot.slane %v3498_v4, 7  ;;  %v3525_v46 = vrot.slane %v3523_v18, 7  ;;  %v4712_v23 = vrot.slane %v4710_v20, 5  ;;  %v4714_v35 = vshrl.u32 %v11525_v22, 16 }
 0x369   : > { %v3520_v40 = vor.u32 %v3518_v11, %v3517_v29  ;;  %v3521_v24 = vrot.slane %v3517_v29, 4  ;;  %v3508_v47 = vrot.slane %v3506_v62, 7  ;;  %5574 = vmatmul.mubr.bf16.gmra.mrb[12].mxu1 %v8543_v3  ;;  %v4707_v53 = vor.u32 %v4706_v16, %v4703_v9  ;;  %v11562_v11 = vld [vmem:[#allocation3 + $0x64] sm:$0xf]  ;;  %v11571_v62 = vld [vmem:[#allocation3 + $0x6c] sm:$0xf] }
 0x36a   : > { %v3503_v61 = vor.u32 %v3501_v17, %v3500_v63  ;;  %v3504_v48 = vrot.slane %v3500_v63, 4  ;;  %v3528_v13 = vor.u32 %v3526_v50, %v3525_v46  ;;  %v3530_v25 = vrot.slane %v3525_v46, 4 }
 0x36b   : > { %v3688_v37 = vsel %vm11222_vm11, %v3520_v40, %v3687_v39  ;;  %v3511_v5 = vor.u32 %v3509_v7, %v3508_v47  ;;  %v3513_v34 = vrot.slane %v3508_v47, 4  ;;  %v4716_v44 = vrot.slane %v4714_v35, 4  ;;  %v11579_v47 = vld [vmem:[#allocation3 + $0x70] sm:$0xf] }
 0x36c   : > { %3689 = vst [vmem:[#allocation3 + $0xc0] sm:$0xf] %v3688_v37  ;;  %v3681_v52 = vsel %vm11222_vm11, %v3503_v61, %v3680_v10  ;;  %v3529_v12 = vsel %vm11229_vm12, %v3521_v24, %v3528_v13  ;;  %v3692_v6 = vsel %vm11023_vm6, %v3530_v25, %v3691_v38  ;;  %v4720_v43 = vshll.u32 %v11535_v32, 16  ;;  %v11573_v10 = vld [vmem:[#allocation3 + $0x68] sm:$0x1] }
 0x36d   : > { %3682 = vst [vmem:[#allocation3 + $0xb4] sm:$0xf] %v3681_v52  ;;  %3690 = vst [vmem:[#allocation3 + $0xc4] sm:$0xf] %v3529_v12  ;;  %v3512_v51 = vsel %vm11229_vm12, %v3504_v48, %v3511_v5  ;;  %v3685_v3 = vsel %vm11023_vm6, %v3513_v34, %v3684_v31  ;;  %v4708_v19 = vrot.slane %v4707_v53, 4  ;;  %v4717_v55 = vor.u32 %v4716_v44, %v4712_v23 }
 0x36e   : > { %3693 = vst [vmem:[#allocation3 + $0xc8] sm:$0x1] %v3692_v6  ;;  %3683 = vst [vmem:[#allocation3 + $0xb8] sm:$0xf] %v3512_v51  ;;  %v4725_v59 = vshrl.u32 %v11539_v27, 16  ;;  %v4728_v60 = vshll.u32 %v11539_v27, 16  ;;  %v8544_v40 = vcombine.low %v11511_v36, %v11525_v22 }
 0x36f   : > { %3686 = vst [vmem:[#allocation3 + $0xbc] sm:$0x1] %v3685_v3  ;;  %v4734_v8 = vshll.u32 %v11547_v41, 16  ;;  %v4738_v1 = vshrl.u32 %v11547_v41, 16  ;;  %v4718_v9 = vrot.slane %v4717_v55, 4  ;;  %v4722_v20 = vrot.slane %v4720_v43, 5 }
 0x370   : > { %v4727_v28 = vrot.slane %v4725_v59, 4  ;;  %v4730_v54 = vrot.slane %v4728_v60, 5  ;;  %v4744_v4 = vshll.u32 %v11556_v30, 16  ;;  %v4749_v17 = vshrl.u32 %v11554_v2, 16  ;;  %v11587_v53 = vld [vmem:[#allocation3 + $0x74] sm:$0x1] }
 0x371   : > { %v4736_v42 = vrot.slane %v4734_v8, 5  ;;  %v4740_v14 = vrot.slane %v4738_v1, 4  ;;  %v4713_v18 = vsel %vm11348_vm1, %v4708_v19, %v4712_v23  ;;  %v4723_v29 = vsel %vm11348_vm1, %v4718_v9, %v4722_v20  ;;  %v11592_v19 = vld [vmem:[#allocation3 + $0x78] sm:$0xf]  ;;  %v11594_v55 = vld [vmem:[#allocation3 + $0x7c] sm:$0xf] }
 0x372   : > { %v4731_v39 = vor.u32 %v4730_v54, %v4727_v28  ;;  %v4752_v50 = vshll.u32 %v11554_v2, 16  ;;  %v8560_v7 = vcombine.low %v4713_v18, %v4723_v29  ;;  %v4751_v46 = vrot.slane %v4749_v17, 4 }
 0x373   : > { %v4741_v63 = vor.u32 %v4740_v14, %v4736_v42  ;;  %v4758_v16 = vshll.u32 %v11562_v11, 16  ;;  %v4762_v38 = vshrl.u32 %v11562_v11, 16  ;;  %v4746_v61 = vrot.slane %v4744_v4, 5 }
 0x374   : > { %v4732_v24 = vrot.slane %v4731_v39, 4  ;;  %v4754_v23 = vrot.slane %v4752_v50, 5  ;;  %5581 = vmatprep.mubr.bf16.mxu1 %v8560_v7  ;;  %v4773_v13 = vshrl.u32 %v11571_v62, 16  ;;  %v4768_v5 = vshll.u32 %v11573_v10, 16  ;;  %v11607_v50 = vld [vmem:[#allocation3 + $0x84] sm:$0xf] }
 0x375   : > { %v4742_v35 = vrot.slane %v4741_v63, 4  ;;  %v4760_v48 = vrot.slane %v4758_v16, 5  ;;  %5582 = vmatmul.mubr.bf16.gmra.mrb[16].mxu1 %v8544_v40  ;;  %v4764_v37 = vrot.slane %v4762_v38, 4  ;;  %v4776_v12 = vshll.u32 %v11571_v62, 16  ;;  %v11609_v40 = vld [vmem:[#allocation3 + $0x88] sm:$0xf] }
 0x376   : > { %v4737_v25 = vsel %vm11348_vm1, %v4732_v24, %v4736_v42  ;;  %v4755_v31 = vor.u32 %v4754_v23, %v4751_v46  ;;  %v4775_v52 = vrot.slane %v4773_v13, 4  ;;  %v4782_v6 = vshll.u32 %v11579_v47, 16  ;;  %v11613_v13 = vld [vmem:[#allocation3 + $0x80] sm:$0x1] }
 0x377   : > { %v4747_v34 = vsel %vm11348_vm1, %v4742_v35, %v4746_v61  ;;  %v4765_v3 = vor.u32 %v4764_v37, %v4760_v48  ;;  %v4786_v43 = vshrl.u32 %v11579_v47, 16  ;;  %v8545_v59 = vcombine.low %v11539_v27, %v11547_v41 }
 0x378   : > { %v8561_v44 = vcombine.low %v4737_v25, %v4747_v34  ;;  %v4756_v51 = vrot.slane %v4755_v31, 4  ;;  %v4778_v60 = vrot.slane %v4776_v12, 5  ;;  %v4784_v8 = vrot.slane %v4782_v6, 5 }
 0x379   : > { %v4766_v1 = vrot.slane %v4765_v3, 4  ;;  %v4770_v9 = vrot.slane %v4768_v5, 5  ;;  %v4788_v20 = vrot.slane %v4786_v43, 4  ;;  %v4792_v28 = vshll.u32 %v11587_v53, 16 }
 0x37a   : > { %5589 = vmatprep.mubr.bf16.mxu1 %v8561_v44  ;;  %v4761_v54 = vsel %vm11348_vm1, %v4756_v51, %v4760_v48  ;;  %v4797_v42 = vshrl.u32 %v11592_v19, 16  ;;  %v4800_v14 = vshll.u32 %v11592_v19, 16  ;;  %v4806_v4 = vshll.u32 %v11594_v55, 16 }
 0x37b   : > { %v4771_v17 = vsel %vm11348_vm1, %v4766_v1, %v4770_v9  ;;  %v4779_v18 = vor.u32 %v4778_v60, %v4775_v52  ;;  %v4789_v29 = vor.u32 %v4788_v20, %v4784_v8  ;;  %v4810_v39 = vshrl.u32 %v11594_v55, 16  ;;  %v11624_v60 = vld [vmem:[#allocation3 + $0x90] sm:$0xf]  ;;  %v11626_v1 = vld [vmem:[#allocation3 + $0x94] sm:$0xf] }
 0x37c   : > { %v8562_v7 = vcombine.low %v4761_v54, %v4771_v17  ;;  %v4808_v46 = vrot.slane %v4806_v4, 5  ;;  %v4799_v24 = vrot.slane %v4797_v42, 4  ;;  %v4802_v23 = vrot.slane %v4800_v14, 5  ;;  %v11628_v42 = vld [vmem:[#allocation3 + $0x8c] sm:$0x1] }
 0x37d   : > { %5590 = vmatmul.mubr.bf16.gmra.mrb[20].mxu1 %v8545_v59  ;;  %v4790_v63 = vrot.slane %v4789_v29, 4  ;;  %v4812_v16 = vrot.slane %v4810_v39, 4  ;;  %v4821_v38 = vshrl.u32 %v11607_v50, 16  ;;  %v4824_v35 = vshll.u32 %v11607_v50, 16  ;;  %v11636_v39 = vld [vmem:[#allocation3 + $0x9c] sm:$0xf] }
 0x37e   : > { %5597 = vmatprep.mubr.bf16.mxu1 %v8562_v7  ;;  %v4780_v61 = vrot.slane %v4779_v18, 4  ;;  %v4794_v48 = vrot.slane %v4792_v28, 5  ;;  %v4830_v25 = vshll.u32 %v11609_v40, 16  ;;  %v4834_v5 = vshrl.u32 %v11609_v40, 16 }
 0x37f   : > { %v4813_v37 = vor.u32 %v4812_v16, %v4808_v46  ;;  %v4803_v34 = vor.u32 %v4802_v23, %v4799_v24  ;;  %v4816_v52 = vshll.u32 %v11613_v13, 16  ;;  %v4823_v12 = vrot.slane %v4821_v38, 4  ;;  %v11643_v23 = vld [vmem:[#allocation3 + $0xa0] sm:$0xf]  ;;  %v11645_v38 = vld [vmem:[#allocation3 + $0xac] sm:$0xf] }
 0x380   : > { %v4795_v31 = vsel %vm11348_vm1, %v4790_v63, %v4794_v48  ;;  %v4826_v6 = vrot.slane %v4824_v35, 5  ;;  %v8546_v44 = vcombine.low %v11554_v2, %v11562_v11  ;;  %v4785_v51 = vsel %vm11348_vm1, %v4780_v61, %v4784_v8  ;;  %v11647_v35 = vld [vmem:[#allocation3 + $0x98] sm:$0x1] }
 0x381   : > { %v8563_v3 = vcombine.low %v4785_v51, %v4795_v31  ;;  %v4832_v43 = vrot.slane %v4830_v25, 5  ;;  %v4836_v59 = vrot.slane %v4834_v5, 4  ;;  %v4814_v9 = vrot.slane %v4813_v37, 4 }
 0x382   : > { %v4804_v20 = vrot.slane %v4803_v34, 4  ;;  %v4818_v28 = vrot.slane %v4816_v52, 5  ;;  %v4827_v54 = vor.u32 %v4826_v6, %v4823_v12  ;;  %v4845_v14 = vshrl.u32 %v11624_v60, 16  ;;  %v11654_v12 = vld [vmem:[#allocation3 + $0xa8] sm:$0xf] }
 0x383   : > { %v4848_v4 = vshll.u32 %v11624_v60, 16  ;;  %v4854_v8 = vshll.u32 %v11626_v1, 16  ;;  %v4858_v17 = vshrl.u32 %v11626_v1, 16  ;;  %v4837_v18 = vor.u32 %v4836_v59, %v4832_v43 }
 0x384   : > { %v4819_v29 = vsel %vm11348_vm1, %v4814_v9, %v4818_v28  ;;  %v8547_v7 = vcombine.low %v11571_v62, %v11579_v47  ;;  %v4809_v63 = vsel %vm11348_vm1, %v4804_v20, %v4808_v46  ;;  %v4828_v16 = vrot.slane %v4827_v54, 4 }
 0x385   : > { %5598 = vmatmul.mubr.bf16.gmra.mrb[24].mxu1 %v8546_v44  ;;  %v4840_v24 = vshll.u32 %v11628_v42, 16  ;;  %v4847_v61 = vrot.slane %v4845_v14, 4  ;;  %v4850_v48 = vrot.slane %v4848_v4, 5  ;;  %v11649_v25 = vrot.slane %v4854_v8, 5  ;;  %v11665_v14 = vld [vmem:[#allocation3 + $0xb4] sm:$0xf] }
 0x386   : > { %5605 = vmatprep.mubr.bf16.mxu1 %v8563_v3  ;;  %v4860_v31 = vrot.slane %v4858_v17, 4  ;;  %v8564_v37 = vcombine.low %v4809_v63, %v4819_v29  ;;  %v4838_v5 = vrot.slane %v4837_v18, 4  ;;  %v4869_v34 = vshrl.u32 %v11636_v39, 16  ;;  %14488 = vst [vmem:[#allocation9_spill] sm:$0xff] %v11665_v14  ;;  %v11667_v4 = vld [vmem:[#allocation3 + $0xb8] sm:$0xf] }
 0x387   : > { %v4878_v46 = vshll.u32 %v11643_v23, 16  ;;  %v4882_v52 = vshrl.u32 %v11643_v23, 16  ;;  %v4902_v6 = vshll.u32 %v11645_v38, 16  ;;  %v4906_v44 = vshrl.u32 %v11645_v38, 16  ;;  %14489 = vst [vmem:[#allocation10_spill] sm:$0xff] %v11667_v4 }
 0x388   : > { %v8548_v51 = vcombine.low %v11592_v19, %v11594_v55  ;;  %v4842_v3 = vrot.slane %v4840_v24, 5  ;;  %v4864_v59 = vshll.u32 %v11647_v35, 16  ;;  %v4833_v9 = vsel %vm11348_vm1, %v4828_v16, %v4832_v43  ;;  %v11677_v24 = vld [vmem:[#allocation3 + $0xa4] sm:$0x1] }
 0x389   : > { %v4851_v20 = vor.u32 %v4850_v48, %v4847_v61  ;;  %v4861_v28 = vor.u32 %v4860_v31, %v11649_v25  ;;  %v4872_v54 = vshll.u32 %v11636_v39, 16  ;;  %v4871_v17 = vrot.slane %v4869_v34, 4 }
 0x38a   : > { %v4843_v8 = vsel %vm11348_vm1, %v4838_v5, %v4842_v3  ;;  %v4893_v18 = vshrl.u32 %v11654_v12, 16  ;;  %v4896_v29 = vshll.u32 %v11654_v12, 16  ;;  %v4884_v43 = vrot.slane %v4882_v52, 4 }
 0x38b   : > { %v11675_v63 = vrot.slane %v4902_v6, 5  ;;  %v4908_v16 = vrot.slane %v4906_v44, 4  ;;  %v4917_v61 = vshrl.u32 %v11665_v14, 16  ;;  %v4920_v48 = vshll.u32 %v11665_v14, 16 }
 0x38c   : > { %v4926_v31 = vshll.u32 %v11667_v4, 16  ;;  %v8565_v5 = vcombine.low %v4833_v9, %v4843_v8  ;;  %v4852_v34 = vrot.slane %v4851_v20, 4  ;;  %v4862_v3 = vrot.slane %v4861_v28, 4  ;;  %v11690_v9 = vld [vmem:[#allocation3 + $0xbc] sm:$0x1] }
 0x38d   : > { %5606 = vmatmul.mubr.bf16.gmra.mrb[28].mxu1 %v8547_v7  ;;  %v11673_v7 = vrot.slane %v4878_v46, 5  ;;  %v4874_v45 = vrot.slane %v4872_v54, 5  ;;  %v4895_v46 = vrot.slane %v4893_v18, 4  ;;  %v4898_v49 = vrot.slane %v4896_v29, 5  ;;  %v10435_v54 = vld [vmem:[#allocation3 + $0x18] sm:$0xf] }
 0x38e   : > { %5613 = vmatprep.mubr.bf16.mxu1 %v8564_v37  ;;  %v4930_v37 = vshrl.u32 %v11667_v4, 16  ;;  %v11683_v52 = vrot.slane %v4926_v31, 5  ;;  %v4888_v21 = vshll.u32 %v11677_v24, 16  ;;  %v4909_v15 = vor.u32 %v4908_v16, %v11675_v63 }
 0x38f   : > { %v4885_v44 = vor.u32 %v4884_v43, %v11673_v7  ;;  %v4866_v56 = vrot.slane %v4864_v59, 5  ;;  %v4919_v20 = vrot.slane %v4917_v61, 4  ;;  %v4922_v28 = vrot.slane %v4920_v48, 5  ;;  %v11697_v43 = vld [vmem:[#allocation3 + $0xc4] sm:$0xf] }
 0x390   : > { %v4932_v6 = vrot.slane %v4930_v37, 4  ;;  %v8524_v8 = vrot.slane %v10435_v54, 9  ;;  %v8549_v18 = vcombine.low %v11607_v50, %v11609_v40  ;;  %v4875_v29 = vor.u32 %v4874_v45, %v4871_v17  ;;  %v11703_v48 = vld [vmem:[#allocation3 + $0xc0] sm:$0xf] }
 0x391   : > { %v4867_v16 = vsel %vm11348_vm1, %v4862_v3, %v4866_v56  ;;  %v4899_v59 = vor.u32 %v4898_v49, %v4895_v46  ;;  %v4912_v31 = vshll.u32 %v11687_v0, 16  ;;  %v4886_v37 = vrot.slane %v4885_v44, 4 }
 0x392   : > { %v4933_v61 = vor.u32 %v4932_v6, %v11683_v52  ;;  %v4910_v54 = vrot.slane %v4909_v15, 4  ;;  %v4936_v4 = vshll.u32 %v11690_v9, 16  ;;  %v4923_v14 = vor.u32 %v4922_v28, %v4919_v20 }
 0x393   : > { %v4950_v45 = vshll.u32 %v11697_v43, 16  ;;  %v14490_v17 = vrot.slane %v11311_v57, 5  ;;  %v4944_v3 = vshll.u32 %v11703_v48, 16  ;;  %v4900_v46 = vrot.slane %v4899_v59, 4 }
 0x394   : > { %v4914_v6 = vrot.slane %v4912_v31, 5  ;;  %v4934_v44 = vrot.slane %v4933_v61, 4  ;;  %v4938_v20 = vrot.slane %v4936_v4, 5  ;;  %v8551_v31 = vcombine.low %v11636_v39, %v11643_v23 }
 0x395   : > { %5614 = vmatmul.mubr.bf16.gmra.mrb[32].mxu1 %v8548_v51  ;;  %v4857_v51 = vsel %vm11348_vm1, %v4852_v34, %v11649_v25  ;;  %v4954_v25 = vshrl.u32 %v11697_v43, 16  ;;  %v11712_v56 = vsel %vm11380_vm2, %v8524_v8, %v14490_v17  ;;  %v4941_v34 = vshrl.u32 %v11703_v48, 16 }
 0x396   : > { %5621 = vmatprep.mubr.bf16.mxu1 %v8565_v5  ;;  %v4890_v5 = vrot.slane %v4888_v21, 5  ;;  %v8566_v49 = vcombine.low %v4857_v51, %v4867_v16  ;;  %v8572_v15 = vcombine.low %v11712_v56, %v11388_v58  ;;  %v4876_v21 = vrot.slane %v4875_v29, 4  ;;  %v11722_v51 = vld [vmem:[#allocation3 + $0xc8] sm:$0x1] }
 0x397   : > { %v4915_v28 = vsel %vm11348_vm1, %v4910_v54, %v4914_v6  ;;  %v4924_v8 = vrot.slane %v4923_v14, 4  ;;  %v11724_v16 = vrot.slane %v4950_v45, 5  ;;  %v4956_v17 = vrot.slane %v4954_v25, 4  ;;  %v14497_v56 = vld [vmem:[#allocation6_spill] sm:$0xff] }
 0x398   : > { %v4891_v57 = vsel %vm11348_vm1, %v4886_v37, %v4890_v5  ;;  %v8550_v29 = vcombine.low %v11624_v60, %v11626_v1  ;;  %v11728_v59 = vrot.slane %v4941_v34, 4  ;;  %v4881_v4 = vsel %vm11348_vm1, %v4876_v21, %v11673_v7 }
 0x399   : > { %v4905_v14 = vsel %vm11348_vm1, %v4900_v46, %v11675_v63  ;;  %v4939_v61 = vsel %vm11348_vm1, %v4934_v44, %v4938_v20  ;;  %v8567_v37 = vcombine.low %v4881_v4, %v4891_v57  ;;  %v8552_v54 = vcombine.low %v11654_v12, %v11645_v38 }
 0x39a   : > { %v8568_v5 = vcombine.low %v4905_v14, %v4915_v28  ;;  %v4960_v45 = vshll.u32 %v11722_v51, 16  ;;  %v4929_v7 = vsel %vm11348_vm1, %v4924_v8, %v11683_v52  ;;  %v4957_v25 = vor.u32 %v4956_v17, %v11724_v16 }
 0x39b   : > { %v5049_v63 = vrot.slane %v11525_v22, 5  ;;  %v11751_v34 = vcombine.low %v4929_v7, %v4939_v61  ;;  %v8529_v21 = vrot.slane %v11539_v27, 9  ;;  %v5056_v46 = vrot.slane %v11547_v41, 5 }
 0x39c   : > { %v5052_v44 = vrot.slane %v11535_v32, 5  ;;  %v8530_v20 = vrot.slane %v11554_v2, 9  ;;  %v5063_v27 = vrot.slane %v11562_v11, 5  ;;  %v11769_v41 = vrot.slane %v4957_v25, 4 }
 0x39d   : > { %5622 = vmatmul.mubr.bf16.gmra.mrb[36].mxu1 %v8549_v18  ;;  %v11730_v18 = vrot.slane %v4944_v3, 5  ;;  %v5051_v52 = vrot.slane %v5049_v63, 4  ;;  %v11765_v22 = vsel %vm11380_vm2, %v8529_v21, %v5056_v46  ;;  %v5058_v57 = vrot.slane %v5056_v46, 4 }
 0x39e   : > { %5629 = vmatprep.mubr.bf16.mxu1 %v8566_v49  ;;  %v8528_v49 = vrot.slane %v11511_v36, 9  ;;  %v5059_v36 = vrot.slane %v11556_v30, 5  ;;  %v5066_v32 = vrot.slane %v11573_v10, 5  ;;  %v8531_v30 = vrot.slane %v11571_v62, 9 }
 0x39f   : > { %v4947_v3 = vor.u32 %v11730_v18, %v11728_v59  ;;  %v11773_v28 = vsel %vm11380_vm2, %v5051_v52, %v5052_v44  ;;  %v11785_v2 = vsel %vm11380_vm2, %v8530_v20, %v5063_v27  ;;  %v5065_v11 = vrot.slane %v5063_v27, 4 }
 0x3a0   : > { %v11759_v6 = vsel %vm11380_vm2, %v8528_v49, %v5049_v63  ;;  %v11781_v17 = vsel %vm11380_vm2, %v5058_v57, %v5059_v36  ;;  %v5070_v4 = vrot.slane %v11579_v47, 5  ;;  %v5073_v10 = vrot.slane %v11587_v53, 5 }
 0x3a1   : > { %v8576_v8 = vcombine.low %v11759_v6, %v11773_v28  ;;  %v8532_v62 = vrot.slane %v11592_v19, 9  ;;  %v11794_v14 = vsel %vm11380_vm2, %v5065_v11, %v5066_v32  ;;  %v5077_v61 = vrot.slane %v11594_v55, 5  ;;  %v14491_v11 = vld [vmem:[#allocation9_spill] sm:$0xff]  ;;  %v10367_v28 = vld [vmem:[%s14362_s4 + $0x38] sm:$0xff]  }
 0x3a2   : > { %v8533_v7 = vrot.slane %v11607_v50, 9  ;;  %v8578_v25 = vcombine.low %v11785_v2, %v11794_v14  ;;  %v11803_v47 = vsel %vm11380_vm2, %v8531_v30, %v5070_v4  ;;  %v5072_v53 = vrot.slane %v5070_v4, 4  ;;  %v10365_v6 = vld [vmem:[%s14362_s4 + $0x30] sm:$0xff]  }
 0x3a3   : > { %v5084_v19 = vrot.slane %v11609_v40, 5  ;;  %v11808_v49 = vsel %vm11380_vm2, %v8532_v62, %v5077_v61  ;;  %v5079_v63 = vrot.slane %v5077_v61, 4  ;;  %v5087_v55 = vrot.slane %v11628_v42, 5  ;;  %v14492_v62 = vld [vmem:[#allocation10_spill] sm:$0xff] }
 0x3a4   : > { %v11814_v50 = vsel %vm11380_vm2, %v5072_v53, %v5073_v10  ;;  %v5091_v40 = vrot.slane %v11626_v1, 5  ;;  %v8535_v44 = vrot.slane %v11636_v39, 9  ;;  %v5101_v39 = vrot.slane %v11677_v24, 5 }
 0x3a5   : > { %5630 = vmatmul.mubr.bf16.gmra.mrb[40].mxu1 %v8550_v29  ;;  %v8577_v29 = vcombine.low %v11765_v22, %v11781_v17  ;;  %v11818_v21 = vsel %vm11380_vm2, %v8533_v7, %v5084_v19  ;;  %v5086_v46 = vrot.slane %v5084_v19, 4  ;;  %v8579_v52 = vcombine.low %v11803_v47, %v11814_v50  ;;  %v10366_v22 = vld [vmem:[%s14362_s4 + $0x78] sm:$0xff]   ;;  %v12020_v50 = vld [vmem:[#allocation3 + $0x10] sm:$0xf] }
 0x3a6   : > { %5637 = vmatprep.mubr.bf16.mxu1 %v8567_v37  ;;  %v5080_v37 = vrot.slane %v11613_v13, 5  ;;  %v8534_v13 = vrot.slane %v11624_v60, 9  ;;  %v5094_v60 = vrot.slane %v11647_v35, 5  ;;  %v5098_v35 = vrot.slane %v11643_v23, 5 }
 0x3a7   : > { %v11833_v57 = vsel %vm11380_vm2, %v5086_v46, %v5087_v55  ;;  %v5105_v32 = vrot.slane %v11645_v38, 5  ;;  %v5108_v30 = vrot.slane %v11687_v0, 5  ;;  %v8537_v4 = vrot.slane %v14491_v11, 9 }
 0x3a8   : > { %v11825_v42 = vsel %vm11380_vm2, %v5079_v63, %v5080_v37  ;;  %v11837_v1 = vsel %vm11380_vm2, %v8534_v13, %v5091_v40  ;;  %v8581_v20 = vcombine.low %v11818_v21, %v11833_v57  ;;  %v11855_v23 = vsel %vm11380_vm2, %v8535_v44, %v5098_v35 }
 0x3a9   : > { %v8580_v36 = vcombine.low %v11808_v49, %v11825_v42  ;;  %v5100_v24 = vrot.slane %v5098_v35, 4  ;;  %v5112_v61 = vrot.slane %v14492_v62, 5  ;;  %v5107_v7 = vrot.slane %v5105_v32, 4 }
 0x3aa   : > { %v5115_v53 = vrot.slane %v11690_v9, 5  ;;  %v8538_v0 = vrot.slane %v11703_v48, 9  ;;  %v5119_v13 = vrot.slane %v11697_v43, 5  ;;  %v5122_v9 = vrot.slane %v11722_v51, 5 }
 0x3ab   : > { %v11866_v19 = vsel %vm11380_vm2, %v5100_v24, %v5101_v39  ;;  %v11870_v63 = vsel %vm11380_vm2, %v8537_v4, %v5112_v61  ;;  %v5114_v55 = vrot.slane %v5112_v61, 4  ;;  %v10487_v39 = vmov 0  }
 0x3ac   : > { %v8583_v46 = vcombine.low %v11855_v23, %v11866_v19  ;;  %v5121_v35 = vrot.slane %v5119_v13, 4  ;;  %319 = vst [vmem:[#allocation3] sm:$0xf] %v10487_v39  ;;  %320 = vst [vmem:[#allocation3 + $0x4] sm:$0xf] %v10487_v39  ;;  %v8553_v59 = vcombine.low %v14491_v11, %v14492_v62  ;;  %v3779_v57 = vshll.u32 %v12020_v50, 16 }
 0x3ad   : > { %5638 = vmatmul.mubr.bf16.gmra.mrb[44].mxu1 %v8551_v31  ;;  %v5093_v31 = vrot.slane %v5091_v40, 4  ;;  %v11877_v40 = vsel %vm11380_vm2, %v5107_v7, %v5108_v30  ;;  %v11887_v44 = vsel %vm11380_vm2, %v5114_v55, %v5115_v53  ;;  %321 = vst [vmem:[#allocation3 + $0x8] sm:$0x1] %v10487_v39  ;;  %323 = vst [vmem:[#allocation3 + $0xcc] sm:$0xf] %v10487_v39 }
 0x3ae   : > { %5645 = vmatprep.mubr.bf16.mxu1 %v8568_v5  ;;  %v8536_v5 = vrot.slane %v11654_v12, 9  ;;  %324 = vst [vmem:[#allocation3 + $0xd0] sm:$0xf] %v10487_v39  ;;  %325 = vst [vmem:[#allocation3 + $0xd4] sm:$0x1] %v10487_v39  ;;  %v8585_v38 = vcombine.low %v11870_v63, %v11887_v44  ;;  %v4948_v12 = vrot.slane %v4947_v3, 4 }
 0x3af   : > { %v11846_v27 = vsel %vm11380_vm2, %v5093_v31, %v5094_v60  ;;  %v11891_v31 = vsel %vm11380_vm2, %v8538_v0, %v5119_v13  ;;  %v10436_v30 = vld [vmem:[#allocation3 + $0x10] sm:$0xf]  ;;  %v10437_v0 = vld [vmem:[#allocation3 + $0x14] sm:$0x1]  ;;  %v10438_v62 = vld [vmem:[#allocation3 + $0xc] sm:$0xf] }
 0x3b0   : > { %v8582_v10 = vcombine.low %v11837_v1, %v11846_v27  ;;  %v11860_v37 = vsel %vm11380_vm2, %v8536_v5, %v5105_v32  ;;  %v11903_v5 = vsel %vm11380_vm2, %v5121_v35, %v5122_v9  ;;  %v5014_v4 = vrot.slane %v10436_v30, 5  ;;  %v10439_v13 = vld [vmem:[#allocation3 + $0x28] sm:$0xf] }
 0x3b1   : > { %v8584_v60 = vcombine.low %v11860_v37, %v11877_v40  ;;  %v8586_v32 = vcombine.low %v11891_v31, %v11903_v5  ;;  %v4953_v51 = vsel %vm11348_vm1, %v4948_v12, %v11724_v16  ;;  %v5017_v11 = vrot.slane %v10437_v0, 5  ;;  %v12205_v31 = vld [vmem:[#allocation3 + $0x9c] sm:$0xf] }
 0x3b2   : > { %v5016_v24 = vrot.slane %v5014_v4, 4  ;;  %v8523_v55 = vrot.slane %v10438_v62, 9  ;;  %v5028_v9 = vrot.slane %v10439_v13, 5  ;;  %v8554_v35 = vcombine.low %v11703_v48, %v11697_v43  ;;  %v10353_v43 = vld [vmem:[%s14362_s4] sm:$0xff]   ;;  %v10443_v62 = vld [vmem:[#allocation3 + $0x38] sm:$0x1] }
 0x3b3   : > { %v14496_v13 = vld [vmem:[#allocation8_spill] sm:$0xff]  ;;  %v12008_v2 = vld [vmem:[#allocation3 + $0x4] sm:$0xf]  ;;  %v3781_v27 = vrot.slane %v3779_v57, 5 }
 0x3b4   : > { %v385_v3 = vld [vmem:[#allocation3 + $0x8] sm:$0x1]  ;;  %v5018_v16 = vsel %vm11380_vm2, %v5016_v24, %v5017_v11  ;;  %v5015_v39 = vsel %vm11380_vm2, %v8523_v55, %v5014_v4  ;;  %v14495_v24 = vld [vmem:[#allocation7_spill] sm:$0xff]  ;;  %v10354_v4 = vld [vmem:[%s14362_s4 + $0x48] sm:$0xff]   ;;  %v5038_v55 = vrot.slane %v10443_v62, 5  ;;  %14498 = vst [vmem:[#allocation9_spill] sm:$0xff] %v12008_v2 }
 0x3b5   : > { %5646 = vmatmul.mubr.bf16.gmra.mrb[48].mxu1 %v8552_v54  ;;  %v4962_v54 = vrot.slane %v4960_v45, 5  ;;  %v329_v45 = vld [vmem:[#allocation3] sm:$0x1]  ;;  %v8571_v12 = vcombine.low %v5015_v39, %v5018_v16  ;;  %v10355_v16 = vld [vmem:[%s14362_s4 + $0x8] sm:$0xff]   ;;  %v10444_v39 = vld [vmem:[#allocation3 + $0x30] sm:$0xf] }
 0x3b6   : > { %5653 = vmatprep.mubr.bf16.mxu1 %v11751_v34  ;;  %v330_v7 = vsel %vm11023_vm6, 0, %v329_v45  ;;  %v3759_v47 = vshrl.u32 %v12008_v2, 16 }
 0x3b7   : > { %v4963_v34 = vsel %vm11348_vm1, %v11769_v41, %v4962_v54  ;;  %v386_v41 = vsel %vm11094_vm8, 0, %v385_v3  ;;  %331 = vst [vmem:[#allocation3] sm:$0x1] %v330_v7  ;;  %v5030_v54 = vrot.slane %v5028_v9, 4  ;;  %v5042_v7 = vrot.slane %v14495_v24, 5  ;;  %v10360_v24 = vld [vmem:[%s14362_s4 + $0x60] sm:$0xff]  }
 0x3b8   : > { %v8570_v18 = vcombine.low %v4953_v51, %v4963_v34  ;;  %387 = vst [vmem:[#allocation3 + $0x8] sm:$0x1] %v386_v41  ;;  %v10440_v34 = vld [vmem:[#allocation3 + $0x2c] sm:$0x1]  ;;  %v3761_v42 = vrot.slane %v3759_v47, 4 }
 0x3b9   : > { %v5031_v30 = vrot.slane %v10440_v34, 5  ;;  %v5044_v11 = vrot.slane %v5042_v7, 4  ;;  %v12066_v47 = vld [vmem:[#allocation3 + $0x30] sm:$0xf] }
 0x3bb   : > { %v5032_v3 = vsel %vm11380_vm2, %v5030_v54, %v5031_v30  ;;  %v10357_v30 = vld [vmem:[%s14362_s4 + $0x10] sm:$0xff]  }
 0x3bd   : > { %5654 = vmatmul.mubr.bf16.gmra.mrb[52].mxu1 %v8553_v59  ;;  %v10441_v59 = vld [vmem:[#allocation3 + $0x34] sm:$0xf] }
 0x3be   : > { %5661 = vmatprep.mubr.bf16.mxu1 %v8570_v18  ;;  %v5035_v51 = vrot.slane %v10441_v59, 5  ;;  %v10442_v18 = vld [vmem:[#allocation3 + $0x24] sm:$0xf]  ;;  %v12006_v17 = vld [vmem:[#allocation3] sm:$0xf] }
 0x3bf   : > { %v8525_v45 = vrot.slane %v10442_v18, 9  ;;  %v3749_v14 = vshll.u32 %v12006_v17, 16  ;;  %v12026_v21 = vld [vmem:[#allocation3 + $0x8] sm:$0x1] }
 0x3c0   : > { %v5037_v0 = vrot.slane %v5035_v51, 4  ;;  %14499 = vst [vmem:[#allocation10_spill] sm:$0xff] %v12026_v21  ;;  %v3765_v1 = vshll.u32 %v12026_v21, 16 }
 0x3c1   : > { %v5029_v48 = vsel %vm11380_vm2, %v8525_v45, %v5028_v9  ;;  %v5045_v9 = vrot.slane %v14496_v13, 5  ;;  %v10358_v45 = vld [vmem:[%s14362_s4 + $0x58] sm:$0xff]  }
 0x3c2   : > { %v8573_v41 = vcombine.low %v5029_v48, %v5032_v3  ;;  %v5039_v58 = vsel %vm11380_vm2, %v5037_v0, %v5038_v55  ;;  %v10363_v48 = vld [vmem:[%s14362_s4 + $0x28] sm:$0xff]   ;;  %v3751_v0 = vrot.slane %v3749_v14, 5 }
 0x3c3   : > { %v5046_v54 = vsel %vm11380_vm2, %v5044_v11, %v5045_v9  ;;  %v12035_v55 = vld [vmem:[#allocation3 + $0x18] sm:$0xf]  ;;  %v12042_v9 = vld [vmem:[#allocation3 + $0x24] sm:$0xf] }
 0x3c4   : > { %v3818_v23 = vshrl.u32 %v12042_v9, 16  ;;  %v3821_v19 = vshll.u32 %v12042_v9, 16 }
 0x3c5   : > { %5662 = vmatmul.mubr.bf16.gmra.mrb[56].mxu1 %v8554_v35  ;;  %v10356_v35 = vld [vmem:[%s14362_s4 + $0x50] sm:$0xff]  }
 0x3c6   : > { %9740 = vmatprep.mubr.bf16.mxu1 %v8571_v12  ;;  %v8526_v12 = vrot.slane %v10444_v39, 9 }
 0x3c8   : > { %v5036_v34 = vsel %vm11380_vm2, %v8526_v12, %v5035_v51  ;;  %v10359_v51 = vld [vmem:[%s14362_s4 + $0x18] sm:$0xff]   ;;  %v3794_v12 = vshrl.u32 %v12035_v55, 16 }
 0x3c9   : > { %v8574_v59 = vcombine.low %v5036_v34, %v5039_v58  ;;  %v3797_v58 = vshll.u32 %v12035_v55, 16 }
 0x3cd   : > { %9741 = vmatmul.mubr.bf16.vlgmr.msra.gmra.mrb[60].mxu1 %v8572_v15  ;;  %v8527_v15 = vrot.slane %v14497_v56, 9 }
 0x3ce   : > { %9147 = vmatpush3.bf16.msra.mxu1 %v10353_v43  ;;  %9744 = vmatprep.mubr.bf16.mxu1 %v8573_v41  ;;  %v10362_v43 = vld [vmem:[%s14362_s4 + $0x68] sm:$0xff]  }
 0x3cf   : > { %9148 = vmatprep.subr.bf16.mxu1 %v10354_v4  ;;  %v5043_v18 = vsel %vm11380_vm2, %v8527_v15, %v5042_v7  ;;  %v10361_v7 = vld [vmem:[%s14362_s4 + $0x20] sm:$0xff]   ;;  %v10364_v4 = vld [vmem:[%s14362_s4 + $0x70] sm:$0xff]  }
 0x3d0   : > { %v8575_v3 = vcombine.low %v5043_v18, %v5046_v54  ;;  %v3767_v18 = vrot.slane %v3765_v1, 5 }
 0x3d2   : > { %9149 = vmatpush3.bf16.msra.mxu1 %v10355_v16 }
 0x3d3   : > { %9150 = vmatprep.subr.bf16.mxu1 %v10356_v35 }
 0x3d5   : > { %9745 = vmatmul.mubr.bf16.gmra.mrb[64].mxu1 %v8574_v59 }
 0x3d6   : > { %9748 = vmatprep.mubr.bf16.mxu1 %v8575_v3  ;;  %9151 = vmatpush3.bf16.msra.mxu1 %v10357_v30 }
 0x3d7   : > { %9152 = vmatprep.subr.bf16.mxu1 %v10358_v45  ;;  %v12051_v45 = vld [vmem:[#allocation3 + $0x28] sm:$0xf] }
 0x3da   : > { %9153 = vmatpush3.bf16.msra.mxu1 %v10359_v51  ;;  %v3796_v51 = vrot.slane %v3794_v12, 4  ;;  %v12083_v12 = vld [vmem:[#allocation3 + $0x54] sm:$0xf] }
 0x3db   : > { %9154 = vmatprep.subr.bf16.mxu1 %v10360_v24  ;;  %v3799_v24 = vrot.slane %v3797_v58, 5  ;;  %v12085_v58 = vld [vmem:[#allocation3 + $0x58] sm:$0xf] }
 0x3dd   : > { %9749 = vmatmul.mubr.bf16.gmra.mrb[68].mxu1 %v8576_v8  ;;  %v12003_v8 = vld [vmem:[%s14362_s4 + $0x80] sm:$0xff]  }
 0x3de   : > { %9752 = vmatprep.mubr.bf16.mxu1 %v8577_v29  ;;  %9155 = vmatpush3.bf16.msra.mxu1 %v10361_v7  ;;  %v3746_v29 = vshrl.u32 %v12006_v17, 16 }
 0x3df   : > { %9156 = vmatprep.subr.bf16.mxu1 %v10362_v43 }
 0x3e0   : > { %v3748_v41 = vrot.slane %v3746_v29, 4  ;;  %v3831_v29 = vshrl.u32 %v12051_v45, 16 }
 0x3e2   : > { %9157 = vmatpush3.bf16.msra.mxu1 %v10363_v48  ;;  %v3752_v35 = vor.u32 %v3751_v0, %v3748_v41  ;;  %v3702_v48 = vld [vmem:[#allocation3 + $0x20] sm:$0x1] }
 0x3e3   : > { %9158 = vmatprep.subr.bf16.mxu1 %v10364_v4  ;;  %v3820_v4 = vrot.slane %v3818_v23, 4  ;;  %v12096_v23 = vld [vmem:[#allocation3 + $0x64] sm:$0xf] }
 0x3e4   : > { %v3753_v30 = vrot.slane %v3752_v35, 4  ;;  %v12074_v35 = vld [vmem:[#allocation3 + $0x34] sm:$0xf] }
 0x3e5   : > { %9753 = vmatmul.mubr.bf16.gmra.mrb[72].mxu1 %v8578_v25  ;;  %v3755_v25 = vshll.u32 %v12008_v2, 16 }
 0x3e6   : > { %9756 = vmatprep.mubr.bf16.mxu1 %v8579_v52  ;;  %9159 = vmatpush3.bf16.msra.mxu1 %v10365_v6  ;;  %v12022_v52 = vld [vmem:[#allocation3 + $0xc] sm:$0xf]  ;;  %v3823_v6 = vrot.slane %v3821_v19, 5 }
 0x3e7   : > { %9160 = vmatprep.subr.bf16.mxu1 %v10366_v22  ;;  %v3757_v49 = vrot.slane %v3755_v25, 5  ;;  %v3770_v11 = vshrl.u32 %v12022_v52, 16  ;;  %v3773_v62 = vshll.u32 %v12022_v52, 16  ;;  %v3813_v25 = vshll.u32 %v3702_v48, 16  ;;  %v12207_v48 = vld [vmem:[#allocation3 + $0xa0] sm:$0xf] }
 0x3e8   : > { %v3824_v44 = vor.u32 %v3823_v6, %v3820_v4  ;;  %v12125_v6 = vld [vmem:[#allocation3 + $0x6c] sm:$0xf] }
 0x3e9   : > { %v3762_v39 = vor.u32 %v3761_v42, %v3757_v49  ;;  %v3772_v56 = vrot.slane %v3770_v11, 4  ;;  %v3775_v15 = vrot.slane %v3773_v62, 5  ;;  %v3758_v14 = vsel %vm11348_vm1, %v3753_v30, %v3757_v49  ;;  %v3705_v42 = vld [vmem:[#allocation3 + $0x2c] sm:$0x1] }
 0x3ea   : > { %9161 = vmatpush3.bf16.msra.mxu1 %v10367_v28  ;;  %v3827_v28 = vshll.u32 %v12051_v45, 16  ;;  %v3842_v11 = vshrl.u32 %v12066_v47, 16  ;;  %v3845_v49 = vshll.u32 %v12066_v47, 16  ;;  %v12081_v1 = vrot.slane %v3824_v44, 4  ;;  %v12149_v44 = vld [vmem:[#allocation3 + $0x74] sm:$0x1] }
 0x3eb   : > { %9772 = vmatprep.subr.bf16.mxu1 %v12003_v8  ;;  %v3763_v59 = vrot.slane %v3762_v39, 4  ;;  %v3776_v7 = vor.u32 %v3775_v15, %v3772_v56  ;;  %v3851_v30 = vshll.u32 %v12074_v35, 16 }
 0x3ec   : > { %v12068_v57 = vrot.slane %v3827_v28, 5 }
 0x3ed   : > { %9757 = vmatmul.mubr.bf16.gmra.mrb[76].mxu1 %v8580_v36  ;;  %v12024_v36 = vld [vmem:[#allocation3 + $0x1c] sm:$0xf]  ;;  %v3768_v37 = vsel %vm11348_vm1, %v3763_v59, %v3767_v18  ;;  %v3777_v41 = vrot.slane %v3776_v7, 4  ;;  %v3855_v18 = vshrl.u32 %v12074_v35, 16  ;;  %v8475_v7 = vcombine.low %v12006_v17, %v12008_v2 }
 0x3ee   : > { %9760 = vmatprep.mubr.bf16.mxu1 %v8581_v20  ;;  %v3783_v20 = vshrl.u32 %v12020_v50, 16  ;;  %v3803_v16 = vshll.u32 %v12024_v36, 16  ;;  %v3807_v13 = vshrl.u32 %v12024_v36, 16  ;;  %v12133_v17 = vld [vmem:[#allocation3 + $0x7c] sm:$0xf] }
 0x3ef   : > { %v3782_v56 = vsel %vm11348_vm1, %v3777_v41, %v3781_v27  ;;  %v12145_v41 = vrot.slane %v3851_v30, 5 }
 0x3f0   : > { %v12049_v54 = vrot.slane %v3803_v16, 5  ;;  %v3809_v34 = vrot.slane %v3807_v13, 4  ;;  %v3815_v13 = vrot.slane %v3813_v25, 5 }
 0x3f2   : > { %v3810_v22 = vor.u32 %v3809_v34, %v12049_v54  ;;  %v12100_v34 = vrot.slane %v3845_v49, 5 }
 0x3f4   : > { %v3811_v0 = vrot.slane %v3810_v22, 4  ;;  %v12127_v22 = vld [vmem:[#allocation3 + $0x78] sm:$0xf] }
 0x3f5   : > { %9761 = vmatmul.mubr.bf16.gmra.mrb[80].mxu1 %v8582_v10  ;;  %v3785_v10 = vrot.slane %v3783_v20, 4  ;;  %v3833_v20 = vrot.slane %v3831_v29, 4  ;;  %v12131_v29 = vld [vmem:[#allocation3 + $0x70] sm:$0xf] }
 0x3f6   : > { %9764 = vmatprep.mubr.bf16.mxu1 %v8583_v46  ;;  %v3699_v46 = vld [vmem:[#allocation3 + $0x14] sm:$0x1]  ;;  %v3816_v15 = vsel %vm11348_vm1, %v3811_v0, %v3815_v13  ;;  %v4238_v0 = vrot.slane %v12096_v23, 5  ;;  %v12165_v13 = vld [vmem:[#allocation3 + $0x88] sm:$0xf]  ;;  %v4245_v30 = vrot.slane %v12131_v29, 5 }
 0x3f7   : > { %v3786_v3 = vor.u32 %v3785_v10, %v3781_v27  ;;  %v3789_v43 = vshll.u32 %v3699_v46, 16  ;;  %v3837_v10 = vshll.u32 %v3705_v42, 16  ;;  %v3834_v5 = vor.u32 %v3833_v20, %v12068_v57  ;;  %v12103_v27 = vld [vmem:[#allocation3 + $0x5c] sm:$0x1]  ;;  %v12155_v20 = vld [vmem:[#allocation3 + $0x80] sm:$0x1] }
 0x3f8   : > { %v12098_v46 = vrot.slane %v3842_v11, 4  ;;  %v12153_v42 = vrot.slane %v3855_v18, 4 }
 0x3f9   : > { %v3787_v40 = vrot.slane %v3786_v3, 4  ;;  %v3791_v63 = vrot.slane %v3789_v43, 5  ;;  %v12109_v3 = vld [vmem:[#allocation3 + $0x68] sm:$0x1]  ;;  %v12121_v4 = vrot.slane %v3837_v10, 5  ;;  %v12129_v28 = vrot.slane %v3834_v5, 4 }
 0x3fa   : > { %v4241_v49 = vrot.slane %v12109_v3, 5  ;;  %v12167_v10 = vld [vmem:[#allocation3 + $0x90] sm:$0xf]  ;;  %v4240_v5 = vrot.slane %v4238_v0, 4 }
 0x3fb   : > { %v3792_v62 = vsel %vm11348_vm1, %v3787_v40, %v3791_v63  ;;  %v4234_v40 = vrot.slane %v12103_v27, 5  ;;  %v12147_v63 = vld [vmem:[#allocation3 + $0x40] sm:$0xf] }
 0x3fc   : > { %v8492_v19 = vcombine.low %v3782_v56, %v3792_v62  ;;  %v8468_v62 = vrot.slane %v12125_v6, 9  ;;  %v4252_v56 = vrot.slane %v12133_v17, 5 }
 0x3fd   : > { %9765 = vmatmul.mubr.bf16.gmra.mrb[84].mxu1 %v8584_v60  ;;  %v3800_v60 = vor.u32 %v3799_v24, %v3796_v51  ;;  %v8466_v51 = vrot.slane %v12083_v12, 9  ;;  %v4231_v24 = vrot.slane %v12085_v58, 5 }
 0x3fe   : > { %9768 = vmatprep.mubr.bf16.mxu1 %v8585_v38  ;;  %v8491_v38 = vcombine.low %v3758_v14, %v3768_v37  ;;  %v4254_v18 = vrot.slane %v4252_v56, 4 }
 0x3ff   : > { %v3801_v16 = vrot.slane %v3800_v60, 4  ;;  %v12137_v14 = vsel %vm11380_vm2, %v8466_v51, %v4231_v24  ;;  %v4233_v37 = vrot.slane %v4231_v24, 4  ;;  %v10371_v60 = vld [vmem:[%s14362_s4 + $0x88] sm:$0xff]   ;;  %v12182_v51 = vld [vmem:[#allocation3 + $0x8c] sm:$0x1] }
 0x400   : > { %14500 = vst [vmem:[#allocation7_spill] sm:$0xff] %v12137_v14  ;;  %v12184_v24 = vld [vmem:[#allocation3 + $0x94] sm:$0xf] }
 0x401   : > { %v3806_v59 = vsel %vm11348_vm1, %v3801_v16, %v12049_v54  ;;  %v12123_v54 = vld [vmem:[#allocation3 + $0x38] sm:$0x1]  ;;  %v12159_v11 = vsel %vm11380_vm2, %v4233_v37, %v4234_v40  ;;  %v12163_v16 = vld [vmem:[#allocation3 + $0x84] sm:$0xf]  ;;  %14503 = vst [vmem:[#allocation11_spill] sm:$0xff] %v12184_v24  ;;  %v8469_v37 = vrot.slane %v12127_v22, 9  ;;  %v12195_v40 = vsel %vm11380_vm2, %v4240_v5, %v4241_v49 }
 0x402   : > { %v12115_v43 = vcombine.low %v3806_v59, %v3816_v15  ;;  %14501 = vst [vmem:[#allocation8_spill] sm:$0xff] %v12159_v11  ;;  %14504 = vst [vmem:[#allocation12_spill] sm:$0xff] %v12195_v40  ;;  %v4255_v5 = vrot.slane %v12155_v20, 5  ;;  %v12212_v59 = vld [vmem:[#allocation3 + $0xa4] sm:$0x1]  ;;  %v8470_v39 = vrot.slane %v12163_v16, 9 }
 0x403   : > { %v12222_v25 = vsel %vm11380_vm2, %v8469_v37, %v4252_v56  ;;  %v12225_v49 = vld [vmem:[#allocation3 + $0xac] sm:$0xf]  ;;  %v4259_v40 = vrot.slane %v12165_v13, 5  ;;  %v4266_v37 = vrot.slane %v12184_v24, 5  ;;  %v12253_v24 = vld [vmem:[#allocation3 + $0xb0] sm:$0x1] }
 0x404   : > { %14507 = vst [vmem:[#allocation15_spill] sm:$0xff] %v12222_v25  ;;  %v10377_v56 = vld [vmem:[%s14362_s4 + $0x98] sm:$0xff]   ;;  %v4276_v14 = vrot.slane %v12212_v59, 5 }
 0x405   : > { %9769 = vmatmul.mubr.bf16.gmra.mrb[88].mxu1 %v8586_v32  ;;  %v12094_v32 = vld [vmem:[#allocation3 + $0x60] sm:$0xf]  ;;  %v12248_v21 = vsel %vm11380_vm2, %v8470_v39, %v4259_v40  ;;  %v4261_v2 = vrot.slane %v4259_v40, 4  ;;  %v12264_v40 = vld [vmem:[#allocation3 + $0xb4] sm:$0xf] }
 0x406   : > { %6007 = vmatprep.mubr.bf16.mxu1 %v8491_v38  ;;  %v8467_v38 = vrot.slane %v12094_v32, 9 }
 0x408   : > { %v12173_v15 = vsel %vm11380_vm2, %v8467_v38, %v4238_v0  ;;  %v12199_v38 = vsel %vm11380_vm2, %v8468_v62, %v4245_v30  ;;  %v4247_v0 = vrot.slane %v4245_v30, 4  ;;  %v12214_v62 = vld [vmem:[#allocation3 + $0xa8] sm:$0xf] }
 0x409   : > { %14502 = vst [vmem:[#allocation6_spill] sm:$0xff] %v12173_v15  ;;  %14505 = vst [vmem:[#allocation13_spill] sm:$0xff] %v12199_v38  ;;  %v4262_v15 = vrot.slane %v12182_v51, 5 }
 0x40d   : > { %6008 = vmatmul.mubr.bf16.vlgmr.msra.gmra.mrb[92].mxu1 %v8475_v7  ;;  %v4248_v7 = vrot.slane %v12149_v44, 5 }
 0x40e   : > { %9773 = vmatpush3.bf16.msra.mxu1 %v12003_v8  ;;  %6015 = vmatprep.mubr.bf16.mxu1 %v8492_v19  ;;  %v10374_v8 = vld [vmem:[%s14362_s4 + $0x90] sm:$0xff]   ;;  %v12191_v19 = vld [vmem:[#allocation3 + $0x98] sm:$0x1] }
 0x40f   : > { %9774 = vmatprep.subr.bf16.mxu1 %v10371_v60  ;;  %v12218_v30 = vsel %vm11380_vm2, %v4247_v0, %v4248_v7  ;;  %v8471_v7 = vrot.slane %v12167_v10, 9  ;;  %v4269_v61 = vrot.slane %v12191_v19, 5 }
 0x410   : > { %14506 = vst [vmem:[#allocation14_spill] sm:$0xff] %v12218_v30  ;;  %v8472_v30 = vrot.slane %v12205_v31, 9 }
 0x412   : > { %9775 = vmatpush3.bf16.msra.mxu1 %v10371_v60  ;;  %v12237_v60 = vsel %vm11380_vm2, %v4254_v18, %v4255_v5  ;;  %v14510_v18 = vcombine.low %v12022_v52, %v12020_v50  ;;  %v12266_v50 = vld [vmem:[#allocation3 + $0xb8] sm:$0xf]  ;;  %v12270_v52 = vsel %vm11380_vm2, %v4261_v2, %v4262_v15 }
 0x413   : > { %v9032_v53 = vpop.f32.mrb[0].mxu1  ;;  %9776 = vmatprep.subr.bf16.mxu1 %v10374_v8  ;;  %14508 = vst [vmem:[#allocation16_spill] sm:$0xff] %v12237_v60  ;;  %14513 = vst [vmem:[#allocation20_spill] sm:$0xff] %v12270_v52 }
 0x414   : > { %v9033_v0 = vpop.f32.mrb[1].mxu1 }
 0x415   : > { %v12242_v38 = vadd.f32 %v9033_v0, %v9032_v53  ;;  %v9035_v11 = vpop.f32.mrb[2].mxu1  ;;  %6016 = vmatmul.mubr.bf16.gmra.mrb[96].mxu1 %v14510_v18  ;;  %v12257_v53 = vsel %vm11380_vm2, %v8471_v7, %v4266_v37  ;;  %v4268_v0 = vrot.slane %v4266_v37, 4  ;;  %v8473_v7 = vrot.slane %v12214_v62, 9  ;;  %v12274_v18 = vld [vmem:[#allocation3 + $0x3c] sm:$0xf] }
 0x416   : > { %v9036_v5 = vpop.f32.mrb[3].mxu1  ;;  %14511 = vst [vmem:[#allocation18_spill] sm:$0xff] %v12257_v53  ;;  %6023 = vmatprep.mubr.bf16.mxu1 %v12115_v43  ;;  %9777 = vmatpush3.bf16.msra.mxu1 %v10374_v8  ;;  %v4280_v37 = vrot.slane %v12225_v49, 5  ;;  %v10380_v43 = vld [vmem:[%s14362_s4 + $0xa0] sm:$0xff]   ;;  %v3866_v52 = vshrl.u32 %v12274_v18, 16 }
 0x417   : > { %14509 = vst [vmem:[#allocation17_spill] sm:$0xff] %v12242_v38  ;;  %v4273_v38 = vrot.slane %v12207_v48, 5  ;;  %v12262_v39 = vadd.f32 %v9036_v5, %v9035_v11  ;;  %9778 = vmatprep.subr.bf16.mxu1 %v10377_v56  ;;  %v12283_v8 = vsel %vm11380_vm2, %v4268_v0, %v4269_v61  ;;  %v12289_v5 = vld [vmem:[#allocation3 + $0xbc] sm:$0x1]  ;;  %v4283_v11 = vrot.slane %v12253_v24, 5 }
 0x418   : > { %14514 = vst [vmem:[#allocation21_spill] sm:$0xff] %v12283_v8  ;;  %v12295_v60 = vsel %vm11380_vm2, %v8473_v7, %v4280_v37  ;;  %v4282_v25 = vrot.slane %v4280_v37, 4  ;;  %v3879_v61 = vshrl.u32 %v12147_v63, 16  ;;  %v4290_v53 = vrot.slane %v12289_v5, 5 }
 0x419   : > { %14512 = vst [vmem:[#allocation19_spill] sm:$0xff] %v12262_v39  ;;  %v12287_v2 = vsel %vm11380_vm2, %v8472_v30, %v4273_v38  ;;  %v4275_v15 = vrot.slane %v4273_v38, 4  ;;  %14516 = vst [vmem:[#allocation23_spill] sm:$0xff] %v12295_v60  ;;  %v8474_v38 = vrot.slane %v12264_v40, 9  ;;  %v4287_v30 = vrot.slane %v12266_v50, 5 }
 0x41a   : > { %14515 = vst [vmem:[#allocation22_spill] sm:$0xff] %v12287_v2  ;;  %v3869_v39 = vshll.u32 %v12274_v18, 16  ;;  %9779 = vmatpush3.bf16.msra.mxu1 %v10377_v56  ;;  %v12311_v37 = vsel %vm11380_vm2, %v4282_v25, %v4283_v11  ;;  %v14519_v25 = vsel %vm11348_vm1, %v12129_v28, %v12121_v4  ;;  %v14520_v11 = vsel %vm11348_vm1, %v12081_v1, %v12068_v57 }
 0x41b   : > { %v12301_v0 = vsel %vm11380_vm2, %v4275_v15, %v4276_v14  ;;  %14518 = vst [vmem:[#allocation25_spill] sm:$0xff] %v12311_v37  ;;  %9780 = vmatprep.subr.bf16.mxu1 %v10380_v43  ;;  %v10383_v14 = vld [vmem:[%s14362_s4 + $0xa8] sm:$0xff]   ;;  %v12320_v8 = vsel %vm11380_vm2, %v8474_v38, %v4287_v30  ;;  %v4289_v56 = vrot.slane %v4287_v30, 4  ;;  %v8494_v7 = vcombine.low %v14520_v11, %v14519_v25 }
 0x41c   : > { %14517 = vst [vmem:[#allocation24_spill] sm:$0xff] %v12301_v0  ;;  %v9026_v0 = vpop.f32.mrb[32].mxu0  ;;  %v14521_v15 = vcombine.low %v12035_v55, %v12024_v36  ;;  %v14522_v38 = vor.u32 %v12153_v42, %v12145_v41  ;;  %v14523_v60 = vshll.u32 %v12147_v63, 16  ;;  %v3881_v4 = vrot.slane %v3879_v61, 4  ;;  %v12349_v36 = vld [vmem:[#allocation3 + $0x48] sm:$0xf] }
 0x41d   : > { %v9027_v37 = vpop.f32.mrb[33].mxu0  ;;  %v12345_v28 = vsel %vm11380_vm2, %v4289_v56, %v4290_v53  ;;  %v12351_v55 = vld [vmem:[#allocation3 + $0x4c] sm:$0xf] }
 0x41e   : > { %6024 = vmatmul.mubr.bf16.gmra.mrb[100].mxu1 %v14521_v15  ;;  %v3859_v30 = vrot.slane %v14522_v38, 4  ;;  %v12341_v2 = vrot.slane %v14523_v60, 5  ;;  %v12347_v57 = vadd.f32 %v9027_v37, %v9026_v0  ;;  %v9029_v1 = vpop.f32.mrb[34].mxu0  ;;  %v14525_v60 = vor.u32 %v12100_v34, %v12098_v46  ;;  %v10386_v37 = vld [vmem:[%s14362_s4 + $0xb0] sm:$0xff]  }
 0x41f   : > { %6031 = vmatprep.mubr.bf16.mxu1 %v8494_v7  ;;  %9781 = vmatpush3.bf16.msra.mxu1 %v10380_v43  ;;  %v14526_v15 = vshll.u32 %v12123_v54, 16  ;;  %v9030_v56 = vpop.f32.mrb[35].mxu0  ;;  %v3868_v7 = vrot.slane %v3866_v52, 4  ;;  %v3871_v0 = vrot.slane %v3869_v39, 5  ;;  %v12365_v43 = vld [vmem:[#allocation3 + $0x44] sm:$0x1]  ;;  %v8478_v38 = vcombine.low %v12042_v9, %v12051_v45 }
 0x420   : > { %14524 = vst [vmem:[#allocation26_spill] sm:$0xff] %v12347_v57  ;;  %v3849_v61 = vrot.slane %v14525_v60, 4  ;;  %9782 = vmatprep.subr.bf16.mxu1 %v10383_v14  ;;  %v12363_v25 = vadd.f32 %v9030_v56, %v9029_v1  ;;  %v3882_v46 = vor.u32 %v3881_v4, %v12341_v2  ;;  %v3899_v34 = vshll.u32 %v12351_v55, 16  ;;  %v10389_v4 = vld [vmem:[%s14362_s4 + $0xb8] sm:$0xff]  }
 0x421   : > { %v3863_v53 = vrot.slane %v14526_v15, 5  ;;  %v3903_v54 = vshrl.u32 %v12351_v55, 16  ;;  %v3890_v39 = vshrl.u32 %v12349_v36, 16  ;;  %v3893_v52 = vshll.u32 %v12349_v36, 16 }
 0x422   : > { %14527 = vst [vmem:[#allocation27_spill] sm:$0xff] %v12363_v25  ;;  %v3854_v1 = vsel %vm11348_vm1, %v3849_v61, %v12145_v41  ;;  %v3872_v60 = vor.u32 %v3871_v0, %v3868_v7  ;;  %v3901_v56 = vrot.slane %v3899_v34, 5  ;;  %v12383_v41 = vld [vmem:[#allocation3 + $0x50] sm:$0x1]  ;;  %v3927_v34 = vshrl.u32 %v12085_v58, 16 }
 0x423   : > { %v3864_v11 = vsel %vm11348_vm1, %v3859_v30, %v3863_v53  ;;  %9783 = vmatpush3.bf16.msra.mxu1 %v10383_v14  ;;  %v3885_v30 = vshll.u32 %v12365_v43, 16  ;;  %v3883_v53 = vrot.slane %v3882_v46, 4  ;;  %v3905_v14 = vrot.slane %v3903_v54, 4  ;;  %v10392_v61 = vld [vmem:[%s14362_s4 + $0x1c0] sm:$0xff]  }
 0x424   : > { %9784 = vmatprep.subr.bf16.mxu1 %v10386_v37  ;;  %v8495_v15 = vcombine.low %v3854_v1, %v3864_v11  ;;  %v3892_v42 = vrot.slane %v3890_v39, 4  ;;  %v3895_v9 = vrot.slane %v3893_v52, 5  ;;  %v3873_v45 = vrot.slane %v3872_v60, 4 }
 0x425   : > { %v3887_v25 = vrot.slane %v3885_v30, 5  ;;  %v3906_v11 = vor.u32 %v3905_v14, %v3901_v56  ;;  %v3923_v46 = vshll.u32 %v12085_v58, 16  ;;  %v3909_v52 = vshll.u32 %v12383_v41, 16 }
 0x426   : > { %6032 = vmatmul.mubr.bf16.gmra.mrb[104].mxu1 %v8478_v38  ;;  %v3896_v39 = vor.u32 %v3895_v9, %v3892_v42  ;;  %v3878_v38 = vsel %vm11348_vm1, %v3873_v45, %v12341_v2  ;;  %v3914_v60 = vshrl.u32 %v12083_v12, 16  ;;  %v3917_v30 = vshll.u32 %v12083_v12, 16 }
 0x427   : > { %6039 = vmatprep.mubr.bf16.mxu1 %v8495_v15  ;;  %9785 = vmatpush3.bf16.msra.mxu1 %v10386_v37  ;;  %v3888_v7 = vsel %vm11348_vm1, %v3883_v53, %v3887_v25  ;;  %v8479_v37 = vcombine.low %v12066_v47, %v12074_v35  ;;  %v3907_v35 = vrot.slane %v3906_v11, 4  ;;  %v3925_v42 = vrot.slane %v3923_v46, 5 }
 0x428   : > { %9786 = vmatprep.subr.bf16.mxu1 %v10389_v4  ;;  %v8496_v15 = vcombine.low %v3878_v38, %v3888_v7  ;;  %v3897_v14 = vrot.slane %v3896_v39, 4  ;;  %v3911_v9 = vrot.slane %v3909_v52, 5  ;;  %v3916_v2 = vrot.slane %v3914_v60, 4 }
 0x429   : > { %v3919_v45 = vrot.slane %v3917_v30, 5  ;;  %v3951_v7 = vshrl.u32 %v12096_v23, 16  ;;  %v3938_v46 = vshrl.u32 %v12094_v32, 16  ;;  %v3933_v60 = vshll.u32 %v12103_v27, 16 }
 0x42a   : > { %v9038_v0 = vpop.f32.mrb[4].mxu1  ;;  %v3902_v39 = vsel %vm11348_vm1, %v3897_v14, %v3901_v56  ;;  %v3975_v27 = vshrl.u32 %v12131_v29, 16 }
 0x42b   : > { %v9039_v54 = vpop.f32.mrb[5].mxu1  ;;  %9787 = vmatpush3.bf16.msra.mxu1 %v10389_v4  ;;  %v3929_v4 = vrot.slane %v3927_v34, 4  ;;  %v3941_v34 = vshll.u32 %v12094_v32, 16  ;;  %v3935_v57 = vrot.slane %v3933_v60, 5 }
 0x42c   : > { %v12398_v1 = vadd.f32 %v9039_v54, %v9038_v0  ;;  %v9041_v25 = vpop.f32.mrb[6].mxu1  ;;  %9282 = vmatprep.subr.bf16.mxu1 %v10392_v61  ;;  %v3912_v0 = vsel %vm11348_vm1, %v3907_v35, %v3911_v9  ;;  %v3947_v61 = vshll.u32 %v12096_v23, 16  ;;  %v3953_v35 = vrot.slane %v3951_v7, 4 }
 0x42d   : > { %v9042_v53 = vpop.f32.mrb[7].mxu1  ;;  %v8497_v30 = vcombine.low %v3902_v39, %v3912_v0  ;;  %v3943_v9 = vrot.slane %v3941_v34, 5  ;;  %v3957_v0 = vshll.u32 %v12109_v3, 16  ;;  %v3977_v3 = vrot.slane %v3975_v27, 4 }
 0x42e   : > { %14528 = vst [vmem:[#allocation28_spill] sm:$0xff] %v12398_v1  ;;  %6040 = vmatmul.mubr.bf16.gmra.mrb[108].mxu1 %v8479_v37  ;;  %v12402_v47 = vadd.f32 %v9042_v53, %v9041_v25  ;;  %v3930_v1 = vor.u32 %v3929_v4, %v3925_v42  ;;  %v8480_v37 = vcombine.low %v12274_v18, %v12147_v63  ;;  %v3949_v18 = vrot.slane %v3947_v61, 5 }
 0x42f   : > { %6047 = vmatprep.mubr.bf16.mxu1 %v8496_v15  ;;  %v3920_v25 = vor.u32 %v3919_v45, %v3916_v2  ;;  %v3940_v4 = vrot.slane %v3938_v46, 4  ;;  %v3971_v2 = vshll.u32 %v12131_v29, 16  ;;  %v3981_v27 = vshll.u32 %v12149_v44, 16 }
 0x430   : > { %14529 = vst [vmem:[#allocation29_spill] sm:$0xff] %v12402_v47  ;;  %v3931_v63 = vrot.slane %v3930_v1, 4  ;;  %v3954_v14 = vor.u32 %v3953_v35, %v3949_v18  ;;  %v3962_v1 = vshrl.u32 %v12125_v6, 16  ;;  %v3999_v35 = vshrl.u32 %v12133_v17, 16 }
 0x431   : > { %v3921_v47 = vrot.slane %v3920_v25, 4  ;;  %v3944_v45 = vor.u32 %v3943_v9, %v3940_v4  ;;  %v4019_v44 = vshll.u32 %v12165_v13, 16 }
 0x432   : > { %v9044_v54 = vpop.f32.mrb[8].mxu1  ;;  %v3936_v56 = vsel %vm11348_vm1, %v3931_v63, %v3935_v57  ;;  %v3955_v39 = vrot.slane %v3954_v14, 4  ;;  %v3989_v14 = vshll.u32 %v12127_v22, 16 }
 0x433   : > { %v9045_v11 = vpop.f32.mrb[9].mxu1  ;;  %v3926_v61 = vsel %vm11348_vm1, %v3921_v47, %v3925_v42  ;;  %v3945_v60 = vrot.slane %v3944_v45, 4  ;;  %v3995_v42 = vshll.u32 %v12133_v17, 16 }
 0x434   : > { %v12414_v52 = vadd.f32 %v9045_v11, %v9044_v54  ;;  %v9047_v38 = vpop.f32.mrb[10].mxu1  ;;  %v8481_v54 = vcombine.low %v12349_v36, %v12351_v55  ;;  %v8498_v57 = vcombine.low %v3926_v61, %v3936_v56  ;;  %v3986_v56 = vshrl.u32 %v12127_v22, 16 }
 0x435   : > { %v9048_v15 = vpop.f32.mrb[11].mxu1  ;;  %v3950_v45 = vsel %vm11348_vm1, %v3945_v60, %v3949_v18  ;;  %v4023_v18 = vshrl.u32 %v12165_v13, 16 }
 0x436   : > { %14530 = vst [vmem:[#allocation30_spill] sm:$0xff] %v12414_v52  ;;  %6048 = vmatmul.mubr.bf16.gmra.mrb[112].mxu1 %v8480_v37  ;;  %v12417_v53 = vadd.f32 %v9048_v15, %v9047_v38  ;;  %v3965_v37 = vshll.u32 %v12125_v6, 16  ;;  %v3973_v38 = vrot.slane %v3971_v2, 5  ;;  %v3964_v15 = vrot.slane %v3962_v1, 4 }
 0x437   : > { %6055 = vmatprep.mubr.bf16.mxu1 %v8497_v30  ;;  %v3959_v30 = vrot.slane %v3957_v0, 5  ;;  %v8482_v2 = vcombine.low %v12083_v12, %v12085_v58  ;;  %v3997_v1 = vrot.slane %v3995_v42, 5  ;;  %v4013_v12 = vshll.u32 %v12163_v16, 16 }
 0x438   : > { %14531 = vst [vmem:[#allocation31_spill] sm:$0xff] %v12417_v53  ;;  %v3967_v47 = vrot.slane %v3965_v37, 5  ;;  %v3978_v9 = vor.u32 %v3977_v3, %v3973_v38  ;;  %v3988_v37 = vrot.slane %v3986_v56, 4  ;;  %v4010_v3 = vshrl.u32 %v12163_v16, 16 }
 0x439   : > { %v3960_v4 = vsel %vm11348_vm1, %v3955_v39, %v3959_v30 }
 0x43a   : > { %v3968_v0 = vor.u32 %v3967_v47, %v3964_v15  ;;  %v8499_v61 = vcombine.low %v3950_v45, %v3960_v4  ;;  %v4005_v15 = vshll.u32 %v12155_v20, 16 }
 0x43c   : > { %v9050_v7 = vpop.f32.mrb[12].mxu1 }
 0x43d   : > { %v9051_v11 = vpop.f32.mrb[13].mxu1 }
 0x43e   : > { %6056 = vmatmul.mubr.bf16.gmra.mrb[116].mxu1 %v8481_v54  ;;  %v12430_v46 = vadd.f32 %v9051_v11, %v9050_v7  ;;  %v9053_v34 = vpop.f32.mrb[14].mxu1  ;;  %v4001_v54 = vrot.slane %v3999_v35, 4  ;;  %v3979_v7 = vrot.slane %v3978_v9, 4  ;;  %v3983_v11 = vrot.slane %v3981_v27, 5 }
 0x43f   : > { %6063 = vmatprep.mubr.bf16.mxu1 %v8498_v57  ;;  %v9054_v25 = vpop.f32.mrb[15].mxu1  ;;  %v3991_v57 = vrot.slane %v3989_v14, 5  ;;  %v8483_v35 = vcombine.low %v12094_v32, %v12096_v23  ;;  %v4012_v14 = vrot.slane %v4010_v3, 4 }
 0x440   : > { %14532 = vst [vmem:[#allocation32_spill] sm:$0xff] %v12430_v46  ;;  %v12432_v63 = vadd.f32 %v9054_v25, %v9053_v34  ;;  %v3969_v34 = vrot.slane %v3968_v0, 4  ;;  %v4002_v39 = vor.u32 %v4001_v54, %v3997_v1  ;;  %v3984_v60 = vsel %vm11348_vm1, %v3979_v7, %v3983_v11  ;;  %v12674_v46 = vld [vmem:[#allocation3 + $0x98] sm:$0x1] }
 0x441   : > { %v3992_v30 = vor.u32 %v3991_v57, %v3988_v37  ;;  %v12460_v0 = vrot.slane %v4019_v44, 5  ;;  %v4025_v54 = vrot.slane %v4023_v18, 4  ;;  %v4029_v7 = vshll.u32 %v12182_v51, 16  ;;  %14561 = vst [vmem:[#allocation55_spill] sm:$0xff] %v12674_v46 }
 0x442   : > { %14533 = vst [vmem:[#allocation33_spill] sm:$0xff] %v12432_v63  ;;  %v3974_v9 = vsel %vm11348_vm1, %v3969_v34, %v3973_v38  ;;  %v4003_v56 = vrot.slane %v4002_v39, 4  ;;  %v4034_v38 = vshrl.u32 %v12167_v10, 16  ;;  %v4037_v37 = vshll.u32 %v12167_v10, 16 }
 0x443   : > { %v8500_v45 = vcombine.low %v3974_v9, %v3984_v60  ;;  %v3993_v20 = vrot.slane %v3992_v30, 4  ;;  %v8484_v11 = vcombine.low %v12125_v6, %v12131_v29  ;;  %v8485_v34 = vcombine.low %v12127_v22, %v12133_v17 }
 0x444   : > { %v4026_v39 = vor.u32 %v4025_v54, %v12460_v0  ;;  %v4067_v6 = vshll.u32 %v12207_v48, 16  ;;  %v4071_v29 = vshrl.u32 %v12207_v48, 16  ;;  %v4091_v9 = vshll.u32 %v12225_v49, 16 }
 0x445   : > { %v3998_v51 = vsel %vm11348_vm1, %v3993_v20, %v3997_v1  ;;  %v4061_v54 = vshll.u32 %v12205_v31, 16 }
 0x446   : > { %6064 = vmatmul.mubr.bf16.gmra.mrb[120].mxu1 %v8482_v2  ;;  %v4015_v2 = vrot.slane %v4013_v12, 5  ;;  %v4031_v12 = vrot.slane %v4029_v7, 5  ;;  %v12489_v20 = vrot.slane %v4067_v6, 5  ;;  %v4085_v7 = vshll.u32 %v12214_v62, 16 }
 0x447   : > { %6071 = vmatprep.mubr.bf16.mxu1 %v8499_v61  ;;  %v4007_v61 = vrot.slane %v4005_v15, 5  ;;  %v4036_v15 = vrot.slane %v4034_v38, 4  ;;  %v4115_v38 = vshll.u32 %v12266_v50, 16  ;;  %v4063_v6 = vrot.slane %v4061_v54, 5 }
 0x448   : > { %v9056_v58 = vpop.f32.mrb[16].mxu1  ;;  %v4016_v23 = vor.u32 %v4015_v2, %v4012_v14  ;;  %v4077_v54 = vshll.u32 %v12212_v59, 16  ;;  %v4125_v59 = vshll.u32 %v12289_v5, 16 }
 0x449   : > { %v9057_v25 = vpop.f32.mrb[17].mxu1  ;;  %v4008_v32 = vsel %vm11348_vm1, %v4003_v56, %v4007_v61  ;;  %v4095_v56 = vshrl.u32 %v12225_v49, 16  ;;  %v4073_v61 = vrot.slane %v4071_v29, 4 }
 0x44a   : > { %v12452_v47 = vadd.f32 %v9057_v25, %v9056_v58  ;;  %v9059_v42 = vpop.f32.mrb[18].mxu1  ;;  %v14536_v58 = vld [vmem:[#allocation11_spill] sm:$0xff]  ;;  %v8501_v30 = vcombine.low %v3998_v51, %v4008_v32  ;;  %v4017_v17 = vrot.slane %v4016_v23, 4  ;;  %v4106_v32 = vshrl.u32 %v12264_v40, 16 }
 0x44b   : > { %v9060_v4 = vpop.f32.mrb[19].mxu1  ;;  %v4043_v44 = vshll.u32 %v14536_v58, 16  ;;  %v4047_v18 = vshrl.u32 %v14536_v58, 16  ;;  %v4109_v23 = vshll.u32 %v12264_v40, 16  ;;  %v4097_v51 = vrot.slane %v4095_v56, 4 }
 0x44c   : > { %14534 = vst [vmem:[#allocation34_spill] sm:$0xff] %v12452_v47  ;;  %v12458_v27 = vadd.f32 %v9060_v4, %v9059_v42  ;;  %v4039_v42 = vrot.slane %v4037_v37, 5  ;;  %v4027_v4 = vrot.slane %v4026_v39, 4  ;;  %v4119_v37 = vshrl.u32 %v12266_v50, 16 }
 0x44d   : > { %v12485_v14 = vrot.slane %v4043_v44, 5  ;;  %v4049_v2 = vrot.slane %v4047_v18, 4 }
 0x44e   : > { %14535 = vst [vmem:[#allocation35_spill] sm:$0xff] %v12458_v27  ;;  %6072 = vmatmul.mubr.bf16.gmra.mrb[124].mxu1 %v8483_v35  ;;  %v4053_v35 = vshll.u32 %v12191_v19, 16  ;;  %v4082_v19 = vshrl.u32 %v12214_v62, 16  ;;  %v4040_v39 = vor.u32 %v4039_v42, %v4036_v15  ;;  %v4032_v18 = vsel %vm11348_vm1, %v4027_v4, %v4031_v12 }
 0x44f   : > { %6079 = vmatprep.mubr.bf16.mxu1 %v8500_v45  ;;  %v4058_v45 = vshrl.u32 %v12205_v31, 16  ;;  %v4087_v27 = vrot.slane %v4085_v7, 5  ;;  %v4111_v15 = vrot.slane %v4109_v23, 5  ;;  %v12508_v42 = vrot.slane %v4115_v38, 5 }
 0x450   : > { %v9062_v57 = vpop.f32.mrb[20].mxu1  ;;  %v4101_v7 = vshll.u32 %v12253_v24, 16  ;;  %v8486_v24 = vcombine.low %v12163_v16, %v12165_v13  ;;  %v14543_v13 = vld [vmem:[#allocation9_spill] sm:$0xff] }
 0x451   : > { %v9063_v3 = vpop.f32.mrb[21].mxu1 }
 0x452   : > { %v12476_v25 = vadd.f32 %v9063_v3, %v9062_v57  ;;  %v9065_v60 = vpop.f32.mrb[22].mxu1  ;;  %v12500_v3 = vrot.slane %v4091_v9, 5  ;;  %v4121_v9 = vrot.slane %v4119_v37, 4 }
 0x453   : > { %v9066_v22 = vpop.f32.mrb[23].mxu1 }
 0x454   : > { %14537 = vst [vmem:[#allocation11_spill] sm:$0xff] %v12476_v25  ;;  %v12481_v1 = vadd.f32 %v9066_v22, %v9065_v60  ;;  %v4050_v60 = vor.u32 %v4049_v2, %v12485_v14  ;;  %v4084_v25 = vrot.slane %v4082_v19, 4  ;;  %v4098_v4 = vor.u32 %v4097_v51, %v12500_v3 }
 0x455   : > { %v4122_v37 = vor.u32 %v4121_v9, %v12508_v42  ;;  %v12539_v9 = vld [vmem:[#allocation3 + $0x48] sm:$0xf] }
 0x456   : > { %14538 = vst [vmem:[#allocation36_spill] sm:$0xff] %v12481_v1  ;;  %6080 = vmatmul.mubr.bf16.gmra.mrb[128].mxu1 %v8484_v11  ;;  %v4022_v11 = vsel %vm11348_vm1, %v4017_v17, %v12460_v0  ;;  %v4074_v1 = vor.u32 %v4073_v61, %v12489_v20  ;;  %v4108_v17 = vrot.slane %v4106_v32, 4  ;;  %v4051_v2 = vrot.slane %v4050_v60, 4 }
 0x457   : > { %6087 = vmatprep.mubr.bf16.mxu1 %v8501_v30  ;;  %v4060_v30 = vrot.slane %v4058_v45, 4  ;;  %v8502_v12 = vcombine.low %v4022_v11, %v4032_v18  ;;  %v4055_v61 = vrot.slane %v4053_v35, 5  ;;  %v4088_v19 = vor.u32 %v4087_v27, %v4084_v25 }
 0x458   : > { %v9068_v57 = vpop.f32.mrb[24].mxu1  ;;  %v4041_v32 = vrot.slane %v4040_v39, 4  ;;  %v4075_v23 = vrot.slane %v4074_v1, 4  ;;  %v4112_v38 = vor.u32 %v4111_v15, %v4108_v17  ;;  %v4079_v18 = vrot.slane %v4077_v54, 5  ;;  %v12537_v15 = vld [vmem:[#allocation3 + $0x3c] sm:$0xf] }
 0x459   : > { %v9069_v44 = vpop.f32.mrb[25].mxu1  ;;  %v4064_v45 = vor.u32 %v4063_v6, %v4060_v30  ;;  %v4089_v25 = vrot.slane %v4088_v19, 4  ;;  %v4103_v35 = vrot.slane %v4101_v7, 5  ;;  %v14398_v17 = vrot.slane %v14543_v13, 5  ;;  %v12563_v7 = vld [vmem:[#allocation3 + $0x54] sm:$0xf] }
 0x45a   : > { %v12505_v29 = vadd.f32 %v9069_v44, %v9068_v57  ;;  %v9071_v22 = vpop.f32.mrb[26].mxu1  ;;  %v4099_v44 = vrot.slane %v4098_v4, 4  ;;  %v4046_v39 = vsel %vm11348_vm1, %v4041_v32, %v12485_v14  ;;  %v4080_v30 = vsel %vm11348_vm1, %v4075_v23, %v4079_v18  ;;  %v12606_v23 = vld [vmem:[#allocation3 + $0x6c] sm:$0xf] }
 0x45b   : > { %v9072_v0 = vpop.f32.mrb[27].mxu1  ;;  %v4065_v51 = vrot.slane %v4064_v45, 4  ;;  %v12528_v6 = vrot.slane %v4112_v38, 4  ;;  %v8487_v14 = vcombine.low %v12167_v10, %v14536_v58  ;;  %v12546_v4 = vrot.slane %v4125_v59, 5  ;;  %v12550_v45 = vld [vmem:[#allocation3 + $0x4c] sm:$0xf] }
 0x45c   : > { %14539 = vst [vmem:[#allocation37_spill] sm:$0xff] %v12505_v29  ;;  %v12510_v56 = vadd.f32 %v9072_v0, %v9071_v22  ;;  %v12530_v22 = vrot.slane %v4122_v37, 4  ;;  %v4104_v16 = vsel %vm11348_vm1, %v4099_v44, %v4103_v35  ;;  %v4094_v19 = vsel %vm11348_vm1, %v4089_v25, %v12500_v3  ;;  %v12559_v58 = vld [vmem:[#allocation3 + $0x44] sm:$0x1]  ;;  %v12575_v38 = vld [vmem:[#allocation3] sm:$0xf] }
 0x45d   : > { %v12565_v32 = vcombine.low %v4094_v19, %v4104_v16  ;;  %v12580_v44 = vld [vmem:[#allocation3 + $0x5c] sm:$0x1]  ;;  %v12588_v18 = vrot.slane %v14398_v17, 4  ;;  %v14544_v59 = vld [vmem:[#allocation10_spill] sm:$0xff]  ;;  %v8688_v17 = vrot.slane %v12563_v7, 9 }
 0x45e   : > { %14540 = vst [vmem:[#allocation38_spill] sm:$0xff] %v12510_v56  ;;  %6088 = vmatmul.mubr.bf16.gmra.mrb[132].mxu1 %v8485_v34  ;;  %v4056_v34 = vsel %vm11348_vm1, %v4051_v2, %v4055_v61  ;;  %v12548_v2 = vld [vmem:[#allocation3 + $0x40] sm:$0xf]  ;;  %v12599_v19 = vld [vmem:[#allocation3 + $0x68] sm:$0x1] }
 0x45f   : > { %6095 = vmatprep.mubr.bf16.mxu1 %v8502_v12  ;;  %v8503_v0 = vcombine.low %v4046_v39, %v4056_v34  ;;  %v4070_v12 = vsel %vm11348_vm1, %v4065_v51, %v12489_v20  ;;  %v12561_v20 = vld [vmem:[#allocation3 + $0x50] sm:$0x1]  ;;  %v12584_v34 = vld [vmem:[#allocation3 + $0x64] sm:$0xf]  ;;  %v6801_v25 = vrot.slane %v12548_v2, 5  ;;  %v8687_v39 = vrot.slane %v12539_v9, 9 }
 0x460   : > { %v9074_v57 = vpop.f32.mrb[28].mxu1  ;;  %v8504_v54 = vcombine.low %v4070_v12, %v4080_v30  ;;  %v6808_v30 = vrot.slane %v12550_v45, 5  ;;  %v12608_v3 = vld [vmem:[#allocation3 + $0x78] sm:$0xf]  ;;  %v12630_v29 = vld [vmem:[#allocation3 + $0x80] sm:$0x1] }
 0x461   : > { %v9075_v11 = vpop.f32.mrb[29].mxu1  ;;  %v6803_v37 = vrot.slane %v6801_v25, 4  ;;  %14547 = vst [vmem:[#allocation41_spill] sm:$0xff] %v12608_v3  ;;  %14553 = vst [vmem:[#allocation47_spill] sm:$0xff] %v12630_v29  ;;  %v8691_v63 = vrot.slane %v12608_v3, 9 }
 0x462   : > { %v12519_v60 = vadd.f32 %v9075_v11, %v9074_v57  ;;  %v9077_v27 = vpop.f32.mrb[30].mxu1  ;;  %v12578_v57 = vld [vmem:[#allocation3 + $0x58] sm:$0xf]  ;;  %v12582_v11 = vld [vmem:[#allocation3 + $0x60] sm:$0xf]  ;;  %v12612_v61 = vsel %vm11380_vm2, %v8687_v39, %v6808_v30  ;;  %v6822_v39 = vrot.slane %v12584_v34, 5 }
 0x463   : > { %v9078_v1 = vpop.f32.mrb[31].mxu1  ;;  %14548 = vst [vmem:[#allocation42_spill] sm:$0xff] %v12612_v61  ;;  %v8689_v56 = vrot.slane %v12582_v11, 9 }
 0x464   : > { %14541 = vst [vmem:[#allocation39_spill] sm:$0xff] %v12519_v60  ;;  %v12532_v5 = vadd.f32 %v9078_v1, %v9077_v27  ;;  %v6804_v1 = vrot.slane %v12559_v58, 5 }
 0x466   : > { %14542 = vst [vmem:[#allocation40_spill] sm:$0xff] %v12532_v5  ;;  %6096 = vmatmul.mubr.bf16.gmra.mrb[136].mxu1 %v8486_v24  ;;  %v8686_v24 = vrot.slane %v12537_v15, 9  ;;  %v12624_v60 = vsel %vm11380_vm2, %v6803_v37, %v6804_v1 }
 0x467   : > { %6103 = vmatprep.mubr.bf16.mxu1 %v8503_v0  ;;  %v6811_v0 = vrot.slane %v12561_v20, 5  ;;  %14551 = vst [vmem:[#allocation45_spill] sm:$0xff] %v12624_v60  ;;  %v6824_v60 = vrot.slane %v6822_v39, 4 }
 0x468   : > { %v9080_v51 = vpop.f32.mrb[32].mxu1  ;;  %v12603_v27 = vsel %vm11380_vm2, %v8686_v24, %v6801_v25  ;;  %v12618_v24 = vld [vmem:[#allocation3 + $0x70] sm:$0xf]  ;;  %v12620_v25 = vld [vmem:[#allocation3 + $0x74] sm:$0x1] }
 0x469   : > { %v9081_v35 = vpop.f32.mrb[33].mxu1  ;;  %14546 = vst [vmem:[#allocation10_spill] sm:$0xff] %v12603_v27  ;;  %14550 = vst [vmem:[#allocation44_spill] sm:$0xff] %v12620_v25  ;;  %v6829_v27 = vrot.slane %v12618_v24, 5  ;;  %v6832_v47 = vrot.slane %v12620_v25, 5 }
 0x46a   : > { %v12597_v16 = vadd.f32 %v9081_v35, %v9080_v51  ;;  %v9083_v12 = vpop.f32.mrb[34].mxu1  ;;  %v6810_v51 = vrot.slane %v6808_v30, 4  ;;  %v6815_v35 = vrot.slane %v12578_v57, 5  ;;  %v12628_v30 = vld [vmem:[#allocation3 + $0x7c] sm:$0xf] }
 0x46b   : > { %v9084_v10 = vpop.f32.mrb[35].mxu1  ;;  %14552 = vst [vmem:[#allocation46_spill] sm:$0xff] %v12628_v30  ;;  %v6831_v25 = vrot.slane %v6829_v27, 4 }
 0x46c   : > { %14545 = vst [vmem:[#allocation9_spill] sm:$0xff] %v12597_v16  ;;  %v6818_v16 = vrot.slane %v12580_v44, 5  ;;  %v12616_v5 = vadd.f32 %v9084_v10, %v9083_v12  ;;  %v12636_v12 = vsel %vm11380_vm2, %v6810_v51, %v6811_v0  ;;  %v12640_v37 = vsel %vm11380_vm2, %v8688_v17, %v6815_v35  ;;  %v12653_v51 = vld [vmem:[#allocation3 + $0x88] sm:$0xf]  ;;  %v12655_v17 = vld [vmem:[#allocation3 + $0x94] sm:$0xf] }
 0x46d   : > { %14554 = vst [vmem:[#allocation48_spill] sm:$0xff] %v12636_v12  ;;  %14555 = vst [vmem:[#allocation49_spill] sm:$0xff] %v12640_v37  ;;  %v6817_v1 = vrot.slane %v6815_v35, 4  ;;  %v12650_v10 = vsel %vm11380_vm2, %v8689_v56, %v6822_v39  ;;  %v6825_v0 = vrot.slane %v12599_v19, 5  ;;  %v8690_v35 = vrot.slane %v12606_v23, 9 }
 0x46e   : > { %14549 = vst [vmem:[#allocation43_spill] sm:$0xff] %v12616_v5  ;;  %6104 = vmatmul.mubr.bf16.gmra.mrb[140].mxu1 %v8487_v14  ;;  %v12642_v5 = vld [vmem:[#allocation3 + $0x84] sm:$0xf]  ;;  %v12644_v14 = vld [vmem:[#allocation3 + $0x90] sm:$0xf]  ;;  %14558 = vst [vmem:[#allocation52_spill] sm:$0xff] %v12650_v10 }
 0x46f   : > { %6111 = vmatprep.mubr.bf16.mxu1 %v8504_v54  ;;  %14556 = vst [vmem:[#allocation50_spill] sm:$0xff] %v12642_v5  ;;  %14557 = vst [vmem:[#allocation51_spill] sm:$0xff] %v12644_v14  ;;  %v12659_v54 = vsel %vm11380_vm2, %v6817_v1, %v6818_v16  ;;  %v12664_v56 = vld [vmem:[#allocation3 + $0x8c] sm:$0x1]  ;;  %v12670_v61 = vsel %vm11380_vm2, %v6824_v60, %v6825_v0  ;;  %v6836_v16 = vrot.slane %v12628_v30, 5  ;;  %v6839_v39 = vrot.slane %v12630_v29, 5 }
 0x470   : > { %14559 = vst [vmem:[#allocation53_spill] sm:$0xff] %v12659_v54  ;;  %v9086_v12 = vpop.f32.mrb[36].mxu1  ;;  %14560 = vst [vmem:[#allocation54_spill] sm:$0xff] %v12670_v61  ;;  %v12680_v52 = vsel %vm11380_vm2, %v8690_v35, %v6829_v27  ;;  %v12685_v0 = vld [vmem:[#allocation3 + $0x9c] sm:$0xf]  ;;  %v8692_v53 = vrot.slane %v12642_v5, 9  ;;  %v12696_v27 = vsel %vm11380_vm2, %v6831_v25, %v6832_v47  ;;  %v14571_v25 = vcombine.low %v12205_v31, %v12207_v48 }
 0x471   : > { %v9087_v1 = vpop.f32.mrb[37].mxu1  ;;  %14562 = vst [vmem:[#allocation56_spill] sm:$0xff] %v12680_v52  ;;  %14564 = vst [vmem:[#allocation58_spill] sm:$0xff] %v12685_v0  ;;  %v6334_v37 = vld [vmem:[#allocation3 + $0xa8] sm:$0xf]  ;;  %v12689_v30 = vsel %vm11380_vm2, %v8691_v63, %v6836_v16  ;;  %v6838_v3 = vrot.slane %v6836_v16, 4 }
 0x472   : > { %v12683_v54 = vadd.f32 %v9087_v1, %v9086_v12  ;;  %v9089_v60 = vpop.f32.mrb[38].mxu1  ;;  %14565 = vst [vmem:[#allocation59_spill] sm:$0xff] %v12689_v30  ;;  %v12692_v10 = vld [vmem:[#allocation3 + $0xa0] sm:$0xf]  ;;  %14566 = vst [vmem:[#allocation60_spill] sm:$0xff] %v12696_v27  ;;  %v6843_v12 = vrot.slane %v12653_v51, 5 }
 0x473   : > { %v9090_v61 = vpop.f32.mrb[39].mxu1  ;;  %v6846_v35 = vrot.slane %v12664_v56, 5  ;;  %v8693_v1 = vrot.slane %v12644_v14, 9  ;;  %v12703_v63 = vld [vmem:[#allocation3 + $0xa4] sm:$0x1]  ;;  %v12711_v29 = vsel %vm11380_vm2, %v6838_v3, %v6839_v39  ;;  %v6850_v47 = vrot.slane %v12655_v17, 5 }
 0x474   : > { %14563 = vst [vmem:[#allocation57_spill] sm:$0xff] %v12683_v54  ;;  %v12701_v54 = vadd.f32 %v9090_v61, %v9089_v60  ;;  %14568 = vst [vmem:[#allocation62_spill] sm:$0xff] %v12703_v63  ;;  %v12705_v16 = vld [vmem:[#allocation3 + $0xac] sm:$0xf]  ;;  %v6336_v14 = vld [vmem:[#allocation3 + $0xb0] sm:$0x1]  ;;  %v12721_v60 = vsel %vm11380_vm2, %v8692_v53, %v6843_v12 }
 0x475   : > { %14569 = vst [vmem:[#allocation63_spill] sm:$0xff] %v12705_v16  ;;  %14570 = vst [vmem:[#allocation64_spill] sm:$0xff] %v12711_v29  ;;  %v6853_v5 = vrot.slane %v12674_v46, 5  ;;  %v6337_v3 = vld [vmem:[#allocation3 + $0xb4] sm:$0xf]  ;;  %v12727_v39 = vsel %vm11380_vm2, %v8693_v1, %v6850_v47  ;;  %v6852_v31 = vrot.slane %v6850_v47, 4 }
 0x476   : > { %14567 = vst [vmem:[#allocation61_spill] sm:$0xff] %v12701_v54  ;;  %6112 = vmatmul.mubr.bf16.gmra.mrb[144].mxu1 %v14571_v25  ;;  %14572 = vst [vmem:[#allocation65_spill] sm:$0xff] %v12721_v60  ;;  %v6845_v54 = vrot.slane %v6843_v12, 4  ;;  %v8694_v48 = vrot.slane %v12685_v0, 9  ;;  %v6857_v25 = vrot.slane %v12692_v10, 5  ;;  %v6860_v12 = vrot.slane %v12703_v63, 5 }
 0x477   : > { %6119 = vmatprep.mubr.bf16.mxu1 %v12565_v32  ;;  %14573 = vst [vmem:[#allocation66_spill] sm:$0xff] %v12727_v39  ;;  %v12731_v61 = vld [vmem:[#allocation3 + $0xb8] sm:$0xf]  ;;  %v8695_v29 = vrot.slane %v6334_v37, 9  ;;  %v6864_v32 = vrot.slane %v12705_v16, 5  ;;  %v12743_v47 = vsel %vm11380_vm2, %v6852_v31, %v6853_v5  ;;  %v6867_v1 = vrot.slane %v6336_v14, 5 }
 0x478   : > { %v12735_v53 = vsel %vm11380_vm2, %v6845_v54, %v6846_v35  ;;  %v9092_v30 = vpop.f32.mrb[40].mxu1  ;;  %v6339_v27 = vld [vmem:[#allocation3 + $0xbc] sm:$0x1]  ;;  %14575 = vst [vmem:[#allocation68_spill] sm:$0xff] %v12743_v47  ;;  %v12747_v52 = vsel %vm11380_vm2, %v8694_v48, %v6857_v25  ;;  %v6859_v54 = vrot.slane %v6857_v25, 4  ;;  %v8696_v25 = vrot.slane %v6337_v3, 9 }
 0x479   : > { %14574 = vst [vmem:[#allocation67_spill] sm:$0xff] %v12735_v53  ;;  %14576 = vst [vmem:[#allocation69_spill] sm:$0xff] %v12747_v52  ;;  %v9093_v35 = vpop.f32.mrb[41].mxu1  ;;  %v6340_v0 = vld [vmem:[#allocation3 + $0xc0] sm:$0xf]  ;;  %v12753_v63 = vsel %vm11380_vm2, %v8695_v29, %v6864_v32  ;;  %v6866_v16 = vrot.slane %v6864_v32, 4  ;;  %v14579_v29 = vsel %vm11348_vm1, %v12530_v22, %v12546_v4 }
 0x47a   : > { %14577 = vst [vmem:[#allocation70_spill] sm:$0xff] %v12753_v63  ;;  %v12755_v53 = vadd.f32 %v9093_v35, %v9092_v30  ;;  %v9095_v5 = vpop.f32.mrb[42].mxu1  ;;  %v6341_v31 = vld [vmem:[#allocation3 + $0xc4] sm:$0xf]  ;;  %v12759_v48 = vsel %vm11380_vm2, %v6859_v54, %v6860_v12  ;;  %v6871_v60 = vrot.slane %v12731_v61, 5  ;;  %v14580_v30 = vsel %vm11348_vm1, %v12528_v6, %v12508_v42 }
 0x47b   : > { %14578 = vst [vmem:[#allocation71_spill] sm:$0xff] %v12759_v48  ;;  %v9096_v46 = vpop.f32.mrb[43].mxu1  ;;  %v8506_v14 = vcombine.low %v14580_v30, %v14579_v29  ;;  %v12776_v3 = vsel %vm11380_vm2, %v6866_v16, %v6867_v1  ;;  %v6874_v12 = vrot.slane %v6339_v27, 5  ;;  %v6342_v35 = vld [vmem:[#allocation3 + $0xc8] sm:$0x1]  ;;  %v14583_v6 = vcombine.low %v12214_v62, %v12225_v49 }
 0x47c   : > { %14581 = vst [vmem:[#allocation72_spill] sm:$0xff] %v12776_v3  ;;  %v12778_v54 = vadd.f32 %v9096_v46, %v9095_v5  ;;  %v12784_v4 = vsel %vm11380_vm2, %v8696_v25, %v6871_v60  ;;  %v6873_v42 = vrot.slane %v6871_v60, 4  ;;  %v8697_v29 = vrot.slane %v6340_v0, 9  ;;  %v12956_v48 = vld [vmem:[#allocation3 + $0x34] sm:$0xf] }
 0x47d   : > { %14582 = vst [vmem:[#allocation73_spill] sm:$0xff] %v12784_v4  ;;  %v6878_v30 = vrot.slane %v6341_v31, 5  ;;  %v14584_v27 = vrot.slane %v14543_v13, 5  ;;  %v14585_v46 = vrot.slane %v12575_v38, 9  ;;  %v14586_v1 = vrot.slane %v14544_v59, 5 }
 0x47e   : > { %6120 = vmatmul.mubr.bf16.gmra.mrb[148].mxu1 %v14583_v6  ;;  %v12802_v49 = vsel %vm11380_vm2, %v6873_v42, %v6874_v12  ;;  %v6881_v0 = vrot.slane %v6342_v35, 5  ;;  %v10446_v31 = vld [vmem:[#allocation3 + $0x10] sm:$0xf]  ;;  %v8490_v35 = vcombine.low %v12264_v40, %v12266_v50  ;;  %v10452_v40 = vld [vmem:[#allocation3 + $0x18] sm:$0xf] }
 0x47f   : > { %6127 = vmatprep.mubr.bf16.mxu1 %v8506_v14  ;;  %v4183_v16 = vsel %vm11380_vm2, %v14585_v46, %v14584_v27  ;;  %v4186_v60 = vsel %vm11380_vm2, %v12588_v18, %v14586_v1  ;;  %14587 = vst [vmem:[#allocation74_spill] sm:$0xff] %v12802_v49  ;;  %v12808_v13 = vsel %vm11380_vm2, %v8697_v29, %v6878_v30  ;;  %v6880_v38 = vrot.slane %v6878_v30, 4  ;;  %v10447_v14 = vld [vmem:[#allocation3 + $0x1c] sm:$0xf]  ;;  %v10451_v29 = vld [vmem:[#allocation3 + $0x28] sm:$0xf] }
 0x480   : > { %14588 = vst [vmem:[#allocation75_spill] sm:$0xff] %v12808_v13  ;;  %v9098_v5 = vpop.f32.mrb[44].mxu1  ;;  %v4189_v59 = vrot.slane %v10446_v31, 5  ;;  %v4196_v6 = vrot.slane %v10447_v14, 5  ;;  %v8507_v27 = vcombine.low %v4183_v16, %v4186_v60  ;;  %v10448_v14 = vld [vmem:[#allocation3 + $0x14] sm:$0x1] }
 0x481   : > { %v9099_v25 = vpop.f32.mrb[45].mxu1  ;;  %v12812_v18 = vsel %vm11380_vm2, %v6880_v38, %v6881_v0  ;;  %v4192_v62 = vrot.slane %v10448_v14, 5  ;;  %v10449_v38 = vld [vmem:[#allocation3 + $0x20] sm:$0x1]  ;;  %v4203_v22 = vrot.slane %v10451_v29, 5  ;;  %v8461_v50 = vrot.slane %v10452_v40, 9 }
 0x482   : > { %14589 = vst [vmem:[#allocation76_spill] sm:$0xff] %v12812_v18  ;;  %v12814_v12 = vadd.f32 %v9099_v25, %v9098_v5  ;;  %v9101_v42 = vpop.f32.mrb[46].mxu1  ;;  %v4191_v1 = vrot.slane %v4189_v59, 4  ;;  %v4198_v31 = vrot.slane %v4196_v6, 4  ;;  %v4199_v0 = vrot.slane %v10449_v38, 5  ;;  %v14612_v49 = vld [vmem:[#allocation23_spill] sm:$0xff] }
 0x483   : > { %v9102_v46 = vpop.f32.mrb[47].mxu1  ;;  %v10450_v25 = vld [vmem:[#allocation3 + $0xc] sm:$0xf]  ;;  %v12974_v39 = vld [vmem:[#allocation3 + $0x38] sm:$0x1] }
 0x484   : > { %v12820_v30 = vadd.f32 %v9102_v46, %v9101_v42  ;;  %v8460_v16 = vrot.slane %v10450_v25, 9  ;;  %v4193_v60 = vsel %vm11380_vm2, %v4191_v1, %v4192_v62  ;;  %v4200_v42 = vsel %vm11380_vm2, %v4198_v31, %v4199_v0  ;;  %v10453_v46 = vld [vmem:[#allocation3 + $0x34] sm:$0xf]  ;;  %v10394_v31 = vld [vmem:[%s14362_s4 + $0x1c8] sm:$0xff]  }
 0x485   : > { %v10393_v62 = vld [vmem:[%s14362_s4 + $0x180] sm:$0xff]   ;;  %v4197_v25 = vsel %vm11380_vm2, %v8461_v50, %v4196_v6  ;;  %v10455_v6 = vld [vmem:[#allocation3 + $0x38] sm:$0x1] }
 0x486   : > { %6128 = vmatmul.mubr.bf16.gmra.mrb[152].mxu1 %v8490_v35  ;;  %v4210_v35 = vrot.slane %v10453_v46, 5  ;;  %v4190_v38 = vsel %vm11380_vm2, %v8460_v16, %v4189_v59  ;;  %v10454_v59 = vld [vmem:[#allocation3 + $0x2c] sm:$0x1]  ;;  %v4213_v50 = vrot.slane %v10455_v6, 5  ;;  %v10396_v46 = vld [vmem:[%s14362_s4 + $0x1d0] sm:$0xff]   ;;  %v4224_v6 = vrot.slane %v12351_v55, 5 }
 0x487   : > { %9788 = vmatprep.mubr.bf16.mxu1 %v8507_v27  ;;  %v8508_v29 = vcombine.low %v4190_v38, %v4193_v60  ;;  %v4206_v16 = vrot.slane %v10454_v59, 5  ;;  %v10395_v60 = vld [vmem:[%s14362_s4 + $0x188] sm:$0xff]   ;;  %v10398_v55 = vld [vmem:[%s14362_s4 + $0x1d8] sm:$0xff]  }
 0x488   : > { %v9104_v5 = vpop.f32.mrb[48].mxu1  ;;  %v4212_v40 = vrot.slane %v4210_v35, 4 }
 0x489   : > { %v9105_v32 = vpop.f32.mrb[49].mxu1 }
 0x48a   : > { %v12826_v14 = vadd.f32 %v9105_v32, %v9104_v5  ;;  %v9107_v27 = vpop.f32.mrb[50].mxu1  ;;  %v8509_v32 = vcombine.low %v4197_v25, %v4200_v42  ;;  %v4205_v5 = vrot.slane %v4203_v22, 4  ;;  %v10456_v42 = vld [vmem:[#allocation3 + $0x24] sm:$0xf] }
 0x48b   : > { %v9108_v1 = vpop.f32.mrb[51].mxu1  ;;  %v8462_v38 = vrot.slane %v10456_v42, 9 }
 0x48c   : > { %v12838_v0 = vadd.f32 %v9108_v1, %v9107_v27  ;;  %v10457_v1 = vld [vmem:[#allocation3 + $0x40] sm:$0xf] }
 0x48d   : > { %v4204_v13 = vsel %vm11380_vm2, %v8462_v38, %v4203_v22  ;;  %v4226_v22 = vrot.slane %v4224_v6, 4  ;;  %v10459_v38 = vld [vmem:[#allocation3 + $0x3c] sm:$0xf] }
 0x48e   : > { %9789 = vmatmul.mubr.bf16.vlgmr.msra.gmra.mrb[60].mxu1 %v8508_v29  ;;  %v4217_v29 = vrot.slane %v10457_v1, 5 }
 0x48f   : > { %9283 = vmatpush3.bf16.msra.mxu1 %v10393_v62  ;;  %9792 = vmatprep.mubr.bf16.mxu1 %v8509_v32  ;;  %v4207_v62 = vsel %vm11380_vm2, %v4205_v5, %v4206_v16  ;;  %v10458_v32 = vld [vmem:[#allocation3 + $0x30] sm:$0xf]  ;;  %v10397_v5 = vld [vmem:[%s14362_s4 + $0x190] sm:$0xff]  }
 0x490   : > { %9284 = vmatprep.subr.bf16.mxu1 %v10394_v31  ;;  %v9110_v27 = vpop.f32.mrb[52].mxu1  ;;  %v8463_v59 = vrot.slane %v10458_v32, 9  ;;  %v4214_v31 = vsel %vm11380_vm2, %v4212_v40, %v4213_v50  ;;  %v8510_v42 = vcombine.low %v4204_v13, %v4207_v62  ;;  %v10399_v13 = vld [vmem:[%s14362_s4 + $0x198] sm:$0xff]   ;;  %v8464_v62 = vrot.slane %v10459_v38, 9  ;;  %v14596_v38 = vld [vmem:[#allocation12_spill] sm:$0xff] }
 0x491   : > { %v9111_v25 = vpop.f32.mrb[53].mxu1 }
 0x492   : > { %v12851_v37 = vadd.f32 %v9111_v25, %v9110_v27  ;;  %v9113_v18 = vpop.f32.mrb[54].mxu1  ;;  %v4211_v1 = vsel %vm11380_vm2, %v8463_v59, %v4210_v35  ;;  %v4219_v27 = vrot.slane %v4217_v29, 4  ;;  %v4227_v35 = vrot.slane %v12383_v41, 5 }
 0x493   : > { %9285 = vmatpush3.bf16.msra.mxu1 %v10395_v60  ;;  %v9114_v16 = vpop.f32.mrb[55].mxu1  ;;  %v8511_v50 = vcombine.low %v4211_v1, %v4214_v31  ;;  %v4220_v60 = vrot.slane %v12365_v43, 5  ;;  %v8465_v43 = vrot.slane %v12349_v36, 9  ;;  %v10402_v36 = vld [vmem:[%s14362_s4 + $0x1e8] sm:$0xff]  }
 0x494   : > { %9286 = vmatprep.subr.bf16.mxu1 %v10396_v46  ;;  %v12863_v40 = vadd.f32 %v9114_v16, %v9113_v18  ;;  %v10400_v18 = vld [vmem:[%s14362_s4 + $0x1e0] sm:$0xff]   ;;  %v4228_v59 = vsel %vm11380_vm2, %v4226_v22, %v4227_v35  ;;  %v10405_v22 = vld [vmem:[%s14362_s4 + $0x1b0] sm:$0xff]   ;;  %v14593_v35 = vld [vmem:[#allocation8_spill] sm:$0xff] }
 0x495   : > { %v4221_v25 = vsel %vm11380_vm2, %v4219_v27, %v4220_v60  ;;  %v10401_v16 = vld [vmem:[%s14362_s4 + $0x1a0] sm:$0xff]   ;;  %v10406_v60 = vld [vmem:[%s14362_s4 + $0x1f8] sm:$0xff]  }
 0x496   : > { %9793 = vmatmul.mubr.bf16.gmra.mrb[64].mxu1 %v8510_v42 }
 0x497   : > { %9796 = vmatprep.mubr.bf16.mxu1 %v8511_v50  ;;  %9287 = vmatpush3.bf16.msra.mxu1 %v10397_v5  ;;  %v4218_v5 = vsel %vm11380_vm2, %v8464_v62, %v4217_v29  ;;  %v10403_v29 = vld [vmem:[%s14362_s4 + $0x1a8] sm:$0xff]  }
 0x498   : > { %9288 = vmatprep.subr.bf16.mxu1 %v10398_v55  ;;  %v9116_v46 = vpop.f32.mrb[56].mxu1  ;;  %v8512_v1 = vcombine.low %v4218_v5, %v4221_v25  ;;  %v4225_v55 = vsel %vm11380_vm2, %v8465_v43, %v4224_v6  ;;  %v10404_v6 = vld [vmem:[%s14362_s4 + $0x1f0] sm:$0xff]   ;;  %v10407_v25 = vld [vmem:[%s14362_s4 + $0x1b8] sm:$0xff]   ;;  %v14601_v5 = vld [vmem:[#allocation15_spill] sm:$0xff] }
 0x499   : > { %v9117_v32 = vpop.f32.mrb[57].mxu1  ;;  %v8513_v27 = vcombine.low %v4225_v55, %v4228_v59  ;;  %v14598_v43 = vld [vmem:[#allocation13_spill] sm:$0xff]  ;;  %v14599_v59 = vld [vmem:[#allocation14_spill] sm:$0xff]  ;;  %v12927_v55 = vld [vmem:[#allocation3 + $0x18] sm:$0xf] }
 0x49a   : > { %v12878_v31 = vadd.f32 %v9117_v32, %v9116_v46  ;;  %v9119_v41 = vpop.f32.mrb[58].mxu1  ;;  %v14595_v46 = vld [vmem:[#allocation6_spill] sm:$0xff]  ;;  %v12916_v32 = vld [vmem:[%s14362_s4 + $0x200] sm:$0xff]  }
 0x49b   : > { %9289 = vmatpush3.bf16.msra.mxu1 %v10399_v13  ;;  %v9120_v42 = vpop.f32.mrb[59].mxu1  ;;  %v14592_v13 = vld [vmem:[#allocation7_spill] sm:$0xff]  ;;  %v14597_v62 = vcombine.low %v14595_v46, %v14596_v38  ;;  %v14607_v46 = vld [vmem:[#allocation21_spill] sm:$0xff] }
 0x49c   : > { %14590 = vst [vmem:[#allocation77_spill] sm:$0xff] %v12878_v31  ;;  %9290 = vmatprep.subr.bf16.mxu1 %v10400_v18  ;;  %v12890_v50 = vadd.f32 %v9120_v42, %v9119_v41  ;;  %v14594_v18 = vcombine.low %v14592_v13, %v14593_v35  ;;  %v14600_v41 = vcombine.low %v14598_v43, %v14599_v59  ;;  %v12941_v59 = vld [vmem:[#allocation3 + $0x24] sm:$0xf] }
 0x49e   : > { %14591 = vst [vmem:[#allocation78_spill] sm:$0xff] %v12890_v50  ;;  %9797 = vmatmul.mubr.bf16.gmra.mrb[68].mxu1 %v8512_v1  ;;  %v12925_v1 = vld [vmem:[#allocation3 + $0x1c] sm:$0xf] }
 0x49f   : > { %9800 = vmatprep.mubr.bf16.mxu1 %v8513_v27  ;;  %9291 = vmatpush3.bf16.msra.mxu1 %v10401_v16  ;;  %v14602_v16 = vld [vmem:[#allocation16_spill] sm:$0xff]  ;;  %v6360_v27 = vshrl.u32 %v12925_v1, 16 }
 0x4a0   : > { %9292 = vmatprep.subr.bf16.mxu1 %v10402_v36  ;;  %v14603_v42 = vcombine.low %v14601_v5, %v14602_v16  ;;  %v6356_v36 = vshll.u32 %v12925_v1, 16 }
 0x4a1   : > { %v6362_v35 = vrot.slane %v6360_v27, 4 }
 0x4a2   : > { %v6358_v13 = vrot.slane %v6356_v36, 5  ;;  %v6374_v36 = vshll.u32 %v12941_v59, 16 }
 0x4a3   : > { %9293 = vmatpush3.bf16.msra.mxu1 %v10403_v29  ;;  %v6347_v29 = vshrl.u32 %v12927_v55, 16 }
 0x4a4   : > { %9294 = vmatprep.subr.bf16.mxu1 %v10404_v6  ;;  %v6350_v6 = vshll.u32 %v12927_v55, 16  ;;  %v6363_v5 = vor.u32 %v6362_v35, %v6358_v13  ;;  %v14613_v35 = vld [vmem:[#allocation25_spill] sm:$0xff]  ;;  %v6376_v63 = vrot.slane %v6374_v36, 5 }
 0x4a5   : > { %v14614_v4 = vcombine.low %v14612_v49, %v14613_v35  ;;  %v436_v35 = vld [vmem:[#allocation3 + $0xd4] sm:$0x1] }
 0x4a6   : > { %9801 = vmatmul.mubr.bf16.gmra.mrb[72].mxu1 %v14594_v18  ;;  %v14606_v18 = vld [vmem:[#allocation18_spill] sm:$0xff]  ;;  %v6352_v43 = vrot.slane %v6350_v6, 5  ;;  %v6364_v6 = vrot.slane %v6363_v5, 4 }
 0x4a7   : > { %9804 = vmatprep.mubr.bf16.mxu1 %v14597_v62  ;;  %9295 = vmatpush3.bf16.msra.mxu1 %v10405_v22  ;;  %v14604_v22 = vld [vmem:[#allocation20_spill] sm:$0xff]  ;;  %v14608_v38 = vcombine.low %v14606_v18, %v14607_v46  ;;  %v12939_v62 = vld [vmem:[#allocation3 + $0x28] sm:$0xf] }
 0x4a8   : > { %9296 = vmatprep.subr.bf16.mxu1 %v10406_v60  ;;  %v14605_v60 = vcombine.low %v12248_v21, %v14604_v22  ;;  %v6380_v16 = vshll.u32 %v12939_v62, 16  ;;  %v6384_v21 = vshrl.u32 %v12939_v62, 16  ;;  %v14610_v18 = vld [vmem:[#allocation24_spill] sm:$0xff] }
 0x4aa   : > { %v6382_v46 = vrot.slane %v6380_v16, 5  ;;  %v6404_v16 = vshll.u32 %v12956_v48, 16 }
 0x4ab   : > { %9297 = vmatpush3.bf16.msra.mxu1 %v10407_v25  ;;  %v6349_v25 = vrot.slane %v6347_v29, 4 }
 0x4ac   : > { %9820 = vmatprep.subr.bf16.mxu1 %v12916_v32 }
 0x4ad   : > { %v6353_v27 = vor.u32 %v6352_v43, %v6349_v25  ;;  %v12958_v25 = vld [vmem:[#allocation3 + $0x2c] sm:$0x1]  ;;  %v12960_v43 = vld [vmem:[#allocation3 + $0x30] sm:$0xf] }
 0x4ae   : > { %9805 = vmatmul.mubr.bf16.gmra.mrb[76].mxu1 %v14600_v41  ;;  %v12943_v41 = vld [vmem:[#allocation3 + $0x20] sm:$0x1]  ;;  %v6395_v36 = vshrl.u32 %v12960_v43, 16 }
 0x4af   : > { %9808 = vmatprep.mubr.bf16.mxu1 %v14603_v42  ;;  %v6371_v42 = vshrl.u32 %v12941_v59, 16  ;;  %v6366_v22 = vshll.u32 %v12943_v41, 16  ;;  %v6354_v52 = vrot.slane %v6353_v27, 4  ;;  %v6398_v27 = vshll.u32 %v12960_v43, 16 }
 0x4b1   : > { %v6373_v3 = vrot.slane %v6371_v42, 4  ;;  %v6368_v47 = vrot.slane %v6366_v22, 5  ;;  %v6359_v42 = vsel %vm11348_vm1, %v6354_v52, %v6358_v13  ;;  %v6397_v52 = vrot.slane %v6395_v36, 4 }
 0x4b2   : > { %v6400_v13 = vrot.slane %v6398_v27, 5  ;;  %v6419_v36 = vshrl.u32 %v12537_v15, 16  ;;  %v6422_v27 = vshll.u32 %v12537_v15, 16 }
 0x4b3   : > { %v6377_v49 = vor.u32 %v6376_v63, %v6373_v3  ;;  %v380_v3 = vld [vmem:[#allocation3 + $0xcc] sm:$0x1] }
 0x4b4   : > { %v381_v31 = vsel %vm11023_vm6, 0, %v380_v3 }
 0x4b5   : > { %382 = vst [vmem:[#allocation3 + $0xcc] sm:$0x1] %v381_v31  ;;  %v10411_v31 = vld [vmem:[%s14362_s4 + $0x208] sm:$0xff]  }
 0x4b6   : > { %9809 = vmatmul.mubr.bf16.gmra.mrb[80].mxu1 %v14605_v60  ;;  %v14609_v60 = vld [vmem:[#allocation22_spill] sm:$0xff] }
 0x4b7   : > { %9812 = vmatprep.mubr.bf16.mxu1 %v14608_v38  ;;  %v14611_v29 = vcombine.low %v14609_v60, %v14610_v18  ;;  %v6386_v38 = vrot.slane %v6384_v21, 4  ;;  %v6369_v60 = vsel %vm11348_vm1, %v6364_v6, %v6368_v47  ;;  %v6408_v21 = vshrl.u32 %v12956_v48, 16 }
 0x4b8   : > { %v8715_v22 = vcombine.low %v6359_v42, %v6369_v60  ;;  %v14615_v18 = vcombine.low %v12320_v8, %v12345_v28  ;;  %v437_v42 = vsel %vm11094_vm8, 0, %v436_v35  ;;  %v10414_v35 = vld [vmem:[%s14362_s4 + $0x210] sm:$0xff]   ;;  %v6452_v60 = vshll.u32 %v12550_v45, 16 }
 0x4b9   : > { %v6387_v5 = vor.u32 %v6386_v38, %v6382_v46  ;;  %v6410_v6 = vrot.slane %v6408_v21, 4  ;;  %v6378_v38 = vrot.slane %v6377_v49, 4  ;;  %438 = vst [vmem:[#allocation3 + $0xd4] sm:$0x1] %v437_v42  ;;  %v8699_v21 = vcombine.low %v12927_v55, %v12925_v1 }
 0x4ba   : > { %v6414_v49 = vshll.u32 %v12974_v39, 16  ;;  %v6456_v42 = vshrl.u32 %v12550_v45, 16 }
 0x4bb   : > { %v6388_v47 = vrot.slane %v6387_v5, 4  ;;  %v6428_v5 = vshll.u32 %v12548_v2, 16  ;;  %v6383_v50 = vsel %vm11348_vm1, %v6378_v38, %v6382_v46  ;;  %v6421_v46 = vrot.slane %v6419_v36, 4 }
 0x4bc   : > { %v6416_v3 = vrot.slane %v6414_v49, 5  ;;  %v6424_v38 = vrot.slane %v6422_v27, 5  ;;  %v10417_v49 = vld [vmem:[%s14362_s4 + $0x218] sm:$0xff]   ;;  %v6454_v36 = vrot.slane %v6452_v60, 5 }
 0x4be   : > { %9813 = vmatmul.mubr.bf16.gmra.mrb[84].mxu1 %v14611_v29  ;;  %v6406_v29 = vrot.slane %v6404_v16, 5  ;;  %v6432_v16 = vshrl.u32 %v12548_v2, 16 }
 0x4bf   : > { %9816 = vmatprep.mubr.bf16.mxu1 %v14614_v4  ;;  %v6390_v4 = vshll.u32 %v12958_v25, 16 }
 0x4c0   : > { %v6411_v28 = vor.u32 %v6410_v6, %v6406_v29  ;;  %v6434_v6 = vrot.slane %v6432_v16, 4  ;;  %v6443_v16 = vshrl.u32 %v12539_v9, 16 }
 0x4c1   : > { %v6392_v63 = vrot.slane %v6390_v4, 5  ;;  %v6401_v4 = vor.u32 %v6400_v13, %v6397_v52 }
 0x4c3   : > { %v6393_v8 = vsel %vm11348_vm1, %v6388_v47, %v6392_v63  ;;  %v6430_v47 = vrot.slane %v6428_v5, 5  ;;  %v6402_v63 = vrot.slane %v6401_v4, 4  ;;  %v6425_v5 = vor.u32 %v6424_v38, %v6421_v46 }
 0x4c4   : > { %v6467_v38 = vshrl.u32 %v12563_v7, 16 }
 0x4c5   : > { %v6435_v13 = vor.u32 %v6434_v6, %v6430_v47  ;;  %v6476_v6 = vshll.u32 %v12578_v57, 16 }
 0x4c6   : > { %9817 = vmatmul.mubr.bf16.gmra.mrb[88].mxu1 %v14615_v18  ;;  %v6412_v18 = vrot.slane %v6411_v28, 4  ;;  %v6407_v28 = vsel %vm11348_vm1, %v6402_v63, %v6406_v29  ;;  %v6445_v29 = vrot.slane %v6443_v16, 4  ;;  %v6480_v63 = vshrl.u32 %v12578_v57, 16 }
 0x4c7   : > { %7307 = vmatprep.mubr.bf16.mxu1 %v8715_v22  ;;  %v8716_v22 = vcombine.low %v6383_v50, %v6393_v8  ;;  %v6438_v8 = vshll.u32 %v12559_v58, 16  ;;  %v6436_v4 = vrot.slane %v6435_v13, 4  ;;  %v6426_v58 = vrot.slane %v6425_v5, 4 }
 0x4c8   : > { %v6417_v52 = vsel %vm11348_vm1, %v6412_v18, %v6416_v3  ;;  %v10420_v18 = vld [vmem:[%s14362_s4 + $0x220] sm:$0xff]   ;;  %v6482_v5 = vrot.slane %v6480_v63, 4 }
 0x4c9   : > { %v8717_v50 = vcombine.low %v6407_v28, %v6417_v52  ;;  %v6440_v27 = vrot.slane %v6438_v8, 5  ;;  %v8701_v52 = vcombine.low %v12960_v43, %v12956_v48  ;;  %v6431_v13 = vsel %vm11348_vm1, %v6426_v58, %v6430_v47 }
 0x4ca   : > { %v6478_v28 = vrot.slane %v6476_v6, 5  ;;  %v6504_v6 = vshrl.u32 %v12584_v34, 16 }
 0x4cb   : > { %v6441_v3 = vsel %vm11348_vm1, %v6436_v4, %v6440_v27 }
 0x4cc   : > { %v8718_v8 = vcombine.low %v6431_v13, %v6441_v3  ;;  %v6486_v3 = vshll.u32 %v12580_v44, 16 }
 0x4ce   : > { %7308 = vmatmul.mubr.bf16.vlgmr.msra.gmra.mrb[156].mxu1 %v8699_v21  ;;  %v6446_v21 = vshll.u32 %v12539_v9, 16 }
 0x4cf   : > { %9821 = vmatpush3.bf16.msra.mxu1 %v12916_v32  ;;  %7315 = vmatprep.mubr.bf16.mxu1 %v8716_v22  ;;  %v8700_v32 = vcombine.low %v12941_v59, %v12939_v62 }
 0x4d0   : > { %9822 = vmatprep.subr.bf16.mxu1 %v10411_v31  ;;  %v6448_v22 = vrot.slane %v6446_v21, 5  ;;  %v6469_v21 = vrot.slane %v6467_v38, 4  ;;  %v6494_v38 = vshll.u32 %v12582_v11, 16 }
 0x4d2   : > { %v6449_v60 = vor.u32 %v6448_v22, %v6445_v29  ;;  %v6500_v22 = vshll.u32 %v12584_v34, 16 }
 0x4d3   : > { %9823 = vmatpush3.bf16.msra.mxu1 %v10411_v31  ;;  %v6458_v31 = vrot.slane %v6456_v42, 4  ;;  %v6462_v42 = vshll.u32 %v12561_v20, 16  ;;  %v10426_v20 = vld [vmem:[%s14362_s4 + $0x230] sm:$0xff]  }
 0x4d4   : > { %9824 = vmatprep.subr.bf16.mxu1 %v10414_v35 }
 0x4d5   : > { %v6459_v46 = vor.u32 %v6458_v31, %v6454_v36  ;;  %v6464_v4 = vrot.slane %v6462_v42, 5  ;;  %v6483_v31 = vor.u32 %v6482_v5, %v6478_v28  ;;  %v14618_v42 = vld [vmem:[#allocation26_spill] sm:$0xff] }
 0x4d6   : > { %7316 = vmatmul.mubr.bf16.gmra.mrb[160].mxu1 %v8700_v32  ;;  %v10423_v32 = vld [vmem:[%s14362_s4 + $0x228] sm:$0xff]  }
 0x4d7   : > { %7323 = vmatprep.mubr.bf16.mxu1 %v8717_v50  ;;  %9825 = vmatpush3.bf16.msra.mxu1 %v10414_v35  ;;  %v6470_v35 = vshll.u32 %v12563_v7, 16  ;;  %v6460_v16 = vrot.slane %v6459_v46, 4  ;;  %v6450_v50 = vrot.slane %v6449_v60, 4  ;;  %v6491_v46 = vshrl.u32 %v12582_v11, 16  ;;  %v10429_v60 = vld [vmem:[%s14362_s4 + $0x238] sm:$0xff]  }
 0x4d8   : > { %9826 = vmatprep.subr.bf16.mxu1 %v10417_v49 }
 0x4d9   : > { %v6465_v27 = vsel %vm11348_vm1, %v6460_v16, %v6464_v4  ;;  %v6455_v13 = vsel %vm11348_vm1, %v6450_v50, %v6454_v36  ;;  %v6484_v16 = vrot.slane %v6483_v31, 4  ;;  %v14619_v4 = vld [vmem:[#allocation27_spill] sm:$0xff]  ;;  %v6493_v36 = vrot.slane %v6491_v46, 4 }
 0x4da   : > { %v8719_v5 = vcombine.low %v6455_v13, %v6465_v27  ;;  %v6496_v50 = vrot.slane %v6494_v38, 5  ;;  %v6524_v27 = vshll.u32 %v12618_v24, 16  ;;  %v6528_v31 = vshrl.u32 %v12618_v24, 16 }
 0x4db   : > { %9827 = vmatpush3.bf16.msra.mxu1 %v10417_v49  ;;  %v6472_v49 = vrot.slane %v6470_v35, 5  ;;  %v6518_v38 = vshll.u32 %v12606_v23, 16 }
 0x4dc   : > { %9828 = vmatprep.subr.bf16.mxu1 %v10420_v18  ;;  %v6497_v46 = vor.u32 %v6496_v50, %v6493_v36  ;;  %v14622_v50 = vld [vmem:[#allocation41_spill] sm:$0xff] }
 0x4dd   : > { %v6473_v29 = vor.u32 %v6472_v49, %v6469_v21  ;;  %v6502_v21 = vrot.slane %v6500_v22, 5  ;;  %v6506_v49 = vrot.slane %v6504_v6, 4  ;;  %v6520_v36 = vrot.slane %v6518_v38, 5  ;;  %v14624_v38 = vld [vmem:[#allocation44_spill] sm:$0xff] }
 0x4de   : > { %7324 = vmatmul.mubr.bf16.gmra.mrb[164].mxu1 %v8701_v52  ;;  %v8702_v52 = vcombine.low %v12537_v15, %v12548_v2  ;;  %v6488_v2 = vrot.slane %v6486_v3, 5 }
 0x4df   : > { %7331 = vmatprep.mubr.bf16.mxu1 %v8718_v8  ;;  %9829 = vmatpush3.bf16.msra.mxu1 %v10420_v18  ;;  %v6507_v6 = vor.u32 %v6506_v49, %v6502_v21  ;;  %v14621_v49 = vld [vmem:[#allocation19_spill] sm:$0xff] }
 0x4e0   : > { %9830 = vmatprep.subr.bf16.mxu1 %v10423_v32  ;;  %v9162_v47 = vpop.f32.mrb[92].mxu1 }
 0x4e1   : > { %v9163_v58 = vpop.f32.mrb[93].mxu1 }
 0x4e2   : > { %v9164_v63 = vadd.f32 %v9163_v58, %v9162_v47  ;;  %v9165_v18 = vpop.f32.mrb[94].mxu1  ;;  %v6489_v58 = vsel %vm11348_vm1, %v6484_v16, %v6488_v2  ;;  %v6530_v16 = vrot.slane %v6528_v31, 4  ;;  %v6498_v2 = vrot.slane %v6497_v46, 4 }
 0x4e3   : > { %9831 = vmatpush3.bf16.msra.mxu1 %v10423_v32  ;;  %v9166_v35 = vpop.f32.mrb[95].mxu1  ;;  %v6474_v32 = vrot.slane %v6473_v29, 4 }
 0x4e4   : > { %9832 = vmatprep.subr.bf16.mxu1 %v10426_v20  ;;  %v13047_v8 = vadd.f32 %v9164_v63, %v14618_v42  ;;  %v9167_v44 = vadd.f32 %v9166_v35, %v9165_v18  ;;  %v6510_v63 = vshll.u32 %v12599_v19, 16  ;;  %v14620_v42 = vld [vmem:[#allocation17_spill] sm:$0xff]  ;;  %v6508_v19 = vrot.slane %v6507_v6, 4 }
 0x4e5   : > { %v6479_v22 = vsel %vm11348_vm1, %v6474_v32, %v6478_v28  ;;  %v8704_v6 = vcombine.low %v12563_v7, %v12578_v57  ;;  %v6503_v46 = vsel %vm11348_vm1, %v6498_v2, %v6502_v21 }
 0x4e6   : > { %7332 = vmatmul.mubr.bf16.gmra.mrb[168].mxu1 %v8702_v52  ;;  %v13050_v15 = vadd.f32 %v9167_v44, %v14619_v4  ;;  %v8703_v52 = vcombine.low %v12539_v9, %v12550_v45  ;;  %v8720_v13 = vcombine.low %v6479_v22, %v6489_v58  ;;  %v6512_v32 = vrot.slane %v6510_v63, 5  ;;  %v14623_v45 = vld [vmem:[#allocation46_spill] sm:$0xff] }
 0x4e7   : > { %7339 = vmatprep.mubr.bf16.mxu1 %v8719_v5  ;;  %9833 = vmatpush3.bf16.msra.mxu1 %v10426_v20  ;;  %v6515_v20 = vshrl.u32 %v12606_v23, 16  ;;  %v6526_v5 = vrot.slane %v6524_v27, 5  ;;  %v6542_v9 = vshll.u32 %v14622_v50, 16  ;;  %v6548_v58 = vshll.u32 %v14623_v45, 16 }
 0x4e8   : > { %9834 = vmatprep.subr.bf16.mxu1 %v10429_v60  ;;  %v9168_v47 = vpop.f32.mrb[96].mxu1  ;;  %v6513_v63 = vsel %vm11348_vm1, %v6508_v19, %v6512_v32  ;;  %v14626_v32 = vld [vmem:[#allocation29_spill] sm:$0xff] }
 0x4e9   : > { %v9169_v29 = vpop.f32.mrb[97].mxu1  ;;  %v6531_v31 = vor.u32 %v6530_v16, %v6526_v5  ;;  %v8721_v57 = vcombine.low %v6503_v46, %v6513_v63  ;;  %v14628_v46 = vld [vmem:[#allocation50_spill] sm:$0xff] }
 0x4ea   : > { %v9170_v18 = vadd.f32 %v9169_v29, %v9168_v47  ;;  %v9171_v3 = vpop.f32.mrb[98].mxu1  ;;  %v6539_v47 = vshrl.u32 %v14622_v50, 16  ;;  %v6552_v29 = vshrl.u32 %v14623_v45, 16 }
 0x4eb   : > { %9835 = vmatpush3.bf16.msra.mxu1 %v10429_v60  ;;  %v9172_v35 = vpop.f32.mrb[99].mxu1  ;;  %v6517_v60 = vrot.slane %v6515_v20, 4  ;;  %v6532_v19 = vrot.slane %v6531_v31, 4  ;;  %v8705_v31 = vcombine.low %v12582_v11, %v12584_v34 }
 0x4ec   : > { %v13064_v44 = vadd.f32 %v9170_v18, %v14620_v42  ;;  %v9173_v28 = vadd.f32 %v9172_v35, %v9171_v3  ;;  %v6534_v35 = vshll.u32 %v14624_v38, 16  ;;  %v6544_v42 = vrot.slane %v6542_v9, 5 }
 0x4ed   : > { %v6521_v20 = vor.u32 %v6520_v36, %v6517_v60  ;;  %v6554_v16 = vrot.slane %v6552_v29, 4  ;;  %v6576_v29 = vshrl.u32 %v12653_v51, 16 }
 0x4ee   : > { %7340 = vmatmul.mubr.bf16.gmra.mrb[172].mxu1 %v8703_v52  ;;  %v13067_v4 = vadd.f32 %v9173_v28, %v14621_v49  ;;  %v13080_v28 = vrot.slane %v6548_v58, 5  ;;  %v14625_v49 = vld [vmem:[#allocation28_spill] sm:$0xff]  ;;  %v6536_v2 = vrot.slane %v6534_v35, 5  ;;  %v6572_v58 = vshll.u32 %v12653_v51, 16  ;;  %v14629_v51 = vld [vmem:[#allocation30_spill] sm:$0xff] }
 0x4ef   : > { %7347 = vmatprep.mubr.bf16.mxu1 %v8720_v13  ;;  %v6541_v13 = vrot.slane %v6539_v47, 4  ;;  %v6522_v21 = vrot.slane %v6521_v20, 4  ;;  %v6563_v20 = vshrl.u32 %v14628_v46, 16  ;;  %v6578_v34 = vrot.slane %v6576_v29, 4 }
 0x4f0   : > { %v6555_v36 = vor.u32 %v6554_v16, %v13080_v28  ;;  %v6537_v9 = vsel %vm11348_vm1, %v6532_v19, %v6536_v2  ;;  %v13103_v11 = vrot.slane %v6572_v58, 5  ;;  %v14631_v19 = vld [vmem:[#allocation31_spill] sm:$0xff]  ;;  %v8706_v29 = vcombine.low %v12606_v23, %v12618_v24 }
 0x4f1   : > { %v9174_v27 = vpop.f32.mrb[100].mxu1  ;;  %v6545_v60 = vor.u32 %v6544_v42, %v6541_v13  ;;  %v6527_v63 = vsel %vm11348_vm1, %v6522_v21, %v6526_v5  ;;  %v6566_v42 = vshll.u32 %v14628_v46, 16  ;;  %v13107_v5 = vld [vmem:[#allocation3 + $0xd0] sm:$0xf]  ;;  %v6582_v24 = vshll.u32 %v12664_v56, 16 }
 0x4f2   : > { %v9175_v22 = vpop.f32.mrb[101].mxu1  ;;  %v8722_v35 = vcombine.low %v6527_v63, %v6537_v9  ;;  %v6556_v13 = vrot.slane %v6555_v36, 4  ;;  %v6885_v2 = vrot.slane %v13107_v5, 5  ;;  %v6579_v63 = vor.u32 %v6578_v34, %v13103_v11  ;;  %v14634_v34 = vld [vmem:[#allocation32_spill] sm:$0xff] }
 0x4f3   : > { %v9176_v18 = vadd.f32 %v9175_v22, %v9174_v27  ;;  %v9177_v3 = vpop.f32.mrb[102].mxu1  ;;  %v6568_v9 = vrot.slane %v6566_v42, 5  ;;  %v14633_v42 = vld [vmem:[#allocation51_spill] sm:$0xff] }
 0x4f4   : > { %v9178_v52 = vpop.f32.mrb[103].mxu1  ;;  %v6580_v56 = vrot.slane %v6579_v63, 4 }
 0x4f5   : > { %v13083_v50 = vadd.f32 %v9176_v18, %v14625_v49  ;;  %v9179_v7 = vadd.f32 %v9178_v52, %v9177_v3  ;;  %v14627_v18 = vld [vmem:[#allocation47_spill] sm:$0xff]  ;;  %v6546_v52 = vrot.slane %v6545_v60, 4 }
 0x4f6   : > { %7348 = vmatmul.mubr.bf16.gmra.mrb[176].mxu1 %v8704_v6  ;;  %v6558_v3 = vshll.u32 %v14627_v18, 16  ;;  %v6596_v18 = vshll.u32 %v12655_v17, 16 }
 0x4f7   : > { %v13086_v45 = vadd.f32 %v9179_v7, %v14626_v32  ;;  %7355 = vmatprep.mubr.bf16.mxu1 %v8721_v57  ;;  %v13105_v7 = vld [vmem:[#allocation3 + $0xcc] sm:$0xf]  ;;  %v13109_v57 = vld [vmem:[#allocation3 + $0xd4] sm:$0x1]  ;;  %v6551_v23 = vsel %vm11348_vm1, %v6546_v52, %v13080_v28 }
 0x4f8   : > { %v8698_v21 = vrot.slane %v13105_v7, 9  ;;  %v6888_v60 = vrot.slane %v13109_v57, 5  ;;  %v6560_v36 = vrot.slane %v6558_v3, 5  ;;  %v6600_v3 = vshrl.u32 %v12655_v17, 16 }
 0x4f9   : > { %v9180_v47 = vpop.f32.mrb[104].mxu1  ;;  %v6598_v52 = vrot.slane %v6596_v18, 5 }
 0x4fa   : > { %v9181_v27 = vpop.f32.mrb[105].mxu1 }
 0x4fb   : > { %v9182_v22 = vadd.f32 %v9181_v27, %v9180_v47  ;;  %v9183_v6 = vpop.f32.mrb[106].mxu1  ;;  %v6565_v47 = vrot.slane %v6563_v20, 4  ;;  %v13121_v27 = vsel %vm11380_vm2, %v8698_v21, %v6885_v2 }
 0x4fc   : > { %v9184_v38 = vpop.f32.mrb[107].mxu1 }
 0x4fd   : > { %v13101_v16 = vadd.f32 %v9182_v22, %v14629_v51  ;;  %v9185_v49 = vadd.f32 %v9184_v38, %v9183_v6  ;;  %v6561_v6 = vsel %vm11348_vm1, %v6556_v13, %v6560_v36  ;;  %v6569_v13 = vor.u32 %v6568_v9, %v6565_v47 }
 0x4fe   : > { %7356 = vmatmul.mubr.bf16.gmra.mrb[180].mxu1 %v8705_v31  ;;  %v6887_v31 = vrot.slane %v6885_v2, 4  ;;  %v6587_v51 = vshrl.u32 %v14633_v42, 16  ;;  %v8723_v28 = vcombine.low %v6551_v23, %v6561_v6  ;;  %v6602_v2 = vrot.slane %v6600_v3, 4  ;;  %v10460_v3 = vld [vmem:[#allocation3 + $0x78] sm:$0xf] }
 0x4ff   : > { %14630 = vst [vmem:[#allocation7_spill] sm:$0xff] %v13101_v16  ;;  %v13112_v32 = vadd.f32 %v9185_v49, %v14631_v19  ;;  %7363 = vmatprep.mubr.bf16.mxu1 %v8722_v35  ;;  %v6590_v49 = vshll.u32 %v14633_v42, 16  ;;  %v6570_v47 = vrot.slane %v6569_v13, 4  ;;  %v6584_v9 = vrot.slane %v6582_v24, 5 }
 0x500   : > { %v13134_v38 = vsel %vm11380_vm2, %v6887_v31, %v6888_v60  ;;  %v14636_v60 = vld [vmem:[#allocation33_spill] sm:$0xff]  ;;  %v6620_v6 = vshll.u32 %v12692_v10, 16  ;;  %v6707_v16 = vshrl.u32 %v13105_v7, 16 }
 0x501   : > { %14632 = vst [vmem:[#allocation8_spill] sm:$0xff] %v13112_v32  ;;  %v9186_v58 = vpop.f32.mrb[108].mxu1  ;;  %v6592_v31 = vrot.slane %v6590_v49, 5 }
 0x502   : > { %v9187_v22 = vpop.f32.mrb[109].mxu1 }
 0x503   : > { %v9188_v46 = vadd.f32 %v9187_v22, %v9186_v58  ;;  %v9189_v20 = vpop.f32.mrb[110].mxu1  ;;  %v6589_v58 = vrot.slane %v6587_v51, 4  ;;  %v6575_v51 = vsel %vm11348_vm1, %v6570_v47, %v13103_v11 }
 0x504   : > { %v9190_v35 = vpop.f32.mrb[111].mxu1 }
 0x505   : > { %v13141_v19 = vadd.f32 %v9188_v46, %v14634_v34  ;;  %v9191_v21 = vadd.f32 %v9190_v35, %v9189_v20  ;;  %v6585_v46 = vsel %vm11348_vm1, %v6580_v56, %v6584_v9  ;;  %v6603_v34 = vor.u32 %v6602_v2, %v6598_v52  ;;  %v10461_v20 = vld [vmem:[#allocation3 + $0x7c] sm:$0xf]  ;;  %v14638_v35 = vld [vmem:[#allocation55_spill] sm:$0xff]  ;;  %v14640_v2 = vld [vmem:[#allocation34_spill] sm:$0xff] }
 0x506   : > { %7364 = vmatmul.mubr.bf16.gmra.mrb[184].mxu1 %v8706_v29  ;;  %v6624_v29 = vshrl.u32 %v12692_v10, 16  ;;  %v8707_v23 = vcombine.low %v10460_v3, %v10461_v20  ;;  %v6606_v13 = vshll.u32 %v14638_v35, 16  ;;  %v6593_v49 = vor.u32 %v6592_v31, %v6589_v58  ;;  %v14642_v20 = vld [vmem:[#allocation35_spill] sm:$0xff] }
 0x507   : > { %14635 = vst [vmem:[#allocation6_spill] sm:$0xff] %v13141_v19  ;;  %v13144_v36 = vadd.f32 %v9191_v21, %v14636_v60  ;;  %7371 = vmatprep.mubr.bf16.mxu1 %v8723_v28  ;;  %v14639_v21 = vld [vmem:[#allocation58_spill] sm:$0xff]  ;;  %v8724_v9 = vcombine.low %v6575_v51, %v6585_v46 }
 0x508   : > { %v6611_v28 = vshrl.u32 %v14639_v21, 16  ;;  %v6614_v56 = vshll.u32 %v14639_v21, 16  ;;  %v6626_v3 = vrot.slane %v6624_v29, 4  ;;  %v6594_v17 = vrot.slane %v6593_v49, 4 }
 0x509   : > { %14637 = vst [vmem:[#allocation12_spill] sm:$0xff] %v13144_v36  ;;  %v9192_v22 = vpop.f32.mrb[112].mxu1  ;;  %v6608_v11 = vrot.slane %v6606_v13, 5 }
 0x50a   : > { %v9193_v42 = vpop.f32.mrb[113].mxu1  ;;  %v6613_v47 = vrot.slane %v6611_v28, 4  ;;  %v6616_v58 = vrot.slane %v6614_v56, 5  ;;  %v6599_v28 = vsel %vm11348_vm1, %v6594_v17, %v6598_v52 }
 0x50b   : > { %v9194_v63 = vadd.f32 %v9193_v42, %v9192_v22  ;;  %v9195_v18 = vpop.f32.mrb[114].mxu1  ;;  %v6604_v22 = vrot.slane %v6603_v34, 4  ;;  %v6622_v42 = vrot.slane %v6620_v6, 5 }
 0x50c   : > { %v9196_v24 = vpop.f32.mrb[115].mxu1  ;;  %v6617_v56 = vor.u32 %v6616_v58, %v6613_v47 }
 0x50d   : > { %v13157_v60 = vadd.f32 %v9194_v63, %v14640_v2  ;;  %v9197_v10 = vadd.f32 %v9196_v24, %v9195_v18  ;;  %v6609_v63 = vsel %vm11348_vm1, %v6604_v22, %v6608_v11  ;;  %v6627_v21 = vor.u32 %v6626_v3, %v6622_v42  ;;  %v14644_v18 = vld [vmem:[#allocation63_spill] sm:$0xff]  ;;  %v10463_v24 = vld [vmem:[#allocation3 + $0x88] sm:$0xf] }
 0x50e   : > { %7372 = vmatmul.mubr.bf16.gmra.mrb[188].mxu1 %v8707_v23  ;;  %v6644_v46 = vshll.u32 %v14644_v18, 16  ;;  %v6648_v34 = vshrl.u32 %v14644_v18, 16  ;;  %v10462_v23 = vld [vmem:[#allocation3 + $0x84] sm:$0xf]  ;;  %v14645_v2 = vld [vmem:[#allocation62_spill] sm:$0xff]  ;;  %v14646_v3 = vld [vmem:[#allocation11_spill] sm:$0xff]  ;;  %v8725_v11 = vcombine.low %v6599_v28, %v6609_v63 }
 0x50f   : > { %14641 = vst [vmem:[#allocation13_spill] sm:$0xff] %v13157_v60  ;;  %v13160_v35 = vadd.f32 %v9197_v10, %v14642_v20  ;;  %7379 = vmatprep.mubr.bf16.mxu1 %v8724_v9  ;;  %v8708_v51 = vcombine.low %v10462_v23, %v10463_v24  ;;  %v6630_v49 = vshll.u32 %v14645_v2, 16  ;;  %v13169_v10 = vld [vmem:[#allocation3 + $0xa8] sm:$0xf]  ;;  %v14648_v24 = vld [vmem:[#allocation36_spill] sm:$0xff]  ;;  %v6618_v17 = vrot.slane %v6617_v56, 4 }
 0x510   : > { %v6635_v9 = vshrl.u32 %v13169_v10, 16  ;;  %v6638_v22 = vshll.u32 %v13169_v10, 16  ;;  %v13176_v18 = vrot.slane %v6644_v46, 5  ;;  %v6650_v23 = vrot.slane %v6648_v34, 4  ;;  %v10466_v56 = vld [vmem:[#allocation3 + $0x90] sm:$0xf] }
 0x511   : > { %14643 = vst [vmem:[#allocation14_spill] sm:$0xff] %v13160_v35  ;;  %v9198_v31 = vpop.f32.mrb[116].mxu1  ;;  %v6632_v52 = vrot.slane %v6630_v49, 5  ;;  %v6672_v46 = vshrl.u32 %v12731_v61, 16 }
 0x512   : > { %v9199_v36 = vpop.f32.mrb[117].mxu1  ;;  %v6637_v47 = vrot.slane %v6635_v9, 4  ;;  %v6640_v58 = vrot.slane %v6638_v22, 5  ;;  %v6651_v63 = vor.u32 %v6650_v23, %v13176_v18  ;;  %v10467_v9 = vld [vmem:[#allocation3 + $0x94] sm:$0xf]  ;;  %v14650_v23 = vld [vmem:[#allocation37_spill] sm:$0xff] }
 0x513   : > { %v9200_v6 = vadd.f32 %v9199_v36, %v9198_v31  ;;  %v9201_v29 = vpop.f32.mrb[118].mxu1  ;;  %v6628_v31 = vrot.slane %v6627_v21, 4  ;;  %v6668_v21 = vshll.u32 %v12731_v61, 16  ;;  %v8709_v22 = vcombine.low %v10466_v56, %v10467_v9 }
 0x514   : > { %v9202_v13 = vpop.f32.mrb[119].mxu1 }
 0x515   : > { %v13174_v20 = vadd.f32 %v9200_v6, %v14646_v3  ;;  %v9203_v36 = vadd.f32 %v9202_v13, %v9201_v29  ;;  %v6633_v6 = vsel %vm11348_vm1, %v6628_v31, %v6632_v52  ;;  %v6623_v3 = vsel %vm11348_vm1, %v6618_v17, %v6622_v42 }
 0x516   : > { %7380 = vmatmul.mubr.bf16.gmra.mrb[192].mxu1 %v8708_v51  ;;  %v13186_v51 = vld [vmem:[#allocation3 + $0xb4] sm:$0xf]  ;;  %v13195_v52 = vrot.slane %v6668_v21, 5  ;;  %v13203_v21 = vld [vmem:[#allocation3 + $0xc4] sm:$0xf] }
 0x517   : > { %14647 = vst [vmem:[#allocation15_spill] sm:$0xff] %v13174_v20  ;;  %v13179_v2 = vadd.f32 %v9203_v36, %v14648_v24  ;;  %7387 = vmatprep.mubr.bf16.mxu1 %v8725_v11  ;;  %v6659_v13 = vshrl.u32 %v13186_v51, 16  ;;  %v6662_v49 = vshll.u32 %v13186_v51, 16  ;;  %v6641_v36 = vor.u32 %v6640_v58, %v6637_v47  ;;  %v10468_v11 = vld [vmem:[#allocation3 + $0xb0] sm:$0x1]  ;;  %v14652_v20 = vld [vmem:[#allocation38_spill] sm:$0xff] }
 0x518   : > { %v6654_v31 = vshll.u32 %v10468_v11, 16  ;;  %v6652_v24 = vrot.slane %v6651_v63, 4  ;;  %v10469_v58 = vld [vmem:[#allocation3 + $0xbc] sm:$0x1] }
 0x519   : > { %14649 = vst [vmem:[#allocation16_spill] sm:$0xff] %v13179_v2  ;;  %v9204_v35 = vpop.f32.mrb[120].mxu1  ;;  %v6674_v2 = vrot.slane %v6672_v46, 4  ;;  %v6661_v56 = vrot.slane %v6659_v13, 4  ;;  %v6664_v9 = vrot.slane %v6662_v49, 5  ;;  %v6642_v42 = vrot.slane %v6641_v36, 4 }
 0x51a   : > { %v9205_v60 = vpop.f32.mrb[121].mxu1  ;;  %v6656_v17 = vrot.slane %v6654_v31, 5  ;;  %v6678_v11 = vshll.u32 %v10469_v58, 16  ;;  %v6692_v46 = vshll.u32 %v13203_v21, 16  ;;  %v10472_v31 = vld [vmem:[#allocation3 + $0x9c] sm:$0xf] }
 0x51b   : > { %v9206_v34 = vadd.f32 %v9205_v60, %v9204_v35  ;;  %v9207_v29 = vpop.f32.mrb[122].mxu1  ;;  %v8726_v35 = vcombine.low %v6623_v3, %v6633_v6  ;;  %v6675_v63 = vor.u32 %v6674_v2, %v13195_v52  ;;  %v6665_v49 = vor.u32 %v6664_v9, %v6661_v56 }
 0x51c   : > { %v9208_v28 = vpop.f32.mrb[123].mxu1  ;;  %v6657_v6 = vsel %vm11348_vm1, %v6652_v24, %v6656_v17  ;;  %v6647_v2 = vsel %vm11348_vm1, %v6642_v42, %v13176_v18  ;;  %v6680_v9 = vrot.slane %v6678_v11, 5  ;;  %v6694_v58 = vrot.slane %v6692_v46, 5  ;;  %v10474_v11 = vld [vmem:[#allocation3 + $0xac] sm:$0xf] }
 0x51d   : > { %v13193_v61 = vadd.f32 %v9206_v34, %v14650_v23  ;;  %v9209_v60 = vadd.f32 %v9208_v28, %v9207_v29  ;;  %v13207_v28 = vld [vmem:[#allocation3 + $0xc0] sm:$0xf]  ;;  %v6676_v56 = vrot.slane %v6675_v63, 4  ;;  %v6666_v32 = vrot.slane %v6665_v49, 4 }
 0x51e   : > { %7388 = vmatmul.mubr.bf16.gmra.mrb[196].mxu1 %v8709_v22  ;;  %v6683_v22 = vshrl.u32 %v13207_v28, 16  ;;  %v6686_v3 = vshll.u32 %v13207_v28, 16  ;;  %v10473_v23 = vld [vmem:[#allocation3 + $0xa0] sm:$0xf]  ;;  %v6710_v18 = vshll.u32 %v13105_v7, 16  ;;  %v6716_v42 = vshll.u32 %v13107_v5, 16 }
 0x51f   : > { %14651 = vst [vmem:[#allocation20_spill] sm:$0xff] %v13193_v61  ;;  %v13198_v19 = vadd.f32 %v9209_v60, %v14652_v20  ;;  %7395 = vmatprep.mubr.bf16.mxu1 %v8726_v35  ;;  %v6696_v20 = vshrl.u32 %v13203_v21, 16  ;;  %v8710_v60 = vcombine.low %v10472_v31, %v10473_v23  ;;  %v14654_v35 = vld [vmem:[#allocation39_spill] sm:$0xff]  ;;  %v8711_v46 = vcombine.low %v13169_v10, %v10474_v11 }
 0x520   : > { %v6685_v31 = vrot.slane %v6683_v22, 4  ;;  %v6688_v23 = vrot.slane %v6686_v3, 5  ;;  %v6671_v22 = vsel %vm11348_vm1, %v6666_v32, %v13195_v52 }
 0x521   : > { %14653 = vst [vmem:[#allocation18_spill] sm:$0xff] %v13198_v19  ;;  %v9210_v47 = vpop.f32.mrb[124].mxu1  ;;  %v14656_v19 = vld [vmem:[#allocation40_spill] sm:$0xff] }
 0x522   : > { %v9211_v34 = vpop.f32.mrb[125].mxu1  ;;  %v6689_v3 = vor.u32 %v6688_v23, %v6685_v31 }
 0x523   : > { %v9212_v29 = vadd.f32 %v9211_v34, %v9210_v47  ;;  %v9213_v13 = vpop.f32.mrb[126].mxu1  ;;  %v8727_v47 = vcombine.low %v6647_v2, %v6657_v6  ;;  %v6698_v34 = vrot.slane %v6696_v20, 4  ;;  %v6720_v6 = vshrl.u32 %v13107_v5, 16 }
 0x524   : > { %v9214_v36 = vpop.f32.mrb[127].mxu1  ;;  %v6690_v52 = vrot.slane %v6689_v3, 4 }
 0x525   : > { %v13215_v24 = vadd.f32 %v9212_v29, %v14654_v35  ;;  %v9215_v17 = vadd.f32 %v9214_v36, %v9213_v13  ;;  %v6699_v20 = vor.u32 %v6698_v34, %v6694_v58  ;;  %v10475_v36 = vld [vmem:[#allocation3 + $0xc8] sm:$0x1]  ;;  %v6709_v35 = vrot.slane %v6707_v16, 4  ;;  %v14659_v34 = vld [vmem:[#allocation43_spill] sm:$0xff] }
 0x526   : > { %7396 = vmatmul.mubr.bf16.gmra.mrb[200].mxu1 %v8710_v60  ;;  %v6702_v60 = vshll.u32 %v10475_v36, 16  ;;  %v6726_v16 = vshll.u32 %v13109_v57, 16 }
 0x527   : > { %14655 = vst [vmem:[#allocation21_spill] sm:$0xff] %v13215_v24  ;;  %v13218_v61 = vadd.f32 %v9215_v17, %v14656_v19  ;;  %7403 = vmatprep.mubr.bf16.mxu1 %v8727_v47  ;;  %v6681_v19 = vsel %vm11348_vm1, %v6676_v56, %v6680_v9  ;;  %v6712_v17 = vrot.slane %v6710_v18, 5  ;;  %v6718_v47 = vrot.slane %v6716_v42, 5  ;;  %v14658_v24 = vld [vmem:[#allocation9_spill] sm:$0xff] }
 0x528   : > { %v8728_v56 = vcombine.low %v6671_v22, %v6681_v19  ;;  %v6700_v9 = vrot.slane %v6699_v20, 4  ;;  %v6704_v32 = vrot.slane %v6702_v60, 5  ;;  %v10476_v19 = vld [vmem:[#allocation3 + $0xb8] sm:$0xf]  ;;  %v6728_v3 = vrot.slane %v6726_v16, 5 }
 0x529   : > { %14657 = vst [vmem:[#allocation22_spill] sm:$0xff] %v13218_v61  ;;  %v9216_v29 = vpop.f32.mrb[128].mxu1  ;;  %v6722_v61 = vrot.slane %v6720_v6, 4  ;;  %v6713_v31 = vor.u32 %v6712_v17, %v6709_v35 }
 0x52a   : > { %v9217_v63 = vpop.f32.mrb[129].mxu1 }
 0x52b   : > { %v9218_v13 = vadd.f32 %v9217_v63, %v9216_v29  ;;  %v9219_v49 = vpop.f32.mrb[130].mxu1  ;;  %v6723_v23 = vor.u32 %v6722_v61, %v6718_v47  ;;  %v14660_v61 = vld [vmem:[#allocation57_spill] sm:$0xff] }
 0x52c   : > { %v9220_v2 = vpop.f32.mrb[131].mxu1 }
 0x52d   : > { %v13231_v10 = vadd.f32 %v9218_v13, %v14658_v24  ;;  %v9221_v11 = vadd.f32 %v9220_v2, %v9219_v49  ;;  %v6705_v24 = vsel %vm11348_vm1, %v6700_v9, %v6704_v32  ;;  %v6695_v13 = vsel %vm11348_vm1, %v6690_v52, %v6694_v58  ;;  %v14661_v2 = vld [vmem:[#allocation61_spill] sm:$0xff] }
 0x52e   : > { %7404 = vmatmul.mubr.bf16.gmra.mrb[204].mxu1 %v8711_v46  ;;  %v8712_v46 = vcombine.low %v13186_v51, %v10476_v19  ;;  %v6714_v49 = vrot.slane %v6713_v31, 4  ;;  %v6724_v22 = vrot.slane %v6723_v23, 4  ;;  %v8729_v60 = vcombine.low %v6695_v13, %v6705_v24 }
 0x52f   : > { %v13234_v29 = vadd.f32 %v9221_v11, %v14659_v34  ;;  %7411 = vmatprep.mubr.bf16.mxu1 %v8728_v56  ;;  %v6780_v56 = vrot.slane %v12925_v1, 5  ;;  %v8713_v31 = vcombine.low %v13207_v28, %v13203_v21  ;;  %v8683_v21 = vrot.slane %v12927_v55, 9 }
 0x530   : > { %v6719_v51 = vsel %vm11348_vm1, %v6714_v49, %v6718_v47  ;;  %v6729_v17 = vsel %vm11348_vm1, %v6724_v22, %v6728_v3  ;;  %v6794_v28 = vrot.slane %v12956_v48, 5  ;;  %v6790_v55 = vrot.slane %v12958_v25, 5 }
 0x531   : > { %v9222_v18 = vpop.f32.mrb[132].mxu1  ;;  %v8730_v32 = vcombine.low %v6719_v51, %v6729_v17  ;;  %v6782_v47 = vrot.slane %v6780_v56, 4  ;;  %v6797_v48 = vrot.slane %v12974_v39, 5  ;;  %v8684_v22 = vrot.slane %v12941_v59, 9 }
 0x532   : > { %v9223_v42 = vpop.f32.mrb[133].mxu1 }
 0x533   : > { %v9224_v6 = vadd.f32 %v9223_v42, %v9222_v18  ;;  %v9225_v63 = vpop.f32.mrb[134].mxu1  ;;  %v6783_v18 = vrot.slane %v12943_v41, 5  ;;  %v6787_v42 = vrot.slane %v12939_v62, 5  ;;  %v6781_v41 = vsel %vm11380_vm2, %v8683_v21, %v6780_v56 }
 0x534   : > { %v9226_v20 = vpop.f32.mrb[135].mxu1 }
 0x535   : > { %v13243_v36 = vadd.f32 %v9224_v6, %v14660_v61  ;;  %v9227_v57 = vadd.f32 %v9226_v20, %v9225_v63  ;;  %v8714_v6 = vcombine.low %v13105_v7, %v13107_v5  ;;  %v6789_v13 = vrot.slane %v6787_v42, 4 }
 0x536   : > { %7412 = vmatmul.mubr.bf16.gmra.mrb[208].mxu1 %v8712_v46  ;;  %v6796_v7 = vrot.slane %v6794_v28, 4  ;;  %v8685_v61 = vrot.slane %v12960_v43, 9 }
 0x537   : > { %v13246_v35 = vadd.f32 %v9227_v57, %v14661_v2  ;;  %7419 = vmatprep.mubr.bf16.mxu1 %v8729_v60 }
 0x538   : > { %v6798_v57 = vsel %vm11380_vm2, %v6796_v7, %v6797_v48  ;;  %v6795_v39 = vsel %vm11380_vm2, %v8685_v61, %v6794_v28  ;;  %v14668_v28 = vld [vmem:[#allocation77_spill] sm:$0xff]  ;;  %v14677_v48 = vld [vmem:[#allocation60_spill] sm:$0xff] }
 0x539   : > { %v9228_v58 = vpop.f32.mrb[136].mxu1  ;;  %v14682_v61 = vld [vmem:[#allocation65_spill] sm:$0xff] }
 0x53a   : > { %v9229_v11 = vpop.f32.mrb[137].mxu1 }
 0x53b   : > { %v9230_v9 = vadd.f32 %v9229_v11, %v9228_v58  ;;  %v9231_v34 = vpop.f32.mrb[138].mxu1  ;;  %v8733_v58 = vcombine.low %v6795_v39, %v6798_v57  ;;  %v14683_v57 = vld [vmem:[#allocation67_spill] sm:$0xff] }
 0x53c   : > { %v9232_v52 = vpop.f32.mrb[139].mxu1  ;;  %v14689_v39 = vld [vmem:[#allocation71_spill] sm:$0xff] }
 0x53d   : > { %v13256_v23 = vadd.f32 %v9230_v9, %v12755_v53  ;;  %v9233_v16 = vadd.f32 %v9232_v52, %v9231_v34  ;;  %v6784_v53 = vsel %vm11380_vm2, %v6782_v47, %v6783_v18  ;;  %v14665_v18 = vld [vmem:[#allocation42_spill] sm:$0xff] }
 0x53e   : > { %7420 = vmatmul.mubr.bf16.gmra.mrb[212].mxu1 %v8713_v31  ;;  %v8731_v20 = vcombine.low %v6781_v41, %v6784_v53  ;;  %v14662_v31 = vld [vmem:[#allocation10_spill] sm:$0xff] }
 0x53f   : > { %v13259_v33 = vadd.f32 %v9233_v16, %v12778_v54  ;;  %7427 = vmatprep.mubr.bf16.mxu1 %v8730_v32  ;;  %v14663_v16 = vld [vmem:[#allocation45_spill] sm:$0xff] }
 0x541   : > { %v9234_v1 = vpop.f32.mrb[140].mxu1 }
 0x542   : > { %v9235_v24 = vpop.f32.mrb[141].mxu1 }
 0x543   : > { %v9236_v63 = vadd.f32 %v9235_v24, %v9234_v1  ;;  %v9237_v54 = vpop.f32.mrb[142].mxu1 }
 0x544   : > { %v9238_v19 = vpop.f32.mrb[143].mxu1 }
 0x545   : > { %v13272_v46 = vadd.f32 %v9236_v63, %v12814_v12  ;;  %v9239_v62 = vadd.f32 %v9238_v19, %v9237_v54  ;;  %v6791_v12 = vsel %vm11380_vm2, %v6789_v13, %v6790_v55  ;;  %v14669_v54 = vld [vmem:[#allocation49_spill] sm:$0xff]  ;;  %v14674_v13 = vld [vmem:[#allocation54_spill] sm:$0xff]  ;;  %v14676_v55 = vld [vmem:[#allocation56_spill] sm:$0xff] }
 0x546   : > { %7428 = vmatmul.mubr.bf16.gmra.mrb[216].mxu1 %v8714_v6  ;;  %v14670_v19 = vld [vmem:[#allocation53_spill] sm:$0xff] }
 0x547   : > { %v13276_v5 = vadd.f32 %v9239_v62, %v12820_v30  ;;  %9836 = vmatprep.mubr.bf16.mxu1 %v8731_v20  ;;  %v6788_v30 = vsel %vm11380_vm2, %v8684_v22, %v6787_v42  ;;  %v14671_v41 = vcombine.low %v14669_v54, %v14670_v19  ;;  %v14672_v62 = vld [vmem:[#allocation78_spill] sm:$0xff]  ;;  %v14673_v20 = vld [vmem:[#allocation52_spill] sm:$0xff]  ;;  %v14679_v22 = vld [vmem:[#allocation59_spill] sm:$0xff] }
 0x548   : > { %v8732_v51 = vcombine.low %v6788_v30, %v6791_v12  ;;  %v14675_v7 = vcombine.low %v14673_v20, %v14674_v13  ;;  %v14680_v12 = vld [vmem:[#allocation64_spill] sm:$0xff] }
 0x549   : > { %v9240_v49 = vpop.f32.mrb[144].mxu1  ;;  %v14686_v30 = vld [vmem:[#allocation68_spill] sm:$0xff] }
 0x54a   : > { %v9241_v3 = vpop.f32.mrb[145].mxu1 }
 0x54b   : > { %v9242_v60 = vadd.f32 %v9241_v3, %v9240_v49  ;;  %v9243_v25 = vpop.f32.mrb[146].mxu1  ;;  %v14678_v49 = vcombine.low %v14676_v55, %v14677_v48  ;;  %v14681_v3 = vcombine.low %v14679_v22, %v14680_v12 }
 0x54c   : > { %v9244_v2 = vpop.f32.mrb[147].mxu1 }
 0x54d   : > { %v13290_v59 = vadd.f32 %v9242_v60, %v12826_v14  ;;  %v9245_v17 = vadd.f32 %v9244_v2, %v9243_v25  ;;  %v14664_v14 = vcombine.low %v14662_v31, %v14663_v16  ;;  %v14684_v60 = vcombine.low %v14682_v61, %v14683_v57  ;;  %v14685_v25 = vld [vmem:[#allocation66_spill] sm:$0xff]  ;;  %v14698_v31 = vld [vmem:[#allocation76_spill] sm:$0xff] }
 0x54e   : > { %9837 = vmatmul.mubr.bf16.vlgmr.msra.gmra.mrb[60].mxu1 %v8732_v51  ;;  %v14687_v2 = vcombine.low %v14685_v25, %v14686_v30  ;;  %v14688_v51 = vld [vmem:[#allocation69_spill] sm:$0xff]  ;;  %v14702_v25 = vld [vmem:[#allocation8_spill] sm:$0xff] }
 0x54f   : > { %v13293_v43 = vadd.f32 %v9245_v17, %v12838_v0  ;;  %9840 = vmatprep.mubr.bf16.mxu1 %v8733_v58  ;;  %v14666_v0 = vld [vmem:[#allocation48_spill] sm:$0xff]  ;;  %v14690_v17 = vcombine.low %v14688_v51, %v14689_v39  ;;  %v14691_v58 = vld [vmem:[#allocation70_spill] sm:$0xff] }
 0x550   : > { %v14667_v1 = vcombine.low %v14665_v18, %v14666_v0 }
 0x551   : > { %v9246_v11 = vpop.f32.mrb[148].mxu1 }
 0x552   : > { %v9247_v56 = vpop.f32.mrb[149].mxu1 }
 0x553   : > { %v9248_v9 = vadd.f32 %v9247_v56, %v9246_v11  ;;  %v9249_v34 = vpop.f32.mrb[150].mxu1  ;;  %v14692_v11 = vld [vmem:[#allocation72_spill] sm:$0xff] }
 0x554   : > { %v9250_v32 = vpop.f32.mrb[151].mxu1  ;;  %v14693_v56 = vcombine.low %v14691_v58, %v14692_v11 }
 0x555   : > { %v13296_v52 = vadd.f32 %v9248_v9, %v12851_v37  ;;  %v9251_v26 = vadd.f32 %v9250_v32, %v9249_v34  ;;  %v14694_v9 = vld [vmem:[#allocation73_spill] sm:$0xff]  ;;  %v14695_v34 = vld [vmem:[#allocation74_spill] sm:$0xff] }
 0x556   : > { %9841 = vmatmul.mubr.bf16.gmra.mrb[64].mxu1 %v14664_v14  ;;  %v14696_v32 = vcombine.low %v14694_v9, %v14695_v34  ;;  %v14700_v14 = vcombine.low %v13121_v27, %v13134_v38 }
 0x557   : > { %v13302_v47 = vadd.f32 %v9251_v26, %v12863_v40  ;;  %9844 = vmatprep.mubr.bf16.mxu1 %v14667_v1  ;;  %v14697_v26 = vld [vmem:[#allocation75_spill] sm:$0xff] }
 0x558   : > { %v14699_v16 = vcombine.low %v14697_v26, %v14698_v31 }
 0x559   : > { %v9252_v42 = vpop.f32.mrb[152].mxu1 }
 0x55a   : > { %v9253_v24 = vpop.f32.mrb[153].mxu1 }
 0x55b   : > { %v9254_v6 = vadd.f32 %v9253_v24, %v9252_v42  ;;  %v9255_v21 = vpop.f32.mrb[154].mxu1 }
 0x55c   : > { %v9256_v53 = vpop.f32.mrb[155].mxu1 }
 0x55d   : > { %v13308_v37 = vadd.f32 %v9254_v6, %v14668_v28  ;;  %v9257_v63 = vadd.f32 %v9256_v53, %v9255_v21 }
 0x55e   : > { %9845 = vmatmul.mubr.bf16.gmra.mrb[68].mxu1 %v14671_v41 }
 0x55f   : > { %v13314_v40 = vadd.f32 %v9257_v63, %v14672_v62  ;;  %9848 = vmatprep.mubr.bf16.mxu1 %v14675_v7 }
 0x566   : > { %9849 = vmatmul.mubr.bf16.gmra.mrb[72].mxu1 %v14678_v49 }
 0x567   : > { %9852 = vmatprep.mubr.bf16.mxu1 %v14681_v3 }
 0x56e   : > { %9853 = vmatmul.mubr.bf16.gmra.mrb[76].mxu1 %v14684_v60 }
 0x56f   : > { %9856 = vmatprep.mubr.bf16.mxu1 %v14687_v2 }
 0x576   : > { %9857 = vmatmul.mubr.bf16.gmra.mrb[80].mxu1 %v14690_v17 }
 0x577   : > { %9860 = vmatprep.mubr.bf16.mxu1 %v14693_v56  ;;  %v14704_v56 = vld [vmem:[#allocation12_spill] sm:$0xff] }
 0x57e   : > { %9861 = vmatmul.mubr.bf16.gmra.mrb[84].mxu1 %v14696_v32 }
 0x57f   : > { %9864 = vmatprep.mubr.bf16.mxu1 %v14699_v16 }
 0x586   : > { %9865 = vmatmul.mubr.bf16.gmra.mrb[88].mxu1 %v14700_v14 }
 0x5a1   : > { %v9298_v18 = vpop.f32.mrb[156].mxu1 }
 0x5a2   : > { %v9299_v0 = vpop.f32.mrb[157].mxu1 }
 0x5a3   : > { %v9300_v1 = vadd.f32 %v9299_v0, %v9298_v18  ;;  %v9301_v42 = vpop.f32.mrb[158].mxu1  ;;  %v14705_v18 = vld [vmem:[#allocation13_spill] sm:$0xff] }
 0x5a4   : > { %v9302_v24 = vpop.f32.mrb[159].mxu1 }
 0x5a5   : > { %v9303_v6 = vadd.f32 %v9302_v24, %v9301_v42  ;;  %v13347_v21 = vadd.f32 %v13047_v8, %v9300_v1  ;;  %v14706_v1 = vld [vmem:[#allocation14_spill] sm:$0xff] }
 0x5a7   : > { %v13350_v53 = vadd.f32 %v13050_v15, %v9303_v6 }
 0x5a9   : > { %v9304_v28 = vpop.f32.mrb[160].mxu1 }
 0x5aa   : > { %v9305_v63 = vpop.f32.mrb[161].mxu1 }
 0x5ab   : > { %v9306_v54 = vadd.f32 %v9305_v63, %v9304_v28  ;;  %v9307_v19 = vpop.f32.mrb[162].mxu1 }
 0x5ac   : > { %v9308_v41 = vpop.f32.mrb[163].mxu1 }
 0x5ad   : > { %v9309_v62 = vadd.f32 %v9308_v41, %v9307_v19  ;;  %v13353_v27 = vadd.f32 %v13064_v44, %v9306_v54  ;;  %v14707_v41 = vld [vmem:[#allocation15_spill] sm:$0xff] }
 0x5af   : > { %v13356_v38 = vadd.f32 %v13067_v4, %v9309_v62  ;;  %v14701_v4 = vld [vmem:[#allocation7_spill] sm:$0xff] }
 0x5b1   : > { %v9310_v20 = vpop.f32.mrb[164].mxu1 }
 0x5b2   : > { %v9311_v13 = vpop.f32.mrb[165].mxu1 }
 0x5b3   : > { %v9312_v7 = vadd.f32 %v9311_v13, %v9310_v20  ;;  %v9313_v8 = vpop.f32.mrb[166].mxu1  ;;  %v14708_v20 = vld [vmem:[#allocation16_spill] sm:$0xff] }
 0x5b4   : > { %v9314_v55 = vpop.f32.mrb[167].mxu1 }
 0x5b5   : > { %v9315_v48 = vadd.f32 %v9314_v55, %v9313_v8  ;;  %v13359_v15 = vadd.f32 %v13083_v50, %v9312_v7 }
 0x5b7   : > { %v13362_v49 = vadd.f32 %v13086_v45, %v9315_v48  ;;  %v14703_v45 = vld [vmem:[#allocation6_spill] sm:$0xff] }
 0x5b9   : > { %v9316_v22 = vpop.f32.mrb[168].mxu1 }
 0x5ba   : > { %v9317_v12 = vpop.f32.mrb[169].mxu1 }
 0x5bb   : > { %v9318_v3 = vadd.f32 %v9317_v12, %v9316_v22  ;;  %v9319_v44 = vpop.f32.mrb[170].mxu1 }
 0x5bc   : > { %v9320_v61 = vpop.f32.mrb[171].mxu1 }
 0x5bd   : > { %v9321_v57 = vadd.f32 %v9320_v61, %v9319_v44  ;;  %v13365_v60 = vadd.f32 %v14701_v4, %v9318_v3  ;;  %v14709_v3 = vld [vmem:[#allocation20_spill] sm:$0xff]  ;;  %v14710_v61 = vld [vmem:[#allocation18_spill] sm:$0xff] }
 0x5bf   : > { %v13368_v30 = vadd.f32 %v14702_v25, %v9321_v57 }
 0x5c1   : > { %v9322_v2 = vpop.f32.mrb[172].mxu1 }
 0x5c2   : > { %v9323_v51 = vpop.f32.mrb[173].mxu1 }
 0x5c3   : > { %v9324_v39 = vadd.f32 %v9323_v51, %v9322_v2  ;;  %v9325_v50 = vpop.f32.mrb[174].mxu1 }
 0x5c4   : > { %v9326_v17 = vpop.f32.mrb[175].mxu1 }
 0x5c5   : > { %v9327_v58 = vadd.f32 %v9326_v17, %v9325_v50  ;;  %v13371_v11 = vadd.f32 %v14703_v45, %v9324_v39  ;;  %v14711_v17 = vld [vmem:[#allocation21_spill] sm:$0xff]  ;;  %v14712_v45 = vld [vmem:[#allocation22_spill] sm:$0xff] }
 0x5c7   : > { %v13374_v9 = vadd.f32 %v14704_v56, %v9327_v58 }
 0x5c9   : > { %v9328_v34 = vpop.f32.mrb[176].mxu1 }
 0x5ca   : > { %v9329_v32 = vpop.f32.mrb[177].mxu1 }
 0x5cb   : > { %v9330_v26 = vadd.f32 %v9329_v32, %v9328_v34  ;;  %v9331_v31 = vpop.f32.mrb[178].mxu1 }
 0x5cc   : > { %v9332_v16 = vpop.f32.mrb[179].mxu1 }
 0x5cd   : > { %v9333_v14 = vadd.f32 %v9332_v16, %v9331_v31  ;;  %v13377_v0 = vadd.f32 %v14705_v18, %v9330_v26 }
 0x5cf   : > { %v13380_v42 = vadd.f32 %v14706_v1, %v9333_v14 }
 0x5d1   : > { %v9334_v24 = vpop.f32.mrb[180].mxu1 }
 0x5d2   : > { %v9335_v6 = vpop.f32.mrb[181].mxu1 }
 0x5d3   : > { %v9336_v28 = vadd.f32 %v9335_v6, %v9334_v24  ;;  %v9337_v63 = vpop.f32.mrb[182].mxu1 }
 0x5d4   : > { %v9338_v54 = vpop.f32.mrb[183].mxu1 }
 0x5d5   : > { %v9339_v19 = vadd.f32 %v9338_v54, %v9337_v63  ;;  %v13383_v62 = vadd.f32 %v14707_v41, %v9336_v28 }
 0x5d7   : > { %v13386_v13 = vadd.f32 %v14708_v20, %v9339_v19 }
 0x5d9   : > { %v9340_v7 = vpop.f32.mrb[184].mxu1 }
 0x5da   : > { %v9341_v8 = vpop.f32.mrb[185].mxu1 }
 0x5db   : > { %v9342_v55 = vadd.f32 %v9341_v8, %v9340_v7  ;;  %v9343_v48 = vpop.f32.mrb[186].mxu1 }
 0x5dc   : > { %v9344_v22 = vpop.f32.mrb[187].mxu1 }
 0x5dd   : > { %v9345_v12 = vadd.f32 %v9344_v22, %v9343_v48  ;;  %v13389_v44 = vadd.f32 %v14709_v3, %v9342_v55 }
 0x5df   : > { %v13392_v57 = vadd.f32 %v14710_v61, %v9345_v12 }
 0x5e1   : > { %v9346_v4 = vpop.f32.mrb[188].mxu1 }
 0x5e2   : > { %v9347_v25 = vpop.f32.mrb[189].mxu1 }
 0x5e3   : > { %v9348_v2 = vadd.f32 %v9347_v25, %v9346_v4  ;;  %v9349_v51 = vpop.f32.mrb[190].mxu1 }
 0x5e4   : > { %v9350_v39 = vpop.f32.mrb[191].mxu1 }
 0x5e5   : > { %v9351_v50 = vadd.f32 %v9350_v39, %v9349_v51  ;;  %v13395_v58 = vadd.f32 %v14711_v17, %v9348_v2 }
 0x5e7   : > { %v13398_v56 = vadd.f32 %v14712_v45, %v9351_v50 }
 0x5e9   : > { %v9352_v34 = vpop.f32.mrb[192].mxu1 }
 0x5ea   : > { %v9353_v32 = vpop.f32.mrb[193].mxu1 }
 0x5eb   : > { %v9354_v26 = vadd.f32 %v9353_v32, %v9352_v34  ;;  %v9355_v31 = vpop.f32.mrb[194].mxu1 }
 0x5ec   : > { %v9356_v16 = vpop.f32.mrb[195].mxu1 }
 0x5ed   : > { %v9357_v14 = vadd.f32 %v9356_v16, %v9355_v31  ;;  %v13401_v18 = vadd.f32 %v13231_v10, %v9354_v26 }
 0x5ef   : > { %v13404_v1 = vadd.f32 %v13234_v29, %v9357_v14 }
 0x5f1   : > { %v9358_v24 = vpop.f32.mrb[196].mxu1 }
 0x5f2   : > { %v9359_v6 = vpop.f32.mrb[197].mxu1 }
 0x5f3   : > { %v9360_v28 = vadd.f32 %v9359_v6, %v9358_v24  ;;  %v9361_v63 = vpop.f32.mrb[198].mxu1 }
 0x5f4   : > { %v9362_v54 = vpop.f32.mrb[199].mxu1 }
 0x5f5   : > { %v9363_v19 = vadd.f32 %v9362_v54, %v9361_v63  ;;  %v13407_v41 = vadd.f32 %v13243_v36, %v9360_v28  ;;  %v13450_v63 = vld [vmem:[%s13434_s18 + $0x10] sm:$0xff] }
 0x5f7   : > { %v13410_v20 = vadd.f32 %v13246_v35, %v9363_v19 }
 0x5f9   : > { %v9364_v7 = vpop.f32.mrb[200].mxu1 }
 0x5fa   : > { %v9365_v8 = vpop.f32.mrb[201].mxu1 }
 0x5fb   : > { %v9366_v55 = vadd.f32 %v9365_v8, %v9364_v7  ;;  %v9367_v10 = vpop.f32.mrb[202].mxu1  ;;  %v7704_v7 = vsel %vm7700_vm3, %v13450_v63, 0.0  ;;  %v13458_v8 = vld [vmem:[%s13434_s18 + $0x18] sm:$0xff] }
 0x5fc   : > { %v9368_v48 = vpop.f32.mrb[203].mxu1 }
 0x5fd   : > { %v9369_v22 = vadd.f32 %v9368_v48, %v9367_v10  ;;  %v13413_v29 = vadd.f32 %v13256_v23, %v9366_v55  ;;  %v13464_v55 = vld [vmem:[%s13434_s18 + $0x28] sm:$0xff] }
 0x5ff   : > { %v13416_v12 = vadd.f32 %v13259_v33, %v9369_v22  ;;  %v7706_v22 = vsel %vm7700_vm3, %v13458_v8, 0.0 }
 0x601   : > { %v9370_v3 = vpop.f32.mrb[204].mxu1 }
 0x602   : > { %v9371_v61 = vpop.f32.mrb[205].mxu1 }
 0x603   : > { %v9372_v4 = vadd.f32 %v9371_v61, %v9370_v3  ;;  %v9373_v36 = vpop.f32.mrb[206].mxu1  ;;  %v13471_v61 = vld [vmem:[%s13434_s18 + $0x30] sm:$0xff] }
 0x604   : > { %v9374_v25 = vpop.f32.mrb[207].mxu1 }
 0x605   : > { %v9375_v2 = vadd.f32 %v9374_v25, %v9373_v36  ;;  %v13419_v35 = vadd.f32 %v13272_v46, %v9372_v4 }
 0x607   : > { %v13422_v51 = vadd.f32 %v13276_v5, %v9375_v2  ;;  %v7710_v2 = vsel %vm7700_vm3, %v13464_v55, 0.0 }
 0x609   : > { %v9376_v39 = vpop.f32.mrb[208].mxu1 }
 0x60a   : > { %v9377_v50 = vpop.f32.mrb[209].mxu1 }
 0x60b   : > { %v9378_v23 = vadd.f32 %v9377_v50, %v9376_v39  ;;  %v9379_v17 = vpop.f32.mrb[210].mxu1  ;;  %v13476_v50 = vld [vmem:[%s13434_s18 + $0x38] sm:$0xff] }
 0x60c   : > { %v9380_v45 = vpop.f32.mrb[211].mxu1 }
 0x60d   : > { %v9381_v33 = vadd.f32 %v9380_v45, %v9379_v17  ;;  %v13425_v34 = vadd.f32 %v13290_v59, %v9378_v23  ;;  %v13437_v59 = vld [vmem:[%s13434_s18] sm:$0xff] }
 0x60e   : > { %v7701_v6 = vsel %vm7700_vm3, %v13437_v59, 0.0 }
 0x60f   : > { %v13428_v32 = vadd.f32 %v13293_v43, %v9381_v33  ;;  %v13440_v43 = vld [vmem:[%s13434_s18 + $0x8] sm:$0xff]  ;;  %v7712_v33 = vsel %vm7700_vm3, %v13471_v61, 0.0 }
 0x610   : > { %v7702_v28 = vsel %vm7700_vm3, %v13440_v43, 0.0 }
 0x611   : > { %v9382_v26 = vpop.f32.mrb[212].mxu1  ;;  %v7703_v54 = vadd.f32 %v7702_v28, %v7701_v6 }
 0x612   : > { %v9383_v31 = vpop.f32.mrb[213].mxu1 }
 0x613   : > { %v9384_v46 = vadd.f32 %v9383_v31, %v9382_v26  ;;  %v9385_v16 = vpop.f32.mrb[214].mxu1  ;;  %v7705_v10 = vadd.f32 %v7704_v7, %v7703_v54  ;;  %v13484_v26 = vld [vmem:[%s13434_s18 + $0x40] sm:$0xff]  ;;  %v13503_v7 = vld [vmem:[%s13434_s18 + $0x50] sm:$0xff] }
 0x614   : > { %v9386_v5 = vpop.f32.mrb[215].mxu1  ;;  %v7716_v28 = vsel %vm7700_vm3, %v13484_v26, 0.0 }
 0x615   : > { %v9387_v14 = vadd.f32 %v9386_v5, %v9385_v16  ;;  %v13443_v24 = vadd.f32 %v13296_v52, %v9384_v46  ;;  %v13461_v52 = vld [vmem:[%s13434_s18 + $0x20] sm:$0xff]  ;;  %v7707_v4 = vadd.f32 %v7706_v22, %v7705_v10  ;;  %v7714_v16 = vsel %vm7700_vm3, %v13476_v50, 0.0  ;;  %v13492_v5 = vld [vmem:[%s13434_s18 + $0x48] sm:$0xff] }
 0x617   : > { %v13453_v19 = vadd.f32 %v13302_v47, %v9387_v14  ;;  %v7708_v47 = vsel %vm7700_vm3, %v13461_v52, 0.0 }
 0x618   : > { %v7709_v23 = vadd.f32 %v7708_v47, %v7707_v4  ;;  %v7718_v47 = vsel %vm7700_vm3, %v13492_v5, 0.0 }
 0x619   : > { %v9388_v48 = vpop.f32.mrb[216].mxu1 }
 0x61a   : > { %v9389_v3 = vpop.f32.mrb[217].mxu1  ;;  %v7711_v31 = vadd.f32 %v7710_v2, %v7709_v23 }
 0x61b   : > { %v9390_v36 = vadd.f32 %v9389_v3, %v9388_v48  ;;  %v9391_v25 = vpop.f32.mrb[218].mxu1 }
 0x61c   : > { %v9392_v39 = vpop.f32.mrb[219].mxu1  ;;  %v7713_v14 = vadd.f32 %v7712_v33, %v7711_v31  ;;  %v13534_v33 = vld [vmem:[%s13434_s18 + $0x68] sm:$0xff] }
 0x61d   : > { %v9393_v17 = vadd.f32 %v9392_v39, %v9391_v25  ;;  %v13479_v45 = vadd.f32 %v13308_v37, %v9390_v36  ;;  %v13497_v37 = vld [vmem:[%s14363_s5] ss:$0 sm:$0xff]  ;;  %v13513_v25 = vld [vmem:[%s13434_s18 + $0x58] sm:$0xff] }
 0x61e   : > { %v7715_v10 = vadd.f32 %v7714_v16, %v7713_v14 }
 0x61f   : > { %v13487_v46 = vadd.f32 %v13314_v40, %v9393_v17 }
 0x621   : > { %v9838_v6 = vpop.f32.mrb[60].mxu1 }
 0x622   : > { %v9886_v54 = vadd.f32 %v13353_v27, %v9838_v6  ;;  %v7470_v40 = vpop.f32.mrb[61].mxu1  ;;  %v7717_v27 = vadd.f32 %v7716_v28, %v7715_v10 }
 0x623   : > { %v9889_v48 = vadd.f32 %v13347_v21, %v7470_v40  ;;  %v9839_v22 = vpop.f32.mrb[62].mxu1  ;;  %v7720_v21 = vsel %vm7700_vm3, %v13503_v7, 0.0  ;;  %v13545_v40 = vld [vmem:[%s13434_s18 + $0x70] sm:$0xff] }
 0x624   : > { %v9892_v3 = vadd.f32 %v13356_v38, %v9839_v22  ;;  %v7473_v4 = vpop.f32.mrb[63].mxu1  ;;  %v13510_v36 = vadd.f32 %v9886_v54, %v13497_v37  ;;  %v13524_v38 = vld [vmem:[%s13434_s18 + $0x60] sm:$0xff]  ;;  %v7719_v23 = vadd.f32 %v7718_v47, %v7717_v27  ;;  %v7726_v47 = vsel %vm7700_vm3, %v13534_v33, 0.0  ;;  %v13557_v27 = vld [vmem:[%s13434_s18 + $0x78] sm:$0xff] }
 0x625   : > { %v9895_v2 = vadd.f32 %v13350_v53, %v7473_v4  ;;  %v13517_v39 = vadd.f32 %v9889_v48, %v13497_v37  ;;  %v7722_v53 = vsel %vm7700_vm3, %v13513_v25, 0.0  ;;  %v7724_v6 = vsel %vm7700_vm3, %v13524_v38, 0.0 }
 0x626   : > { %8040 = vrot.lane.b32.xlu1 %v13510_v36, %s10488_s22  ;;  %v13531_v17 = vadd.f32 %v9892_v3, %v13497_v37  ;;  %v7721_v31 = vadd.f32 %v7720_v21, %v7719_v23 }
 0x627   : > { %8036 = vrot.lane.b32.xlu0 %v13517_v39, %s10488_s22  ;;  %v13537_v16 = vadd.f32 %v9895_v2, %v13497_v37 }
 0x628   : > { %v7723_v10 = vadd.f32 %v7722_v53, %v7721_v31  ;;  %v13566_v53 = vld [vmem:[%s13434_s18 + $0x80] sm:$0xff] }
 0x629   : > { %v9842_v14 = vpop.f32.mrb[64].mxu1 }
 0x62a   : > { %v9898_v28 = vadd.f32 %v13365_v60, %v9842_v14  ;;  %v7486_v54 = vpop.f32.mrb[65].mxu1  ;;  %8042 = vrot.lane.b32.xlu1 %v13531_v17, %s10488_s22  ;;  %v7725_v2 = vadd.f32 %v7724_v6, %v7723_v10 }
 0x62b   : > { %v9901_v48 = vadd.f32 %v13359_v15, %v7486_v54  ;;  %v9843_v22 = vpop.f32.mrb[66].mxu1  ;;  %8038 = vrot.lane.b32.xlu0 %v13537_v16, %s10488_s22  ;;  %v7728_v15 = vsel %vm7700_vm3, %v13545_v40, 0.0  ;;  %v7732_v54 = vsel %vm7700_vm3, %v13566_v53, 0.0 }
 0x62c   : > { %v13553_v60 = vadd.f32 %v9898_v28, %v13497_v37  ;;  %v9904_v3 = vadd.f32 %v13368_v30, %v9843_v22  ;;  %v7489_v4 = vpop.f32.mrb[67].mxu1  ;;  %v7727_v31 = vadd.f32 %v7726_v47, %v7725_v2  ;;  %v7730_v30 = vsel %vm7700_vm3, %v13557_v27, 0.0 }
 0x62d   : > { %v9907_v21 = vadd.f32 %v13362_v49, %v7489_v4  ;;  %v13575_v49 = vld [vmem:[%s13434_s18 + $0x88] sm:$0xff]  ;;  %v13578_v6 = vadd.f32 %v9901_v48, %v13497_v37 }
 0x62e   : > { %v13563_v23 = vadd.f32 %v9904_v3, %v13497_v37  ;;  %v7729_v14 = vadd.f32 %v7728_v15, %v7727_v31  ;;  %v13587_v3 = vld [vmem:[%s13434_s18 + $0x90] sm:$0xff]  ;;  %v7734_v48 = vsel %vm7700_vm3, %v13575_v49, 0.0 }
 0x62f   : > { %8048 = vrot.lane.b32.xlu0 %v13553_v60, %s10488_s22  ;;  %14714 = vst [vmem:[#allocation23_spill] sm:$0xff] %v13578_v6  ;;  %v13583_v10 = vadd.f32 %v9907_v21, %v13497_v37 }
 0x630   : > { %14713 = vst [vmem:[#allocation24_spill] sm:$0xff] %v13563_v23  ;;  %8050 = vrot.lane.b32.xlu1 %v13563_v23, %s10488_s22  ;;  %v7731_v4 = vadd.f32 %v7730_v30, %v7729_v14  ;;  %v13601_v30 = vld [vmem:[%s13434_s18 + $0x98] sm:$0xff] }
 0x631   : > { %v9846_v28 = vpop.f32.mrb[68].mxu1  ;;  %14715 = vst [vmem:[#allocation25_spill] sm:$0xff] %v13583_v10 }
 0x632   : > { %v9910_v22 = vadd.f32 %v13377_v0, %v9846_v28  ;;  %v7502_v47 = vpop.f32.mrb[69].mxu1  ;;  %v7736_v28 = vsel %vm7700_vm3, %v13587_v3, 0.0 }
 0x633   : > { %v9913_v2 = vadd.f32 %v13371_v11, %v7502_v47  ;;  %v9847_v15 = vpop.f32.mrb[70].mxu1  ;;  %8044 = vrot.lane.b32.xlu0 %v13578_v6, %s10488_s22  ;;  %v7733_v11 = vadd.f32 %v7732_v54, %v7731_v4 }
 0x634   : > { %v13595_v21 = vadd.f32 %v9910_v22, %v13497_v37  ;;  %v9916_v0 = vadd.f32 %v13380_v42, %v9847_v15  ;;  %v7505_v31 = vpop.f32.mrb[71].mxu1  ;;  %8046 = vrot.lane.b32.xlu1 %v13583_v10, %s10488_s22  ;;  %v13610_v22 = vld [vmem:[%s13434_s18 + $0xa0] sm:$0xff]  ;;  %v7738_v42 = vsel %vm7700_vm3, %v13601_v30, 0.0 }
 0x635   : > { %v9919_v14 = vadd.f32 %v13374_v9, %v7505_v31  ;;  %v7735_v6 = vadd.f32 %v7734_v48, %v7733_v11  ;;  %v13619_v9 = vld [vmem:[%s13434_s18 + $0xa8] sm:$0xff]  ;;  %v13622_v4 = vadd.f32 %v9913_v2, %v13497_v37  ;;  %v7740_v48 = vsel %vm7700_vm3, %v13610_v22, 0.0 }
 0x636   : > { %14716 = vst [vmem:[#allocation4_spill] sm:$0xff] %v13595_v21  ;;  %v13607_v47 = vadd.f32 %v9916_v0, %v13497_v37  ;;  %v7742_v2 = vsel %vm7700_vm3, %v13619_v9, 0.0 }
 0x637   : > { %8056 = vrot.lane.b32.xlu0 %v13595_v21, %s10488_s22  ;;  %v7737_v54 = vadd.f32 %v7736_v28, %v7735_v6  ;;  %14718 = vst [vmem:[#allocation26_spill] sm:$0xff] %v13622_v4  ;;  %v13627_v0 = vadd.f32 %v9919_v14, %v13497_v37  ;;  %v13631_v21 = vld [vmem:[%s13434_s18 + $0xb0] sm:$0xff] }
 0x638   : > { %14717 = vst [vmem:[#allocation5_spill] sm:$0xff] %v13607_v47  ;;  %8058 = vrot.lane.b32.xlu1 %v13607_v47, %s10488_s22 }
 0x639   : > { %v9850_v15 = vpop.f32.mrb[72].mxu1  ;;  %14719 = vst [vmem:[#allocation27_spill] sm:$0xff] %v13627_v0  ;;  %v7739_v47 = vadd.f32 %v7738_v42, %v7737_v54  ;;  %v13645_v42 = vld [vmem:[%s13434_s18 + $0xb8] sm:$0xff] }
 0x63a   : > { %v9922_v31 = vadd.f32 %v13389_v44, %v9850_v15  ;;  %v7518_v11 = vpop.f32.mrb[73].mxu1 }
 0x63b   : > { %v9925_v6 = vadd.f32 %v13383_v62, %v7518_v11  ;;  %v9851_v28 = vpop.f32.mrb[74].mxu1  ;;  %8052 = vrot.lane.b32.xlu0 %v13622_v4, %s10488_s22  ;;  %v7741_v62 = vadd.f32 %v7740_v48, %v7739_v47  ;;  %v7744_v11 = vsel %vm7700_vm3, %v13631_v21, 0.0 }
 0x63c   : > { %v13639_v14 = vadd.f32 %v9922_v31, %v13497_v37  ;;  %v9928_v44 = vadd.f32 %v13392_v57, %v9851_v28  ;;  %v7521_v15 = vpop.f32.mrb[75].mxu1  ;;  %8054 = vrot.lane.b32.xlu1 %v13627_v0, %s10488_s22  ;;  %v13654_v31 = vld [vmem:[%s13434_s18 + $0xc0] sm:$0xff]  ;;  %v7746_v57 = vsel %vm7700_vm3, %v13645_v42, 0.0 }
 0x63d   : > { %v9931_v54 = vadd.f32 %v13386_v13, %v7521_v15  ;;  %v7743_v10 = vadd.f32 %v7742_v2, %v7741_v62  ;;  %v13663_v13 = vld [vmem:[%s13434_s18 + $0xc8] sm:$0xff]  ;;  %v13666_v48 = vadd.f32 %v9925_v6, %v13497_v37  ;;  %v7748_v2 = vsel %vm7700_vm3, %v13654_v31, 0.0 }
 0x63e   : > { %14720 = vst [vmem:[#allocation17_spill] sm:$0xff] %v13639_v14  ;;  %v13651_v4 = vadd.f32 %v9928_v44, %v13497_v37  ;;  %v7750_v6 = vsel %vm7700_vm3, %v13663_v13, 0.0 }
 0x63f   : > { %8064 = vrot.lane.b32.xlu0 %v13639_v14, %s10488_s22  ;;  %v7745_v47 = vadd.f32 %v7744_v11, %v7743_v10  ;;  %14722 = vst [vmem:[#allocation41_spill] sm:$0xff] %v13666_v48  ;;  %v13671_v44 = vadd.f32 %v9931_v54, %v13497_v37  ;;  %v13675_v14 = vld [vmem:[%s13434_s18 + $0xd0] sm:$0xff] }
 0x640   : > { %14721 = vst [vmem:[#allocation19_spill] sm:$0xff] %v13651_v4  ;;  %8066 = vrot.lane.b32.xlu1 %v13651_v4, %s10488_s22 }
 0x641   : > { %v9854_v28 = vpop.f32.mrb[76].mxu1  ;;  %14723 = vst [vmem:[#allocation46_spill] sm:$0xff] %v13671_v44  ;;  %v7747_v4 = vadd.f32 %v7746_v57, %v7745_v47  ;;  %v13689_v57 = vld [vmem:[%s13434_s18 + $0xd8] sm:$0xff] }
 0x642   : > { %v9934_v15 = vadd.f32 %v13401_v18, %v9854_v28  ;;  %v7534_v62 = vpop.f32.mrb[77].mxu1 }
 0x643   : > { %v9937_v10 = vadd.f32 %v13395_v58, %v7534_v62  ;;  %v9855_v11 = vpop.f32.mrb[78].mxu1  ;;  %8060 = vrot.lane.b32.xlu0 %v13666_v48, %s10488_s22  ;;  %v7749_v58 = vadd.f32 %v7748_v2, %v7747_v4  ;;  %v7752_v62 = vsel %vm7700_vm3, %v13675_v14, 0.0 }
 0x644   : > { %v13683_v54 = vadd.f32 %v9934_v15, %v13497_v37  ;;  %v9940_v18 = vadd.f32 %v13404_v1, %v9855_v11  ;;  %v7537_v28 = vpop.f32.mrb[79].mxu1  ;;  %8062 = vrot.lane.b32.xlu1 %v13671_v44, %s10488_s22  ;;  %v13698_v15 = vld [vmem:[%s13434_s18 + $0xe0] sm:$0xff]  ;;  %v7754_v1 = vsel %vm7700_vm3, %v13689_v57, 0.0 }
 0x645   : > { %v9943_v47 = vadd.f32 %v13398_v56, %v7537_v28  ;;  %v7751_v0 = vadd.f32 %v7750_v6, %v7749_v58  ;;  %v13707_v56 = vld [vmem:[%s13434_s18 + $0xe8] sm:$0xff]  ;;  %v13710_v2 = vadd.f32 %v9937_v10, %v13497_v37  ;;  %v7756_v6 = vsel %vm7700_vm3, %v13698_v15, 0.0 }
 0x646   : > { %14724 = vst [vmem:[#allocation44_spill] sm:$0xff] %v13683_v54  ;;  %v13695_v48 = vadd.f32 %v9940_v18, %v13497_v37  ;;  %v7758_v10 = vsel %vm7700_vm3, %v13707_v56, 0.0 }
 0x647   : > { %8072 = vrot.lane.b32.xlu0 %v13683_v54, %s10488_s22  ;;  %v7753_v4 = vadd.f32 %v7752_v62, %v7751_v0  ;;  %v13715_v18 = vadd.f32 %v9943_v47, %v13497_v37  ;;  %v13719_v54 = vld [vmem:[%s13434_s18 + $0xf0] sm:$0xff] }
 0x648   : > { %14725 = vst [vmem:[#allocation28_spill] sm:$0xff] %v13695_v48  ;;  %8074 = vrot.lane.b32.xlu1 %v13695_v48, %s10488_s22 }
 0x649   : > { %v9858_v11 = vpop.f32.mrb[80].mxu1  ;;  %v7755_v48 = vadd.f32 %v7754_v1, %v7753_v4  ;;  %v7760_v4 = vsel %vm7700_vm3, %v13719_v54, 0.0 }
 0x64a   : > { %v9946_v28 = vadd.f32 %v13413_v29, %v9858_v11  ;;  %v7550_v58 = vpop.f32.mrb[81].mxu1  ;;  %v13733_v29 = vld [vmem:[%s13434_s18 + $0xf8] sm:$0xff] }
 0x64b   : > { %v9949_v44 = vadd.f32 %v13407_v41, %v7550_v58  ;;  %v9859_v0 = vpop.f32.mrb[82].mxu1  ;;  %8068 = vrot.lane.b32.xlu0 %v13710_v2, %s10488_s22  ;;  %v7757_v1 = vadd.f32 %v7756_v6, %v7755_v48 }
 0x64c   : > { %v13727_v62 = vadd.f32 %v9946_v28, %v13497_v37  ;;  %v9952_v47 = vadd.f32 %v13416_v12, %v9859_v0  ;;  %v7553_v23 = vpop.f32.mrb[83].mxu1  ;;  %8070 = vrot.lane.b32.xlu1 %v13715_v18, %s10488_s22  ;;  %v7762_v12 = vsel %vm7700_vm3, %v13733_v29, 0.0 }
 0x64d   : > { %v9955_v41 = vadd.f32 %v13410_v20, %v7553_v23  ;;  %v7759_v58 = vadd.f32 %v7758_v10, %v7757_v1  ;;  %v13748_v48 = vadd.f32 %v9949_v44, %v13497_v37 }
 0x64e   : > { %v13739_v11 = vadd.f32 %v9952_v47, %v13497_v37 }
 0x64f   : > { %8080 = vrot.lane.b32.xlu0 %v13727_v62, %s10488_s22  ;;  %v7761_v28 = vadd.f32 %v7760_v4, %v7759_v58  ;;  %v13751_v23 = vadd.f32 %v9955_v41, %v13497_v37 }
 0x650   : > { %14726 = vst [vmem:[#allocation29_spill] sm:$0xff] %v13739_v11  ;;  %8082 = vrot.lane.b32.xlu1 %v13739_v11, %s10488_s22 }
 0x651   : > { %v9862_v20 = vpop.f32.mrb[84].mxu1  ;;  %v7763_v10 = vadd.f32 %v7762_v12, %v7761_v28 }
 0x652   : > { %v9958_v6 = vadd.f32 %v13425_v34, %v9862_v20  ;;  %v7566_v0 = vpop.f32.mrb[85].mxu1 }
 0x653   : > { %v9961_v47 = vadd.f32 %v13419_v35, %v7566_v0  ;;  %v9863_v1 = vpop.f32.mrb[86].mxu1  ;;  %8076 = vrot.lane.b32.xlu0 %v13748_v48, %s10488_s22  ;;  %v7764_v41 = vrot.slane %v7763_v10, 4 }
 0x654   : > { %v13758_v11 = vadd.f32 %v9958_v6, %v13497_v37  ;;  %v9964_v44 = vadd.f32 %v13428_v32, %v9863_v1  ;;  %v7569_v4 = vpop.f32.mrb[87].mxu1  ;;  %8078 = vrot.lane.b32.xlu1 %v13751_v23, %s10488_s22 }
 0x655   : > { %v9967_v34 = vadd.f32 %v13422_v51, %v7569_v4  ;;  %v7765_v35 = vadd.f32 %v7764_v41, %v7763_v10  ;;  %v13772_v32 = vadd.f32 %v9961_v47, %v13497_v37 }
 0x656   : > { %v13765_v58 = vadd.f32 %v9964_v44, %v13497_v37 }
 0x657   : > { %8088 = vrot.lane.b32.xlu0 %v13758_v11, %s10488_s22  ;;  %v7766_v12 = vrot.slane %v7765_v35, 2  ;;  %v13775_v20 = vadd.f32 %v9967_v34, %v13497_v37 }
 0x658   : > { %8090 = vrot.lane.b32.xlu1 %v13765_v58, %s10488_s22 }
 0x659   : > { %v9866_v28 = vpop.f32.mrb[88].mxu1  ;;  %v7767_v0 = vadd.f32 %v7766_v12, %v7765_v35 }
 0x65a   : > { %v9970_v51 = vadd.f32 %v13479_v45, %v9866_v28  ;;  %v7582_v6 = vpop.f32.mrb[89].mxu1 }
 0x65b   : > { %v9973_v10 = vadd.f32 %v13443_v24, %v7582_v6  ;;  %v9867_v1 = vpop.f32.mrb[90].mxu1  ;;  %8084 = vrot.lane.b32.xlu0 %v13772_v32, %s10488_s22  ;;  %v7768_v45 = vrot.slane %v7767_v0, 1 }
 0x65c   : > { %v9976_v44 = vadd.f32 %v13487_v46, %v9867_v1  ;;  %v7585_v4 = vpop.f32.mrb[91].mxu1  ;;  %8086 = vrot.lane.b32.xlu1 %v13775_v20, %s10488_s22  ;;  %v13794_v24 = vadd.f32 %v9970_v51, %v13497_v37 }
 0x65d   : > { %v13785_v47 = vadd.f32 %v9973_v10, %v13497_v37  ;;  %v9979_v41 = vadd.f32 %v13453_v19, %v7585_v4  ;;  %v7769_v46 = vadd.f32 %v7768_v45, %v7767_v0 }
 0x65e   : > { %v13799_v35 = vadd.f32 %v9976_v44, %v13497_v37 }
 0x65f   : > { %v13789_v34 = vadd.f32 %v9979_v41, %v13497_v37  ;;  %8092 = vrot.lane.b32.xlu0 %v13785_v47, %s10488_s22  ;;  %v13805_v19 = vmul.f32 0.00390625, %v7769_v46 }
 0x661   : > { %8094 = vrot.lane.b32.xlu1 %v13789_v34, %s10488_s22  ;;  %v13809_v12 = vsub.f32 %v13437_v59, %v13805_v19  ;;  %v13813_v28 = vsub.f32 %v13440_v43, %v13805_v19  ;;  %v13817_v37 = vsub.f32 %v13450_v63, %v13805_v19  ;;  %v13821_v51 = vsub.f32 %v13458_v8, %v13805_v19 }
 0x662   : > { %v13825_v6 = vsub.f32 %v13461_v52, %v13805_v19  ;;  %v13835_v63 = vsub.f32 %v13464_v55, %v13805_v19  ;;  %v13841_v52 = vsub.f32 %v13471_v61, %v13805_v19  ;;  %v13850_v55 = vsub.f32 %v13476_v50, %v13805_v19 }
 0x663   : > { %8096 = vrot.lane.b32.xlu0 %v13794_v24, %s10488_s22  ;;  %v7804_v59 = vmul.f32 %v13809_v12, %v13809_v12  ;;  %v7805_v0 = vmul.f32 %v13813_v28, %v13813_v28  ;;  %v7806_v43 = vmul.f32 %v13817_v37, %v13817_v37  ;;  %v7807_v8 = vmul.f32 %v13821_v51, %v13821_v51 }
 0x664   : > { %14727 = vst [vmem:[#allocation47_spill] sm:$0xff] %v13825_v6  ;;  %v7808_v10 = vmul.f32 %v13825_v6, %v13825_v6  ;;  %v7809_v45 = vmul.f32 %v13835_v63, %v13835_v63  ;;  %v13857_v6 = vsub.f32 %v13484_v26, %v13805_v19  ;;  %v13864_v50 = vsub.f32 %v13492_v5, %v13805_v19 }
 0x665   : > { %8098 = vrot.lane.b32.xlu1 %v13799_v35, %s10488_s22  ;;  %v7836_v1 = vsel %vm7700_vm3, %v7804_v59, 0.0  ;;  %v7837_v44 = vsel %vm7700_vm3, %v7805_v0, 0.0  ;;  %v7839_v4 = vsel %vm7700_vm3, %v7806_v43, 0.0  ;;  %v7841_v61 = vsel %vm7700_vm3, %v7807_v8, 0.0 }
 0x666   : > { %v7838_v41 = vadd.f32 %v7837_v44, %v7836_v1  ;;  %v7810_v59 = vmul.f32 %v13841_v52, %v13841_v52  ;;  %v7843_v0 = vsel %vm7700_vm3, %v7808_v10, 0.0  ;;  %v7811_v1 = vmul.f32 %v13850_v55, %v13850_v55 }
 0x667   : > { %v7845_v8 = vsel %vm7700_vm3, %v7809_v45, 0.0  ;;  %v13871_v26 = vsub.f32 %v13503_v7, %v13805_v19  ;;  %v13878_v5 = vsub.f32 %v13513_v25, %v13805_v19  ;;  %v13885_v7 = vsub.f32 %v13524_v38, %v13805_v19 }
 0x668   : > { %v7840_v46 = vadd.f32 %v7839_v4, %v7838_v41  ;;  %v7812_v4 = vmul.f32 %v13857_v6, %v13857_v6  ;;  %v7847_v10 = vsel %vm7700_vm3, %v7810_v59, 0.0  ;;  %v7849_v45 = vsel %vm7700_vm3, %v7811_v1, 0.0 }
 0x669   : > { %v13892_v25 = vsub.f32 %v13534_v33, %v13805_v19  ;;  %v13899_v38 = vsub.f32 %v13545_v40, %v13805_v19  ;;  %v13906_v33 = vsub.f32 %v13557_v27, %v13805_v19  ;;  %v13913_v40 = vsub.f32 %v13566_v53, %v13805_v19 }
 0x66a   : > { %v7842_v43 = vadd.f32 %v7841_v61, %v7840_v46  ;;  %v7813_v61 = vmul.f32 %v13864_v50, %v13864_v50  ;;  %v7851_v59 = vsel %vm7700_vm3, %v7812_v4, 0.0  ;;  %v13920_v27 = vsub.f32 %v13575_v49, %v13805_v19 }
 0x66b   : > { %14728 = vst [vmem:[#allocation50_spill] sm:$0xff] %v13913_v40  ;;  %v13927_v53 = vsub.f32 %v13587_v3, %v13805_v19  ;;  %v13934_v49 = vsub.f32 %v13601_v30, %v13805_v19  ;;  %v13941_v3 = vsub.f32 %v13610_v22, %v13805_v19  ;;  %v13948_v30 = vsub.f32 %v13619_v9, %v13805_v19 }
 0x66c   : > { %v7844_v44 = vadd.f32 %v7843_v0, %v7842_v43  ;;  %v7814_v0 = vmul.f32 %v13871_v26, %v13871_v26  ;;  %v7853_v1 = vsel %vm7700_vm3, %v7813_v61, 0.0  ;;  %14729 = vst [vmem:[#allocation30_spill] sm:$0xff] %v13920_v27  ;;  %v13955_v22 = vsub.f32 %v13631_v21, %v13805_v19 }
 0x66d   : > { %14730 = vst [vmem:[#allocation31_spill] sm:$0xff] %v13927_v53  ;;  %14731 = vst [vmem:[#allocation51_spill] sm:$0xff] %v13934_v49  ;;  %v13962_v9 = vsub.f32 %v13645_v42, %v13805_v19  ;;  %v13969_v21 = vsub.f32 %v13654_v31, %v13805_v19  ;;  %v13978_v42 = vsub.f32 %v13663_v13, %v13805_v19 }
 0x66e   : > { %v7846_v41 = vadd.f32 %v7845_v8, %v7844_v44  ;;  %v7815_v8 = vmul.f32 %v13878_v5, %v13878_v5  ;;  %v7855_v4 = vsel %vm7700_vm3, %v7814_v0, 0.0  ;;  %14732 = vst [vmem:[#allocation32_spill] sm:$0xff] %v13941_v3  ;;  %14733 = vst [vmem:[#allocation33_spill] sm:$0xff] %v13948_v30  ;;  %v13994_v13 = vsub.f32 %v13689_v57, %v13805_v19 }
 0x66f   : > { %14734 = vst [vmem:[#allocation55_spill] sm:$0xff] %v13955_v22  ;;  %14735 = vst [vmem:[#allocation58_spill] sm:$0xff] %v13962_v9 }
 0x670   : > { %v7848_v46 = vadd.f32 %v7847_v10, %v7846_v41  ;;  %v7816_v10 = vmul.f32 %v13885_v7, %v13885_v7  ;;  %v7857_v61 = vsel %vm7700_vm3, %v7815_v8, 0.0  ;;  %14736 = vst [vmem:[#allocation34_spill] sm:$0xff] %v13969_v21  ;;  %14737 = vst [vmem:[#allocation35_spill] sm:$0xff] %v13978_v42 }
 0x671   : > { %14739 = vst [vmem:[#allocation62_spill] sm:$0xff] %v13994_v13 }
 0x672   : > { %v7850_v43 = vadd.f32 %v7849_v45, %v7848_v46  ;;  %v7817_v45 = vmul.f32 %v13892_v25, %v13892_v25  ;;  %v7859_v0 = vsel %vm7700_vm3, %v7816_v10, 0.0 }
 0x674   : > { %v7852_v44 = vadd.f32 %v7851_v59, %v7850_v43  ;;  %v7818_v59 = vmul.f32 %v13899_v38, %v13899_v38  ;;  %v7861_v8 = vsel %vm7700_vm3, %v7817_v45, 0.0 }
 0x676   : > { %v7854_v41 = vadd.f32 %v7853_v1, %v7852_v44  ;;  %v7819_v1 = vmul.f32 %v13906_v33, %v13906_v33  ;;  %v7863_v10 = vsel %vm7700_vm3, %v7818_v59, 0.0 }
 0x678   : > { %v7856_v46 = vadd.f32 %v7855_v4, %v7854_v41  ;;  %v7820_v4 = vmul.f32 %v13913_v40, %v13913_v40  ;;  %v7865_v45 = vsel %vm7700_vm3, %v7819_v1, 0.0 }
 0x67a   : > { %v7858_v43 = vadd.f32 %v7857_v61, %v7856_v46  ;;  %v7821_v61 = vmul.f32 %v13920_v27, %v13920_v27  ;;  %v7867_v59 = vsel %vm7700_vm3, %v7820_v4, 0.0 }
 0x67c   : > { %v7860_v44 = vadd.f32 %v7859_v0, %v7858_v43  ;;  %v7822_v0 = vmul.f32 %v13927_v53, %v13927_v53  ;;  %v7869_v1 = vsel %vm7700_vm3, %v7821_v61, 0.0 }
 0x67e   : > { %v7862_v41 = vadd.f32 %v7861_v8, %v7860_v44  ;;  %v7823_v8 = vmul.f32 %v13934_v49, %v13934_v49  ;;  %v7871_v4 = vsel %vm7700_vm3, %v7822_v0, 0.0  ;;  %v7942_v49 = vadd.f32 1.0, %v13510_v36  ;;  %v14762_v36 = vld [vmem:[#allocation26_spill] sm:$0xff] }
 0x680   : > { %v7864_v46 = vadd.f32 %v7863_v10, %v7862_v41  ;;  %v7824_v10 = vmul.f32 %v13941_v3, %v13941_v3  ;;  %v7873_v61 = vsel %vm7700_vm3, %v7823_v8, 0.0  ;;  %v7827_v8 = vmul.f32 %v13962_v9, %v13962_v9 }
 0x682   : > { %v7866_v43 = vadd.f32 %v7865_v45, %v7864_v46  ;;  %v7825_v45 = vmul.f32 %v13948_v30, %v13948_v30  ;;  %v7875_v0 = vsel %vm7700_vm3, %v7824_v10, 0.0  ;;  %v7828_v10 = vmul.f32 %v13969_v21, %v13969_v21 }
 0x683   : > { %v14021_v21 = vsub.f32 %v13719_v54, %v13805_v19 }
 0x684   : > { %v7868_v44 = vadd.f32 %v7867_v59, %v7866_v43  ;;  %v7826_v59 = vmul.f32 %v13955_v22, %v13955_v22 }
 0x685   : > { %14742 = vst [vmem:[#allocation37_spill] sm:$0xff] %v14021_v21 }
 0x686   : > { %v7870_v41 = vadd.f32 %v7869_v1, %v7868_v44  ;;  %v7877_v44 = vsel %vm7700_vm3, %v7825_v45, 0.0  ;;  %v7829_v45 = vmul.f32 %v13978_v42, %v13978_v42  ;;  %v14012_v42 = vsub.f32 %v13707_v56, %v13805_v19 }
 0x688   : > { %v7872_v46 = vadd.f32 %v7871_v4, %v7870_v41  ;;  %v13987_v41 = vsub.f32 %v13675_v14, %v13805_v19  ;;  %v14003_v14 = vsub.f32 %v13698_v15, %v13805_v19  ;;  %14741 = vst [vmem:[#allocation36_spill] sm:$0xff] %v14012_v42 }
 0x68a   : > { %v7874_v43 = vadd.f32 %v7873_v61, %v7872_v46  ;;  %14738 = vst [vmem:[#allocation63_spill] sm:$0xff] %v13987_v41  ;;  %v7879_v61 = vsel %vm7700_vm3, %v7826_v59, 0.0  ;;  %14740 = vst [vmem:[#allocation11_spill] sm:$0xff] %v14003_v14  ;;  %v7830_v59 = vmul.f32 %v13987_v41, %v13987_v41 }
 0x68c   : > { %v7876_v4 = vadd.f32 %v7875_v0, %v7874_v43  ;;  %v7881_v0 = vsel %vm7700_vm3, %v7827_v8, 0.0  ;;  %v7831_v8 = vmul.f32 %v13994_v13, %v13994_v13  ;;  %v14030_v13 = vsub.f32 %v13733_v29, %v13805_v19 }
 0x68e   : > { %v7878_v46 = vadd.f32 %v7877_v44, %v7876_v4  ;;  %v7883_v44 = vsel %vm7700_vm3, %v7828_v10, 0.0  ;;  %v7832_v10 = vmul.f32 %v14003_v14, %v14003_v14  ;;  %14743 = vst [vmem:[#allocation38_spill] sm:$0xff] %v14030_v13  ;;  %v7834_v14 = vmul.f32 %v14021_v21, %v14021_v21 }
 0x68f   : > { %v7835_v29 = vmul.f32 %v14030_v13, %v14030_v13 }
 0x690   : > { %v7880_v43 = vadd.f32 %v7879_v61, %v7878_v46  ;;  %v7885_v61 = vsel %vm7700_vm3, %v7829_v45, 0.0  ;;  %v7833_v45 = vmul.f32 %v14012_v42, %v14012_v42 }
 0x691   : > { %v7897_v21 = vsel %vm7700_vm3, %v7835_v29, 0.0 }
 0x692   : > { %v7882_v57 = vadd.f32 %v7881_v0, %v7880_v43  ;;  %v7887_v0 = vsel %vm7700_vm3, %v7830_v59, 0.0  ;;  %v7891_v59 = vsel %vm7700_vm3, %v7832_v10, 0.0  ;;  %v7893_v19 = vsel %vm7700_vm3, %v7833_v45, 0.0 }
 0x694   : > { %v7884_v46 = vadd.f32 %v7883_v44, %v7882_v57  ;;  %v7889_v44 = vsel %vm7700_vm3, %v7831_v8, 0.0  ;;  %v7895_v8 = vsel %vm7700_vm3, %v7834_v14, 0.0 }
 0x696   : > { %v7886_v56 = vadd.f32 %v7885_v61, %v7884_v46 }
 0x698   : > { %v13974_v1 = vpop.permute.xlu1 %8040  ;;  %v7888_v57 = vadd.f32 %v7887_v0, %v7886_v56 }
 0x699   : > { %v13983_v31 = vpop.permute.xlu0 %8036 }
 0x69a   : > { %v7890_v61 = vadd.f32 %v7889_v44, %v7888_v57 }
 0x69c   : > { %v14008_v4 = vpop.permute.xlu1 %8042  ;;  %v7892_v46 = vadd.f32 %v7891_v59, %v7890_v61 }
 0x69d   : > { %v13999_v30 = vpop.permute.xlu0 %8038 }
 0x69e   : > { %v7894_v56 = vadd.f32 %v7893_v19, %v7892_v46 }
 0x6a0   : > { %v7896_v3 = vadd.f32 %v7895_v8, %v7894_v56 }
 0x6a1   : > { %v14017_v15 = vpop.permute.xlu0 %8048 }
 0x6a2   : > { %v14026_v43 = vpop.permute.xlu1 %8050  ;;  %v7898_v44 = vadd.f32 %v7897_v21, %v7896_v3 }
 0x6a4   : > { %v7899_v57 = vrot.slane %v7898_v44, 4 }
 0x6a5   : > { %v14035_v54 = vpop.permute.xlu0 %8044 }
 0x6a6   : > { %v14040_v41 = vpop.permute.xlu1 %8046  ;;  %v7900_v59 = vadd.f32 %v7899_v57, %v7898_v44 }
 0x6a8   : > { %v7901_v61 = vrot.slane %v7900_v59, 2 }
 0x6a9   : > { %v14045_v42 = vpop.permute.xlu0 %8056 }
 0x6aa   : > { %v14048_v0 = vpop.permute.xlu1 %8058  ;;  %v7902_v19 = vadd.f32 %v7901_v61, %v7900_v59  ;;  %v7940_v59 = vadd.f32 1.0, %v13517_v39  ;;  %v7943_v61 = vadd.f32 1.0, %v13531_v17  ;;  %v14090_v39 = vadd.f32 1.0, %v14762_v36  ;;  %v14763_v17 = vld [vmem:[#allocation27_spill] sm:$0xff]  ;;  %v14769_v36 = vld [vmem:[#allocation28_spill] sm:$0xff] }
 0x6ab   : > { %14744 = vst [vmem:[#allocation39_spill] sm:$0xff] %v14048_v0 }
 0x6ac   : > { %v7903_v46 = vrot.slane %v7902_v19, 1 }
 0x6ad   : > { %v14051_v10 = vpop.permute.xlu0 %8052 }
 0x6ae   : > { %14745 = vst [vmem:[#allocation40_spill] sm:$0xff] %v14051_v10  ;;  %v14053_v9 = vpop.permute.xlu1 %8054  ;;  %v7904_v56 = vadd.f32 %v7903_v46, %v7902_v19  ;;  %v7946_v19 = vadd.f32 1.0, %v13553_v60  ;;  %v14757_v46 = vld [vmem:[#allocation24_spill] sm:$0xff] }
 0x6af   : > { %14746 = vst [vmem:[#allocation9_spill] sm:$0xff] %v14053_v9  ;;  %v14111_v9 = vadd.f32 1.0, %v14769_v36  ;;  %v14133_v36 = vadd.f32 1.0, %v13751_v23  ;;  %v14153_v23 = vadd.f32 1.0, %v13789_v34 }
 0x6b0   : > { %v7905_v27 = vmul.f32 0.00390625, %v7904_v56  ;;  %v7947_v56 = vadd.f32 1.0, %v14757_v46  ;;  %v14765_v46 = vld [vmem:[#allocation19_spill] sm:$0xff] }
 0x6b1   : > { %v14055_v13 = vpop.permute.xlu0 %8064  ;;  %14775 = vst [vmem:[#allocation60_spill] sm:$0xff] %v14153_v23 }
 0x6b2   : > { %14747 = vst [vmem:[#allocation43_spill] sm:$0xff] %v14055_v13  ;;  %v14057_v45 = vpop.permute.xlu1 %8066  ;;  %v7906_v40 = vadd.f32 1e-05, %v7905_v27  ;;  %v14759_v27 = vld [vmem:[#allocation25_spill] sm:$0xff] }
 0x6b3   : > { %14748 = vst [vmem:[#allocation57_spill] sm:$0xff] %v14057_v45 }
 0x6b4   : > { %10432 = vrsqrt.f32 %v7906_v40  ;;  %v7945_v40 = vadd.f32 1.0, %v14759_v27 }
 0x6b5   : > { %v14059_v22 = vpop.permute.xlu0 %8060 }
 0x6b6   : > { %14749 = vst [vmem:[#allocation61_spill] sm:$0xff] %v14059_v22  ;;  %v14061_v14 = vpop.permute.xlu1 %8062  ;;  %v14099_v22 = vadd.f32 1.0, %v14765_v46 }
 0x6b7   : > { %14750 = vst [vmem:[#allocation10_spill] sm:$0xff] %v14061_v14  ;;  %v14093_v14 = vadd.f32 1.0, %v14763_v17  ;;  %v14114_v17 = vadd.f32 1.0, %v13710_v2  ;;  %v14136_v2 = vadd.f32 1.0, %v13758_v11  ;;  %v14156_v11 = vadd.f32 1.0, %v13794_v24 }
 0x6b9   : > { %v14063_v29 = vpop.permute.xlu0 %8072  ;;  %14776 = vst [vmem:[#allocation59_spill] sm:$0xff] %v14156_v11 }
 0x6ba   : > { %14751 = vst [vmem:[#allocation45_spill] sm:$0xff] %v14063_v29  ;;  %v14065_v8 = vpop.permute.xlu1 %8074  ;;  %v14760_v29 = vld [vmem:[#allocation4_spill] sm:$0xff] }
 0x6bb   : > { %14752 = vst [vmem:[#allocation42_spill] sm:$0xff] %v14065_v8  ;;  %v7941_v8 = vadd.f32 1.0, %v13537_v16  ;;  %v14764_v16 = vld [vmem:[#allocation17_spill] sm:$0xff] }
 0x6bc   : > { %v14096_v60 = vadd.f32 1.0, %v14764_v16  ;;  %v14117_v16 = vadd.f32 1.0, %v13715_v18  ;;  %v14139_v18 = vadd.f32 1.0, %v13765_v58  ;;  %v14159_v58 = vadd.f32 1.0, %v13799_v35  ;;  %v14778_v35 = vld [vmem:[#allocation47_spill] sm:$0xff] }
 0x6bd   : > { %v14067_v3 = vpop.permute.xlu0 %8068 }
 0x6be   : > { %14753 = vst [vmem:[#allocation48_spill] sm:$0xff] %v14067_v3  ;;  %v14069_v21 = vpop.permute.xlu1 %8070  ;;  %v14758_v3 = vld [vmem:[#allocation23_spill] sm:$0xff]  ;;  %14777 = vst [vmem:[#allocation64_spill] sm:$0xff] %v14159_v58 }
 0x6bf   : > { %14754 = vst [vmem:[#allocation77_spill] sm:$0xff] %v14069_v21  ;;  %v7944_v21 = vadd.f32 1.0, %v14758_v3  ;;  %v14766_v3 = vld [vmem:[#allocation41_spill] sm:$0xff] }
 0x6c0   : > { %v14102_v27 = vadd.f32 1.0, %v14766_v3  ;;  %v14124_v3 = vadd.f32 1.0, %v13727_v62  ;;  %v14145_v62 = vadd.f32 1.0, %v13775_v20 }
 0x6c1   : > { %v14071_v44 = vpop.permute.xlu0 %8080 }
 0x6c2   : > { %14755 = vst [vmem:[#allocation49_spill] sm:$0xff] %v14071_v44  ;;  %v14073_v57 = vpop.permute.xlu1 %8082  ;;  %v14084_v44 = vadd.f32 1.0, %v14760_v29  ;;  %v14767_v29 = vld [vmem:[#allocation46_spill] sm:$0xff]  ;;  %14773 = vst [vmem:[#allocation54_spill] sm:$0xff] %v14145_v62 }
 0x6c3   : > { %14756 = vst [vmem:[#allocation53_spill] sm:$0xff] %v14073_v57  ;;  %v14761_v57 = vld [vmem:[#allocation5_spill] sm:$0xff]  ;;  %v14105_v45 = vadd.f32 1.0, %v14767_v29 }
 0x6c4   : > { %v14087_v53 = vadd.f32 1.0, %v14761_v57  ;;  %v14768_v57 = vld [vmem:[#allocation44_spill] sm:$0xff]  ;;  %v14771_v29 = vld [vmem:[#allocation29_spill] sm:$0xff] }
 0x6c5   : > { %v14108_v13 = vadd.f32 1.0, %v14768_v57  ;;  %v14119_v46 = vpop.permute.xlu0 %8076  ;;  %v14127_v0 = vadd.f32 1.0, %v14771_v29  ;;  %v14130_v57 = vadd.f32 1.0, %v13748_v48  ;;  %v14147_v29 = vpop.eup %10432  ;;  %v14150_v48 = vadd.f32 1.0, %v13785_v47 }
 0x6c6   : > { %v14121_v10 = vpop.permute.xlu1 %8078  ;;  %v7908_v20 = vmul.f32 %v14147_v29, %v13809_v12  ;;  %v7911_v47 = vmul.f32 %v14147_v29, %v13821_v51  ;;  %v7909_v34 = vmul.f32 %v14147_v29, %v13813_v28  ;;  %v7914_v24 = vmul.f32 %v14147_v29, %v13841_v52 }
 0x6c7   : > { %14770 = vst [vmem:[#allocation78_spill] sm:$0xff] %v14121_v10  ;;  %v14142_v10 = vadd.f32 1.0, %v13772_v32  ;;  %14774 = vst [vmem:[#allocation56_spill] sm:$0xff] %v14150_v48  ;;  %v7910_v32 = vmul.f32 %v14147_v29, %v13817_v37  ;;  %v7915_v11 = vmul.f32 %v14147_v29, %v13850_v55  ;;  %v7912_v58 = vmul.f32 %v14147_v29, %v14778_v35  ;;  %v14787_v35 = vld [vmem:[#allocation51_spill] sm:$0xff] }
 0x6c8   : > { %v7913_v37 = vmul.f32 %v14147_v29, %v13835_v63  ;;  %v7972_v12 = vmul.f32 %v7940_v59, %v7908_v20  ;;  %v7975_v48 = vmul.f32 %v7943_v61, %v7911_v47  ;;  %v7973_v62 = vmul.f32 %v7941_v8, %v7909_v34  ;;  %v14784_v47 = vld [vmem:[#allocation61_spill] sm:$0xff]  ;;  %v14785_v34 = vld [vmem:[#allocation10_spill] sm:$0xff] }
 0x6c9   : > { %14772 = vst [vmem:[#allocation52_spill] sm:$0xff] %v14142_v10  ;;  %v7974_v23 = vmul.f32 %v7942_v49, %v7910_v32  ;;  %v14177_v51 = vpop.permute.xlu0 %8088  ;;  %v7978_v28 = vmul.f32 %v7946_v19, %v7914_v24  ;;  %v7979_v52 = vmul.f32 %v7947_v56, %v7915_v11  ;;  %v7976_v63 = vmul.f32 %v7944_v21, %v7912_v58  ;;  %v14782_v11 = vld [vmem:[#allocation43_spill] sm:$0xff]  ;;  %v14783_v58 = vld [vmem:[#allocation57_spill] sm:$0xff] }
 0x6ca   : > { %v14179_v10 = vpop.permute.xlu1 %8090  ;;  %v7977_v55 = vmul.f32 %v7945_v40, %v7913_v37  ;;  %v8132_v8 = vadd.f32 %v13983_v31, %v7972_v12  ;;  %v8135_v59 = vadd.f32 %v14008_v4, %v7975_v48  ;;  %v8133_v61 = vadd.f32 %v13999_v30, %v7973_v62  ;;  %v14779_v40 = vld [vmem:[#allocation39_spill] sm:$0xff]  ;;  %v14781_v48 = vld [vmem:[#allocation9_spill] sm:$0xff]  ;;  %v14788_v12 = vld [vmem:[#allocation50_spill] sm:$0xff] }
 0x6cb   : > { %v8134_v49 = vadd.f32 %v13974_v1, %v7974_v23  ;;  %v8138_v32 = vadd.f32 %v14017_v15, %v7978_v28  ;;  %v8139_v20 = vadd.f32 %v14026_v43, %v7979_v52  ;;  %v8136_v19 = vadd.f32 %v14035_v54, %v7976_v63  ;;  %v14789_v52 = vld [vmem:[#allocation30_spill] sm:$0xff] }
 0x6cc   : > { %v8137_v21 = vadd.f32 %v14040_v41, %v7977_v55  ;;  %8164 = vst.msk [vmem:[%s14185_s25] sm:$0xff] %vm7700_vm3, %v8132_v8  ;;  %8167 = vst.msk [vmem:[%s14185_s25 + $0x18] sm:$0xff] %vm7700_vm3, %v8135_v59  ;;  %v7918_v30 = vmul.f32 %v14147_v29, %v13871_v26  ;;  %v7919_v1 = vmul.f32 %v14147_v29, %v13878_v5  ;;  %v14790_v55 = vld [vmem:[#allocation55_spill] sm:$0xff]  ;;  %v14791_v8 = vld [vmem:[#allocation58_spill] sm:$0xff] }
 0x6cd   : > { %8166 = vst.msk [vmem:[%s14185_s25 + $0x10] sm:$0xff] %vm7700_vm3, %v8134_v49  ;;  %8165 = vst.msk [vmem:[%s14185_s25 + $0x8] sm:$0xff] %vm7700_vm3, %v8133_v61  ;;  %v7916_v31 = vmul.f32 %v14147_v29, %v13857_v6  ;;  %v7917_v41 = vmul.f32 %v14147_v29, %v13864_v50  ;;  %v7922_v26 = vmul.f32 %v14147_v29, %v13899_v38  ;;  %v14231_v38 = vpop.permute.xlu0 %8084  ;;  %v14792_v61 = vld [vmem:[#allocation32_spill] sm:$0xff] }
 0x6ce   : > { %8170 = vst.msk [vmem:[%s14185_s25 + $0x30] sm:$0xff] %vm7700_vm3, %v8138_v32  ;;  %8171 = vst.msk [vmem:[%s14185_s25 + $0x38] sm:$0xff] %vm7700_vm3, %v8139_v20  ;;  %v7923_v5 = vmul.f32 %v14147_v29, %v13906_v33  ;;  %v7920_v6 = vmul.f32 %v14147_v29, %v13885_v7  ;;  %v7921_v50 = vmul.f32 %v14147_v29, %v13892_v25  ;;  %v14233_v33 = vpop.permute.xlu1 %8086  ;;  %v14793_v20 = vld [vmem:[#allocation33_spill] sm:$0xff] }
 0x6cf   : > { %8168 = vst.msk [vmem:[%s14185_s25 + $0x20] sm:$0xff] %vm7700_vm3, %v8136_v19  ;;  %8169 = vst.msk [vmem:[%s14185_s25 + $0x28] sm:$0xff] %vm7700_vm3, %v8137_v21  ;;  %v7982_v4 = vmul.f32 %v14084_v44, %v7918_v30  ;;  %v7983_v15 = vmul.f32 %v14087_v53, %v7919_v1  ;;  %v7980_v43 = vmul.f32 %v14090_v39, %v7916_v31  ;;  %v14780_v39 = vld [vmem:[#allocation40_spill] sm:$0xff] }
 0x6d0   : > { %v7981_v54 = vmul.f32 %v14093_v14, %v7917_v41  ;;  %v7986_v7 = vmul.f32 %v14096_v60, %v7922_v26  ;;  %v7987_v25 = vmul.f32 %v14099_v22, %v7923_v5  ;;  %v7984_v44 = vmul.f32 %v14102_v27, %v7920_v6 }
 0x6d1   : > { %v7985_v53 = vmul.f32 %v14105_v45, %v7921_v50  ;;  %v8142_v56 = vadd.f32 %v14045_v42, %v7982_v4  ;;  %v8143_v14 = vadd.f32 %v14779_v40, %v7983_v15  ;;  %v8140_v62 = vadd.f32 %v14780_v39, %v7980_v43  ;;  %v14786_v42 = vld [vmem:[#allocation31_spill] sm:$0xff]  ;;  %v8093_v41 = vpop.permute.xlu0 %8092  ;;  %v14794_v4 = vld [vmem:[#allocation45_spill] sm:$0xff]  ;;  %v14795_v15 = vld [vmem:[#allocation42_spill] sm:$0xff] }
 0x6d2   : > { %v8141_v23 = vadd.f32 %v14781_v48, %v7981_v54  ;;  %v8146_v60 = vadd.f32 %v14782_v11, %v7986_v7  ;;  %v8147_v22 = vadd.f32 %v14783_v58, %v7987_v25  ;;  %v8144_v27 = vadd.f32 %v14784_v47, %v7984_v44  ;;  %v14796_v43 = vld [vmem:[#allocation48_spill] sm:$0xff]  ;;  %v14797_v54 = vld [vmem:[#allocation77_spill] sm:$0xff]  ;;  %v14805_v11 = vld [vmem:[#allocation11_spill] sm:$0xff] }
 0x6d3   : > { %v8145_v45 = vadd.f32 %v14785_v34, %v7985_v53  ;;  %8174 = vst.msk [vmem:[%s14185_s25 + $0x50] sm:$0xff] %vm7700_vm3, %v8142_v56  ;;  %8175 = vst.msk [vmem:[%s14185_s25 + $0x58] sm:$0xff] %vm7700_vm3, %v8143_v14  ;;  %v7926_v24 = vmul.f32 %v14147_v29, %v14786_v42  ;;  %v7927_v37 = vmul.f32 %v14147_v29, %v14787_v35  ;;  %v8095_v26 = vpop.permute.xlu1 %8094  ;;  %v14798_v25 = vld [vmem:[#allocation49_spill] sm:$0xff]  ;;  %v14800_v53 = vld [vmem:[#allocation78_spill] sm:$0xff] }
 0x6d4   : > { %8172 = vst.msk [vmem:[%s14185_s25 + $0x40] sm:$0xff] %vm7700_vm3, %v8140_v62  ;;  %8173 = vst.msk [vmem:[%s14185_s25 + $0x48] sm:$0xff] %vm7700_vm3, %v8141_v23  ;;  %v7924_v28 = vmul.f32 %v14147_v29, %v14788_v12  ;;  %v7925_v63 = vmul.f32 %v14147_v29, %v14789_v52  ;;  %v7930_v49 = vmul.f32 %v14147_v29, %v14790_v55  ;;  %v14799_v44 = vld [vmem:[#allocation53_spill] sm:$0xff]  ;;  %v14801_v56 = vld [vmem:[#allocation63_spill] sm:$0xff] }
 0x6d5   : > { %8178 = vst.msk [vmem:[%s14185_s25 + $0x70] sm:$0xff] %vm7700_vm3, %v8146_v60  ;;  %8179 = vst.msk [vmem:[%s14185_s25 + $0x78] sm:$0xff] %vm7700_vm3, %v8147_v22  ;;  %v7931_v59 = vmul.f32 %v14147_v29, %v14791_v8  ;;  %v7928_v32 = vmul.f32 %v14147_v29, %v14792_v61  ;;  %v7929_v19 = vmul.f32 %v14147_v29, %v14793_v20  ;;  %v14802_v14 = vld [vmem:[#allocation62_spill] sm:$0xff]  ;;  %v14806_v58 = vld [vmem:[#allocation36_spill] sm:$0xff]  ;;  %v8097_v52 = vpop.permute.xlu0 %8096 }
 0x6d6   : > { %8176 = vst.msk [vmem:[%s14185_s25 + $0x60] sm:$0xff] %vm7700_vm3, %v8144_v27  ;;  %8177 = vst.msk [vmem:[%s14185_s25 + $0x68] sm:$0xff] %vm7700_vm3, %v8145_v45  ;;  %v7990_v21 = vmul.f32 %v14108_v13, %v7926_v24  ;;  %v7991_v30 = vmul.f32 %v14111_v9, %v7927_v37  ;;  %v7988_v1 = vmul.f32 %v14114_v17, %v7924_v28  ;;  %v14803_v62 = vld [vmem:[#allocation34_spill] sm:$0xff]  ;;  %v14807_v47 = vld [vmem:[#allocation37_spill] sm:$0xff] }
 0x6d7   : > { %v7989_v31 = vmul.f32 %v14117_v16, %v7925_v63  ;;  %v7994_v5 = vmul.f32 %v14124_v3, %v7930_v49  ;;  %v7995_v6 = vmul.f32 %v14127_v0, %v7931_v59  ;;  %v7992_v50 = vmul.f32 %v14130_v57, %v7928_v32  ;;  %v14808_v34 = vld [vmem:[#allocation38_spill] sm:$0xff]  ;;  %v14809_v35 = vld [vmem:[#allocation52_spill] sm:$0xff]  ;;  %v8099_v63 = vpop.permute.xlu1 %8098 }
 0x6d8   : > { %v7993_v13 = vmul.f32 %v14133_v36, %v7929_v19  ;;  %v8150_v9 = vadd.f32 %v14794_v4, %v7990_v21  ;;  %v8151_v17 = vadd.f32 %v14795_v15, %v7991_v30  ;;  %v8148_v16 = vadd.f32 %v14796_v43, %v7988_v1  ;;  %v14810_v12 = vld [vmem:[#allocation54_spill] sm:$0xff]  ;;  %v14811_v55 = vld [vmem:[#allocation56_spill] sm:$0xff] }
 0x6d9   : > { %v8149_v7 = vadd.f32 %v14797_v54, %v7989_v31  ;;  %v8154_v3 = vadd.f32 %v14798_v25, %v7994_v5  ;;  %v8155_v0 = vadd.f32 %v14799_v44, %v7995_v6  ;;  %v8152_v57 = vadd.f32 %v14119_v46, %v7992_v50  ;;  %v14804_v46 = vld [vmem:[#allocation35_spill] sm:$0xff]  ;;  %v14812_v8 = vld [vmem:[#allocation60_spill] sm:$0xff] }
 0x6da   : > { %v8153_v36 = vadd.f32 %v14800_v53, %v7993_v13  ;;  %8182 = vst.msk [vmem:[%s14185_s25 + $0x90] sm:$0xff] %vm7700_vm3, %v8150_v9  ;;  %8183 = vst.msk [vmem:[%s14185_s25 + $0x98] sm:$0xff] %vm7700_vm3, %v8151_v17  ;;  %v7934_v40 = vmul.f32 %v14147_v29, %v14801_v56  ;;  %v7935_v39 = vmul.f32 %v14147_v29, %v14802_v14  ;;  %v14814_v61 = vld [vmem:[#allocation64_spill] sm:$0xff] }
 0x6db   : > { %8180 = vst.msk [vmem:[%s14185_s25 + $0x80] sm:$0xff] %vm7700_vm3, %v8148_v16  ;;  %8181 = vst.msk [vmem:[%s14185_s25 + $0x88] sm:$0xff] %vm7700_vm3, %v8149_v7  ;;  %v7932_v48 = vmul.f32 %v14147_v29, %v14803_v62  ;;  %v7933_v23 = vmul.f32 %v14147_v29, %v14804_v46  ;;  %v7936_v60 = vmul.f32 %v14147_v29, %v14805_v11 }
 0x6dc   : > { %8186 = vst.msk [vmem:[%s14185_s25 + $0xb0] sm:$0xff] %vm7700_vm3, %v8154_v3  ;;  %8187 = vst.msk [vmem:[%s14185_s25 + $0xb8] sm:$0xff] %vm7700_vm3, %v8155_v0  ;;  %v7937_v22 = vmul.f32 %v14147_v29, %v14806_v58  ;;  %v7938_v27 = vmul.f32 %v14147_v29, %v14807_v47  ;;  %v7939_v45 = vmul.f32 %v14147_v29, %v14808_v34  ;;  %v14813_v29 = vld [vmem:[#allocation59_spill] sm:$0xff] }
 0x6dd   : > { %8184 = vst.msk [vmem:[%s14185_s25 + $0xa0] sm:$0xff] %vm7700_vm3, %v8152_v57  ;;  %8185 = vst.msk [vmem:[%s14185_s25 + $0xa8] sm:$0xff] %vm7700_vm3, %v8153_v36  ;;  %v7998_v42 = vmul.f32 %v14136_v2, %v7934_v40  ;;  %v7999_v24 = vmul.f32 %v14139_v18, %v7935_v39  ;;  %v7996_v37 = vmul.f32 %v14809_v35, %v7932_v48 }
 0x6de   : > { %v7997_v28 = vmul.f32 %v14810_v12, %v7933_v23  ;;  %v8000_v49 = vmul.f32 %v14811_v55, %v7936_v60  ;;  %v8001_v59 = vmul.f32 %v14812_v8, %v7937_v22  ;;  %v8002_v2 = vmul.f32 %v14813_v29, %v7938_v27 }
 0x6df   : > { %v8003_v18 = vmul.f32 %v14814_v61, %v7939_v45  ;;  %v8158_v32 = vadd.f32 %v14177_v51, %v7998_v42  ;;  %v8159_v20 = vadd.f32 %v14179_v10, %v7999_v24  ;;  %v8156_v19 = vadd.f32 %v14231_v38, %v7996_v37 }
 0x6e0   : > { %v8157_v21 = vadd.f32 %v14233_v33, %v7997_v28  ;;  %v8160_v30 = vadd.f32 %v8093_v41, %v8000_v49  ;;  %v8161_v1 = vadd.f32 %v8095_v26, %v8001_v59  ;;  %v8162_v31 = vadd.f32 %v8097_v52, %v8002_v2 }
 0x6e1   : > { %v8163_v5 = vadd.f32 %v8099_v63, %v8003_v18  ;;  %8190 = vst.msk [vmem:[%s14185_s25 + $0xd0] sm:$0xff] %vm7700_vm3, %v8158_v32  ;;  %8191 = vst.msk [vmem:[%s14185_s25 + $0xd8] sm:$0xff] %vm7700_vm3, %v8159_v20 }
 0x6e2   : > { %8188 = vst.msk [vmem:[%s14185_s25 + $0xc0] sm:$0xff] %vm7700_vm3, %v8156_v19  ;;  %8189 = vst.msk [vmem:[%s14185_s25 + $0xc8] sm:$0xff] %vm7700_vm3, %v8157_v21 }
 0x6e3   : > { %8192 = vst.msk [vmem:[%s14185_s25 + $0xe0] sm:$0xff] %vm7700_vm3, %v8160_v30  ;;  %8193 = vst.msk [vmem:[%s14185_s25 + $0xe8] sm:$0xff] %vm7700_vm3, %v8161_v1 }
 0x6e4   : > { %8194 = vst.msk [vmem:[%s14185_s25 + $0xf0] sm:$0xff] %vm7700_vm3, %v8162_v31  ;;  %8195 = vst.msk [vmem:[%s14185_s25 + $0xf8] sm:$0xff] %vm7700_vm3, %v8163_v5 }
 0x6e5 PF: > { %s16_s21 = sadd.s32 1, %s10483_s21  }
 0x6e6   : > { %p13_p4 = scmp.ge.s32.totalorder %s16_s21, 4  }
 0x6e8   :  { %15 = sbr.rel (!%p13_p4) target bundleno = 1 (0x1), region = 93 }

</bundles_post_ra>
